<compile_context>
chip_gen: v7x
topology: tpu7x:2x2x1
jax: 0.10.0
libtpu: 0.0.40
codegen_flags: <defaults>
</compile_context>

<pallas_src>
import math

import numpy as np
import jax
import jax.numpy as jnp
from jax.experimental import pallas as pl
from jax.experimental.pallas import tpu as pltpu


# ----------------------------------------------------------------------------
# Model dimensions (small, consistent with the module)
# ----------------------------------------------------------------------------
BATCH = 2
C_IN, H_IMG, W_IMG = 8, 16, 16
T_PAST = 8
SEQ = T_PAST + 1          # 9 tokens: [z1] + T past actions
D_MODEL = 32
N_HEADS = 4
D_HEAD = D_MODEL // N_HEADS
D_FF = 64
F_CONV = 16
H1 = W1 = 8               # conv1 output spatial (16 -> 8, stride 2, pad 1)
H2S = W2S = 4             # conv2 output spatial (8 -> 4,  stride 2, pad 1)
N_POS1 = H1 * W1          # 64
N_POS2 = H2S * W2S        # 16


# ----------------------------------------------------------------------------
# The single fused Pallas kernel (built with static slab offsets closed over)
# ----------------------------------------------------------------------------
def _make_kernel(offs):
    def get(p_ref, name):
        r, h, w = offs[name]
        return p_ref[r:r + h, 0:w]

    def kernel(xp_ref, p_ref, out_ref, asm_ref, h2f_ref):
        f32 = jnp.float32
        B = BATCH

        # runtime activations (single packed operand)
        col1 = xp_ref[0:B * N_POS1, 0:C_IN * 9]                      # (128, 72)
        pa = xp_ref[B * N_POS1:B * N_POS1 + B * T_PAST, :]           # (16, 128), lanes 0:3 live

        # ---- conv1: one MXU matmul (+bias, ReLU); rows ordered (b, y, x) ------
        h1 = jnp.dot(col1, get(p_ref, "w1"), preferred_element_type=f32) + get(p_ref, "b1")
        h1 = jnp.maximum(h1, 0.0)                                    # (128, 16)

        # ---- conv2: stacked gather matmul + one weight matmul -----------------
        # gathered rows ordered (p, pos2, b); zero rows implement zero padding.
        gathered = jnp.dot(get(p_ref, "gstack"), h1,
                           preferred_element_type=f32)               # (288, 16)
        # column assembly (the "(288,16)->(32,144) reshape") via 9 aligned stores
        for p in range(9):
            asm_ref[:, p * F_CONV:(p + 1) * F_CONV] = \
                gathered[p * B * N_POS2:(p + 1) * B * N_POS2, :]
        h2 = jnp.dot(asm_ref[...], get(p_ref, "w2"),
                     preferred_element_type=f32) + get(p_ref, "b2")
        h2 = jnp.maximum(h2, 0.0)                                    # (32, 16), rows (pos2, b)

        # ---- flatten (pos2,b)x(cout) -> (b, pos2*16+cout) for the z1 head -----
        for q in range(N_POS2):
            h2f_ref[:, q * F_CONV:(q + 1) * F_CONV] = h2[q * B:(q + 1) * B, :]
        z1 = jnp.dot(h2f_ref[...], get(p_ref, "z1w"),
                     preferred_element_type=f32) + get(p_ref, "z1b")  # (2, 32)

        # ---- lp_expand: one small MXU matmul (K padded 3 -> 8) -----------------
        z2 = jnp.dot(pa[:, 0:8], get(p_ref, "lpw"),
                     preferred_element_type=f32) + get(p_ref, "lpb")  # (16, 32)

        # ---- token sequence (18, 32), rows (b, s), via constant selections -----
        zf = (jnp.dot(get(p_ref, "sz1"), z1, preferred_element_type=f32)
              + jnp.dot(get(p_ref, "sz2"), z2, preferred_element_type=f32))

        # ---- multi-head self-attention, both batches together -----------------
        # 1/sqrt(d_head) is pre-folded into the packed W_q / b_q.
        qkv = jnp.dot(zf, get(p_ref, "wqkv"),
                      preferred_element_type=f32) + get(p_ref, "bqkv")  # (18, 96)
        amask = get(p_ref, "amask")                                   # (18, 18), 0 / -1e9
        wo = get(p_ref, "wo")                                         # (32, 32)

        attn = None
        for h in range(N_HEADS):
            c0 = h * D_HEAD
            qh = qkv[:, c0:c0 + D_HEAD]
            kh = qkv[:, D_MODEL + c0:D_MODEL + c0 + D_HEAD]
            vh = qkv[:, 2 * D_MODEL + c0:2 * D_MODEL + c0 + D_HEAD]
            s = jax.lax.dot_general(qh, kh, (((1,), (1,)), ((), ())),
                                    preferred_element_type=f32) + amask   # (18, 18)
            m = jnp.max(s, axis=-1, keepdims=True)
            e = jnp.exp(s - m)
            inv = pl.reciprocal(jnp.sum(e, axis=-1, keepdims=True), approx=True)
            prob = e * inv
            oh = jnp.dot(prob, vh, preferred_element_type=f32)            # (18, 8)
            contrib = jnp.dot(oh, wo[c0:c0 + D_HEAD, :],                  # fold W_o per head
                              preferred_element_type=f32)
            attn = contrib if attn is None else attn + contrib
        attn = attn + get(p_ref, "bo")

        # ---- post-norm transformer encoder layer (norm_first=False) -----------
        def layernorm(x, gname, bname):
            mu = jnp.mean(x, axis=-1, keepdims=True)
            var = jnp.mean((x - mu) ** 2, axis=-1, keepdims=True)
            return (x - mu) * jax.lax.rsqrt(var + 1e-5) * get(p_ref, gname) + get(p_ref, bname)

        x1 = layernorm(zf + attn, "ln1g", "ln1b")
        ff = jnp.maximum(
            jnp.dot(x1, get(p_ref, "ff1w"), preferred_element_type=f32) + get(p_ref, "ff1b"),
            0.0)
        ff = jnp.dot(ff, get(p_ref, "ff2w"), preferred_element_type=f32) + get(p_ref, "ff2b")
        y = layernorm(x1 + ff, "ln2g", "ln2b")                        # (18, 32)

        # ---- lane-dense final projection + residual last-action broadcast -----
        lastadd = jnp.dot(get(p_ref, "sellast"), pa,
                          preferred_element_type=f32)                 # (18, 128), lanes 0:3 live
        out = (jnp.dot(y, get(p_ref, "locw"), preferred_element_type=f32)
               + get(p_ref, "locb") + lastadd)                        # (18, 128)
        out_ref[...] = out

    return kernel


# ----------------------------------------------------------------------------
# XLA glue: im2col of the raw input image (one-time, tiny)
# ----------------------------------------------------------------------------
def _im2col(x, kh, kw, stride, pad):
    """NCHW im2col; rows ordered (b, yo, xo), columns ordered (ci, dy, dx)."""
    B, C, H, W = x.shape
    Ho = (H + 2 * pad - kh) // stride + 1
    Wo = (W + 2 * pad - kw) // stride + 1
    xp = jnp.pad(x, ((0, 0), (0, 0), (pad, pad), (pad, pad)))
    cols = []
    for dy in range(kh):
        for dx in range(kw):
            cols.append(xp[:, :, dy:dy + stride * Ho:stride, dx:dx + stride * Wo:stride])
    col = jnp.stack(cols, axis=2).reshape(B, C * kh * kw, Ho, Wo)
    return col.transpose(0, 2, 3, 1).reshape(B * Ho * Wo, C * kh * kw)


def _conv2_gather_stack():
    """Stacked one-hot gather matrix for conv2 (k=3, stride=2, pad=1).

    Rows ordered (p, pos2, b); columns index conv1 rows (b, pos1); all-zero
    rows implement zero padding.
    """
    g = np.zeros((9, BATCH * N_POS2, BATCH * N_POS1), np.float32)
    for dy in range(3):
        for dx in range(3):
            p = dy * 3 + dx
            for yo in range(H2S):
                for xo in range(W2S):
                    iy, ix = 2 * yo - 1 + dy, 2 * xo - 1 + dx
                    if 0 <= iy < H1 and 0 <= ix < W1:
                        for b in range(BATCH):
                            r = (yo * W2S + xo) * BATCH + b
                            c = b * N_POS1 + iy * W1 + ix
                            g[p, r, c] = 1.0
    return g.reshape(9 * BATCH * N_POS2, BATCH * N_POS1)


# ----------------------------------------------------------------------------
# Synthetic BC2_Ported parameters (deterministic)
# ----------------------------------------------------------------------------
def _dense_init(key, fan_in, fan_out):
    k1, k2 = jax.random.split(key)
    w = jax.random.normal(k1, (fan_in, fan_out), jnp.float32) / math.sqrt(fan_in)
    b = 0.01 * jax.random.normal(k2, (fan_out,), jnp.float32)
    return w, b


def _conv_init(key, cout, cin, kh, kw):
    k1, k2 = jax.random.split(key)
    w = jax.random.normal(k1, (cout, cin, kh, kw), jnp.float32) / math.sqrt(cin * kh * kw)
    b = 0.01 * jax.random.normal(k2, (cout,), jnp.float32)
    return w, b


def init_params(key):
    keys = jax.random.split(key, 16)
    p = {}
    p["conv1_w"], p["conv1_b"] = _conv_init(keys[0], F_CONV, C_IN, 3, 3)
    p["conv2_w"], p["conv2_b"] = _conv_init(keys[1], F_CONV, F_CONV, 3, 3)
    p["z1_w"], p["z1_b"] = _dense_init(keys[3], F_CONV * N_POS2, D_MODEL)
    p["lp_w"], p["lp_b"] = _dense_init(keys[4], 3, D_MODEL)
    p["wq"], p["bq"] = _dense_init(keys[5], D_MODEL, D_MODEL)
    p["wk"], p["bk"] = _dense_init(keys[6], D_MODEL, D_MODEL)
    p["wv"], p["bv"] = _dense_init(keys[7], D_MODEL, D_MODEL)
    p["wo"], p["bo"] = _dense_init(keys[8], D_MODEL, D_MODEL)
    p["ln1_g"] = jnp.ones((D_MODEL,), jnp.float32)
    p["ln1_b"] = jnp.zeros((D_MODEL,), jnp.float32)
    p["ff1_w"], p["ff1_b"] = _dense_init(keys[9], D_MODEL, D_FF)
    p["ff2_w"], p["ff2_b"] = _dense_init(keys[10], D_FF, D_MODEL)
    p["ln2_g"] = jnp.ones((D_MODEL,), jnp.float32)
    p["ln2_b"] = jnp.zeros((D_MODEL,), jnp.float32)
    p["loc_w"], p["loc_b"] = _dense_init(keys[11], D_MODEL, 3)
    return p


# ----------------------------------------------------------------------------
# Parameter slab packing (one (R, 128) f32 operand, 8-row-aligned blocks)
# ----------------------------------------------------------------------------
def _pack_slab(blocks):
    rows, offs, r = [], {}, 0
    for name, arr in blocks:
        a = np.asarray(arr, np.float32)
        if a.ndim == 1:
            a = a.reshape(1, -1)
        h, w = a.shape
        assert w <= 128, name
        if r % 8:
            padr = 8 - (r % 8)
            rows.append(np.zeros((padr, 128), np.float32))
            r += padr
        buf = np.zeros((h, 128), np.float32)
        buf[:, :w] = a
        offs[name] = (r, h, w)
        rows.append(buf)
        r += h
    if r % 8:
        rows.append(np.zeros((8 - r % 8, 128), np.float32))
    slab = np.concatenate(rows, axis=0)
    return jnp.asarray(slab), offs


def prepare_params(p):
    B = BATCH
    scale = 1.0 / math.sqrt(D_HEAD)

    w1col = np.asarray(p["conv1_w"]).reshape(F_CONV, C_IN * 9).T              # (72, 16)
    w2big = np.stack([np.asarray(p["conv2_w"])[:, :, dy, dx].T
                      for dy in range(3) for dx in range(3)],
                     axis=0).reshape(9 * F_CONV, F_CONV)                      # (144, 16)
    lpw = np.zeros((8, D_MODEL), np.float32)
    lpw[:3] = np.asarray(p["lp_w"])
    wqkv = np.concatenate([np.asarray(p["wq"]) * scale,
                           np.asarray(p["wk"]), np.asarray(p["wv"])], axis=1)  # (32, 96)
    bqkv = np.concatenate([np.asarray(p["bq"]) * scale,
                           np.asarray(p["bk"]), np.asarray(p["bv"])]).reshape(1, -1)
    locw = np.zeros((D_MODEL, 128), np.float32)
    locw[:, :3] = np.asarray(p["loc_w"])
    locb = np.zeros((1, 128), np.float32)
    locb[0, :3] = np.asarray(p["loc_b"])

    # constant selection / mask matrices (token layout: rows (b, s))
    sz1 = np.zeros((B * SEQ, B), np.float32)
    sz2 = np.zeros((B * SEQ, B * T_PAST), np.float32)
    sellast = np.zeros((B * SEQ, B * T_PAST), np.float32)
    for b in range(B):
        sz1[b * SEQ, b] = 1.0
        for t in range(T_PAST):
            sz2[b * SEQ + 1 + t, b * T_PAST + t] = 1.0
        for s in range(SEQ):
            sellast[b * SEQ + s, b * T_PAST + T_PAST - 1] = 1.0
    amask = np.full((B * SEQ, B * SEQ), -1e9, np.float32)
    for b in range(B):
        amask[b * SEQ:(b + 1) * SEQ, b * SEQ:(b + 1) * SEQ] = 0.0

    blocks = [
        ("gstack", _conv2_gather_stack()),
        ("w1", w1col), ("b1", np.asarray(p["conv1_b"]).reshape(1, -1)),
        ("w2", w2big), ("b2", np.asarray(p["conv2_b"]).reshape(1, -1)),
        ("z1w", np.asarray(p["z1_w"])), ("z1b", np.asarray(p["z1_b"]).reshape(1, -1)),
        ("lpw", lpw), ("lpb", np.asarray(p["lp_b"]).reshape(1, -1)),
        ("sz1", sz1), ("sz2", sz2), ("sellast", sellast), ("amask", amask),
        ("wqkv", wqkv), ("bqkv", bqkv),
        ("wo", np.asarray(p["wo"])), ("bo", np.asarray(p["bo"]).reshape(1, -1)),
        ("ln1g", np.asarray(p["ln1_g"]).reshape(1, -1)),
        ("ln1b", np.asarray(p["ln1_b"]).reshape(1, -1)),
        ("ff1w", np.asarray(p["ff1_w"])), ("ff1b", np.asarray(p["ff1_b"]).reshape(1, -1)),
        ("ff2w", np.asarray(p["ff2_w"])), ("ff2b", np.asarray(p["ff2_b"]).reshape(1, -1)),
        ("ln2g", np.asarray(p["ln2_g"]).reshape(1, -1)),
        ("ln2b", np.asarray(p["ln2_b"]).reshape(1, -1)),
        ("locw", locw), ("locb", locb),
    ]
    return _pack_slab(blocks)


# ----------------------------------------------------------------------------
# Forward pass: one pallas_call, 2 operands, lane-dense output
# (exp_num=1, lidar branch statically skipped)
# ----------------------------------------------------------------------------
def build_forward(offs):
    kernel = _make_kernel(offs)
    n_out_rows = BATCH * SEQ

    @jax.jit
    def forward(slab, input_img, past_action):
        col1 = _im2col(input_img, 3, 3, stride=2, pad=1)              # (128, 72)
        xp = jnp.zeros((BATCH * N_POS1 + BATCH * T_PAST, 128), jnp.float32)
        xp = xp.at[0:BATCH * N_POS1, 0:C_IN * 9].set(col1)
        xp = xp.at[BATCH * N_POS1:, 0:3].set(past_action.reshape(BATCH * T_PAST, 3))

        out = pl.pallas_call(
            kernel,
            out_shape=jax.ShapeDtypeStruct((n_out_rows, 128), jnp.float32),
            scratch_shapes=[
                pltpu.VMEM((BATCH * N_POS2, 9 * F_CONV), jnp.float32),   # conv2 column assembly
                pltpu.VMEM((BATCH, N_POS2 * F_CONV), jnp.float32),       # per-batch flatten
            ],
        )(xp, slab)
        return out[:, :3].reshape(BATCH, SEQ, 3)

    return forward


# ----------------------------------------------------------------------------
# Pure-JAX reference of the same synthetic architecture (correctness check)
# ----------------------------------------------------------------------------
def _reference_forward(p, input_img, past_action):
    B = input_img.shape[0]

    def conv2d(x, w, b, stride, pad):
        y = jax.lax.conv_general_dilated(
            x, w, (stride, stride), [(pad, pad), (pad, pad)],
            dimension_numbers=("NCHW", "OIHW", "NCHW"),
            precision=jax.lax.Precision.HIGHEST)
        return y + b.reshape(1, -1, 1, 1)

    def ln(x, g, b):
        m = x.mean(-1, keepdims=True)
        v = ((x - m) ** 2).mean(-1, keepdims=True)
        return (x - m) * jax.lax.rsqrt(v + 1e-5) * g + b

    h1 = jax.nn.relu(conv2d(input_img, p["conv1_w"], p["conv1_b"], 2, 1))
    h2 = jax.nn.relu(conv2d(h1, p["conv2_w"], p["conv2_b"], 2, 1))
    z1 = h2.transpose(0, 2, 3, 1).reshape(B, -1) @ p["z1_w"] + p["z1_b"]
    z2 = past_action @ p["lp_w"] + p["lp_b"]
    z = jnp.concatenate([z1[:, None, :], z2], axis=1)            # (B, SEQ, D)

    q = z @ p["wq"] + p["bq"]
    k = z @ p["wk"] + p["bk"]
    v = z @ p["wv"] + p["bv"]
    heads = lambda t: t.reshape(B, SEQ, N_HEADS, D_HEAD).transpose(0, 2, 1, 3)
    s = jnp.einsum("bhqd,bhkd->bhqk", heads(q), heads(k)) / math.sqrt(D_HEAD)
    a = jax.nn.softmax(s, axis=-1)
    o = jnp.einsum("bhqk,bhkd->bhqd", a, heads(v)).transpose(0, 2, 1, 3)
    o = o.reshape(B, SEQ, D_MODEL) @ p["wo"] + p["bo"]
    x1 = ln(z + o, p["ln1_g"], p["ln1_b"])
    ff = jax.nn.relu(x1 @ p["ff1_w"] + p["ff1_b"]) @ p["ff2_w"] + p["ff2_b"]
    y = ln(x1 + ff, p["ln2_g"], p["ln2_b"])
    res = (y @ p["loc_w"] + p["loc_b"]).reshape(B, SEQ, 3)
    return res + past_action[:, -1:, :]


# ----------------------------------------------------------------------------
if __name__ == "__main__":
    jax.config.update("jax_default_matmul_precision", "highest")

    key = jax.random.PRNGKey(0)
    k_params, k_img, k_act = jax.random.split(key, 3)

    params = init_params(k_params)
    slab, offs = prepare_params(params)
    forward = build_forward(offs)

    input_img = jax.random.normal(k_img, (BATCH, C_IN, H_IMG, W_IMG), jnp.float32)
    past_action = jax.random.normal(k_act, (BATCH, T_PAST, 3), jnp.float32)

    predicted_action = jax.block_until_ready(forward(slab, input_img, past_action))

    assert predicted_action.shape == (BATCH, SEQ, 3)
    assert bool(jnp.all(jnp.isfinite(predicted_action)))

    ref = _reference_forward(params, input_img, past_action)
    max_diff = float(jnp.max(jnp.abs(predicted_action - ref)))
    assert max_diff < 5e-2, f"kernel vs reference mismatch: max |diff| = {max_diff}"

    print("KERNEL_OK")
</pallas_src>

<mosaic_0001>
module attributes {stable_mosaic.version = 11 : i64} {
  func.func @kernel(%arg0: memref<144x128xf32, #tpu.memory_space<vmem>>, %arg1: memref<1160x128xf32, #tpu.memory_space<vmem>>, %arg2: memref<18x128xf32, #tpu.memory_space<vmem>>, %arg3: memref<32x144xf32, #tpu.memory_space<vmem>>, %arg4: memref<2x256xf32, #tpu.memory_space<vmem>>) attributes {dimension_semantics = [], scalar_prefetch = 0 : i64, scratch_operands = 2 : i64, tpu.core_type = #tpu.core_type<tc>} {
    %c0 = arith.constant 0 : index
    %c0_0 = arith.constant 0 : index
    %0 = vector.load %arg0[%c0, %c0_0] : memref<144x128xf32, #tpu.memory_space<vmem>>, vector<128x72xf32>
    %c128 = arith.constant 128 : index
    %c0_1 = arith.constant 0 : index
    %1 = vector.load %arg0[%c128, %c0_1] : memref<144x128xf32, #tpu.memory_space<vmem>>, vector<16x128xf32>
    %c288 = arith.constant 288 : index
    %c0_2 = arith.constant 0 : index
    %2 = vector.load %arg1[%c288, %c0_2] : memref<1160x128xf32, #tpu.memory_space<vmem>>, vector<72x16xf32>
    %cst = arith.constant dense<0.000000e+00> : vector<128x16xf32>
    %3 = tpu.matmul %0, %2, %cst {dimension_numbers = #tpu.dot_dimension_numbers<[1], [0], [0], [1], [0, 0, 1, 1], [], []>, precision = #tpu.contract_precision<fp32>} : vector<128x72xf32>, vector<72x16xf32>, vector<128x16xf32> -> vector<128x16xf32>
    %c360 = arith.constant 360 : index
    %c0_3 = arith.constant 0 : index
    %4 = vector.load %arg1[%c360, %c0_3] : memref<1160x128xf32, #tpu.memory_space<vmem>>, vector<1x16xf32>
    %5 = vector.broadcast %4 : vector<1x16xf32> to vector<128x16xf32>
    %6 = arith.addf %3, %5 : vector<128x16xf32>
    %cst_4 = arith.constant 0.000000e+00 : f32
    %7 = vector.broadcast %cst_4 : f32 to vector<128x16xf32>
    %8 = arith.maximumf %6, %7 : vector<128x16xf32>
    %c0_5 = arith.constant 0 : index
    %c0_6 = arith.constant 0 : index
    %9 = vector.load %arg1[%c0_5, %c0_6] : memref<1160x128xf32, #tpu.memory_space<vmem>>, vector<288x128xf32>
    %cst_7 = arith.constant dense<0.000000e+00> : vector<288x16xf32>
    %10 = tpu.matmul %9, %8, %cst_7 {dimension_numbers = #tpu.dot_dimension_numbers<[1], [0], [0], [1], [0, 0, 1, 1], [], []>, precision = #tpu.contract_precision<fp32>} : vector<288x128xf32>, vector<128x16xf32>, vector<288x16xf32> -> vector<288x16xf32>
    %11 = vector.extract_strided_slice %10 {offsets = [0, 0], sizes = [32, 16], strides = [1, 1]} : vector<288x16xf32> to vector<32x16xf32>
    %c0_8 = arith.constant 0 : index
    %c0_9 = arith.constant 0 : index
    %12 = vector.load %arg3[%c0_8, %c0_9] : memref<32x144xf32, #tpu.memory_space<vmem>>, vector<32x16xf32>
    tpu.vector_store %arg3[%c0_8, %c0_9], %11 {strides = array<i32>} : memref<32x144xf32, #tpu.memory_space<vmem>>, vector<32x16xf32>,
    %13 = vector.extract_strided_slice %10 {offsets = [32, 0], sizes = [32, 16], strides = [1, 1]} : vector<288x16xf32> to vector<32x16xf32>
    %c0_10 = arith.constant 0 : index
    %c16 = arith.constant 16 : index
    %14 = vector.load %arg3[%c0_10, %c16] : memref<32x144xf32, #tpu.memory_space<vmem>>, vector<32x16xf32>
    tpu.vector_store %arg3[%c0_10, %c16], %13 {strides = array<i32>} : memref<32x144xf32, #tpu.memory_space<vmem>>, vector<32x16xf32>,
    %15 = vector.extract_strided_slice %10 {offsets = [64, 0], sizes = [32, 16], strides = [1, 1]} : vector<288x16xf32> to vector<32x16xf32>
    %c0_11 = arith.constant 0 : index
    %c32 = arith.constant 32 : index
    %16 = vector.load %arg3[%c0_11, %c32] : memref<32x144xf32, #tpu.memory_space<vmem>>, vector<32x16xf32>
    tpu.vector_store %arg3[%c0_11, %c32], %15 {strides = array<i32>} : memref<32x144xf32, #tpu.memory_space<vmem>>, vector<32x16xf32>,
    %17 = vector.extract_strided_slice %10 {offsets = [96, 0], sizes = [32, 16], strides = [1, 1]} : vector<288x16xf32> to vector<32x16xf32>
    %c0_12 = arith.constant 0 : index
    %c48 = arith.constant 48 : index
    %18 = vector.load %arg3[%c0_12, %c48] : memref<32x144xf32, #tpu.memory_space<vmem>>, vector<32x16xf32>
    tpu.vector_store %arg3[%c0_12, %c48], %17 {strides = array<i32>} : memref<32x144xf32, #tpu.memory_space<vmem>>, vector<32x16xf32>,
    %19 = vector.extract_strided_slice %10 {offsets = [128, 0], sizes = [32, 16], strides = [1, 1]} : vector<288x16xf32> to vector<32x16xf32>
    %c0_13 = arith.constant 0 : index
    %c64 = arith.constant 64 : index
    %20 = vector.load %arg3[%c0_13, %c64] : memref<32x144xf32, #tpu.memory_space<vmem>>, vector<32x16xf32>
    tpu.vector_store %arg3[%c0_13, %c64], %19 {strides = array<i32>} : memref<32x144xf32, #tpu.memory_space<vmem>>, vector<32x16xf32>,
    %21 = vector.extract_strided_slice %10 {offsets = [160, 0], sizes = [32, 16], strides = [1, 1]} : vector<288x16xf32> to vector<32x16xf32>
    %c0_14 = arith.constant 0 : index
    %c80 = arith.constant 80 : index
    %22 = vector.load %arg3[%c0_14, %c80] : memref<32x144xf32, #tpu.memory_space<vmem>>, vector<32x16xf32>
    tpu.vector_store %arg3[%c0_14, %c80], %21 {strides = array<i32>} : memref<32x144xf32, #tpu.memory_space<vmem>>, vector<32x16xf32>,
    %23 = vector.extract_strided_slice %10 {offsets = [192, 0], sizes = [32, 16], strides = [1, 1]} : vector<288x16xf32> to vector<32x16xf32>
    %c0_15 = arith.constant 0 : index
    %c96 = arith.constant 96 : index
    %24 = vector.load %arg3[%c0_15, %c96] : memref<32x144xf32, #tpu.memory_space<vmem>>, vector<32x16xf32>
    tpu.vector_store %arg3[%c0_15, %c96], %23 {strides = array<i32>} : memref<32x144xf32, #tpu.memory_space<vmem>>, vector<32x16xf32>,
    %25 = vector.extract_strided_slice %10 {offsets = [224, 0], sizes = [32, 16], strides = [1, 1]} : vector<288x16xf32> to vector<32x16xf32>
    %c0_16 = arith.constant 0 : index
    %c112 = arith.constant 112 : index
    %26 = vector.load %arg3[%c0_16, %c112] : memref<32x144xf32, #tpu.memory_space<vmem>>, vector<32x16xf32>
    tpu.vector_store %arg3[%c0_16, %c112], %25 {strides = array<i32>} : memref<32x144xf32, #tpu.memory_space<vmem>>, vector<32x16xf32>,
    %27 = vector.extract_strided_slice %10 {offsets = [256, 0], sizes = [32, 16], strides = [1, 1]} : vector<288x16xf32> to vector<32x16xf32>
    %c0_17 = arith.constant 0 : index
    %c128_18 = arith.constant 128 : index
    %28 = vector.load %arg3[%c0_17, %c128_18] : memref<32x144xf32, #tpu.memory_space<vmem>>, vector<32x16xf32>
    tpu.vector_store %arg3[%c0_17, %c128_18], %27 {strides = array<i32>} : memref<32x144xf32, #tpu.memory_space<vmem>>, vector<32x16xf32>,
    %c0_19 = arith.constant 0 : index
    %c0_20 = arith.constant 0 : index
    %29 = vector.load %arg3[%c0_19, %c0_20] : memref<32x144xf32, #tpu.memory_space<vmem>>, vector<32x144xf32>
    %c368 = arith.constant 368 : index
    %c0_21 = arith.constant 0 : index
    %30 = vector.load %arg1[%c368, %c0_21] : memref<1160x128xf32, #tpu.memory_space<vmem>>, vector<144x16xf32>
    %cst_22 = arith.constant dense<0.000000e+00> : vector<32x16xf32>
    %31 = tpu.matmul %29, %30, %cst_22 {dimension_numbers = #tpu.dot_dimension_numbers<[1], [0], [0], [1], [0, 0, 1, 1], [], []>, precision = #tpu.contract_precision<fp32>} : vector<32x144xf32>, vector<144x16xf32>, vector<32x16xf32> -> vector<32x16xf32>
    %c512 = arith.constant 512 : index
    %c0_23 = arith.constant 0 : index
    %32 = vector.load %arg1[%c512, %c0_23] : memref<1160x128xf32, #tpu.memory_space<vmem>>, vector<1x16xf32>
    %33 = vector.broadcast %32 : vector<1x16xf32> to vector<32x16xf32>
    %34 = arith.addf %31, %33 : vector<32x16xf32>
    %cst_24 = arith.constant 0.000000e+00 : f32
    %35 = vector.broadcast %cst_24 : f32 to vector<32x16xf32>
    %36 = arith.maximumf %34, %35 : vector<32x16xf32>
    %37 = vector.extract_strided_slice %36 {offsets = [0, 0], sizes = [2, 16], strides = [1, 1]} : vector<32x16xf32> to vector<2x16xf32>
    %c0_25 = arith.constant 0 : index
    %c0_26 = arith.constant 0 : index
    %38 = vector.load %arg4[%c0_25, %c0_26] : memref<2x256xf32, #tpu.memory_space<vmem>>, vector<2x16xf32>
    tpu.vector_store %arg4[%c0_25, %c0_26], %37 {strides = array<i32>} : memref<2x256xf32, #tpu.memory_space<vmem>>, vector<2x16xf32>,
    %39 = vector.extract_strided_slice %36 {offsets = [2, 0], sizes = [2, 16], strides = [1, 1]} : vector<32x16xf32> to vector<2x16xf32>
    %c0_27 = arith.constant 0 : index
    %c16_28 = arith.constant 16 : index
    %40 = vector.load %arg4[%c0_27, %c16_28] : memref<2x256xf32, #tpu.memory_space<vmem>>, vector<2x16xf32>
    tpu.vector_store %arg4[%c0_27, %c16_28], %39 {strides = array<i32>} : memref<2x256xf32, #tpu.memory_space<vmem>>, vector<2x16xf32>,
    %41 = vector.extract_strided_slice %36 {offsets = [4, 0], sizes = [2, 16], strides = [1, 1]} : vector<32x16xf32> to vector<2x16xf32>
    %c0_29 = arith.constant 0 : index
    %c32_30 = arith.constant 32 : index
    %42 = vector.load %arg4[%c0_29, %c32_30] : memref<2x256xf32, #tpu.memory_space<vmem>>, vector<2x16xf32>
    tpu.vector_store %arg4[%c0_29, %c32_30], %41 {strides = array<i32>} : memref<2x256xf32, #tpu.memory_space<vmem>>, vector<2x16xf32>,
    %43 = vector.extract_strided_slice %36 {offsets = [6, 0], sizes = [2, 16], strides = [1, 1]} : vector<32x16xf32> to vector<2x16xf32>
    %c0_31 = arith.constant 0 : index
    %c48_32 = arith.constant 48 : index
    %44 = vector.load %arg4[%c0_31, %c48_32] : memref<2x256xf32, #tpu.memory_space<vmem>>, vector<2x16xf32>
    tpu.vector_store %arg4[%c0_31, %c48_32], %43 {strides = array<i32>} : memref<2x256xf32, #tpu.memory_space<vmem>>, vector<2x16xf32>,
    %45 = vector.extract_strided_slice %36 {offsets = [8, 0], sizes = [2, 16], strides = [1, 1]} : vector<32x16xf32> to vector<2x16xf32>
    %c0_33 = arith.constant 0 : index
    %c64_34 = arith.constant 64 : index
    %46 = vector.load %arg4[%c0_33, %c64_34] : memref<2x256xf32, #tpu.memory_space<vmem>>, vector<2x16xf32>
    tpu.vector_store %arg4[%c0_33, %c64_34], %45 {strides = array<i32>} : memref<2x256xf32, #tpu.memory_space<vmem>>, vector<2x16xf32>,
    %47 = vector.extract_strided_slice %36 {offsets = [10, 0], sizes = [2, 16], strides = [1, 1]} : vector<32x16xf32> to vector<2x16xf32>
    %c0_35 = arith.constant 0 : index
    %c80_36 = arith.constant 80 : index
    %48 = vector.load %arg4[%c0_35, %c80_36] : memref<2x256xf32, #tpu.memory_space<vmem>>, vector<2x16xf32>
    tpu.vector_store %arg4[%c0_35, %c80_36], %47 {strides = array<i32>} : memref<2x256xf32, #tpu.memory_space<vmem>>, vector<2x16xf32>,
    %49 = vector.extract_strided_slice %36 {offsets = [12, 0], sizes = [2, 16], strides = [1, 1]} : vector<32x16xf32> to vector<2x16xf32>
    %c0_37 = arith.constant 0 : index
    %c96_38 = arith.constant 96 : index
    %50 = vector.load %arg4[%c0_37, %c96_38] : memref<2x256xf32, #tpu.memory_space<vmem>>, vector<2x16xf32>
    tpu.vector_store %arg4[%c0_37, %c96_38], %49 {strides = array<i32>} : memref<2x256xf32, #tpu.memory_space<vmem>>, vector<2x16xf32>,
    %51 = vector.extract_strided_slice %36 {offsets = [14, 0], sizes = [2, 16], strides = [1, 1]} : vector<32x16xf32> to vector<2x16xf32>
    %c0_39 = arith.constant 0 : index
    %c112_40 = arith.constant 112 : index
    %52 = vector.load %arg4[%c0_39, %c112_40] : memref<2x256xf32, #tpu.memory_space<vmem>>, vector<2x16xf32>
    tpu.vector_store %arg4[%c0_39, %c112_40], %51 {strides = array<i32>} : memref<2x256xf32, #tpu.memory_space<vmem>>, vector<2x16xf32>,
    %53 = vector.extract_strided_slice %36 {offsets = [16, 0], sizes = [2, 16], strides = [1, 1]} : vector<32x16xf32> to vector<2x16xf32>
    %c0_41 = arith.constant 0 : index
    %c128_42 = arith.constant 128 : index
    %54 = vector.load %arg4[%c0_41, %c128_42] : memref<2x256xf32, #tpu.memory_space<vmem>>, vector<2x16xf32>
    tpu.vector_store %arg4[%c0_41, %c128_42], %53 {strides = array<i32>} : memref<2x256xf32, #tpu.memory_space<vmem>>, vector<2x16xf32>,
    %55 = vector.extract_strided_slice %36 {offsets = [18, 0], sizes = [2, 16], strides = [1, 1]} : vector<32x16xf32> to vector<2x16xf32>
    %c0_43 = arith.constant 0 : index
    %c144 = arith.constant 144 : index
    %56 = vector.load %arg4[%c0_43, %c144] : memref<2x256xf32, #tpu.memory_space<vmem>>, vector<2x16xf32>
    tpu.vector_store %arg4[%c0_43, %c144], %55 {strides = array<i32>} : memref<2x256xf32, #tpu.memory_space<vmem>>, vector<2x16xf32>,
    %57 = vector.extract_strided_slice %36 {offsets = [20, 0], sizes = [2, 16], strides = [1, 1]} : vector<32x16xf32> to vector<2x16xf32>
    %c0_44 = arith.constant 0 : index
    %c160 = arith.constant 160 : index
    %58 = vector.load %arg4[%c0_44, %c160] : memref<2x256xf32, #tpu.memory_space<vmem>>, vector<2x16xf32>
    tpu.vector_store %arg4[%c0_44, %c160], %57 {strides = array<i32>} : memref<2x256xf32, #tpu.memory_space<vmem>>, vector<2x16xf32>,
    %59 = vector.extract_strided_slice %36 {offsets = [22, 0], sizes = [2, 16], strides = [1, 1]} : vector<32x16xf32> to vector<2x16xf32>
    %c0_45 = arith.constant 0 : index
    %c176 = arith.constant 176 : index
    %60 = vector.load %arg4[%c0_45, %c176] : memref<2x256xf32, #tpu.memory_space<vmem>>, vector<2x16xf32>
    tpu.vector_store %arg4[%c0_45, %c176], %59 {strides = array<i32>} : memref<2x256xf32, #tpu.memory_space<vmem>>, vector<2x16xf32>,
    %61 = vector.extract_strided_slice %36 {offsets = [24, 0], sizes = [2, 16], strides = [1, 1]} : vector<32x16xf32> to vector<2x16xf32>
    %c0_46 = arith.constant 0 : index
    %c192 = arith.constant 192 : index
    %62 = vector.load %arg4[%c0_46, %c192] : memref<2x256xf32, #tpu.memory_space<vmem>>, vector<2x16xf32>
    tpu.vector_store %arg4[%c0_46, %c192], %61 {strides = array<i32>} : memref<2x256xf32, #tpu.memory_space<vmem>>, vector<2x16xf32>,
    %63 = vector.extract_strided_slice %36 {offsets = [26, 0], sizes = [2, 16], strides = [1, 1]} : vector<32x16xf32> to vector<2x16xf32>
    %c0_47 = arith.constant 0 : index
    %c208 = arith.constant 208 : index
    %64 = vector.load %arg4[%c0_47, %c208] : memref<2x256xf32, #tpu.memory_space<vmem>>, vector<2x16xf32>
    tpu.vector_store %arg4[%c0_47, %c208], %63 {strides = array<i32>} : memref<2x256xf32, #tpu.memory_space<vmem>>, vector<2x16xf32>,
    %65 = vector.extract_strided_slice %36 {offsets = [28, 0], sizes = [2, 16], strides = [1, 1]} : vector<32x16xf32> to vector<2x16xf32>
    %c0_48 = arith.constant 0 : index
    %c224 = arith.constant 224 : index
    %66 = vector.load %arg4[%c0_48, %c224] : memref<2x256xf32, #tpu.memory_space<vmem>>, vector<2x16xf32>
    tpu.vector_store %arg4[%c0_48, %c224], %65 {strides = array<i32>} : memref<2x256xf32, #tpu.memory_space<vmem>>, vector<2x16xf32>,
    %67 = vector.extract_strided_slice %36 {offsets = [30, 0], sizes = [2, 16], strides = [1, 1]} : vector<32x16xf32> to vector<2x16xf32>
    %c0_49 = arith.constant 0 : index
    %c240 = arith.constant 240 : index
    %68 = vector.load %arg4[%c0_49, %c240] : memref<2x256xf32, #tpu.memory_space<vmem>>, vector<2x16xf32>
    tpu.vector_store %arg4[%c0_49, %c240], %67 {strides = array<i32>} : memref<2x256xf32, #tpu.memory_space<vmem>>, vector<2x16xf32>,
    %c0_50 = arith.constant 0 : index
    %c0_51 = arith.constant 0 : index
    %69 = vector.load %arg4[%c0_50, %c0_51] : memref<2x256xf32, #tpu.memory_space<vmem>>, vector<2x256xf32>
    %c520 = arith.constant 520 : index
    %c0_52 = arith.constant 0 : index
    %70 = vector.load %arg1[%c520, %c0_52] : memref<1160x128xf32, #tpu.memory_space<vmem>>, vector<256x32xf32>
    %cst_53 = arith.constant dense<0.000000e+00> : vector<2x32xf32>
    %71 = tpu.matmul %69, %70, %cst_53 {dimension_numbers = #tpu.dot_dimension_numbers<[1], [0], [0], [1], [0, 0, 1, 1], [], []>, precision = #tpu.contract_precision<fp32>} : vector<2x256xf32>, vector<256x32xf32>, vector<2x32xf32> -> vector<2x32xf32>
    %c776 = arith.constant 776 : index
    %c0_54 = arith.constant 0 : index
    %72 = vector.load %arg1[%c776, %c0_54] : memref<1160x128xf32, #tpu.memory_space<vmem>>, vector<1x32xf32>
    %73 = vector.broadcast %72 : vector<1x32xf32> to vector<2x32xf32>
    %74 = arith.addf %71, %73 : vector<2x32xf32>
    %75 = vector.extract_strided_slice %1 {offsets = [0, 0], sizes = [16, 8], strides = [1, 1]} : vector<16x128xf32> to vector<16x8xf32>
    %c784 = arith.constant 784 : index
    %c0_55 = arith.constant 0 : index
    %76 = vector.load %arg1[%c784, %c0_55] : memref<1160x128xf32, #tpu.memory_space<vmem>>, vector<8x32xf32>
    %cst_56 = arith.constant dense<0.000000e+00> : vector<16x32xf32>
    %77 = tpu.matmul %75, %76, %cst_56 {dimension_numbers = #tpu.dot_dimension_numbers<[1], [0], [0], [1], [0, 0, 1, 1], [], []>, precision = #tpu.contract_precision<fp32>} : vector<16x8xf32>, vector<8x32xf32>, vector<16x32xf32> -> vector<16x32xf32>
    %c792 = arith.constant 792 : index
    %c0_57 = arith.constant 0 : index
    %78 = vector.load %arg1[%c792, %c0_57] : memref<1160x128xf32, #tpu.memory_space<vmem>>, vector<1x32xf32>
    %79 = vector.broadcast %78 : vector<1x32xf32> to vector<16x32xf32>
    %80 = arith.addf %77, %79 : vector<16x32xf32>
    %c800 = arith.constant 800 : index
    %c0_58 = arith.constant 0 : index
    %81 = vector.load %arg1[%c800, %c0_58] : memref<1160x128xf32, #tpu.memory_space<vmem>>, vector<18x2xf32>
    %cst_59 = arith.constant dense<0.000000e+00> : vector<18x32xf32>
    %82 = tpu.matmul %81, %74, %cst_59 {dimension_numbers = #tpu.dot_dimension_numbers<[1], [0], [0], [1], [0, 0, 1, 1], [], []>, precision = #tpu.contract_precision<fp32>} : vector<18x2xf32>, vector<2x32xf32>, vector<18x32xf32> -> vector<18x32xf32>
    %c824 = arith.constant 824 : index
    %c0_60 = arith.constant 0 : index
    %83 = vector.load %arg1[%c824, %c0_60] : memref<1160x128xf32, #tpu.memory_space<vmem>>, vector<18x16xf32>
    %cst_61 = arith.constant dense<0.000000e+00> : vector<18x32xf32>
    %84 = tpu.matmul %83, %80, %cst_61 {dimension_numbers = #tpu.dot_dimension_numbers<[1], [0], [0], [1], [0, 0, 1, 1], [], []>, precision = #tpu.contract_precision<fp32>} : vector<18x16xf32>, vector<16x32xf32>, vector<18x32xf32> -> vector<18x32xf32>
    %85 = arith.addf %82, %84 : vector<18x32xf32>
    %c896 = arith.constant 896 : index
    %c0_62 = arith.constant 0 : index
    %86 = vector.load %arg1[%c896, %c0_62] : memref<1160x128xf32, #tpu.memory_space<vmem>>, vector<32x96xf32>
    %cst_63 = arith.constant dense<0.000000e+00> : vector<18x96xf32>
    %87 = tpu.matmul %85, %86, %cst_63 {dimension_numbers = #tpu.dot_dimension_numbers<[1], [0], [0], [1], [0, 0, 1, 1], [], []>, precision = #tpu.contract_precision<fp32>} : vector<18x32xf32>, vector<32x96xf32>, vector<18x96xf32> -> vector<18x96xf32>
    %c928 = arith.constant 928 : index
    %c0_64 = arith.constant 0 : index
    %88 = vector.load %arg1[%c928, %c0_64] : memref<1160x128xf32, #tpu.memory_space<vmem>>, vector<1x96xf32>
    %89 = vector.broadcast %88 : vector<1x96xf32> to vector<18x96xf32>
    %90 = arith.addf %87, %89 : vector<18x96xf32>
    %c872 = arith.constant 872 : index
    %c0_65 = arith.constant 0 : index
    %91 = vector.load %arg1[%c872, %c0_65] : memref<1160x128xf32, #tpu.memory_space<vmem>>, vector<18x18xf32>
    %c936 = arith.constant 936 : index
    %c0_66 = arith.constant 0 : index
    %92 = vector.load %arg1[%c936, %c0_66] : memref<1160x128xf32, #tpu.memory_space<vmem>>, vector<32x32xf32>
    %93 = vector.extract_strided_slice %90 {offsets = [0, 0], sizes = [18, 8], strides = [1, 1]} : vector<18x96xf32> to vector<18x8xf32>
    %94 = vector.extract_strided_slice %90 {offsets = [0, 32], sizes = [18, 8], strides = [1, 1]} : vector<18x96xf32> to vector<18x8xf32>
    %95 = vector.extract_strided_slice %90 {offsets = [0, 64], sizes = [18, 8], strides = [1, 1]} : vector<18x96xf32> to vector<18x8xf32>
    %cst_67 = arith.constant dense<0.000000e+00> : vector<18x18xf32>
    %96 = tpu.matmul %93, %94, %cst_67 {dimension_numbers = #tpu.dot_dimension_numbers<[1], [1], [0], [0], [0, 0, 1, 0], [], []>, precision = #tpu.contract_precision<fp32>} : vector<18x8xf32>, vector<18x8xf32>, vector<18x18xf32> -> vector<18x18xf32>
    %97 = arith.addf %96, %91 : vector<18x18xf32>
    %cst_68 = arith.constant dense<0xFF800000> : vector<18xf32>
    %98 = vector.multi_reduction <maximumf>, %97, %cst_68 [1] : vector<18x18xf32> to vector<18xf32>
    %99 = vector.shape_cast %98 : vector<18xf32> to vector<18x1xf32>
    %100 = vector.broadcast %99 : vector<18x1xf32> to vector<18x18xf32>
    %101 = arith.subf %97, %100 : vector<18x18xf32>
    %102 = math.exp %101 : vector<18x18xf32>
    %cst_69 = arith.constant dense<0.000000e+00> : vector<18xf32>
    %103 = vector.multi_reduction <add>, %102, %cst_69 [1] : vector<18x18xf32> to vector<18xf32>
    %104 = vector.shape_cast %103 : vector<18xf32> to vector<18x1xf32>
    %105 = tpu.reciprocal %104 {approx = true} : vector<18x1xf32> -> vector<18x1xf32>
    %106 = vector.broadcast %105 : vector<18x1xf32> to vector<18x18xf32>
    %107 = arith.mulf %102, %106 : vector<18x18xf32>
    %cst_70 = arith.constant dense<0.000000e+00> : vector<18x8xf32>
    %108 = tpu.matmul %107, %95, %cst_70 {dimension_numbers = #tpu.dot_dimension_numbers<[1], [0], [0], [1], [0, 0, 1, 1], [], []>, precision = #tpu.contract_precision<fp32>} : vector<18x18xf32>, vector<18x8xf32>, vector<18x8xf32> -> vector<18x8xf32>
    %109 = vector.extract_strided_slice %92 {offsets = [0, 0], sizes = [8, 32], strides = [1, 1]} : vector<32x32xf32> to vector<8x32xf32>
    %cst_71 = arith.constant dense<0.000000e+00> : vector<18x32xf32>
    %110 = tpu.matmul %108, %109, %cst_71 {dimension_numbers = #tpu.dot_dimension_numbers<[1], [0], [0], [1], [0, 0, 1, 1], [], []>, precision = #tpu.contract_precision<fp32>} : vector<18x8xf32>, vector<8x32xf32>, vector<18x32xf32> -> vector<18x32xf32>
    %111 = vector.extract_strided_slice %90 {offsets = [0, 8], sizes = [18, 8], strides = [1, 1]} : vector<18x96xf32> to vector<18x8xf32>
    %112 = vector.extract_strided_slice %90 {offsets = [0, 40], sizes = [18, 8], strides = [1, 1]} : vector<18x96xf32> to vector<18x8xf32>
    %113 = vector.extract_strided_slice %90 {offsets = [0, 72], sizes = [18, 8], strides = [1, 1]} : vector<18x96xf32> to vector<18x8xf32>
    %cst_72 = arith.constant dense<0.000000e+00> : vector<18x18xf32>
    %114 = tpu.matmul %111, %112, %cst_72 {dimension_numbers = #tpu.dot_dimension_numbers<[1], [1], [0], [0], [0, 0, 1, 0], [], []>, precision = #tpu.contract_precision<fp32>} : vector<18x8xf32>, vector<18x8xf32>, vector<18x18xf32> -> vector<18x18xf32>
    %115 = arith.addf %114, %91 : vector<18x18xf32>
    %cst_73 = arith.constant dense<0xFF800000> : vector<18xf32>
    %116 = vector.multi_reduction <maximumf>, %115, %cst_73 [1] : vector<18x18xf32> to vector<18xf32>
    %117 = vector.shape_cast %116 : vector<18xf32> to vector<18x1xf32>
    %118 = vector.broadcast %117 : vector<18x1xf32> to vector<18x18xf32>
    %119 = arith.subf %115, %118 : vector<18x18xf32>
    %120 = math.exp %119 : vector<18x18xf32>
    %cst_74 = arith.constant dense<0.000000e+00> : vector<18xf32>
    %121 = vector.multi_reduction <add>, %120, %cst_74 [1] : vector<18x18xf32> to vector<18xf32>
    %122 = vector.shape_cast %121 : vector<18xf32> to vector<18x1xf32>
    %123 = tpu.reciprocal %122 {approx = true} : vector<18x1xf32> -> vector<18x1xf32>
    %124 = vector.broadcast %123 : vector<18x1xf32> to vector<18x18xf32>
    %125 = arith.mulf %120, %124 : vector<18x18xf32>
    %cst_75 = arith.constant dense<0.000000e+00> : vector<18x8xf32>
    %126 = tpu.matmul %125, %113, %cst_75 {dimension_numbers = #tpu.dot_dimension_numbers<[1], [0], [0], [1], [0, 0, 1, 1], [], []>, precision = #tpu.contract_precision<fp32>} : vector<18x18xf32>, vector<18x8xf32>, vector<18x8xf32> -> vector<18x8xf32>
    %127 = vector.extract_strided_slice %92 {offsets = [8, 0], sizes = [8, 32], strides = [1, 1]} : vector<32x32xf32> to vector<8x32xf32>
    %cst_76 = arith.constant dense<0.000000e+00> : vector<18x32xf32>
    %128 = tpu.matmul %126, %127, %cst_76 {dimension_numbers = #tpu.dot_dimension_numbers<[1], [0], [0], [1], [0, 0, 1, 1], [], []>, precision = #tpu.contract_precision<fp32>} : vector<18x8xf32>, vector<8x32xf32>, vector<18x32xf32> -> vector<18x32xf32>
    %129 = arith.addf %110, %128 : vector<18x32xf32>
    %130 = vector.extract_strided_slice %90 {offsets = [0, 16], sizes = [18, 8], strides = [1, 1]} : vector<18x96xf32> to vector<18x8xf32>
    %131 = vector.extract_strided_slice %90 {offsets = [0, 48], sizes = [18, 8], strides = [1, 1]} : vector<18x96xf32> to vector<18x8xf32>
    %132 = vector.extract_strided_slice %90 {offsets = [0, 80], sizes = [18, 8], strides = [1, 1]} : vector<18x96xf32> to vector<18x8xf32>
    %cst_77 = arith.constant dense<0.000000e+00> : vector<18x18xf32>
    %133 = tpu.matmul %130, %131, %cst_77 {dimension_numbers = #tpu.dot_dimension_numbers<[1], [1], [0], [0], [0, 0, 1, 0], [], []>, precision = #tpu.contract_precision<fp32>} : vector<18x8xf32>, vector<18x8xf32>, vector<18x18xf32> -> vector<18x18xf32>
    %134 = arith.addf %133, %91 : vector<18x18xf32>
    %cst_78 = arith.constant dense<0xFF800000> : vector<18xf32>
    %135 = vector.multi_reduction <maximumf>, %134, %cst_78 [1] : vector<18x18xf32> to vector<18xf32>
    %136 = vector.shape_cast %135 : vector<18xf32> to vector<18x1xf32>
    %137 = vector.broadcast %136 : vector<18x1xf32> to vector<18x18xf32>
    %138 = arith.subf %134, %137 : vector<18x18xf32>
    %139 = math.exp %138 : vector<18x18xf32>
    %cst_79 = arith.constant dense<0.000000e+00> : vector<18xf32>
    %140 = vector.multi_reduction <add>, %139, %cst_79 [1] : vector<18x18xf32> to vector<18xf32>
    %141 = vector.shape_cast %140 : vector<18xf32> to vector<18x1xf32>
    %142 = tpu.reciprocal %141 {approx = true} : vector<18x1xf32> -> vector<18x1xf32>
    %143 = vector.broadcast %142 : vector<18x1xf32> to vector<18x18xf32>
    %144 = arith.mulf %139, %143 : vector<18x18xf32>
    %cst_80 = arith.constant dense<0.000000e+00> : vector<18x8xf32>
    %145 = tpu.matmul %144, %132, %cst_80 {dimension_numbers = #tpu.dot_dimension_numbers<[1], [0], [0], [1], [0, 0, 1, 1], [], []>, precision = #tpu.contract_precision<fp32>} : vector<18x18xf32>, vector<18x8xf32>, vector<18x8xf32> -> vector<18x8xf32>
    %146 = vector.extract_strided_slice %92 {offsets = [16, 0], sizes = [8, 32], strides = [1, 1]} : vector<32x32xf32> to vector<8x32xf32>
    %cst_81 = arith.constant dense<0.000000e+00> : vector<18x32xf32>
    %147 = tpu.matmul %145, %146, %cst_81 {dimension_numbers = #tpu.dot_dimension_numbers<[1], [0], [0], [1], [0, 0, 1, 1], [], []>, precision = #tpu.contract_precision<fp32>} : vector<18x8xf32>, vector<8x32xf32>, vector<18x32xf32> -> vector<18x32xf32>
    %148 = arith.addf %129, %147 : vector<18x32xf32>
    %149 = vector.extract_strided_slice %90 {offsets = [0, 24], sizes = [18, 8], strides = [1, 1]} : vector<18x96xf32> to vector<18x8xf32>
    %150 = vector.extract_strided_slice %90 {offsets = [0, 56], sizes = [18, 8], strides = [1, 1]} : vector<18x96xf32> to vector<18x8xf32>
    %151 = vector.extract_strided_slice %90 {offsets = [0, 88], sizes = [18, 8], strides = [1, 1]} : vector<18x96xf32> to vector<18x8xf32>
    %cst_82 = arith.constant dense<0.000000e+00> : vector<18x18xf32>
    %152 = tpu.matmul %149, %150, %cst_82 {dimension_numbers = #tpu.dot_dimension_numbers<[1], [1], [0], [0], [0, 0, 1, 0], [], []>, precision = #tpu.contract_precision<fp32>} : vector<18x8xf32>, vector<18x8xf32>, vector<18x18xf32> -> vector<18x18xf32>
    %153 = arith.addf %152, %91 : vector<18x18xf32>
    %cst_83 = arith.constant dense<0xFF800000> : vector<18xf32>
    %154 = vector.multi_reduction <maximumf>, %153, %cst_83 [1] : vector<18x18xf32> to vector<18xf32>
    %155 = vector.shape_cast %154 : vector<18xf32> to vector<18x1xf32>
    %156 = vector.broadcast %155 : vector<18x1xf32> to vector<18x18xf32>
    %157 = arith.subf %153, %156 : vector<18x18xf32>
    %158 = math.exp %157 : vector<18x18xf32>
    %cst_84 = arith.constant dense<0.000000e+00> : vector<18xf32>
    %159 = vector.multi_reduction <add>, %158, %cst_84 [1] : vector<18x18xf32> to vector<18xf32>
    %160 = vector.shape_cast %159 : vector<18xf32> to vector<18x1xf32>
    %161 = tpu.reciprocal %160 {approx = true} : vector<18x1xf32> -> vector<18x1xf32>
    %162 = vector.broadcast %161 : vector<18x1xf32> to vector<18x18xf32>
    %163 = arith.mulf %158, %162 : vector<18x18xf32>
    %cst_85 = arith.constant dense<0.000000e+00> : vector<18x8xf32>
    %164 = tpu.matmul %163, %151, %cst_85 {dimension_numbers = #tpu.dot_dimension_numbers<[1], [0], [0], [1], [0, 0, 1, 1], [], []>, precision = #tpu.contract_precision<fp32>} : vector<18x18xf32>, vector<18x8xf32>, vector<18x8xf32> -> vector<18x8xf32>
    %165 = vector.extract_strided_slice %92 {offsets = [24, 0], sizes = [8, 32], strides = [1, 1]} : vector<32x32xf32> to vector<8x32xf32>
    %cst_86 = arith.constant dense<0.000000e+00> : vector<18x32xf32>
    %166 = tpu.matmul %164, %165, %cst_86 {dimension_numbers = #tpu.dot_dimension_numbers<[1], [0], [0], [1], [0, 0, 1, 1], [], []>, precision = #tpu.contract_precision<fp32>} : vector<18x8xf32>, vector<8x32xf32>, vector<18x32xf32> -> vector<18x32xf32>
    %167 = arith.addf %148, %166 : vector<18x32xf32>
    %c968 = arith.constant 968 : index
    %c0_87 = arith.constant 0 : index
    %168 = vector.load %arg1[%c968, %c0_87] : memref<1160x128xf32, #tpu.memory_space<vmem>>, vector<1x32xf32>
    %169 = vector.broadcast %168 : vector<1x32xf32> to vector<18x32xf32>
    %170 = arith.addf %167, %169 : vector<18x32xf32>
    %171 = arith.addf %85, %170 : vector<18x32xf32>
    %cst_88 = arith.constant dense<0.000000e+00> : vector<18xf32>
    %172 = vector.multi_reduction <add>, %171, %cst_88 [1] : vector<18x32xf32> to vector<18xf32>
    %173 = vector.shape_cast %172 : vector<18xf32> to vector<18x1xf32>
    %cst_89 = arith.constant 3.200000e+01 : f32
    %174 = vector.broadcast %cst_89 : f32 to vector<18x1xf32>
    %175 = arith.divf %173, %174 : vector<18x1xf32>
    %176 = vector.broadcast %175 : vector<18x1xf32> to vector<18x32xf32>
    %177 = arith.subf %171, %176 : vector<18x32xf32>
    %178 = arith.mulf %177, %177 : vector<18x32xf32>
    %cst_90 = arith.constant dense<0.000000e+00> : vector<18xf32>
    %179 = vector.multi_reduction <add>, %178, %cst_90 [1] : vector<18x32xf32> to vector<18xf32>
    %180 = vector.shape_cast %179 : vector<18xf32> to vector<18x1xf32>
    %cst_91 = arith.constant 3.200000e+01 : f32
    %181 = vector.broadcast %cst_91 : f32 to vector<18x1xf32>
    %182 = arith.divf %180, %181 : vector<18x1xf32>
    %183 = vector.broadcast %175 : vector<18x1xf32> to vector<18x32xf32>
    %184 = arith.subf %171, %183 : vector<18x32xf32>
    %cst_92 = arith.constant 9.99999974E-6 : f32
    %185 = vector.broadcast %cst_92 : f32 to vector<18x1xf32>
    %186 = arith.addf %182, %185 : vector<18x1xf32>
    %187 = math.rsqrt %186 : vector<18x1xf32>
    %188 = vector.broadcast %187 : vector<18x1xf32> to vector<18x32xf32>
    %189 = arith.mulf %184, %188 : vector<18x32xf32>
    %c976 = arith.constant 976 : index
    %c0_93 = arith.constant 0 : index
    %190 = vector.load %arg1[%c976, %c0_93] : memref<1160x128xf32, #tpu.memory_space<vmem>>, vector<1x32xf32>
    %191 = vector.broadcast %190 : vector<1x32xf32> to vector<18x32xf32>
    %192 = arith.mulf %189, %191 : vector<18x32xf32>
    %c984 = arith.constant 984 : index
    %c0_94 = arith.constant 0 : index
    %193 = vector.load %arg1[%c984, %c0_94] : memref<1160x128xf32, #tpu.memory_space<vmem>>, vector<1x32xf32>
    %194 = vector.broadcast %193 : vector<1x32xf32> to vector<18x32xf32>
    %195 = arith.addf %192, %194 : vector<18x32xf32>
    %c992 = arith.constant 992 : index
    %c0_95 = arith.constant 0 : index
    %196 = vector.load %arg1[%c992, %c0_95] : memref<1160x128xf32, #tpu.memory_space<vmem>>, vector<32x64xf32>
    %cst_96 = arith.constant dense<0.000000e+00> : vector<18x64xf32>
    %197 = tpu.matmul %195, %196, %cst_96 {dimension_numbers = #tpu.dot_dimension_numbers<[1], [0], [0], [1], [0, 0, 1, 1], [], []>, precision = #tpu.contract_precision<fp32>} : vector<18x32xf32>, vector<32x64xf32>, vector<18x64xf32> -> vector<18x64xf32>
    %c1024 = arith.constant 1024 : index
    %c0_97 = arith.constant 0 : index
    %198 = vector.load %arg1[%c1024, %c0_97] : memref<1160x128xf32, #tpu.memory_space<vmem>>, vector<1x64xf32>
    %199 = vector.broadcast %198 : vector<1x64xf32> to vector<18x64xf32>
    %200 = arith.addf %197, %199 : vector<18x64xf32>
    %cst_98 = arith.constant 0.000000e+00 : f32
    %201 = vector.broadcast %cst_98 : f32 to vector<18x64xf32>
    %202 = arith.maximumf %200, %201 : vector<18x64xf32>
    %c1032 = arith.constant 1032 : index
    %c0_99 = arith.constant 0 : index
    %203 = vector.load %arg1[%c1032, %c0_99] : memref<1160x128xf32, #tpu.memory_space<vmem>>, vector<64x32xf32>
    %cst_100 = arith.constant dense<0.000000e+00> : vector<18x32xf32>
    %204 = tpu.matmul %202, %203, %cst_100 {dimension_numbers = #tpu.dot_dimension_numbers<[1], [0], [0], [1], [0, 0, 1, 1], [], []>, precision = #tpu.contract_precision<fp32>} : vector<18x64xf32>, vector<64x32xf32>, vector<18x32xf32> -> vector<18x32xf32>
    %c1096 = arith.constant 1096 : index
    %c0_101 = arith.constant 0 : index
    %205 = vector.load %arg1[%c1096, %c0_101] : memref<1160x128xf32, #tpu.memory_space<vmem>>, vector<1x32xf32>
    %206 = vector.broadcast %205 : vector<1x32xf32> to vector<18x32xf32>
    %207 = arith.addf %204, %206 : vector<18x32xf32>
    %208 = arith.addf %195, %207 : vector<18x32xf32>
    %cst_102 = arith.constant dense<0.000000e+00> : vector<18xf32>
    %209 = vector.multi_reduction <add>, %208, %cst_102 [1] : vector<18x32xf32> to vector<18xf32>
    %210 = vector.shape_cast %209 : vector<18xf32> to vector<18x1xf32>
    %cst_103 = arith.constant 3.200000e+01 : f32
    %211 = vector.broadcast %cst_103 : f32 to vector<18x1xf32>
    %212 = arith.divf %210, %211 : vector<18x1xf32>
    %213 = vector.broadcast %212 : vector<18x1xf32> to vector<18x32xf32>
    %214 = arith.subf %208, %213 : vector<18x32xf32>
    %215 = arith.mulf %214, %214 : vector<18x32xf32>
    %cst_104 = arith.constant dense<0.000000e+00> : vector<18xf32>
    %216 = vector.multi_reduction <add>, %215, %cst_104 [1] : vector<18x32xf32> to vector<18xf32>
    %217 = vector.shape_cast %216 : vector<18xf32> to vector<18x1xf32>
    %cst_105 = arith.constant 3.200000e+01 : f32
    %218 = vector.broadcast %cst_105 : f32 to vector<18x1xf32>
    %219 = arith.divf %217, %218 : vector<18x1xf32>
    %220 = vector.broadcast %212 : vector<18x1xf32> to vector<18x32xf32>
    %221 = arith.subf %208, %220 : vector<18x32xf32>
    %cst_106 = arith.constant 9.99999974E-6 : f32
    %222 = vector.broadcast %cst_106 : f32 to vector<18x1xf32>
    %223 = arith.addf %219, %222 : vector<18x1xf32>
    %224 = math.rsqrt %223 : vector<18x1xf32>
    %225 = vector.broadcast %224 : vector<18x1xf32> to vector<18x32xf32>
    %226 = arith.mulf %221, %225 : vector<18x32xf32>
    %c1104 = arith.constant 1104 : index
    %c0_107 = arith.constant 0 : index
    %227 = vector.load %arg1[%c1104, %c0_107] : memref<1160x128xf32, #tpu.memory_space<vmem>>, vector<1x32xf32>
    %228 = vector.broadcast %227 : vector<1x32xf32> to vector<18x32xf32>
    %229 = arith.mulf %226, %228 : vector<18x32xf32>
    %c1112 = arith.constant 1112 : index
    %c0_108 = arith.constant 0 : index
    %230 = vector.load %arg1[%c1112, %c0_108] : memref<1160x128xf32, #tpu.memory_space<vmem>>, vector<1x32xf32>
    %231 = vector.broadcast %230 : vector<1x32xf32> to vector<18x32xf32>
    %232 = arith.addf %229, %231 : vector<18x32xf32>
    %c848 = arith.constant 848 : index
    %c0_109 = arith.constant 0 : index
    %233 = vector.load %arg1[%c848, %c0_109] : memref<1160x128xf32, #tpu.memory_space<vmem>>, vector<18x16xf32>
    %cst_110 = arith.constant dense<0.000000e+00> : vector<18x128xf32>
    %234 = tpu.matmul %233, %1, %cst_110 {dimension_numbers = #tpu.dot_dimension_numbers<[1], [0], [0], [1], [0, 0, 1, 1], [], []>, precision = #tpu.contract_precision<fp32>} : vector<18x16xf32>, vector<16x128xf32>, vector<18x128xf32> -> vector<18x128xf32>
    %c1120 = arith.constant 1120 : index
    %c0_111 = arith.constant 0 : index
    %235 = vector.load %arg1[%c1120, %c0_111] : memref<1160x128xf32, #tpu.memory_space<vmem>>, vector<32x128xf32>
    %cst_112 = arith.constant dense<0.000000e+00> : vector<18x128xf32>
    %236 = tpu.matmul %232, %235, %cst_112 {dimension_numbers = #tpu.dot_dimension_numbers<[1], [0], [0], [1], [0, 0, 1, 1], [], []>, precision = #tpu.contract_precision<fp32>} : vector<18x32xf32>, vector<32x128xf32>, vector<18x128xf32> -> vector<18x128xf32>
    %c1152 = arith.constant 1152 : index
    %c0_113 = arith.constant 0 : index
    %237 = vector.load %arg1[%c1152, %c0_113] : memref<1160x128xf32, #tpu.memory_space<vmem>>, vector<1x128xf32>
    %238 = vector.broadcast %237 : vector<1x128xf32> to vector<18x128xf32>
    %239 = arith.addf %236, %238 : vector<18x128xf32>
    %240 = arith.addf %239, %234 : vector<18x128xf32>
    %c0_114 = arith.constant 0 : index
    %c0_115 = arith.constant 0 : index
    %241 = vector.load %arg2[%c0_114, %c0_115] : memref<18x128xf32, #tpu.memory_space<vmem>>, vector<18x128xf32>
    tpu.vector_store %arg2[%c0_114, %c0_115], %240 {strides = array<i32>} : memref<18x128xf32, #tpu.memory_space<vmem>>, vector<18x128xf32>,
    return
  }
}

</mosaic_0001>

<bundles_post_ra>
// kernel: forward.1
= control target key start
LH: loop header
LB: loop body
LE: loop exit
PB: predicated region body
PF: predicated region fallthrough
CT: control target
= control target key end

     0   :  { %vm43_vm0 = vcmask 588800   ;;  %vm3485_vm1 = vcmask 130048   ;;  %s22936_s21 = smov 16   ;;  %s22937_s22 = smov 32   ;;  %vm3506_vm2 = vcmask 261248   ;;  %vm3527_vm3 = vcmask 392448   ;;  %s27805_s1 = inlined_call_operand.vmem [shape: f32[1160,128], index: 1, kind: input, shape index: {}]   ;;  %s27806_s0 = inlined_call_operand.vmem [shape: f32[144,128], index: 0, kind: input, shape index: {}]   ;;  %s27807_s2 = inlined_call_operand.vmem [shape: f32[18,128], index: 2, kind: output, shape index: {}]  }
   0x1   :  { %v29_v0 = vld [vmem:[%s27805_s1 + $0x120] sm:$0xff]  ;;  %v30_v1 = vld [vmem:[%s27805_s1 + $0x128] sm:$0xff]  ;;  %v22977_v2 = vld [vmem:[%s27805_s1 + $0x130] sm:$0xff]  ;;  %s22939_s3 = smov 48   ;;  %s22940_s12 = smov 64   ;;  %vm3548_vm4 = vcmask 523648  }
   0x2   :  { %v93_v3 = vand.u32 4294901760, %v29_v0  ;;  %v96_v4 = vand.u32 4294901760, %v30_v1  ;;  %v22982_v5 = vld [vmem:[%s27805_s1 + $0x138] sm:$0xff]  ;;  %v99_v6 = vand.u32 4294901760, %v22977_v2  ;;  %v22988_v7 = vld [vmem:[%s27805_s1 + $0x140] sm:$0xff]  ;;  %v22993_v8 = vld [vmem:[%s27805_s1 + $0x148] sm:$0xff] }
   0x3   :  { %v102_v9 = vand.u32 4294901760, %v22982_v5  ;;  %v105_v10 = vand.u32 4294901760, %v22988_v7  ;;  %v108_v11 = vand.u32 4294901760, %v22993_v8  ;;  %v23001_v12 = vld [vmem:[%s27805_s1 + $0x150] sm:$0xff]  ;;  %v23006_v13 = vld [vmem:[%s27805_s1 + $0x158] sm:$0xff]  ;;  %v11_v17 = vld [vmem:[%s27806_s0] sm:$0xff] }
   0x4   :  { %v23008_v14 = vpack.c.bf16 %v96_v4, %v93_v3  ;;  %v111_v15 = vand.u32 4294901760, %v23001_v12  ;;  %v114_v16 = vand.u32 4294901760, %v23006_v13  ;;  %v12_v18 = vld [vmem:[%s27806_s0 + $0x8] sm:$0xff]  ;;  %v13_v19 = vld [vmem:[%s27806_s0 + $0x10] sm:$0xff]  ;;  %v45_v22 = vsel %vm43_vm0, %v11_v17, 0  ;;  %v14_v24 = vld [vmem:[%s27806_s0 + $0x18] sm:$0xff] }
   0x5   :  { %v23025_v20 = vpack.c.bf16 %v102_v9, %v99_v6  ;;  %v23031_v21 = vpack.c.bf16 %v108_v11, %v105_v10  ;;  %v48_v23 = vsel %vm43_vm0, %v12_v18, 0  ;;  %v15_v25 = vld [vmem:[%s27806_s0 + $0x20] sm:$0xff]  ;;  %v23048_v27 = vand.u32 4294901760, %v45_v22  ;;  %v16_v34 = vld [vmem:[%s27806_s0 + $0x28] sm:$0xff]  ;;  %v17_v56 = vld [vmem:[%s27806_s0 + $0x30] sm:$0xff]  ;;  %s22941_s23 = smov 80  }
   0x6   :  { %21072 = vmatprep.subr.bf16.mxu0 %v23008_v14  ;;  %v23046_v26 = vpack.c.bf16 %v114_v16, %v111_v15  ;;  %v23050_v28 = vand.u32 4294901760, %v48_v23  ;;  %v51_v29 = vsel %vm43_vm0, %v13_v19, 0  ;;  %v54_v31 = vsel %vm43_vm0, %v14_v24, 0  ;;  %v23102_v51 = vld [vmem:[%s27805_s1 + $0x160] sm:$0xff]  ;;  %v18_v63 = vld [vmem:[%s27806_s0 + $0x38] sm:$0xff]  ;;  %v20_v24 = vld [vmem:[%s27806_s0 + $0x48] sm:$0xff] }
   0x7   :  { %21074 = vmatpush3.bf16.msra.mxu0 %v23008_v14  ;;  %v23054_v30 = vand.u32 4294901760, %v51_v29  ;;  %v23057_v32 = vsub.f32 %v29_v0, %v93_v3  ;;  %v23059_v33 = vsub.f32 %v30_v1, %v96_v4  ;;  %v23066_v35 = vsub.f32 %v45_v22, %v23048_v27  ;;  %v19_v0 = vld [vmem:[%s27806_s0 + $0x40] sm:$0xff]  ;;  %s22942_s5 = smov 96   ;;  %s22943_s10 = smov 112  }
   0x8   :  { %21076 = vmatprep.subr.bf16.mxu0 %v23025_v20  ;;  %v23069_v36 = vsub.f32 %v48_v23, %v23050_v28  ;;  %v23071_v37 = vand.u32 4294901760, %v54_v31  ;;  %v57_v38 = vsel %vm43_vm0, %v15_v25, 0  ;;  %v60_v46 = vsel %vm43_vm0, %v16_v34, 0  ;;  %s22947_s19 = smov 88   ;;  %s22948_s20 = smov 120  }
   0x9   :  { %v23075_v39 = vsub.f32 %v51_v29, %v23054_v30  ;;  %v27824_v40 = vand.u32 4294901760, %v23057_v32  ;;  %v27823_v41 = vand.u32 4294901760, %v23059_v33  ;;  %v23079_v42 = vand.u32 4294901760, %v57_v38  ;;  %s22949_s28 = smov 56   ;;  %s22950_s11 = smov 72  }
   0xa   :  { %v27814_v43 = vand.u32 4294901760, %v23066_v35  ;;  %v27813_v44 = vand.u32 4294901760, %v23069_v36  ;;  %v23084_v45 = vsub.f32 %v54_v31, %v23071_v37  ;;  %v23111_v55 = vand.u32 4294901760, %v60_v46  ;;  %s22951_s13 = smov 104   ;;  %s22952_s15 = smov 40  }
   0xb   :  { %21078 = vmatpush3.bf16.msra.mxu0 %v23025_v20  ;;  %v27812_v47 = vand.u32 4294901760, %v23075_v39  ;;  %v330_v48 = vsub.f32 %v23057_v32, %v27824_v40  ;;  %v337_v49 = vsub.f32 %v23059_v33, %v27823_v41  ;;  %v23096_v50 = vsub.f32 %v57_v38, %v23079_v42 }
   0xc   :  { %21080 = vmatprep.subr.bf16.mxu0 %v23031_v21  ;;  %v169_v52 = vsub.f32 %v23066_v35, %v27814_v43  ;;  %v179_v53 = vsub.f32 %v23069_v36, %v27813_v44  ;;  %v27811_v54 = vand.u32 4294901760, %v23084_v45  ;;  %v23121_v62 = vsub.f32 %v60_v46, %v23111_v55 }
   0xd   :  { %v189_v57 = vsub.f32 %v23075_v39, %v27812_v47  ;;  %v331_v58 = vand.u32 4294901760, %v330_v48  ;;  %v338_v59 = vand.u32 4294901760, %v337_v49  ;;  %v27810_v61 = vand.u32 4294901760, %v23096_v50 }
   0xe   :  { %v170_v60 = vand.u32 4294901760, %v169_v52  ;;  %v23131_v1 = vand.u32 4294901760, %v23102_v51  ;;  %v180_v3 = vand.u32 4294901760, %v179_v53  ;;  %v23136_v4 = vsub.f32 %v23084_v45, %v27811_v54 }
   0xf   :  { %21082 = vmatpush3.bf16.msra.mxu0 %v23031_v21  ;;  %v63_v17 = vsel %vm43_vm0, %v17_v56, 0  ;;  %v190_v18 = vand.u32 4294901760, %v189_v57  ;;  %v27808_v19 = vand.u32 4294901760, %v23121_v62  ;;  %v23146_v23 = vsub.f32 %v22977_v2, %v99_v6 }
  0x10   :  { %21084 = vmatprep.subr.bf16.mxu0 %v23046_v26  ;;  %18629 = vmatprep.mubr.f32.mxu0 %v170_v60  ;;  %v23141_v22 = vand.u32 4294901760, %v63_v17  ;;  %v21087_v25 = vpack.c.bf16 %v338_v59, %v331_v58  ;;  %v23154_v29 = vsub.f32 %v22982_v5, %v102_v9  ;;  %v66_v31 = vsel %vm43_vm0, %v18_v63, 0  ;;  %v21_v60 = vld [vmem:[%s27806_s0 + $0x50] sm:$0xff] }
  0x11   :  { %v69_v34 = vsel %vm43_vm0, %v19_v0, 0  ;;  %v209_v38 = vsub.f32 %v23096_v50, %v27810_v61  ;;  %v27821_v6 = vand.u32 4294901760, %v23146_v23  ;;  %v23165_v46 = vand.u32 4294901760, %v66_v31 }
  0x12   :  { %v23162_v2 = vsub.f32 %v63_v17, %v23141_v22  ;;  %v27820_v5 = vand.u32 4294901760, %v23154_v29  ;;  %v23169_v9 = vand.u32 4294901760, %v69_v34  ;;  %v72_v48 = vsel %vm43_vm0, %v20_v24, 0 }
  0x13   :  { %21086 = vmatpush3.bf16.msra.mxu0 %v23046_v26  ;;  %v23175_v49 = vsub.f32 %v22988_v7, %v105_v10  ;;  %v23181_v52 = vsub.f32 %v23121_v62, %v27808_v19  ;;  %v344_v56 = vsub.f32 %v23146_v23, %v27821_v6  ;;  %v23188_v57 = vsub.f32 %v66_v31, %v23165_v46 }
  0x14   :  { %18627 = vmatprep.subr.mxu0 %v23131_v1  ;;  %v27809_v53 = vand.u32 4294901760, %v23162_v2  ;;  %v351_v7 = vsub.f32 %v23154_v29, %v27820_v5  ;;  %v23194_v10 = vsub.f32 %v69_v34, %v23169_v9  ;;  %v23196_v58 = vand.u32 4294901760, %v72_v48 }
  0x15   :  { %v27818_v59 = vand.u32 4294901760, %v23175_v49  ;;  %v345_v0 = vand.u32 4294901760, %v344_v56  ;;  %v27815_v17 = vand.u32 4294901760, %v23188_v57  ;;  %v23209_v24 = vsub.f32 %v22993_v8, %v108_v11  ;;  %v22_v56 = vld [vmem:[%s27806_s0 + $0x58] sm:$0xff] }
  0x16   :  { %v229_v63 = vsub.f32 %v23162_v2, %v27809_v53  ;;  %v352_v31 = vand.u32 4294901760, %v351_v7  ;;  %v27817_v34 = vand.u32 4294901760, %v23194_v10  ;;  %v23214_v19 = vsub.f32 %v72_v48, %v23196_v58  ;;  %v23_v48 = vld [vmem:[%s27806_s0 + $0x60] sm:$0xff] }
  0x17   :  { %18628 = vmatpush3.msra.mxu0 %v23131_v1  ;;  %v358_v53 = vsub.f32 %v23175_v49, %v27818_v59  ;;  %v200_v8 = vand.u32 4294901760, %v23136_v4  ;;  %v210_v11 = vand.u32 4294901760, %v209_v38  ;;  %v27816_v7 = vand.u32 4294901760, %v23209_v24  ;;  %v24_v4 = vld [vmem:[%s27806_s0 + $0x68] sm:$0xff] }
  0x18   :  { %18630 = vmatmul.mubr.f32.vlgmr.msra.gmra.mrb[0].mxu0 %v180_v3  ;;  %21088 = vmatprep.subr.bf16.mxu0 %v21087_v25  ;;  %v75_v61 = vsel %vm43_vm0, %v21_v60, 0  ;;  %v220_v54 = vand.u32 4294901760, %v23181_v52  ;;  %v230_v47 = vand.u32 4294901760, %v229_v63  ;;  %v21091_v44 = vpack.c.bf16 %v352_v31, %v345_v0 }
  0x19   :  { %18632 = vmatprep.mubr.f32.mxu0 %v190_v18  ;;  %21090 = vmatpush3.bf16.msra.mxu0 %v21087_v25  ;;  %v239_v3 = vsub.f32 %v23188_v57, %v27815_v17  ;;  %v359_v38 = vand.u32 4294901760, %v358_v53  ;;  %v365_v60 = vsub.f32 %v23209_v24, %v27816_v7  ;;  %v23238_v43 = vand.u32 4294901760, %v75_v61  ;;  %v25_v7 = vld [vmem:[%s27806_s0 + $0x70] sm:$0xff] }
  0x1a   :  { %v78_v18 = vsel %vm43_vm0, %v22_v56, 0  ;;  %21092 = vmatprep.subr.bf16.mxu0 %v21091_v44  ;;  %v249_v25 = vsub.f32 %v23194_v10, %v27817_v34  ;;  %v27819_v52 = vand.u32 4294901760, %v23214_v19  ;;  %v81_v0 = vsel %vm43_vm0, %v23_v48, 0 }
  0x1b   :  { %v23245_v63 = vand.u32 4294901760, %v78_v18  ;;  %v366_v53 = vand.u32 4294901760, %v365_v60  ;;  %v23249_v31 = vsub.f32 %v75_v61, %v23238_v43  ;;  %v23251_v17 = vand.u32 4294901760, %v81_v0 }
  0x1c   :  { %18633 = vmatmul.mubr.f32.gmra.mrb[2].mxu0 %v200_v8  ;;  %v84_v56 = vsel %vm43_vm0, %v24_v4, 0  ;;  %v240_v34 = vand.u32 4294901760, %v239_v3  ;;  %v23265_v61 = vsub.f32 %v23001_v12, %v111_v15  ;;  %vm3569_vm5 = vcmask 654848  }
  0x1d   :  { %28011 = vst [vmem:[#allocation4_spill] sm:$0xff] %v23249_v31  ;;  %18635 = vmatprep.mubr.f32.mxu0 %v210_v11  ;;  %21094 = vmatpush3.bf16.msra.mxu0 %v21091_v44  ;;  %v23258_v59 = vsub.f32 %v78_v18, %v23245_v63  ;;  %v23260_v48 = vand.u32 4294901760, %v84_v56  ;;  %v21095_v8 = vpack.c.bf16 %v366_v53, %v359_v38  ;;  %v27822_v4 = vand.u32 4294901760, %v23249_v31  ;;  %v26_v11 = vld [vmem:[%s27806_s0 + $0x78] sm:$0xff] }
  0x1e   :  { %v23269_v60 = vsub.f32 %v81_v0, %v23251_v17  ;;  %v23274_v44 = vsub.f32 %v23006_v13, %v114_v16  ;;  %v371_v15 = vand.u32 4294901760, %v23265_v61  ;;  %v87_v38 = vsel %vm43_vm0, %v25_v7, 0 }
  0x1f   :  { %v27827_v3 = vand.u32 4294901760, %v23258_v59  ;;  %v23281_v12 = vsub.f32 %v84_v56, %v23260_v48  ;;  %v250_v18 = vand.u32 4294901760, %v249_v25  ;;  %v259_v13 = vsub.f32 %v23214_v19, %v27819_v52  ;;  %21096 = vmatprep.subr.bf16.mxu0 %v21095_v8 }
  0x20   :  { %18636 = vmatmul.mubr.f32.gmra.mrb[4].mxu0 %v220_v54  ;;  %v378_v16 = vand.u32 4294901760, %v23274_v44  ;;  %v23289_v0 = vand.u32 4294901760, %v87_v38  ;;  %v269_v53 = vsub.f32 %v23249_v31, %v27822_v4  ;;  %v27828_v56 = vand.u32 4294901760, %v23269_v60 }
  0x21   :  { %28012 = vst [vmem:[#allocation5_spill] sm:$0xff] %v23281_v12  ;;  %18638 = vmatprep.mubr.f32.mxu0 %v230_v47  ;;  %21098 = vmatpush3.bf16.msra.mxu0 %v21095_v8  ;;  %v372_v54 = vsub.f32 %v23265_v61, %v371_v15  ;;  %v90_v7 = vsel %vm43_vm0, %v26_v11, 0  ;;  %v279_v47 = vsub.f32 %v23258_v59, %v27827_v3  ;;  %v260_v4 = vand.u32 4294901760, %v259_v13 }
  0x22   :  { %v379_v25 = vsub.f32 %v23274_v44, %v378_v16  ;;  %v23299_v52 = vsub.f32 %v87_v38, %v23289_v0  ;;  %v23305_v6 = vand.u32 4294901760, %v90_v7  ;;  %v384_v11 = vsub.f32 %v23102_v51, %v23131_v1 }
  0x23   :  { %v373_v5 = vand.u32 4294901760, %v372_v54  ;;  %v270_v40 = vand.u32 4294901760, %v269_v53  ;;  %v289_v38 = vsub.f32 %v23269_v60, %v27828_v56  ;;  %v28014_v13 = vand.u32 4294901760, %v23281_v12 }
  0x24   :  { %18639 = vmatmul.mubr.f32.gmra.mrb[6].mxu0 %v240_v34  ;;  %v380_v41 = vand.u32 4294901760, %v379_v25  ;;  %v23314_v3 = vsub.f32 %v90_v7, %v23305_v6  ;;  %v23316_v8 = vand.u32 4294901760, %v384_v11  ;;  %v280_v34 = vand.u32 4294901760, %v279_v47 }
  0x25   :  { %18641 = vmatprep.mubr.f32.mxu0 %v250_v18  ;;  %v299_v25 = vsub.f32 %v23281_v12, %v28014_v13  ;;  %v28015_v51 = vand.u32 4294901760, %v23057_v32  ;;  %v28016_v18 = vand.u32 4294901760, %v23059_v33  ;;  %v28017_v56 = vand.u32 4294901760, %v23146_v23 }
  0x26   :  { %v21099_v54 = vpack.c.bf16 %v380_v41, %v373_v5  ;;  %28013 = vst [vmem:[#allocation6_spill] sm:$0xff] %v23316_v8  ;;  %v28018_v31 = vand.u32 4294901760, %v23154_v29  ;;  %v386_v5 = vsub.f32 %v384_v11, %v23316_v8  ;;  %v28020_v47 = vand.u32 4294901760, %v23175_v49 }
  0x27   :  { %v23325_v53 = vpack.c.bf16 %v28016_v18, %v28015_v51  ;;  %v28021_v13 = vand.u32 4294901760, %v23209_v24  ;;  %v23341_v51 = vpack.c.bf16 %v378_v16, %v371_v15  ;;  %v290_v18 = vand.u32 4294901760, %v289_v38 }
  0x28   :  { %v23331_v7 = vpack.c.bf16 %v28018_v31, %v28017_v56  ;;  %18642 = vmatmul.mubr.f32.gmra.mrb[8].mxu0 %v260_v4  ;;  %21100 = vmatprep.subr.bf16.mxu0 %v21099_v54  ;;  %v28022_v31 = vand.u32 4294901760, %v23299_v52  ;;  %v387_v56 = vand.u32 4294901760, %v386_v5  ;;  %v21103_v41 = vpack.c.bf16 %v23059_v33, %v23057_v32 }
  0x29   :  { %v23339_v12 = vpack.c.bf16 %v28021_v13, %v28020_v47  ;;  %18644 = vmatprep.mubr.f32.mxu0 %v270_v40  ;;  %21102 = vmatpush3.bf16.msra.mxu0 %v21099_v54  ;;  %v300_v8 = vand.u32 4294901760, %v299_v25  ;;  %v21107_v32 = vpack.c.bf16 %v23154_v29, %v23146_v23  ;;  %v21111_v33 = vpack.c.bf16 %v23209_v24, %v23175_v49  ;;  %v28024_v23 = vld [vmem:[#allocation4_spill] sm:$0xff]  ;;  %v28025_v29 = vld [vmem:[#allocation5_spill] sm:$0xff] }
  0x2a   :  { %28019 = vst [vmem:[#allocation7_spill] sm:$0xff] %v23331_v7  ;;  %v309_v4 = vsub.f32 %v23299_v52, %v28022_v31  ;;  %v28023_v7 = vand.u32 4294901760, %v23314_v3  ;;  %18669 = vmatprep.subr.mxu0 %v387_v56  ;;  %v21115_v16 = vpack.c.bf16 %v23274_v44, %v23265_v61  ;;  %v28026_v49 = vand.u32 4294901760, %v23066_v35 }
  0x2b   :  { %v28027_v24 = vand.u32 4294901760, %v23069_v36  ;;  %v28028_v61 = vand.u32 4294901760, %v23075_v39  ;;  %v28042_v38 = vmov %v28022_v31  ;;  %vm3590_vm6 = vcmask 786048  }
  0x2c   :  { %18645 = vmatmul.mubr.f32.gmra.mrb[10].mxu0 %v280_v34  ;;  %v319_v47 = vsub.f32 %v23314_v3, %v28023_v7  ;;  %v310_v15 = vand.u32 4294901760, %v309_v4  ;;  %vm3611_vm7 = vcmask 917248   ;;  %vm3632_vm8 = vcmask 1048448  }
  0x2d   :  { %18647 = vmatprep.mubr.f32.mxu0 %v290_v18  ;;  %18670 = vmatpush3.msra.mxu0 %v387_v56  ;;  %v1311_v56 = vld [vmem:[%s27805_s1 + $0x40] sm:$0xff]  ;;  %vm4536_vm9 = vcmask 123904   ;;  %vm4550_vm10 = vcmask 255104   ;;  %vm4563_vm11 = vcmask 386304   ;;  %vm4569_vm12 = vcmask 517504  }
  0x2e   :  { %21104 = vmatprep.subr.bf16.mxu0 %v21103_v41  ;;  %v320_v40 = vand.u32 4294901760, %v319_v47  ;;  %vm4582_vm13 = vcmask 648704   ;;  %vm4588_vm14 = vcmask 779904   ;;  %vm4601_vm15 = vcmask 911104  }
  0x2f   :  { %vm4607_vm0 = vcmask 1042304  }
  0x30   :  { %18648 = vmatmul.mubr.f32.gmra.mrb[12].mxu0 %v300_v8  ;;  %v28030_v8 = vand.u32 4294901760, %v23084_v45 }
  0x31   :  { %18650 = vmatprep.mubr.f32.mxu0 %v310_v15  ;;  %v28029_v44 = vld [vmem:[#allocation7_spill] sm:$0xff] }
  0x34   :  { %18651 = vmatmul.mubr.f32.gmra.mrb[14].mxu0 %v320_v40 }
  0x35   :  { %18671 = vmatprep.mubr.f32.mxu0 %v23048_v27 }
  0x38   :  { %18672 = vmatmul.mubr.f32.vlgmr.msra.gmra.mrb[0].mxu0 %v23050_v28 }
  0x39   :  { %18674 = vmatprep.mubr.f32.mxu0 %v23054_v30  ;;  %21106 = vmatpush3.bf16.msra.mxu0 %v21103_v41  ;;  %v1310_v41 = vld [vmem:[%s27805_s1 + $0x38] sm:$0xff] }
  0x3a   :  { %21108 = vmatprep.subr.bf16.mxu0 %v21107_v32  ;;  %v23576_v40 = vand.u32 4294901760, %v1310_v41 }
  0x3c   :  { %18675 = vmatmul.mubr.f32.gmra.mrb[2].mxu0 %v23071_v37  ;;  %28050 = vst [vmem:[#allocation10_spill] sm:$0xff] %v23576_v40 }
  0x3d   :  { %18677 = vmatprep.mubr.f32.mxu0 %v23079_v42  ;;  %21110 = vmatpush3.bf16.msra.mxu0 %v21107_v32 }
  0x3e   :  { %21112 = vmatprep.subr.bf16.mxu0 %v21111_v33 }
  0x40   :  { %18678 = vmatmul.mubr.f32.gmra.mrb[4].mxu0 %v23111_v55 }
  0x41   :  { %18680 = vmatprep.mubr.f32.mxu0 %v23141_v22  ;;  %21114 = vmatpush3.bf16.msra.mxu0 %v21111_v33 }
  0x42   :  { %21116 = vmatprep.subr.bf16.mxu0 %v21115_v16 }
  0x44   :  { %18681 = vmatmul.mubr.f32.gmra.mrb[6].mxu0 %v23165_v46 }
  0x45   :  { %18683 = vmatprep.mubr.f32.mxu0 %v23169_v9  ;;  %21118 = vmatpush3.bf16.msra.mxu0 %v21115_v16 }
  0x46   :  { %18711 = vmatprep.subr.mxu0 %v384_v11 }
  0x48   :  { %18684 = vmatmul.mubr.f32.gmra.mrb[8].mxu0 %v23196_v58 }
  0x49   :  { %18686 = vmatprep.mubr.f32.mxu0 %v23238_v43  ;;  %18712 = vmatpush3.msra.mxu0 %v384_v11  ;;  %v28031_v11 = vand.u32 4294901760, %v23096_v50 }
  0x4a   :  { %21120 = vmatprep.subr.bf16.mxu0 %v23008_v14 }
  0x4c   :  { %18687 = vmatmul.mubr.f32.gmra.mrb[10].mxu0 %v23245_v63 }
  0x4d   :  { %18689 = vmatprep.mubr.f32.mxu0 %v23251_v17 }
  0x50   :  { %18690 = vmatmul.mubr.f32.gmra.mrb[12].mxu0 %v23260_v48 }
  0x51   :  { %18692 = vmatprep.mubr.f32.mxu0 %v23289_v0 }
  0x54   :  { %18693 = vmatmul.mubr.f32.gmra.mrb[14].mxu0 %v23305_v6 }
  0x55   :  { %18713 = vmatprep.mubr.f32.mxu0 %v23066_v35  ;;  %v28032_v35 = vand.u32 4294901760, %v23121_v62 }
  0x58   :  { %18714 = vmatmul.mubr.f32.vlgmr.msra.gmra.mrb[0].mxu0 %v23069_v36  ;;  %v28033_v36 = vand.u32 4294901760, %v23162_v2 }
  0x59   :  { %18716 = vmatprep.mubr.f32.mxu0 %v23075_v39  ;;  %21122 = vmatpush3.bf16.msra.mxu0 %v23008_v14  ;;  %v28034_v39 = vand.u32 4294901760, %v23188_v57 }
  0x5a   :  { %21124 = vmatprep.subr.bf16.mxu0 %v23025_v20 }
  0x5c   :  { %18717 = vmatmul.mubr.f32.gmra.mrb[2].mxu0 %v23084_v45  ;;  %v28035_v45 = vand.u32 4294901760, %v23194_v10 }
  0x5d   :  { %18719 = vmatprep.mubr.f32.mxu0 %v23096_v50  ;;  %21126 = vmatpush3.bf16.msra.mxu0 %v23025_v20  ;;  %v28036_v50 = vld [vmem:[#allocation6_spill] sm:$0xff] }
  0x5e   :  { %21128 = vmatprep.subr.bf16.mxu0 %v23031_v21 }
  0x60   :  { %18720 = vmatmul.mubr.f32.gmra.mrb[4].mxu0 %v23121_v62  ;;  %v28037_v62 = vand.u32 4294901760, %v23214_v19 }
  0x61   :  { %18722 = vmatprep.mubr.f32.mxu0 %v23162_v2  ;;  %21130 = vmatpush3.bf16.msra.mxu0 %v23031_v21  ;;  %v28038_v2 = vand.u32 4294901760, %v28024_v23 }
  0x62   :  { %21132 = vmatprep.subr.bf16.mxu0 %v23046_v26 }
  0x64   :  { %18723 = vmatmul.mubr.f32.gmra.mrb[6].mxu0 %v23188_v57  ;;  %v28039_v57 = vand.u32 4294901760, %v23258_v59 }
  0x65   :  { %18725 = vmatprep.mubr.f32.mxu0 %v23194_v10  ;;  %21134 = vmatpush3.bf16.msra.mxu0 %v23046_v26  ;;  %v28040_v10 = vand.u32 4294901760, %v23269_v60 }
  0x66   :  { %18753 = vmatprep.subr.mxu0 %v23131_v1 }
  0x68   :  { %18726 = vmatmul.mubr.f32.gmra.mrb[8].mxu0 %v23214_v19  ;;  %v28043_v19 = vmov %v28023_v7 }
  0x69   :  { %18728 = vmatprep.mubr.f32.mxu0 %v28024_v23  ;;  %18754 = vmatpush3.msra.mxu0 %v23131_v1 }
  0x6a   :  { %21136 = vmatprep.subr.bf16.mxu0 %v23325_v53 }
  0x6c   :  { %18729 = vmatmul.mubr.f32.gmra.mrb[10].mxu0 %v23258_v59 }
  0x6d   :  { %18731 = vmatprep.mubr.f32.mxu0 %v23269_v60 }
  0x70   :  { %18732 = vmatmul.mubr.f32.gmra.mrb[12].mxu0 %v28025_v29 }
  0x71   :  { %18734 = vmatprep.mubr.f32.mxu0 %v23299_v52 }
  0x74   :  { %18735 = vmatmul.mubr.f32.gmra.mrb[14].mxu0 %v23314_v3  ;;  %v23538_v3 = vld [vmem:[%s27805_s1 + $0x168] ss:$0 sm:$0xff] }
  0x75   :  { %18755 = vmatprep.mubr.f32.mxu0 %v28026_v49 }
  0x78   :  { %18756 = vmatmul.mubr.f32.vlgmr.msra.gmra.mrb[0].mxu0 %v28027_v24 }
  0x79   :  { %18758 = vmatprep.mubr.f32.mxu0 %v28028_v61  ;;  %21138 = vmatpush3.bf16.msra.mxu0 %v23325_v53 }
  0x7a   :  { %21140 = vmatprep.subr.bf16.mxu0 %v28029_v44 }
  0x7c   :  { %18759 = vmatmul.mubr.f32.gmra.mrb[2].mxu0 %v28030_v8  ;;  %v23587_v8 = vld [vmem:[%s27805_s1 + $0x48] sm:$0xff] }
  0x7d   :  { %18761 = vmatprep.mubr.f32.mxu0 %v28031_v11  ;;  %21142 = vmatpush3.bf16.msra.mxu0 %v28029_v44  ;;  %v23582_v44 = vand.u32 4294901760, %v1311_v56 }
  0x7e   :  { %21144 = vmatprep.subr.bf16.mxu0 %v23339_v12 }
  0x7f   :  { %28051 = vst [vmem:[#allocation11_spill] sm:$0xff] %v23582_v44 }
  0x80   :  { %18762 = vmatmul.mubr.f32.gmra.mrb[4].mxu0 %v28032_v35 }
  0x81   :  { %18764 = vmatprep.mubr.f32.mxu0 %v28033_v36  ;;  %21146 = vmatpush3.bf16.msra.mxu0 %v23339_v12  ;;  %v28041_v12 = vand.u32 4294901760, %v28025_v29 }
  0x82   :  { %21148 = vmatprep.subr.bf16.mxu0 %v23341_v51 }
  0x84   :  { %18765 = vmatmul.mubr.f32.gmra.mrb[6].mxu0 %v28034_v39 }
  0x85   :  { %18767 = vmatprep.mubr.f32.mxu0 %v28035_v45  ;;  %21150 = vmatpush3.bf16.msra.mxu0 %v23341_v51 }
  0x86   :  { %18795 = vmatprep.subr.mxu0 %v28036_v50 }
  0x88   :  { %18768 = vmatmul.mubr.f32.gmra.mrb[8].mxu0 %v28037_v62 }
  0x89   :  { %18770 = vmatprep.mubr.f32.mxu0 %v28038_v2  ;;  %18796 = vmatpush3.msra.mxu0 %v28036_v50  ;;  %v23604_v2 = vsub.f32 %v1310_v41, %v23576_v40 }
  0x8a   :  { %21152 = vmatprep.subr.bf16.mxu0 %v23008_v14 }
  0x8c   :  { %18771 = vmatmul.mubr.f32.gmra.mrb[10].mxu0 %v28039_v57 }
  0x8d   :  { %18773 = vmatprep.mubr.f32.mxu0 %v28040_v10 }
  0x90   :  { %18774 = vmatmul.mubr.f32.gmra.mrb[12].mxu0 %v28041_v12 }
  0x91   :  { %18776 = vmatprep.mubr.f32.mxu0 %v28042_v38 }
  0x94   :  { %18777 = vmatmul.mubr.f32.gmra.mrb[14].mxu0 %v28043_v19  ;;  %v23611_v19 = vand.u32 4294901760, %v23587_v8 }
  0x95   :  { %18797 = vmatprep.mubr.f32.mxu0 %v23048_v27 }
  0x98   :  { %18798 = vmatmul.mubr.f32.vlgmr.msra.gmra.mrb[0].mxu0 %v23050_v28 }
  0x99   :  { %18800 = vmatprep.mubr.f32.mxu0 %v23054_v30  ;;  %21154 = vmatpush3.bf16.msra.mxu0 %v23008_v14  ;;  %v1303_v14 = vld [vmem:[%s27805_s1] sm:$0xff] }
  0x9a   :  { %21156 = vmatprep.subr.bf16.mxu0 %v23025_v20 }
  0x9c   :  { %18801 = vmatmul.mubr.f32.gmra.mrb[2].mxu0 %v23071_v37 }
  0x9d   :  { %18803 = vmatprep.mubr.f32.mxu0 %v23079_v42  ;;  %21158 = vmatpush3.bf16.msra.mxu0 %v23025_v20  ;;  %v23486_v20 = vand.u32 4294901760, %v1303_v14 }
  0x9e   :  { %21160 = vmatprep.subr.bf16.mxu0 %v23031_v21 }
  0xa0   :  { %18804 = vmatmul.mubr.f32.gmra.mrb[4].mxu0 %v23111_v55 }
  0xa1   :  { %18806 = vmatprep.mubr.f32.mxu0 %v23141_v22  ;;  %21162 = vmatpush3.bf16.msra.mxu0 %v23031_v21  ;;  %v23489_v21 = vsub.f32 %v1303_v14, %v23486_v20  ;;  %v23616_v14 = vld [vmem:[%s27805_s1 + $0x50] sm:$0xff] }
  0xa2   :  { %21164 = vmatprep.subr.bf16.mxu0 %v23046_v26 }
  0xa3   :  { %28044 = vst [vmem:[#allocation4_spill] sm:$0xff] %v23489_v21 }
  0xa4   :  { %18807 = vmatmul.mubr.f32.gmra.mrb[6].mxu0 %v23165_v46 }
  0xa5   :  { %18809 = vmatprep.mubr.f32.mxu0 %v23169_v9  ;;  %21166 = vmatpush3.bf16.msra.mxu0 %v23046_v26  ;;  %v27839_v26 = vand.u32 4294901760, %v23489_v21 }
  0xa6   :  { %18837 = vmatprep.subr.mxu0 %v23131_v1 }
  0xa8   :  { %18810 = vmatmul.mubr.f32.gmra.mrb[8].mxu0 %v23196_v58 }
  0xa9   :  { %18812 = vmatprep.mubr.f32.mxu0 %v23238_v43  ;;  %18838 = vmatpush3.msra.mxu0 %v23131_v1 }
  0xac   :  { %18813 = vmatmul.mubr.f32.gmra.mrb[10].mxu0 %v23245_v63 }
  0xad   :  { %18815 = vmatprep.mubr.f32.mxu0 %v23251_v17 }
  0xb0   :  { %18816 = vmatmul.mubr.f32.gmra.mrb[12].mxu0 %v23260_v48 }
  0xb1   :  { %18818 = vmatprep.mubr.f32.mxu0 %v23289_v0 }
  0xb4   :  { %18819 = vmatmul.mubr.f32.gmra.mrb[14].mxu0 %v23305_v6 }
  0xb5   :  { %18839 = vmatprep.mubr.f32.mxu0 %v23048_v27  ;;  %v1423_v27 = vsub.f32 %v23489_v21, %v27839_v26 }
  0xb8   :  { %18840 = vmatmul.mubr.f32.vlgmr.msra.gmra.mrb[0].mxu0 %v23050_v28  ;;  %v1424_v28 = vand.u32 4294901760, %v1423_v27 }
  0xb9   :  { %18842 = vmatprep.mubr.f32.mxu0 %v23054_v30  ;;  %v1304_v30 = vld [vmem:[%s27805_s1 + $0x8] sm:$0xff] }
  0xba   :  { %18895 = vmatprep.mubr.f32.mxu1 %v1424_v28 }
  0xbc   :  { %18843 = vmatmul.mubr.f32.gmra.mrb[2].mxu0 %v23071_v37  ;;  %v1305_v37 = vld [vmem:[%s27805_s1 + $0x10] sm:$0xff] }
  0xbd   :  { %18845 = vmatprep.mubr.f32.mxu0 %v23079_v42  ;;  %v1306_v42 = vld [vmem:[%s27805_s1 + $0x18] sm:$0xff] }
  0xbe   :  { %v23508_v1 = vand.u32 4294901760, %v1306_v42 }
  0xc0   :  { %18846 = vmatmul.mubr.f32.gmra.mrb[4].mxu0 %v23111_v55  ;;  %v23506_v55 = vand.u32 4294901760, %v1305_v37 }
  0xc1   :  { %18848 = vmatprep.mubr.f32.mxu0 %v23141_v22  ;;  %v1307_v22 = vld [vmem:[%s27805_s1 + $0x20] sm:$0xff] }
  0xc2   :  { %v23525_v59 = vand.u32 4294901760, %v1307_v22 }
  0xc4   :  { %18849 = vmatmul.mubr.f32.gmra.mrb[6].mxu0 %v23165_v46 }
  0xc5   :  { %18851 = vmatprep.mubr.f32.mxu0 %v23169_v9  ;;  %v23520_v9 = vsub.f32 %v1305_v37, %v23506_v55 }
  0xc7   :  { %28046 = vst [vmem:[#allocation7_spill] sm:$0xff] %v23520_v9 }
  0xc8   :  { %18852 = vmatmul.mubr.f32.gmra.mrb[8].mxu0 %v23196_v58  ;;  %v23523_v58 = vsub.f32 %v1306_v42, %v23508_v1  ;;  %v23621_v42 = vsub.f32 %v1311_v56, %v23582_v44 }
  0xc9   :  { %18854 = vmatprep.mubr.f32.mxu0 %v23238_v43  ;;  %v23504_v43 = vand.u32 4294901760, %v1304_v30 }
  0xca   :  { %28047 = vst [vmem:[#allocation6_spill] sm:$0xff] %v23523_v58  ;;  %v27836_v60 = vand.u32 4294901760, %v23523_v58 }
  0xcb   :  { %v23517_v46 = vsub.f32 %v1304_v30, %v23504_v43 }
  0xcc   :  { %18855 = vmatmul.mubr.f32.gmra.mrb[10].mxu0 %v23245_v63  ;;  %v27837_v63 = vand.u32 4294901760, %v23520_v9  ;;  %v23565_v51 = vsub.f32 %v23523_v58, %v27836_v60 }
  0xcd   :  { %18857 = vmatprep.mubr.f32.mxu0 %v23251_v17  ;;  %28045 = vst [vmem:[#allocation5_spill] sm:$0xff] %v23517_v46  ;;  %v27838_v52 = vand.u32 4294901760, %v23517_v46 }
  0xce   :  { %v23556_v7 = vsub.f32 %v23520_v9, %v27837_v63 }
  0xcf   :  { %v23551_v53 = vsub.f32 %v23517_v46, %v27838_v52 }
  0xd0   :  { %18858 = vmatmul.mubr.f32.gmra.mrb[12].mxu0 %v23260_v48  ;;  %v1309_v48 = vld [vmem:[%s27805_s1 + $0x30] sm:$0xff] }
  0xd1   :  { %18860 = vmatprep.mubr.f32.mxu0 %v23289_v0  ;;  %v23541_v0 = vsub.f32 %v1307_v22, %v23525_v59  ;;  %v23546_v34 = vand.u32 4294901760, %v1309_v48 }
  0xd3   :  { %28048 = vst [vmem:[#allocation8_spill] sm:$0xff] %v23541_v0  ;;  %v27835_v31 = vand.u32 4294901760, %v23541_v0  ;;  %v23574_v15 = vsub.f32 %v1309_v48, %v23546_v34 }
  0xd4   :  { %18861 = vmatmul.mubr.f32.gmra.mrb[14].mxu0 %v23305_v6  ;;  %v1308_v6 = vld [vmem:[%s27805_s1 + $0x28] sm:$0xff] }
  0xd5   :  { %v23527_v17 = vand.u32 4294901760, %v1308_v6  ;;  %v23593_v36 = vsub.f32 %v23541_v0, %v27835_v31 }
  0xd7   :  { %v23544_v54 = vsub.f32 %v1308_v6, %v23527_v17 }
  0xd9   :  { %28049 = vst [vmem:[#allocation9_spill] sm:$0xff] %v23544_v54  ;;  %v27834_v4 = vand.u32 4294901760, %v23544_v54 }
  0xdb   :  { %v23598_v39 = vsub.f32 %v23544_v54, %v27834_v4 }
 0x18b   :  { %v18841_v25 = vpop.f32.mrb[0].mxu0 }
 0x18c   :  { %v22073_v5 = vadd.f32 %v18841_v25, %v23538_v3  ;;  %v1193_v13 = vpop.f32.mrb[1].mxu0 }
 0x18d   :  { %v22074_v18 = vadd.f32 %v23538_v3, %v1193_v13 }
 0x18e   :  { %v1288_v47 = vmax.f32 %v22073_v5, 0.0 }
 0x18f   :  { %v1287_v32 = vmax.f32 %v22074_v18, 0.0  ;;  %v18844_v33 = vpop.f32.mrb[2].mxu0  ;;  %v23637_v18 = vand.u32 4294901760, %v23616_v14 }
 0x190   :  { %v1343_v29 = vand.u32 4294901760, %v1288_v47  ;;  %v22075_v49 = vadd.f32 %v18844_v33, %v23538_v3  ;;  %v1205_v24 = vpop.f32.mrb[3].mxu0 }
 0x191   :  { %v1340_v11 = vand.u32 4294901760, %v1287_v32  ;;  %v22076_v35 = vadd.f32 %v23538_v3, %v1205_v24 }
 0x192   :  { %v23600_v45 = vsub.f32 %v1288_v47, %v1343_v29  ;;  %v1290_v50 = vmax.f32 %v22075_v49, 0.0 }
 0x193   :  { %v23606_v57 = vpack.c.bf16 %v1343_v29, %v1340_v11  ;;  %v23608_v10 = vsub.f32 %v1287_v32, %v1340_v11  ;;  %v1289_v12 = vmax.f32 %v22076_v35, 0.0  ;;  %v18847_v38 = vpop.f32.mrb[4].mxu0 }
 0x194   :  { %v27844_v27 = vand.u32 4294901760, %v23600_v45  ;;  %v1349_v28 = vand.u32 4294901760, %v1290_v50  ;;  %v22077_v30 = vadd.f32 %v18847_v38, %v23538_v3  ;;  %v1217_v37 = vpop.f32.mrb[5].mxu0 }
 0x195   :  { %28052 = vst [vmem:[#allocation12_spill] sm:$0xff] %v23606_v57  ;;  %v27845_v22 = vand.u32 4294901760, %v23608_v10  ;;  %v1346_v6 = vand.u32 4294901760, %v1289_v12  ;;  %v22078_v48 = vadd.f32 %v23538_v3, %v1217_v37  ;;  %21168 = vmatprep.subr.bf16.mxu1 %v23606_v57  ;;  %v23628_v25 = vpack.c.bf16 %v23600_v45, %v23608_v10 }
 0x196   :  { %v23630_v41 = vsub.f32 %v1290_v50, %v1349_v28  ;;  %v1292_v5 = vmax.f32 %v22077_v30, 0.0  ;;  %21170 = vmatpush3.bf16.msra.mxu1 %v23606_v57  ;;  %v1791_v13 = vsub.f32 %v23600_v45, %v27844_v27 }
 0x197   :  { %v23639_v56 = vpack.c.bf16 %v1349_v28, %v1346_v6  ;;  %v23641_v47 = vsub.f32 %v1289_v12, %v1346_v6  ;;  %v1291_v32 = vmax.f32 %v22078_v48, 0.0  ;;  %v18850_v33 = vpop.f32.mrb[6].mxu0  ;;  %v1784_v29 = vsub.f32 %v23608_v10, %v27845_v22 }
 0x198   :  { %v27840_v49 = vand.u32 4294901760, %v23630_v41  ;;  %v1355_v24 = vand.u32 4294901760, %v1292_v5  ;;  %v22079_v11 = vadd.f32 %v18850_v33, %v23538_v3  ;;  %v1229_v35 = vpop.f32.mrb[7].mxu0  ;;  %v1792_v50 = vand.u32 4294901760, %v1791_v13 }
 0x199   :  { %28053 = vst [vmem:[#allocation13_spill] sm:$0xff] %v23639_v56  ;;  %v27842_v38 = vand.u32 4294901760, %v23641_v47  ;;  %v1352_v30 = vand.u32 4294901760, %v1291_v32  ;;  %v22080_v28 = vadd.f32 %v23538_v3, %v1229_v35  ;;  %21172 = vmatprep.subr.bf16.mxu1 %v23639_v56  ;;  %v1785_v12 = vand.u32 4294901760, %v1784_v29 }
 0x19a   :  { %v23651_v37 = vsub.f32 %v1292_v5, %v1355_v24  ;;  %v1294_v6 = vmax.f32 %v22079_v11, 0.0  ;;  %21174 = vmatpush3.bf16.msra.mxu1 %v23639_v56  ;;  %v1805_v48 = vsub.f32 %v23630_v41, %v27840_v49  ;;  %v23659_v13 = vpack.c.bf16 %v23630_v41, %v23641_v47 }
 0x19b   :  { %v23661_v33 = vpack.c.bf16 %v1355_v24, %v1352_v30  ;;  %v23663_v4 = vsub.f32 %v1291_v32, %v1352_v30  ;;  %v1293_v35 = vmax.f32 %v22080_v28, 0.0  ;;  %v18853_v31 = vpop.f32.mrb[8].mxu0  ;;  %v23665_v29 = vpack.c.bf16 %v1792_v50, %v1785_v12 }
 0x19c   :  { %v27841_v5 = vand.u32 4294901760, %v23651_v37  ;;  %v1361_v11 = vand.u32 4294901760, %v1294_v6  ;;  %v22081_v60 = vadd.f32 %v18853_v31, %v23538_v3  ;;  %v1241_v63 = vpop.f32.mrb[9].mxu0  ;;  %v1798_v52 = vsub.f32 %v23641_v47, %v27842_v38 }
 0x19d   :  { %28054 = vst [vmem:[#allocation14_spill] sm:$0xff] %v23661_v33  ;;  %v27843_v26 = vand.u32 4294901760, %v23663_v4  ;;  %v1358_v24 = vand.u32 4294901760, %v1293_v35  ;;  %v22082_v32 = vadd.f32 %v23538_v3, %v1241_v63  ;;  %21176 = vmatprep.subr.bf16.mxu1 %v23661_v33  ;;  %v1806_v30 = vand.u32 4294901760, %v1805_v48 }
 0x19e   :  { %v23675_v50 = vsub.f32 %v1294_v6, %v1361_v11  ;;  %v1296_v28 = vmax.f32 %v22081_v60, 0.0  ;;  %21178 = vmatpush3.bf16.msra.mxu1 %v23661_v33  ;;  %v1799_v12 = vand.u32 4294901760, %v1798_v52  ;;  %v1819_v31 = vsub.f32 %v23651_v37, %v27841_v5 }
 0x19f   :  { %v23681_v61 = vpack.c.bf16 %v1361_v11, %v1358_v24  ;;  %v23683_v23 = vsub.f32 %v1293_v35, %v1358_v24  ;;  %v1295_v62 = vmax.f32 %v22082_v32, 0.0  ;;  %v18856_v16 = vpop.f32.mrb[10].mxu0  ;;  %v1812_v63 = vsub.f32 %v23663_v4, %v27843_v26 }
 0x1a0   :  { %v27848_v6 = vand.u32 4294901760, %v23675_v50  ;;  %v1367_v60 = vand.u32 4294901760, %v1296_v28  ;;  %v22083_v48 = vadd.f32 %v18856_v16, %v23538_v3  ;;  %v1253_v52 = vpop.f32.mrb[11].mxu0  ;;  %v23690_v49 = vpack.c.bf16 %v1806_v30, %v1799_v12 }
 0x1a1   :  { %28055 = vst [vmem:[#allocation15_spill] sm:$0xff] %v23681_v61  ;;  %v27851_v5 = vand.u32 4294901760, %v23683_v23  ;;  %v1364_v11 = vand.u32 4294901760, %v1295_v62  ;;  %v22084_v35 = vadd.f32 %v23538_v3, %v1253_v52  ;;  %21180 = vmatprep.subr.bf16.mxu1 %v23681_v61  ;;  %v1813_v24 = vand.u32 4294901760, %v1812_v63 }
 0x1a2   :  { %v23695_v32 = vsub.f32 %v1296_v28, %v1367_v60  ;;  %v1298_v38 = vmax.f32 %v22083_v48, 0.0  ;;  %21182 = vmatpush3.bf16.msra.mxu1 %v23681_v61  ;;  %v1820_v26 = vand.u32 4294901760, %v1819_v31  ;;  %v1833_v16 = vsub.f32 %v23675_v50, %v27848_v6 }
 0x1a3   :  { %v23701_v30 = vpack.c.bf16 %v1367_v60, %v1364_v11  ;;  %v23703_v12 = vsub.f32 %v1295_v62, %v1364_v11  ;;  %v1297_v27 = vmax.f32 %v22084_v35, 0.0  ;;  %v18859_v22 = vpop.f32.mrb[12].mxu0  ;;  %v1826_v63 = vsub.f32 %v23683_v23, %v27851_v5 }
 0x1a4   :  { %v27862_v28 = vand.u32 4294901760, %v23695_v32  ;;  %v1373_v48 = vand.u32 4294901760, %v1298_v38  ;;  %v22085_v52 = vadd.f32 %v18859_v22, %v23538_v3  ;;  %v1265_v31 = vpop.f32.mrb[13].mxu0  ;;  %v23710_v61 = vpack.c.bf16 %v1820_v26, %v1813_v24 }
 0x1a5   :  { %28056 = vst [vmem:[#allocation16_spill] sm:$0xff] %v23701_v30  ;;  %v1370_v60 = vand.u32 4294901760, %v1297_v27  ;;  %v22086_v62 = vadd.f32 %v23538_v3, %v1265_v31  ;;  %21184 = vmatprep.subr.bf16.mxu1 %v23701_v30  ;;  %v1827_v11 = vand.u32 4294901760, %v1826_v63  ;;  %v1834_v5 = vand.u32 4294901760, %v1833_v16 }
 0x1a6   :  { %v23715_v35 = vsub.f32 %v1298_v38, %v1373_v48  ;;  %v1300_v54 = vmax.f32 %v22085_v52, 0.0  ;;  %21186 = vmatpush3.bf16.msra.mxu1 %v23701_v30  ;;  %v1847_v22 = vsub.f32 %v23695_v32, %v27862_v28  ;;  %v28058_v31 = vand.u32 4294901760, %v23703_v12 }
 0x1a7   :  { %v23721_v26 = vpack.c.bf16 %v1373_v48, %v1370_v60  ;;  %v1852_v24 = vsub.f32 %v1297_v27, %v1370_v60  ;;  %v1299_v6 = vmax.f32 %v22086_v62, 0.0  ;;  %v18862_v33 = vpop.f32.mrb[14].mxu0  ;;  %v23728_v16 = vpack.c.bf16 %v1834_v5, %v1827_v11 }
 0x1a8   :  { %v1840_v0 = vsub.f32 %v23703_v12, %v28058_v31  ;;  %v1860_v38 = vand.u32 4294901760, %v23715_v35  ;;  %v1379_v63 = vand.u32 4294901760, %v1300_v54  ;;  %v22087_v52 = vadd.f32 %v18862_v33, %v23538_v3  ;;  %v1277_v30 = vpop.f32.mrb[15].mxu0 }
 0x1a9   :  { %28057 = vst [vmem:[#allocation17_spill] sm:$0xff] %v23721_v26  ;;  %v1853_v58 = vand.u32 4294901760, %v1852_v24  ;;  %v1376_v56 = vand.u32 4294901760, %v1299_v6  ;;  %v22088_v48 = vadd.f32 %v23538_v3, %v1277_v30  ;;  %21188 = vmatprep.subr.bf16.mxu1 %v23721_v26  ;;  %v1848_v31 = vand.u32 4294901760, %v1847_v22 }
 0x1aa   :  { %v1841_v27 = vand.u32 4294901760, %v1840_v0  ;;  %v1873_v60 = vsub.f32 %v1300_v54, %v1379_v63  ;;  %v1302_v62 = vmax.f32 %v22087_v52, 0.0  ;;  %21190 = vmatpush3.bf16.msra.mxu1 %v23721_v26  ;;  %v1861_v28 = vsub.f32 %v23715_v35, %v1860_v38 }
 0x1ab   :  { %v23734_v9 = vpack.c.bf16 %v1379_v63, %v1376_v56  ;;  %v1866_v33 = vsub.f32 %v1299_v6, %v1376_v56  ;;  %v1301_v46 = vmax.f32 %v22088_v48, 0.0  ;;  %v1854_v5 = vsub.f32 %v1852_v24, %v1853_v58 }
 0x1ac   :  { %v1874_v11 = vand.u32 4294901760, %v1873_v60  ;;  %v1385_v21 = vand.u32 4294901760, %v1302_v62  ;;  %v23736_v57 = vpack.c.bf16 %v1848_v31, %v1841_v27  ;;  %v1862_v3 = vand.u32 4294901760, %v1861_v28 }
 0x1ad   :  { %28059 = vst [vmem:[#allocation18_spill] sm:$0xff] %v23734_v9  ;;  %v1867_v30 = vand.u32 4294901760, %v1866_v33  ;;  %v1382_v44 = vand.u32 4294901760, %v1301_v46  ;;  %21192 = vmatprep.subr.bf16.mxu1 %v23734_v9  ;;  %v1855_v0 = vand.u32 4294901760, %v1854_v5  ;;  %v23741_v54 = vpack.c.bf16 %v23651_v37, %v23663_v4 }
 0x1ae   :  { %v1887_v22 = vsub.f32 %v1302_v62, %v1385_v21  ;;  %21194 = vmatpush3.bf16.msra.mxu1 %v23734_v9  ;;  %v1875_v56 = vsub.f32 %v1873_v60, %v1874_v11  ;;  %v23746_v6 = vpack.c.bf16 %v23675_v50, %v23683_v23  ;;  %v23750_v28 = vpack.c.bf16 %v23695_v32, %v23703_v12 }
 0x1af   :  { %v23752_v63 = vpack.c.bf16 %v1385_v21, %v1382_v44  ;;  %v1880_v52 = vsub.f32 %v1301_v46, %v1382_v44  ;;  %v23754_v48 = vpack.c.bf16 %v1862_v3, %v1855_v0  ;;  %v1868_v27 = vsub.f32 %v1866_v33, %v1867_v30 }
 0x1b0   :  { %28060 = vst [vmem:[#allocation19_spill] sm:$0xff] %v23746_v6  ;;  %v1888_v31 = vand.u32 4294901760, %v1887_v22  ;;  %v1876_v5 = vand.u32 4294901760, %v1875_v56  ;;  %v23757_v62 = vpack.c.bf16 %v23715_v35, %v1852_v24  ;;  %v23759_v9 = vpack.c.bf16 %v1873_v60, %v1866_v33  ;;  %v1314_v35 = vld [vmem:[%s27805_s1 + $0x58] sm:$0xff] }
 0x1b1   :  { %28061 = vst [vmem:[#allocation20_spill] sm:$0xff] %v23752_v63  ;;  %v1881_v26 = vand.u32 4294901760, %v1880_v52  ;;  %21196 = vmatprep.subr.bf16.mxu1 %v23752_v63  ;;  %v1869_v40 = vand.u32 4294901760, %v1868_v27  ;;  %v23762_v6 = vpack.c.bf16 %v1887_v22, %v1880_v52  ;;  %v28062_v21 = vand.u32 4294901760, %v23608_v10 }
 0x1b2   :  { %v28063_v46 = vand.u32 4294901760, %v23600_v45  ;;  %21198 = vmatpush3.bf16.msra.mxu1 %v23752_v63  ;;  %v1889_v24 = vsub.f32 %v1887_v22, %v1888_v31  ;;  %v28065_v60 = vand.u32 4294901760, %v23641_v47  ;;  %v28066_v33 = vand.u32 4294901760, %v23630_v41  ;;  %v1315_v41 = vld [vmem:[%s27805_s1 + $0x60] sm:$0xff] }
 0x1b3   :  { %v28068_v0 = vand.u32 4294901760, %v23663_v4  ;;  %v28069_v10 = vand.u32 4294901760, %v23651_v37  ;;  %v28071_v56 = vand.u32 4294901760, %v23683_v23  ;;  %v28072_v27 = vand.u32 4294901760, %v23675_v50  ;;  %21200 = vmatprep.subr.bf16.mxu1 %v23665_v29 }
 0x1b4   :  { %v23768_v44 = vpack.c.bf16 %v28063_v46, %v28062_v21  ;;  %v23778_v3 = vpack.c.bf16 %v28066_v33, %v28065_v60  ;;  %v23793_v22 = vpack.c.bf16 %v1876_v5, %v1869_v40  ;;  %v1882_v47 = vsub.f32 %v1880_v52, %v1881_v26 }
 0x1b5   :  { %v23784_v45 = vpack.c.bf16 %v28069_v10, %v28068_v0  ;;  %v23790_v21 = vpack.c.bf16 %v28072_v27, %v28071_v56  ;;  %v28074_v4 = vand.u32 4294901760, %v23703_v12  ;;  %v28075_v37 = vand.u32 4294901760, %v23695_v32 }
 0x1b6   :  { %28064 = vst [vmem:[#allocation21_spill] sm:$0xff] %v23768_v44  ;;  %28067 = vst [vmem:[#allocation22_spill] sm:$0xff] %v23778_v3  ;;  %v23804_v23 = vpack.c.bf16 %v1860_v38, %v1853_v58  ;;  %v27885_v50 = vand.u32 4294901760, %v23604_v2  ;;  %v1890_v60 = vand.u32 4294901760, %v1889_v24  ;;  %v23807_v33 = vpack.c.bf16 %v1874_v11, %v1867_v30 }
 0x1b7   :  { %28070 = vst [vmem:[#allocation23_spill] sm:$0xff] %v23784_v45  ;;  %28073 = vst [vmem:[#allocation24_spill] sm:$0xff] %v23790_v21  ;;  %v23802_v46 = vpack.c.bf16 %v28075_v37, %v28074_v4  ;;  %v23809_v40 = vpack.c.bf16 %v1888_v31, %v1881_v26  ;;  %v28080_v5 = vand.u32 4294901760, %v23551_v53  ;;  %v28081_v52 = vand.u32 4294901760, %v23574_v15  ;;  %v1319_v37 = vld [vmem:[%s27805_s1 + $0x80] sm:$0xff]  ;;  %v1328_v45 = vld [vmem:[%s27805_s1 + $0xc8] sm:$0xff] }
 0x1b8   :  { %28077 = vst [vmem:[#allocation26_spill] sm:$0xff] %v23804_v23  ;;  %28078 = vst [vmem:[#allocation27_spill] sm:$0xff] %v23807_v33  ;;  %v23818_v32 = vsub.f32 %v23587_v8, %v23611_v19  ;;  %v23820_v58 = vand.u32 4294901760, %v1314_v35  ;;  %v1883_v38 = vand.u32 4294901760, %v1882_v47  ;;  %v28082_v11 = vand.u32 4294901760, %v23556_v7  ;;  %v1316_v8 = vld [vmem:[%s27805_s1 + $0x68] sm:$0xff] }
 0x1b9   :  { %28076 = vst [vmem:[#allocation25_spill] sm:$0xff] %v23802_v46  ;;  %28079 = vst [vmem:[#allocation28_spill] sm:$0xff] %v23809_v40  ;;  %18896 = vmatmul.mubr.f32.vlgmr.msra.gmra.mrb[0].mxu1 %v28080_v5  ;;  %v1483_v12 = vsub.f32 %v23574_v15, %v28081_v52  ;;  %v1464_v26 = vand.u32 4294901760, %v23593_v36  ;;  %v27884_v53 = vand.u32 4294901760, %v23621_v42  ;;  %v23829_v30 = vsub.f32 %v23616_v14, %v23637_v18  ;;  %v1317_v7 = vld [vmem:[%s27805_s1 + $0x70] sm:$0xff]  ;;  %v1318_v47 = vld [vmem:[%s27805_s1 + $0x78] sm:$0xff] }
 0x1ba   :  { %21202 = vmatpush3.bf16.msra.mxu1 %v23665_v29  ;;  %18898 = vmatprep.mubr.f32.mxu1 %v28082_v11  ;;  %v23831_v31 = vand.u32 4294901760, %v1315_v41  ;;  %v23837_v29 = vpack.c.bf16 %v1890_v60, %v1883_v38  ;;  %v1474_v36 = vand.u32 4294901760, %v23598_v39  ;;  %v1493_v14 = vsub.f32 %v23604_v2, %v27885_v50  ;;  %v1320_v38 = vld [vmem:[%s27805_s1 + $0x88] sm:$0xff] }
 0x1bb   :  { %28083 = vst [vmem:[#allocation29_spill] sm:$0xff] %v23829_v30  ;;  %21204 = vmatprep.subr.bf16.mxu1 %v23690_v49  ;;  %v28084_v24 = vand.u32 4294901760, %v23565_v51  ;;  %v1484_v0 = vand.u32 4294901760, %v1483_v12  ;;  %v27881_v10 = vand.u32 4294901760, %v23818_v32  ;;  %v23850_v56 = vsub.f32 %v1314_v35, %v23820_v58 }
 0x1bc   :  { %v23852_v27 = vand.u32 4294901760, %v1316_v8  ;;  %v1503_v51 = vsub.f32 %v23621_v42, %v27884_v53  ;;  %v27880_v39 = vand.u32 4294901760, %v23829_v30  ;;  %v23863_v4 = vsub.f32 %v1315_v41, %v23831_v31 }
 0x1bd   :  { %18899 = vmatmul.mubr.f32.gmra.mrb[2].mxu1 %v28084_v24  ;;  %28085 = vst [vmem:[#allocation30_spill] sm:$0xff] %v23850_v56  ;;  %v23865_v35 = vand.u32 4294901760, %v1317_v7  ;;  %v1494_v60 = vand.u32 4294901760, %v1493_v14  ;;  %v1513_v5 = vsub.f32 %v23818_v32, %v27881_v10  ;;  %v27882_v52 = vand.u32 4294901760, %v23850_v56 }
 0x1be   :  { %21206 = vmatpush3.bf16.msra.mxu1 %v23690_v49  ;;  %18901 = vmatprep.mubr.f32.mxu1 %v1464_v26  ;;  %28086 = vst [vmem:[#allocation31_spill] sm:$0xff] %v23863_v4  ;;  %v23871_v49 = vand.u32 4294901760, %v1318_v47  ;;  %v23878_v41 = vsub.f32 %v1316_v8, %v23852_v27  ;;  %v23880_v12 = vand.u32 4294901760, %v1319_v37  ;;  %v1504_v11 = vand.u32 4294901760, %v1503_v51  ;;  %v1321_v8 = vld [vmem:[%s27805_s1 + $0x90] sm:$0xff] }
 0x1bf   :  { %28087 = vst [vmem:[#allocation32_spill] sm:$0xff] %v23865_v35  ;;  %21208 = vmatprep.subr.bf16.mxu1 %v23710_v61  ;;  %v1523_v26 = vsub.f32 %v23829_v30, %v27880_v39  ;;  %v23891_v14 = vsub.f32 %v1317_v7, %v23865_v35  ;;  %v1533_v51 = vsub.f32 %v23850_v56, %v27882_v52  ;;  %v1322_v52 = vld [vmem:[%s27805_s1 + $0x98] sm:$0xff] }
 0x1c0   :  { %28088 = vst [vmem:[#allocation33_spill] sm:$0xff] %v23871_v49  ;;  %28089 = vst [vmem:[#allocation34_spill] sm:$0xff] %v23878_v41  ;;  %v23898_v24 = vsub.f32 %v1318_v47, %v23871_v49  ;;  %v27887_v7 = vand.u32 4294901760, %v23878_v41  ;;  %v23907_v39 = vsub.f32 %v1319_v37, %v23880_v12  ;;  %v23931_v50 = vand.u32 4294901760, %v1322_v52 }
 0x1c1   :  { %18902 = vmatmul.mubr.f32.gmra.mrb[4].mxu1 %v1474_v36  ;;  %28090 = vst [vmem:[#allocation35_spill] sm:$0xff] %v23880_v12  ;;  %v27883_v36 = vand.u32 4294901760, %v23863_v4  ;;  %28091 = vst [vmem:[#allocation36_spill] sm:$0xff] %v23891_v14  ;;  %v1524_v10 = vand.u32 4294901760, %v1523_v26  ;;  %v1534_v26 = vand.u32 4294901760, %v1533_v51  ;;  %v28098_v40 = vand.u32 4294901760, %v23891_v14 }
 0x1c2   :  { %21210 = vmatpush3.bf16.msra.mxu1 %v23710_v61  ;;  %18904 = vmatprep.mubr.f32.mxu1 %v1484_v0  ;;  %28092 = vst [vmem:[#allocation37_spill] sm:$0xff] %v23898_v24  ;;  %v23900_v61 = vand.u32 4294901760, %v1320_v38  ;;  %v1514_v0 = vand.u32 4294901760, %v1513_v5  ;;  %28094 = vst [vmem:[#allocation39_spill] sm:$0xff] %v23907_v39  ;;  %v23914_v5 = vand.u32 4294901760, %v1321_v8  ;;  %v27892_v53 = vand.u32 4294901760, %v23907_v39 }
 0x1c3   :  { %21212 = vmatprep.subr.bf16.mxu1 %v23728_v16  ;;  %v1543_v47 = vsub.f32 %v23863_v4, %v27883_v36  ;;  %v1553_v36 = vsub.f32 %v23878_v41, %v27887_v7  ;;  %28097 = vst [vmem:[#allocation42_spill] sm:$0xff] %v23931_v50  ;;  %v1563_v37 = vsub.f32 %v23891_v14, %v28098_v40  ;;  %v1324_v51 = vld [vmem:[%s27805_s1 + $0xa8] sm:$0xff] }
 0x1c4   :  { %28093 = vst [vmem:[#allocation38_spill] sm:$0xff] %v23900_v61  ;;  %28095 = vst [vmem:[#allocation40_spill] sm:$0xff] %v23914_v5  ;;  %v1583_v7 = vsub.f32 %v23907_v39, %v27892_v53  ;;  %v23957_v33 = vsub.f32 %v1322_v52, %v23931_v50  ;;  %v23959_v23 = vand.u32 4294901760, %v1324_v51  ;;  %v1327_v52 = vld [vmem:[%s27805_s1 + $0xc0] sm:$0xff] }
 0x1c5   :  { %18905 = vmatmul.mubr.f32.gmra.mrb[6].mxu1 %v1494_v60  ;;  %v1544_v60 = vand.u32 4294901760, %v1543_v47  ;;  %v1564_v46 = vand.u32 4294901760, %v1563_v37  ;;  %v1329_v37 = vld [vmem:[%s27805_s1 + $0xd0] sm:$0xff] }
 0x1c6   :  { %21214 = vmatpush3.bf16.msra.mxu1 %v23728_v16  ;;  %18907 = vmatprep.mubr.f32.mxu1 %v1504_v11  ;;  %v1323_v16 = vld [vmem:[%s27805_s1 + $0xa0] sm:$0xff]  ;;  %v23925_v11 = vsub.f32 %v1320_v38, %v23900_v61  ;;  %v23938_v38 = vsub.f32 %v1321_v8, %v23914_v5  ;;  %v1554_v8 = vand.u32 4294901760, %v1553_v36  ;;  %28102 = vst [vmem:[#allocation45_spill] sm:$0xff] %v23957_v33  ;;  %28103 = vst [vmem:[#allocation46_spill] sm:$0xff] %v23959_v23  ;;  %v1326_v36 = vld [vmem:[%s27805_s1 + $0xb8] sm:$0xff] }
 0x1c7   :  { %21216 = vmatprep.subr.bf16.mxu1 %v23736_v57  ;;  %v23980_v53 = vsub.f32 %v1324_v51, %v23959_v23  ;;  %v23982_v21 = vand.u32 4294901760, %v1326_v36  ;;  %v23995_v51 = vand.u32 4294901760, %v1327_v52 }
 0x1c8   :  { %28096 = vst [vmem:[#allocation41_spill] sm:$0xff] %v23925_v11  ;;  %28099 = vst [vmem:[#allocation43_spill] sm:$0xff] %v23938_v38  ;;  %v27894_v40 = vand.u32 4294901760, %v23925_v11 }
 0x1c9   :  { %18908 = vmatmul.mubr.f32.gmra.mrb[8].mxu1 %v1514_v0  ;;  %v23940_v0 = vand.u32 4294901760, %v1323_v16  ;;  %28106 = vst [vmem:[#allocation49_spill] sm:$0xff] %v23980_v53  ;;  %28107 = vst [vmem:[#allocation50_spill] sm:$0xff] %v23982_v21 }
 0x1ca   :  { %21218 = vmatpush3.bf16.msra.mxu1 %v23736_v57  ;;  %18910 = vmatprep.mubr.f32.mxu1 %v1524_v10  ;;  %v1325_v57 = vld [vmem:[%s27805_s1 + $0xb0] sm:$0xff]  ;;  %v28101_v10 = vand.u32 4294901760, %v23898_v24  ;;  %28110 = vst [vmem:[#allocation52_spill] sm:$0xff] %v23995_v51 }
 0x1cb   :  { %28100 = vst [vmem:[#allocation44_spill] sm:$0xff] %v23940_v0  ;;  %21220 = vmatprep.subr.bf16.mxu1 %v23754_v48 }
 0x1cc   :  { %v1573_v47 = vsub.f32 %v23898_v24, %v28101_v10  ;;  %v23964_v10 = vsub.f32 %v1323_v16, %v23940_v0  ;;  %v1584_v16 = vand.u32 4294901760, %v1583_v7  ;;  %v24021_v7 = vsub.f32 %v1327_v52, %v23995_v51 }
 0x1cd   :  { %18911 = vmatmul.mubr.f32.gmra.mrb[10].mxu1 %v1534_v26  ;;  %v23966_v26 = vand.u32 4294901760, %v1325_v57 }
 0x1ce   :  { %21222 = vmatpush3.bf16.msra.mxu1 %v23754_v48  ;;  %18913 = vmatprep.mubr.f32.mxu1 %v1544_v60  ;;  %28104 = vst [vmem:[#allocation47_spill] sm:$0xff] %v23964_v10  ;;  %v1574_v48 = vand.u32 4294901760, %v1573_v47  ;;  %v1593_v60 = vsub.f32 %v23925_v11, %v27894_v40  ;;  %v28108_v47 = vand.u32 4294901760, %v23938_v38  ;;  %v1330_v11 = vld [vmem:[%s27805_s1 + $0xd8] sm:$0xff]  ;;  %28116 = vst [vmem:[#allocation56_spill] sm:$0xff] %v24021_v7 }
 0x1cf   :  { %28105 = vst [vmem:[#allocation48_spill] sm:$0xff] %v23966_v26  ;;  %21224 = vmatprep.subr.bf16.mxu1 %v23793_v22 }
 0x1d0   :  { %v1603_v40 = vsub.f32 %v23938_v38, %v28108_v47  ;;  %v1594_v3 = vand.u32 4294901760, %v1593_v60  ;;  %v24010_v38 = vand.u32 4294901760, %v1329_v37 }
 0x1d1   :  { %18914 = vmatmul.mubr.f32.gmra.mrb[12].mxu1 %v1554_v8  ;;  %v23993_v8 = vsub.f32 %v1325_v57, %v23966_v26  ;;  %v24008_v57 = vsub.f32 %v1326_v36, %v23982_v21  ;;  %v1331_v36 = vld [vmem:[%s27805_s1 + $0xe0] sm:$0xff] }
 0x1d2   :  { %21226 = vmatpush3.bf16.msra.mxu1 %v23793_v22  ;;  %18916 = vmatprep.mubr.f32.mxu1 %v1564_v46  ;;  %v24001_v22 = vand.u32 4294901760, %v1328_v45  ;;  %v28112_v46 = vand.u32 4294901760, %v23957_v33  ;;  %28114 = vst [vmem:[#allocation55_spill] sm:$0xff] %v24010_v38  ;;  %v1604_v60 = vand.u32 4294901760, %v1603_v40  ;;  %v24043_v63 = vand.u32 4294901760, %v1331_v36 }
 0x1d3   :  { %28109 = vst [vmem:[#allocation51_spill] sm:$0xff] %v23993_v8  ;;  %21228 = vmatprep.subr.bf16.mxu1 %v23837_v29  ;;  %28113 = vst [vmem:[#allocation54_spill] sm:$0xff] %v24008_v57  ;;  %v27917_v52 = vand.u32 4294901760, %v24008_v57  ;;  %v28121_v39 = vand.u32 4294901760, %v23993_v8 }
 0x1d4   :  { %28111 = vst [vmem:[#allocation53_spill] sm:$0xff] %v24001_v22  ;;  %v1613_v47 = vsub.f32 %v23957_v33, %v28112_v46  ;;  %v24028_v33 = vsub.f32 %v1328_v45, %v24001_v22  ;;  %v24037_v46 = vsub.f32 %v1329_v37, %v24010_v38  ;;  %28122 = vst [vmem:[#allocation60_spill] sm:$0xff] %v24043_v63 }
 0x1d5   :  { %18917 = vmatmul.mubr.f32.gmra.mrb[14].mxu1 %v1574_v48  ;;  %v28115_v48 = vand.u32 4294901760, %v23964_v10  ;;  %v1643_v45 = vsub.f32 %v23993_v8, %v28121_v39  ;;  %v1653_v39 = vsub.f32 %v24008_v57, %v27917_v52  ;;  %v24065_v37 = vsub.f32 %v1331_v36, %v24043_v63 }
 0x1d6   :  { %21230 = vmatpush3.bf16.msra.mxu1 %v23837_v29  ;;  %18919 = vmatprep.mubr.f32.mxu1 %v1584_v16  ;;  %28117 = vst [vmem:[#allocation57_spill] sm:$0xff] %v24028_v33  ;;  %v24030_v29 = vand.u32 4294901760, %v1330_v11  ;;  %v1614_v40 = vand.u32 4294901760, %v1613_v47  ;;  %v28119_v16 = vand.u32 4294901760, %v23980_v53  ;;  %28120 = vst [vmem:[#allocation59_spill] sm:$0xff] %v24037_v46  ;;  %v1333_v47 = vld [vmem:[%s27805_s1 + $0xf0] sm:$0xff] }
 0x1d7   :  { %v1623_v44 = vsub.f32 %v23964_v10, %v28115_v48  ;;  %21232 = vmatprep.subr.bf16.mxu1 %v23628_v25  ;;  %v1644_v8 = vand.u32 4294901760, %v1643_v45  ;;  %28126 = vst [vmem:[#allocation63_spill] sm:$0xff] %v24065_v37 }
 0x1d8   :  { %28118 = vst [vmem:[#allocation58_spill] sm:$0xff] %v24030_v29  ;;  %v1633_v48 = vsub.f32 %v23980_v53, %v28119_v16  ;;  %v27928_v16 = vand.u32 4294901760, %v24037_v46  ;;  %v28125_v53 = vand.u32 4294901760, %v24021_v7 }
 0x1d9   :  { %18920 = vmatmul.mubr.f32.gmra.mrb[16].mxu1 %v1594_v3  ;;  %v1624_v10 = vand.u32 4294901760, %v1623_v44  ;;  %v1332_v3 = vld [vmem:[%s27805_s1 + $0xe8] sm:$0xff]  ;;  %v24053_v44 = vsub.f32 %v1330_v11, %v24030_v29  ;;  %v24067_v11 = vand.u32 4294901760, %v1333_v47 }
 0x1da   :  { %18922 = vmatprep.mubr.f32.mxu1 %v1604_v60  ;;  %v1634_v60 = vand.u32 4294901760, %v1633_v48  ;;  %v24059_v24 = vand.u32 4294901760, %v1332_v3  ;;  %v1663_v14 = vsub.f32 %v24021_v7, %v28125_v53  ;;  %v1335_v48 = vld [vmem:[%s27805_s1 + $0x100] sm:$0xff]  ;;  %v1654_v53 = vand.u32 4294901760, %v1653_v39 }
 0x1db   :  { %28123 = vst [vmem:[#allocation61_spill] sm:$0xff] %v24053_v44  ;;  %28127 = vst [vmem:[#allocation64_spill] sm:$0xff] %v24067_v11  ;;  %v27935_v52 = vand.u32 4294901760, %v24053_v44  ;;  %v1683_v36 = vsub.f32 %v24037_v46, %v27928_v16  ;;  %v24089_v56 = vsub.f32 %v1333_v47, %v24067_v11  ;;  %v28134_v46 = vand.u32 4294901760, %v24065_v37 }
 0x1dc   :  { %28124 = vst [vmem:[#allocation62_spill] sm:$0xff] %v24059_v24  ;;  %v24083_v7 = vsub.f32 %v1332_v3, %v24059_v24  ;;  %v1664_v41 = vand.u32 4294901760, %v1663_v14  ;;  %v1337_v3 = vld [vmem:[%s27805_s1 + $0x110] sm:$0xff] }
 0x1dd   :  { %18923 = vmatmul.mubr.f32.gmra.mrb[18].mxu1 %v1614_v40  ;;  %v1334_v40 = vld [vmem:[%s27805_s1 + $0xf8] sm:$0xff]  ;;  %v1693_v14 = vsub.f32 %v24053_v44, %v27935_v52  ;;  %v24115_v52 = vand.u32 4294901760, %v1337_v3 }
 0x1de   :  { %18925 = vmatprep.mubr.f32.mxu1 %v1624_v10  ;;  %v28128_v10 = vand.u32 4294901760, %v24028_v33  ;;  %28129 = vst [vmem:[#allocation65_spill] sm:$0xff] %v24083_v7  ;;  %v24085_v57 = vand.u32 4294901760, %v1334_v40  ;;  %v27940_v47 = vand.u32 4294901760, %v24083_v7 }
 0x1df   :  { %28135 = vst [vmem:[#allocation70_spill] sm:$0xff] %v24115_v52 }
 0x1e0   :  { %v1673_v45 = vsub.f32 %v24028_v33, %v28128_v10  ;;  %28130 = vst [vmem:[#allocation66_spill] sm:$0xff] %v24085_v57  ;;  %v24091_v10 = vand.u32 4294901760, %v1335_v48  ;;  %v24104_v16 = vsub.f32 %v1334_v40, %v24085_v57  ;;  %v1703_v33 = vsub.f32 %v24065_v37, %v28134_v46 }
 0x1e1   :  { %18926 = vmatmul.mubr.f32.gmra.mrb[20].mxu1 %v1634_v60  ;;  %v1336_v60 = vld [vmem:[%s27805_s1 + $0x108] sm:$0xff]  ;;  %v1694_v40 = vand.u32 4294901760, %v1693_v14  ;;  %v28137_v37 = vand.u32 4294901760, %v24089_v56 }
 0x1e2   :  { %18928 = vmatprep.mubr.f32.mxu1 %v1644_v8  ;;  %28131 = vst [vmem:[#allocation67_spill] sm:$0xff] %v24091_v10  ;;  %v1674_v39 = vand.u32 4294901760, %v1673_v45  ;;  %v1684_v8 = vand.u32 4294901760, %v1683_v36  ;;  %28132 = vst [vmem:[#allocation68_spill] sm:$0xff] %v24104_v16  ;;  %v24106_v4 = vand.u32 4294901760, %v1336_v60  ;;  %v24113_v30 = vsub.f32 %v1335_v48, %v24091_v10 }
 0x1e3   :  { %v27943_v36 = vand.u32 4294901760, %v24104_v16  ;;  %v1704_v48 = vand.u32 4294901760, %v1703_v33  ;;  %v1723_v44 = vsub.f32 %v24089_v56, %v28137_v37 }
 0x1e4   :  { %28133 = vst [vmem:[#allocation69_spill] sm:$0xff] %v24106_v4  ;;  %v24125_v46 = vsub.f32 %v1336_v60, %v24106_v4  ;;  %v27949_v14 = vand.u32 4294901760, %v24113_v30 }
 0x1e5   :  { %18929 = vmatmul.mubr.f32.gmra.mrb[22].mxu1 %v1654_v53  ;;  %v1338_v53 = vld [vmem:[%s27805_s1 + $0x118] sm:$0xff]  ;;  %v1733_v60 = vsub.f32 %v24104_v16, %v27943_v36  ;;  %v1724_v33 = vand.u32 4294901760, %v1723_v44 }
 0x1e6   :  { %18931 = vmatprep.mubr.f32.mxu1 %v1664_v41  ;;  %v1713_v41 = vsub.f32 %v24083_v7, %v27940_v47  ;;  %v24127_v45 = vand.u32 4294901760, %v1338_v53  ;;  %v27948_v7 = vand.u32 4294901760, %v24125_v46  ;;  %v1743_v37 = vsub.f32 %v24113_v30, %v27949_v14  ;;  %v28159_v14 = vld [vmem:[#allocation20_spill] sm:$0xff] }
 0x1e8   :  { %28136 = vst [vmem:[#allocation71_spill] sm:$0xff] %v24127_v45  ;;  %v1714_v47 = vand.u32 4294901760, %v1713_v41  ;;  %v1753_v41 = vsub.f32 %v24125_v46, %v27948_v7  ;;  %v1744_v16 = vand.u32 4294901760, %v1743_v37  ;;  %v28147_v37 = vld [vmem:[#allocation8_spill] sm:$0xff] }
 0x1e9   :  { %18932 = vmatmul.mubr.f32.gmra.mrb[24].mxu1 %v1674_v39  ;;  %v24134_v39 = vsub.f32 %v1337_v3, %v24115_v52  ;;  %v28158_v7 = vld [vmem:[#allocation36_spill] sm:$0xff] }
 0x1ea   :  { %18934 = vmatprep.mubr.f32.mxu1 %v1684_v8  ;;  %v24141_v8 = vsub.f32 %v1338_v53, %v24127_v45  ;;  %v1754_v53 = vand.u32 4294901760, %v1753_v41  ;;  %v28149_v41 = vld [vmem:[#allocation9_spill] sm:$0xff] }
 0x1eb   :  { %v27947_v3 = vand.u32 4294901760, %v24134_v39 }
 0x1ec   :  { %v27946_v36 = vand.u32 4294901760, %v24141_v8 }
 0x1ed   :  { %18935 = vmatmul.mubr.f32.gmra.mrb[26].mxu1 %v1694_v40  ;;  %v1734_v40 = vand.u32 4294901760, %v1733_v60  ;;  %v1763_v44 = vsub.f32 %v24134_v39, %v27947_v3  ;;  %v28157_v3 = vld [vmem:[#allocation34_spill] sm:$0xff] }
 0x1ee   :  { %18937 = vmatprep.mubr.f32.mxu1 %v1704_v48  ;;  %v1773_v48 = vsub.f32 %v24141_v8, %v27946_v36  ;;  %v28156_v36 = vld [vmem:[#allocation18_spill] sm:$0xff] }
 0x1f0   :  { %v1774_v60 = vand.u32 4294901760, %v1773_v48  ;;  %v28152_v48 = vld [vmem:[#allocation29_spill] sm:$0xff] }
 0x1f1   :  { %18938 = vmatmul.mubr.f32.gmra.mrb[28].mxu1 %v1714_v47  ;;  %v1764_v47 = vand.u32 4294901760, %v1763_v44  ;;  %v28150_v44 = vld [vmem:[#allocation15_spill] sm:$0xff] }
 0x1f2   :  { %18940 = vmatprep.mubr.f32.mxu1 %v1724_v33  ;;  %v28140_v33 = vld [vmem:[#allocation11_spill] sm:$0xff] }
 0x1f5   :  { %18941 = vmatmul.mubr.f32.gmra.mrb[30].mxu1 %v1734_v40  ;;  %v28148_v40 = vld [vmem:[#allocation14_spill] sm:$0xff] }
 0x1f6   :  { %18943 = vmatprep.mubr.f32.mxu1 %v1744_v16  ;;  %v28138_v16 = vld [vmem:[#allocation19_spill] sm:$0xff] }
 0x1f9   :  { %18944 = vmatmul.mubr.f32.gmra.mrb[32].mxu1 %v1754_v53  ;;  %v28151_v53 = vld [vmem:[#allocation16_spill] sm:$0xff] }
 0x1fa   :  { %18946 = vmatprep.mubr.f32.mxu1 %v1764_v47  ;;  %v28153_v47 = vld [vmem:[#allocation17_spill] sm:$0xff] }
 0x1fd   :  { %18947 = vmatmul.mubr.f32.gmra.mrb[34].mxu1 %v1774_v60  ;;  %v28154_v60 = vld [vmem:[#allocation30_spill] sm:$0xff] }
 0x1fe   :  { %18981 = vmatprep.mubr.f32.mxu1 %v23486_v20 }
 0x201   :  { %18982 = vmatmul.mubr.f32.vlgmr.msra.gmra.mrb[0].mxu1 %v23504_v43 }
 0x202   :  { %21234 = vmatpush3.bf16.msra.mxu1 %v23628_v25  ;;  %18984 = vmatprep.mubr.f32.mxu1 %v23506_v55  ;;  %v28139_v25 = vld [vmem:[#allocation10_spill] sm:$0xff] }
 0x203   :  { %21236 = vmatprep.subr.bf16.mxu1 %v23659_v13 }
 0x205   :  { %18985 = vmatmul.mubr.f32.gmra.mrb[2].mxu1 %v23508_v1 }
 0x206   :  { %21238 = vmatpush3.bf16.msra.mxu1 %v23659_v13  ;;  %18987 = vmatprep.mubr.f32.mxu1 %v23525_v59  ;;  %v28141_v13 = vld [vmem:[#allocation12_spill] sm:$0xff] }
 0x207   :  { %21240 = vmatprep.subr.bf16.mxu1 %v23741_v54 }
 0x209   :  { %18988 = vmatmul.mubr.f32.gmra.mrb[4].mxu1 %v23527_v17 }
 0x20a   :  { %21242 = vmatpush3.bf16.msra.mxu1 %v23741_v54  ;;  %18990 = vmatprep.mubr.f32.mxu1 %v23546_v34  ;;  %v28143_v54 = vld [vmem:[#allocation5_spill] sm:$0xff] }
 0x20b   :  { %21244 = vmatprep.subr.bf16.mxu1 %v28138_v16 }
 0x20d   :  { %18991 = vmatmul.mubr.f32.gmra.mrb[6].mxu1 %v28139_v25 }
 0x20e   :  { %21246 = vmatpush3.bf16.msra.mxu1 %v28138_v16  ;;  %18993 = vmatprep.mubr.f32.mxu1 %v28140_v33  ;;  %v28155_v16 = vld [vmem:[#allocation31_spill] sm:$0xff] }
 0x20f   :  { %21248 = vmatprep.subr.bf16.mxu1 %v23750_v28 }
 0x211   :  { %18994 = vmatmul.mubr.f32.gmra.mrb[8].mxu1 %v23611_v19 }
 0x212   :  { %21250 = vmatpush3.bf16.msra.mxu1 %v23750_v28  ;;  %18996 = vmatprep.mubr.f32.mxu1 %v23637_v18  ;;  %v28145_v28 = vld [vmem:[#allocation13_spill] sm:$0xff] }
 0x213   :  { %21252 = vmatprep.subr.bf16.mxu1 %v23757_v62 }
 0x215   :  { %18997 = vmatmul.mubr.f32.gmra.mrb[10].mxu1 %v23820_v58 }
 0x216   :  { %21254 = vmatpush3.bf16.msra.mxu1 %v23757_v62  ;;  %18999 = vmatprep.mubr.f32.mxu1 %v23831_v31  ;;  %v28146_v62 = vld [vmem:[#allocation6_spill] sm:$0xff] }
 0x217   :  { %21256 = vmatprep.subr.bf16.mxu1 %v23759_v9 }
 0x219   :  { %19000 = vmatmul.mubr.f32.gmra.mrb[12].mxu1 %v23852_v27 }
 0x21a   :  { %21258 = vmatpush3.bf16.msra.mxu1 %v23759_v9  ;;  %19002 = vmatprep.mubr.f32.mxu1 %v23865_v35  ;;  %v28142_v9 = vld [vmem:[#allocation4_spill] sm:$0xff]  ;;  %v28182_v35 = vand.u32 4294901760, %v28147_v37 }
 0x21b   :  { %21260 = vmatprep.subr.bf16.mxu1 %v23762_v6 }
 0x21d   :  { %19003 = vmatmul.mubr.f32.gmra.mrb[14].mxu1 %v23871_v49  ;;  %v28180_v49 = vld [vmem:[#allocation22_spill] sm:$0xff] }
 0x21e   :  { %21262 = vmatpush3.bf16.msra.mxu1 %v23762_v6  ;;  %19005 = vmatprep.mubr.f32.mxu1 %v23880_v12  ;;  %v28144_v6 = vld [vmem:[#allocation7_spill] sm:$0xff] }
 0x21f   :  { %21264 = vmatprep.subr.bf16.mxu1 %v28141_v13  ;;  %v28179_v12 = vand.u32 4294901760, %v28144_v6 }
 0x221   :  { %19006 = vmatmul.mubr.f32.gmra.mrb[16].mxu1 %v23900_v61  ;;  %v28178_v61 = vand.u32 4294901760, %v28143_v54 }
 0x222   :  { %19008 = vmatprep.mubr.f32.mxu1 %v23914_v5  ;;  %v28177_v5 = vand.u32 4294901760, %v28142_v9 }
 0x225   :  { %19009 = vmatmul.mubr.f32.gmra.mrb[18].mxu1 %v23931_v50  ;;  %v28176_v50 = vld [vmem:[#allocation68_spill] sm:$0xff] }
 0x226   :  { %19011 = vmatprep.mubr.f32.mxu1 %v23940_v0  ;;  %v28175_v0 = vld [vmem:[#allocation65_spill] sm:$0xff] }
 0x229   :  { %19012 = vmatmul.mubr.f32.gmra.mrb[20].mxu1 %v23959_v23  ;;  %v28174_v23 = vld [vmem:[#allocation63_spill] sm:$0xff] }
 0x22a   :  { %19014 = vmatprep.mubr.f32.mxu1 %v23966_v26  ;;  %v28173_v26 = vld [vmem:[#allocation61_spill] sm:$0xff] }
 0x22d   :  { %19015 = vmatmul.mubr.f32.gmra.mrb[22].mxu1 %v23982_v21  ;;  %v28172_v21 = vld [vmem:[#allocation59_spill] sm:$0xff] }
 0x22e   :  { %19017 = vmatprep.mubr.f32.mxu1 %v23995_v51  ;;  %v28171_v51 = vld [vmem:[#allocation57_spill] sm:$0xff] }
 0x231   :  { %19018 = vmatmul.mubr.f32.gmra.mrb[24].mxu1 %v24001_v22  ;;  %v28170_v22 = vld [vmem:[#allocation56_spill] sm:$0xff] }
 0x232   :  { %19020 = vmatprep.mubr.f32.mxu1 %v24010_v38  ;;  %v28169_v38 = vld [vmem:[#allocation54_spill] sm:$0xff] }
 0x235   :  { %19021 = vmatmul.mubr.f32.gmra.mrb[26].mxu1 %v24030_v29  ;;  %v28168_v29 = vld [vmem:[#allocation51_spill] sm:$0xff] }
 0x236   :  { %19023 = vmatprep.mubr.f32.mxu1 %v24043_v63  ;;  %v28167_v63 = vld [vmem:[#allocation49_spill] sm:$0xff] }
 0x239   :  { %19024 = vmatmul.mubr.f32.gmra.mrb[28].mxu1 %v24059_v24  ;;  %v28166_v24 = vld [vmem:[#allocation47_spill] sm:$0xff] }
 0x23a   :  { %19026 = vmatprep.mubr.f32.mxu1 %v24067_v11  ;;  %v28165_v11 = vld [vmem:[#allocation45_spill] sm:$0xff] }
 0x23d   :  { %19027 = vmatmul.mubr.f32.gmra.mrb[30].mxu1 %v24085_v57  ;;  %v28164_v57 = vld [vmem:[#allocation43_spill] sm:$0xff] }
 0x23e   :  { %19029 = vmatprep.mubr.f32.mxu1 %v24091_v10  ;;  %v28163_v10 = vld [vmem:[#allocation41_spill] sm:$0xff] }
 0x241   :  { %19030 = vmatmul.mubr.f32.gmra.mrb[32].mxu1 %v24106_v4  ;;  %v28162_v4 = vld [vmem:[#allocation21_spill] sm:$0xff] }
 0x242   :  { %19032 = vmatprep.mubr.f32.mxu1 %v24115_v52  ;;  %v28161_v52 = vld [vmem:[#allocation39_spill] sm:$0xff] }
 0x245   :  { %19033 = vmatmul.mubr.f32.gmra.mrb[34].mxu1 %v24127_v45  ;;  %v28160_v45 = vld [vmem:[#allocation37_spill] sm:$0xff] }
 0x246   :  { %19067 = vmatprep.mubr.f32.mxu1 %v28142_v9  ;;  %v28183_v9 = vld [vmem:[#allocation23_spill] sm:$0xff] }
 0x249   :  { %19068 = vmatmul.mubr.f32.vlgmr.msra.gmra.mrb[0].mxu1 %v28143_v54  ;;  %v28192_v54 = vld [vmem:[#allocation26_spill] sm:$0xff] }
 0x24a   :  { %21266 = vmatpush3.bf16.msra.mxu1 %v28141_v13  ;;  %19070 = vmatprep.mubr.f32.mxu1 %v28144_v6  ;;  %v28195_v6 = vld [vmem:[#allocation27_spill] sm:$0xff] }
 0x24b   :  { %21268 = vmatprep.subr.bf16.mxu1 %v28145_v28 }
 0x24d   :  { %19071 = vmatmul.mubr.f32.gmra.mrb[2].mxu1 %v28146_v62 }
 0x24e   :  { %21270 = vmatpush3.bf16.msra.mxu1 %v28145_v28  ;;  %19073 = vmatprep.mubr.f32.mxu1 %v28147_v37  ;;  %v28198_v37 = vld [vmem:[#allocation28_spill] sm:$0xff] }
 0x24f   :  { %21272 = vmatprep.subr.bf16.mxu1 %v28148_v40 }
 0x251   :  { %19074 = vmatmul.mubr.f32.gmra.mrb[4].mxu1 %v28149_v41 }
 0x252   :  { %21274 = vmatpush3.bf16.msra.mxu1 %v28148_v40  ;;  %19076 = vmatprep.mubr.f32.mxu1 %v23574_v15 }
 0x253   :  { %21276 = vmatprep.subr.bf16.mxu1 %v28150_v44 }
 0x255   :  { %19077 = vmatmul.mubr.f32.gmra.mrb[6].mxu1 %v23604_v2 }
 0x256   :  { %21278 = vmatpush3.bf16.msra.mxu1 %v28150_v44  ;;  %19079 = vmatprep.mubr.f32.mxu1 %v23621_v42 }
 0x257   :  { %21280 = vmatprep.subr.bf16.mxu1 %v28151_v53 }
 0x259   :  { %19080 = vmatmul.mubr.f32.gmra.mrb[8].mxu1 %v23818_v32 }
 0x25a   :  { %21282 = vmatpush3.bf16.msra.mxu1 %v28151_v53  ;;  %19082 = vmatprep.mubr.f32.mxu1 %v28152_v48 }
 0x25b   :  { %21284 = vmatprep.subr.bf16.mxu1 %v28153_v47 }
 0x25d   :  { %19083 = vmatmul.mubr.f32.gmra.mrb[10].mxu1 %v28154_v60 }
 0x25e   :  { %21286 = vmatpush3.bf16.msra.mxu1 %v28153_v47  ;;  %19085 = vmatprep.mubr.f32.mxu1 %v28155_v16 }
 0x25f   :  { %21288 = vmatprep.subr.bf16.mxu1 %v28156_v36 }
 0x261   :  { %19086 = vmatmul.mubr.f32.gmra.mrb[12].mxu1 %v28157_v3 }
 0x262   :  { %21290 = vmatpush3.bf16.msra.mxu1 %v28156_v36  ;;  %19088 = vmatprep.mubr.f32.mxu1 %v28158_v7 }
 0x263   :  { %21292 = vmatprep.subr.bf16.mxu1 %v28159_v14 }
 0x265   :  { %19089 = vmatmul.mubr.f32.gmra.mrb[14].mxu1 %v28160_v45 }
 0x266   :  { %21294 = vmatpush3.bf16.msra.mxu1 %v28159_v14  ;;  %19091 = vmatprep.mubr.f32.mxu1 %v28161_v52  ;;  %v28181_v14 = vand.u32 4294901760, %v28146_v62  ;;  %v28197_v62 = vand.u32 4294901760, %v28158_v7  ;;  %v28203_v7 = vand.u32 4294901760, %v28165_v11 }
 0x267   :  { %21296 = vmatprep.subr.bf16.mxu1 %v28162_v4 }
 0x269   :  { %19092 = vmatmul.mubr.f32.gmra.mrb[16].mxu1 %v28163_v10 }
 0x26a   :  { %19094 = vmatprep.mubr.f32.mxu1 %v28164_v57 }
 0x26d   :  { %19095 = vmatmul.mubr.f32.gmra.mrb[18].mxu1 %v28165_v11  ;;  %v28210_v11 = vand.u32 4294901760, %v28172_v21 }
 0x26e   :  { %19097 = vmatprep.mubr.f32.mxu1 %v28166_v24 }
 0x271   :  { %19098 = vmatmul.mubr.f32.gmra.mrb[20].mxu1 %v28167_v63 }
 0x272   :  { %19100 = vmatprep.mubr.f32.mxu1 %v28168_v29 }
 0x275   :  { %19101 = vmatmul.mubr.f32.gmra.mrb[22].mxu1 %v28169_v38 }
 0x276   :  { %19103 = vmatprep.mubr.f32.mxu1 %v28170_v22 }
 0x279   :  { %19104 = vmatmul.mubr.f32.gmra.mrb[24].mxu1 %v28171_v51 }
 0x27a   :  { %19106 = vmatprep.mubr.f32.mxu1 %v28172_v21  ;;  %v28217_v21 = vand.u32 4294901760, %v24125_v46 }
 0x27d   :  { %19107 = vmatmul.mubr.f32.gmra.mrb[26].mxu1 %v28173_v26 }
 0x27e   :  { %19109 = vmatprep.mubr.f32.mxu1 %v28174_v23 }
 0x281   :  { %19110 = vmatmul.mubr.f32.gmra.mrb[28].mxu1 %v28175_v0 }
 0x282   :  { %19112 = vmatprep.mubr.f32.mxu1 %v24089_v56 }
 0x285   :  { %19113 = vmatmul.mubr.f32.gmra.mrb[30].mxu1 %v28176_v50 }
 0x286   :  { %19115 = vmatprep.mubr.f32.mxu1 %v24113_v30 }
 0x289   :  { %19116 = vmatmul.mubr.f32.gmra.mrb[32].mxu1 %v24125_v46  ;;  %v28224_v46 = vld [vmem:[#allocation38_spill] sm:$0xff] }
 0x28a   :  { %19118 = vmatprep.mubr.f32.mxu1 %v24134_v39 }
 0x28d   :  { %19119 = vmatmul.mubr.f32.gmra.mrb[34].mxu1 %v24141_v8 }
 0x28e   :  { %19153 = vmatprep.mubr.f32.mxu1 %v28177_v5  ;;  %v28184_v5 = vand.u32 4294901760, %v28149_v41  ;;  %v28199_v41 = vand.u32 4294901760, %v28160_v45  ;;  %v28205_v45 = vand.u32 4294901760, %v28167_v63  ;;  %v28212_v63 = vand.u32 4294901760, %v28174_v23 }
 0x28f   :  { %v28219_v23 = vand.u32 4294901760, %v24141_v8  ;;  %v28226_v8 = vld [vmem:[#allocation42_spill] sm:$0xff] }
 0x291   :  { %19154 = vmatmul.mubr.f32.vlgmr.msra.gmra.mrb[0].mxu1 %v28178_v61  ;;  %v28187_v61 = vand.u32 4294901760, %v23604_v2  ;;  %v28193_v2 = vand.u32 4294901760, %v28154_v60  ;;  %v28202_v60 = vand.u32 4294901760, %v28164_v57  ;;  %v28209_v57 = vand.u32 4294901760, %v28171_v51 }
 0x292   :  { %21298 = vmatpush3.bf16.msra.mxu1 %v28162_v4  ;;  %19156 = vmatprep.mubr.f32.mxu1 %v28179_v12  ;;  %v28185_v4 = vand.u32 4294901760, %v23574_v15  ;;  %v28186_v12 = vld [vmem:[#allocation24_spill] sm:$0xff]  ;;  %v28191_v15 = vand.u32 4294901760, %v28152_v48  ;;  %v28200_v48 = vand.u32 4294901760, %v28161_v52  ;;  %v28206_v52 = vand.u32 4294901760, %v28168_v29 }
 0x293   :  { %21300 = vmatprep.subr.bf16.mxu1 %v28180_v49  ;;  %v28213_v29 = vand.u32 4294901760, %v28175_v0  ;;  %v28216_v51 = vand.u32 4294901760, %v24113_v30  ;;  %v28221_v30 = vld [vmem:[#allocation20_spill] sm:$0xff]  ;;  %v28223_v0 = vld [vmem:[#allocation35_spill] sm:$0xff] }
 0x295   :  { %19157 = vmatmul.mubr.f32.gmra.mrb[2].mxu1 %v28181_v14  ;;  %v28190_v14 = vand.u32 4294901760, %v23818_v32  ;;  %v28196_v32 = vand.u32 4294901760, %v28157_v3  ;;  %v28201_v3 = vand.u32 4294901760, %v28163_v10  ;;  %v28208_v10 = vand.u32 4294901760, %v28170_v22 }
 0x296   :  { %21302 = vmatpush3.bf16.msra.mxu1 %v28180_v49  ;;  %19159 = vmatprep.mubr.f32.mxu1 %v28182_v35  ;;  %v28188_v49 = vand.u32 4294901760, %v23621_v42  ;;  %v28189_v35 = vld [vmem:[#allocation25_spill] sm:$0xff]  ;;  %v28194_v42 = vand.u32 4294901760, %v28155_v16  ;;  %v28204_v16 = vand.u32 4294901760, %v28166_v24  ;;  %v28211_v24 = vand.u32 4294901760, %v28173_v26 }
 0x297   :  { %21304 = vmatprep.subr.bf16.mxu1 %v28183_v9  ;;  %v28215_v22 = vand.u32 4294901760, %v28176_v50  ;;  %v28218_v26 = vand.u32 4294901760, %v24134_v39  ;;  %v28220_v50 = vld [vmem:[#allocation32_spill] sm:$0xff] }
 0x298   :  { %v28225_v39 = vld [vmem:[#allocation40_spill] sm:$0xff] }
 0x299   :  { %19160 = vmatmul.mubr.f32.gmra.mrb[4].mxu1 %v28184_v5  ;;  %v28234_v5 = vld [vmem:[#allocation58_spill] sm:$0xff] }
 0x29a   :  { %21306 = vmatpush3.bf16.msra.mxu1 %v28183_v9  ;;  %19162 = vmatprep.mubr.f32.mxu1 %v28185_v4  ;;  %v28207_v9 = vand.u32 4294901760, %v28169_v38  ;;  %v28214_v38 = vand.u32 4294901760, %v24089_v56  ;;  %v28222_v56 = vld [vmem:[#allocation33_spill] sm:$0xff]  ;;  %v28235_v4 = vld [vmem:[#allocation60_spill] sm:$0xff] }
 0x29b   :  { %21308 = vmatprep.subr.bf16.mxu1 %v28186_v12 }
 0x29d   :  { %19163 = vmatmul.mubr.f32.gmra.mrb[6].mxu1 %v28187_v61  ;;  %v28237_v61 = vld [vmem:[#allocation64_spill] sm:$0xff] }
 0x29e   :  { %21310 = vmatpush3.bf16.msra.mxu1 %v28186_v12  ;;  %19165 = vmatprep.mubr.f32.mxu1 %v28188_v49  ;;  %v28236_v12 = vld [vmem:[#allocation62_spill] sm:$0xff] }
 0x29f   :  { %21312 = vmatprep.subr.bf16.mxu1 %v28189_v35  ;;  %v28238_v49 = vld [vmem:[#allocation66_spill] sm:$0xff] }
 0x2a1   :  { %19166 = vmatmul.mubr.f32.gmra.mrb[8].mxu1 %v28190_v14  ;;  %v28240_v14 = vld [vmem:[#allocation69_spill] sm:$0xff] }
 0x2a2   :  { %21314 = vmatpush3.bf16.msra.mxu1 %v28189_v35  ;;  %19168 = vmatprep.mubr.f32.mxu1 %v28191_v15  ;;  %v28239_v35 = vld [vmem:[#allocation67_spill] sm:$0xff]  ;;  %v28241_v15 = vld [vmem:[#allocation70_spill] sm:$0xff] }
 0x2a3   :  { %21316 = vmatprep.subr.bf16.mxu1 %v28192_v54 }
 0x2a5   :  { %19169 = vmatmul.mubr.f32.gmra.mrb[10].mxu1 %v28193_v2  ;;  %v3651_v2 = vld [vmem:[%s27805_s1 + $0x180] sm:$0xff] }
 0x2a6   :  { %21318 = vmatpush3.bf16.msra.mxu1 %v28192_v54  ;;  %19171 = vmatprep.mubr.f32.mxu1 %v28194_v42  ;;  %v28242_v54 = vld [vmem:[#allocation71_spill] sm:$0xff]  ;;  %v27995_v42 = vmov 0.0|0.0  }
 0x2a7   :  { %21320 = vmatprep.subr.bf16.mxu1 %v28195_v6  ;;  %21413 = vmatprep.subr.bf16.mxu0 %v27995_v42 }
 0x2a9   :  { %19172 = vmatmul.mubr.f32.gmra.mrb[12].mxu1 %v28196_v32 }
 0x2aa   :  { %21322 = vmatpush3.bf16.msra.mxu1 %v28195_v6  ;;  %19174 = vmatprep.mubr.f32.mxu1 %v28197_v62  ;;  %v3652_v62 = vld [vmem:[%s27805_s1 + $0x188] sm:$0xff] }
 0x2ab   :  { %21324 = vmatprep.subr.bf16.mxu1 %v28198_v37 }
 0x2ad   :  { %19175 = vmatmul.mubr.f32.gmra.mrb[14].mxu1 %v28199_v41  ;;  %v3694_v41 = vand.u32 4294901760, %v3652_v62 }
 0x2ae   :  { %21326 = vmatpush3.bf16.msra.mxu1 %v28198_v37  ;;  %19177 = vmatprep.mubr.f32.mxu1 %v28200_v48  ;;  %v3691_v37 = vand.u32 4294901760, %v3651_v2 }
 0x2af   :  { %21328 = vmatprep.subr.bf16.mxu1 %v28141_v13 }
 0x2b1   :  { %19178 = vmatmul.mubr.f32.gmra.mrb[16].mxu1 %v28201_v3 }
 0x2b2   :  { %19180 = vmatprep.mubr.f32.mxu1 %v28202_v60 }
 0x2b5   :  { %19181 = vmatmul.mubr.f32.gmra.mrb[18].mxu1 %v28203_v7  ;;  %v24470_v7 = vsub.f32 %v3651_v2, %v3691_v37 }
 0x2b6   :  { %19183 = vmatprep.mubr.f32.mxu1 %v28204_v16 }
 0x2b9   :  { %19184 = vmatmul.mubr.f32.gmra.mrb[20].mxu1 %v28205_v45 }
 0x2ba   :  { %19186 = vmatprep.mubr.f32.mxu1 %v28206_v52  ;;  %v24475_v52 = vsub.f32 %v3652_v62, %v3694_v41 }
 0x2bd   :  { %19187 = vmatmul.mubr.f32.gmra.mrb[22].mxu1 %v28207_v9 }
 0x2be   :  { %19189 = vmatprep.mubr.f32.mxu1 %v28208_v10 }
 0x2c1   :  { %19190 = vmatmul.mubr.f32.gmra.mrb[24].mxu1 %v28209_v57  ;;  %v21417_v57 = vpack.c.bf16 %v24475_v52, %v24470_v7 }
 0x2c2   :  { %19192 = vmatprep.mubr.f32.mxu1 %v28210_v11 }
 0x2c5   :  { %19193 = vmatmul.mubr.f32.gmra.mrb[26].mxu1 %v28211_v24  ;;  %v3653_v24 = vld [vmem:[%s27805_s1 + $0x190] sm:$0xff] }
 0x2c6   :  { %19195 = vmatprep.mubr.f32.mxu1 %v28212_v63  ;;  %v3654_v63 = vld [vmem:[%s27805_s1 + $0x198] sm:$0xff] }
 0x2c9   :  { %19196 = vmatmul.mubr.f32.gmra.mrb[28].mxu1 %v28213_v29  ;;  %v24495_v29 = vpack.c.bf16 %v3694_v41, %v3691_v37 }
 0x2ca   :  { %19198 = vmatprep.mubr.f32.mxu1 %v28214_v38  ;;  %v3655_v38 = vld [vmem:[%s27805_s1 + $0x1a0] sm:$0xff] }
 0x2cd   :  { %19199 = vmatmul.mubr.f32.gmra.mrb[30].mxu1 %v28215_v22  ;;  %v3697_v22 = vand.u32 4294901760, %v3653_v24 }
 0x2ce   :  { %19201 = vmatprep.mubr.f32.mxu1 %v28216_v51  ;;  %v3700_v51 = vand.u32 4294901760, %v3654_v63 }
 0x2d1   :  { %19202 = vmatmul.mubr.f32.gmra.mrb[32].mxu1 %v28217_v21  ;;  %v3656_v21 = vld [vmem:[%s27805_s1 + $0x1a8] sm:$0xff] }
 0x2d2   :  { %19204 = vmatprep.mubr.f32.mxu1 %v28218_v26  ;;  %v3703_v26 = vand.u32 4294901760, %v3655_v38 }
 0x2d5   :  { %19205 = vmatmul.mubr.f32.gmra.mrb[34].mxu1 %v28219_v23  ;;  %v3706_v23 = vand.u32 4294901760, %v3656_v21 }
 0x2d6   :  { %19239 = vmatprep.mubr.f32.mxu1 %v23486_v20 }
 0x2d9   :  { %19240 = vmatmul.mubr.f32.vlgmr.msra.gmra.mrb[0].mxu1 %v23504_v43 }
 0x2da   :  { %21330 = vmatpush3.bf16.msra.mxu1 %v28141_v13  ;;  %19242 = vmatprep.mubr.f32.mxu1 %v23506_v55  ;;  %v28227_v13 = vld [vmem:[#allocation44_spill] sm:$0xff] }
 0x2db   :  { %21332 = vmatprep.subr.bf16.mxu1 %v28145_v28 }
 0x2dd   :  { %19243 = vmatmul.mubr.f32.gmra.mrb[2].mxu1 %v23508_v1 }
 0x2de   :  { %21334 = vmatpush3.bf16.msra.mxu1 %v28145_v28  ;;  %19245 = vmatprep.mubr.f32.mxu1 %v23525_v59  ;;  %v28228_v28 = vld [vmem:[#allocation46_spill] sm:$0xff] }
 0x2df   :  { %21336 = vmatprep.subr.bf16.mxu1 %v28148_v40 }
 0x2e1   :  { %19246 = vmatmul.mubr.f32.gmra.mrb[4].mxu1 %v23527_v17 }
 0x2e2   :  { %21338 = vmatpush3.bf16.msra.mxu1 %v28148_v40  ;;  %19248 = vmatprep.mubr.f32.mxu1 %v23546_v34  ;;  %v28230_v40 = vld [vmem:[#allocation50_spill] sm:$0xff] }
 0x2e3   :  { %21340 = vmatprep.subr.bf16.mxu1 %v28150_v44 }
 0x2e5   :  { %19249 = vmatmul.mubr.f32.gmra.mrb[6].mxu1 %v28139_v25 }
 0x2e6   :  { %21342 = vmatpush3.bf16.msra.mxu1 %v28150_v44  ;;  %19251 = vmatprep.mubr.f32.mxu1 %v28140_v33  ;;  %v28231_v44 = vld [vmem:[#allocation52_spill] sm:$0xff] }
 0x2e7   :  { %21344 = vmatprep.subr.bf16.mxu1 %v28151_v53 }
 0x2e9   :  { %19252 = vmatmul.mubr.f32.gmra.mrb[8].mxu1 %v23611_v19 }
 0x2ea   :  { %21346 = vmatpush3.bf16.msra.mxu1 %v28151_v53  ;;  %19254 = vmatprep.mubr.f32.mxu1 %v23637_v18  ;;  %v28232_v53 = vld [vmem:[#allocation53_spill] sm:$0xff] }
 0x2eb   :  { %21348 = vmatprep.subr.bf16.mxu1 %v28153_v47 }
 0x2ed   :  { %19255 = vmatmul.mubr.f32.gmra.mrb[10].mxu1 %v23820_v58 }
 0x2ee   :  { %21350 = vmatpush3.bf16.msra.mxu1 %v28153_v47  ;;  %19257 = vmatprep.mubr.f32.mxu1 %v23831_v31  ;;  %v28233_v47 = vld [vmem:[#allocation55_spill] sm:$0xff] }
 0x2ef   :  { %21352 = vmatprep.subr.bf16.mxu1 %v28156_v36 }
 0x2f1   :  { %19258 = vmatmul.mubr.f32.gmra.mrb[12].mxu1 %v23852_v27 }
 0x2f2   :  { %21354 = vmatpush3.bf16.msra.mxu1 %v28156_v36  ;;  %19260 = vmatprep.mubr.f32.mxu1 %v28220_v50  ;;  %v28229_v36 = vld [vmem:[#allocation48_spill] sm:$0xff] }
 0x2f3   :  { %21356 = vmatprep.subr.bf16.mxu1 %v28221_v30 }
 0x2f5   :  { %19261 = vmatmul.mubr.f32.gmra.mrb[14].mxu1 %v28222_v56 }
 0x2f6   :  { %21358 = vmatpush3.bf16.msra.mxu1 %v28221_v30  ;;  %19263 = vmatprep.mubr.f32.mxu1 %v28223_v0  ;;  %v24504_v30 = vsub.f32 %v3653_v24, %v3697_v22 }
 0x2f7   :  { %21359 = vmatprep.subr.bf16.mxu1 %v27995_v42 }
 0x2f9   :  { %19264 = vmatmul.mubr.f32.gmra.mrb[16].mxu1 %v28224_v46 }
 0x2fa   :  { %19266 = vmatprep.mubr.f32.mxu1 %v28225_v39 }
 0x2fd   :  { %19267 = vmatmul.mubr.f32.gmra.mrb[18].mxu1 %v28226_v8 }
 0x2fe   :  { %19269 = vmatprep.mubr.f32.mxu1 %v28227_v13 }
 0x301   :  { %19270 = vmatmul.mubr.f32.gmra.mrb[20].mxu1 %v28228_v28 }
 0x302   :  { %19272 = vmatprep.mubr.f32.mxu1 %v28229_v36 }
 0x305   :  { %19273 = vmatmul.mubr.f32.gmra.mrb[22].mxu1 %v28230_v40 }
 0x306   :  { %19275 = vmatprep.mubr.f32.mxu1 %v28231_v44 }
 0x309   :  { %19276 = vmatmul.mubr.f32.gmra.mrb[24].mxu1 %v28232_v53 }
 0x30a   :  { %19278 = vmatprep.mubr.f32.mxu1 %v28233_v47 }
 0x30d   :  { %19279 = vmatmul.mubr.f32.gmra.mrb[26].mxu1 %v28234_v5 }
 0x30e   :  { %19281 = vmatprep.mubr.f32.mxu1 %v28235_v4 }
 0x311   :  { %19282 = vmatmul.mubr.f32.gmra.mrb[28].mxu1 %v28236_v12 }
 0x312   :  { %19284 = vmatprep.mubr.f32.mxu1 %v28237_v61 }
 0x315   :  { %19285 = vmatmul.mubr.f32.gmra.mrb[30].mxu1 %v28238_v49 }
 0x316   :  { %19287 = vmatprep.mubr.f32.mxu1 %v28239_v35 }
 0x319   :  { %19288 = vmatmul.mubr.f32.gmra.mrb[32].mxu1 %v28240_v14 }
 0x31a   :  { %19290 = vmatprep.mubr.f32.mxu1 %v28241_v15 }
 0x31d   :  { %19291 = vmatmul.mubr.f32.gmra.mrb[34].mxu1 %v28242_v54 }
 0x31e   :  { %19325 = vmatprep.mubr.f32.mxu1 %v23486_v20 }
 0x321   :  { %19326 = vmatmul.mubr.f32.vlgmr.msra.gmra.mrb[0].mxu1 %v23504_v43 }
 0x322   :  { %19328 = vmatprep.mubr.f32.mxu1 %v23506_v55 }
 0x325   :  { %19329 = vmatmul.mubr.f32.gmra.mrb[2].mxu1 %v23508_v1 }
 0x326   :  { %19331 = vmatprep.mubr.f32.mxu1 %v23525_v59 }
 0x329   :  { %19332 = vmatmul.mubr.f32.gmra.mrb[4].mxu1 %v23527_v17 }
 0x32a   :  { %19334 = vmatprep.mubr.f32.mxu1 %v23546_v34 }
 0x32d   :  { %19335 = vmatmul.mubr.f32.gmra.mrb[6].mxu1 %v28139_v25  ;;  %v3649_v25 = vld [vmem:[%s27805_s1 + $0x170] sm:$0xff] }
 0x32e   :  { %19337 = vmatprep.mubr.f32.mxu1 %v28140_v33  ;;  %v3650_v33 = vld [vmem:[%s27805_s1 + $0x178] sm:$0xff]  ;;  %v3685_v6 = vand.u32 4294901760, %v3649_v25 }
 0x32f   :  { %v3688_v32 = vand.u32 4294901760, %v3650_v33 }
 0x330   :  { %v24466_v3 = vsub.f32 %v3649_v25, %v3685_v6  ;;  %v3662_v25 = vld [vmem:[%s27805_s1 + $0x1d8] sm:$0xff] }
 0x331   :  { %19338 = vmatmul.mubr.f32.gmra.mrb[8].mxu1 %v23611_v19  ;;  %v24468_v60 = vsub.f32 %v3650_v33, %v3688_v32  ;;  %v24472_v16 = vpack.c.bf16 %v3688_v32, %v3685_v6  ;;  %v3724_v32 = vand.u32 4294901760, %v3662_v25 }
 0x332   :  { %19340 = vmatprep.mubr.f32.mxu1 %v23637_v18 }
 0x333   :  { %v21414_v9 = vpack.c.bf16 %v24468_v60, %v24466_v3  ;;  %21361 = vmatpush1.bf16.msra.mxu1 %v24472_v16  ;;  %v24581_v41 = vsub.f32 %v3662_v25, %v3724_v32 }
 0x334   :  { %21362 = vmatprep.subr.bf16.mxu1 %v27995_v42 }
 0x335   :  { %19341 = vmatmul.mubr.f32.gmra.mrb[10].mxu1 %v23820_v58  ;;  %21415 = vmatpush1.bf16.msra.mxu0 %v21414_v9  ;;  %v3664_v9 = vld [vmem:[%s27805_s1 + $0x1e8] sm:$0xff] }
 0x336   :  { %19343 = vmatprep.mubr.f32.mxu1 %v23831_v31  ;;  %21416 = vmatprep.subr.bf16.mxu0 %v27995_v42 }
 0x337   :  { %21364 = vmatpush1.bf16.msra.mxu1 %v24495_v29 }
 0x338   :  { %21365 = vmatprep.subr.bf16.mxu1 %v27995_v42 }
 0x339   :  { %19344 = vmatmul.mubr.f32.gmra.mrb[12].mxu1 %v23852_v27  ;;  %21418 = vmatpush1.bf16.msra.mxu0 %v21417_v57 }
 0x33a   :  { %19346 = vmatprep.mubr.f32.mxu1 %v28220_v50  ;;  %21419 = vmatprep.subr.bf16.mxu0 %v27995_v42 }
 0x33d   :  { %19347 = vmatmul.mubr.f32.gmra.mrb[14].mxu1 %v28222_v56  ;;  %v24506_v56 = vsub.f32 %v3654_v63, %v3700_v51 }
 0x33e   :  { %19349 = vmatprep.mubr.f32.mxu1 %v28223_v0  ;;  %v24508_v0 = vsub.f32 %v3655_v38, %v3703_v26  ;;  %v3730_v38 = vand.u32 4294901760, %v3664_v9 }
 0x341   :  { %19350 = vmatmul.mubr.f32.gmra.mrb[16].mxu1 %v28224_v46 }
 0x342   :  { %19352 = vmatprep.mubr.f32.mxu1 %v28225_v39  ;;  %v24513_v39 = vsub.f32 %v3656_v21, %v3706_v23  ;;  %v24601_v21 = vsub.f32 %v3664_v9, %v3730_v38 }
 0x345   :  { %19353 = vmatmul.mubr.f32.gmra.mrb[18].mxu1 %v28226_v8  ;;  %v24515_v8 = vpack.c.bf16 %v3700_v51, %v3697_v22 }
 0x346   :  { %19355 = vmatprep.mubr.f32.mxu1 %v28227_v13  ;;  %v21420_v13 = vpack.c.bf16 %v24506_v56, %v24504_v30 }
 0x347   :  { %21367 = vmatpush1.bf16.msra.mxu1 %v24515_v8 }
 0x348   :  { %21421 = vmatpush1.bf16.msra.mxu0 %v21420_v13  ;;  %21368 = vmatprep.subr.bf16.mxu1 %v27995_v42 }
 0x349   :  { %19356 = vmatmul.mubr.f32.gmra.mrb[20].mxu1 %v28228_v28  ;;  %21422 = vmatprep.subr.bf16.mxu0 %v27995_v42 }
 0x34a   :  { %19358 = vmatprep.mubr.f32.mxu1 %v28229_v36  ;;  %v21423_v36 = vpack.c.bf16 %v24513_v39, %v24508_v0 }
 0x34c   :  { %21424 = vmatpush1.bf16.msra.mxu0 %v21423_v36 }
 0x34d   :  { %19359 = vmatmul.mubr.f32.gmra.mrb[22].mxu1 %v28230_v40  ;;  %21425 = vmatprep.subr.bf16.mxu0 %v27995_v42 }
 0x34e   :  { %19361 = vmatprep.mubr.f32.mxu1 %v28231_v44  ;;  %v3657_v44 = vld [vmem:[%s27805_s1 + $0x1b0] sm:$0xff] }
 0x351   :  { %19362 = vmatmul.mubr.f32.gmra.mrb[24].mxu1 %v28232_v53  ;;  %v3658_v53 = vld [vmem:[%s27805_s1 + $0x1b8] sm:$0xff] }
 0x352   :  { %19364 = vmatprep.mubr.f32.mxu1 %v28233_v47  ;;  %v24535_v47 = vpack.c.bf16 %v3706_v23, %v3703_v26  ;;  %v3665_v23 = vld [vmem:[%s27805_s1 + $0x1f0] sm:$0xff] }
 0x353   :  { %v3733_v36 = vand.u32 4294901760, %v3665_v23 }
 0x354   :  { %21370 = vmatpush1.bf16.msra.mxu1 %v24535_v47 }
 0x355   :  { %19365 = vmatmul.mubr.f32.gmra.mrb[26].mxu1 %v28234_v5  ;;  %v3709_v5 = vand.u32 4294901760, %v3657_v44  ;;  %21371 = vmatprep.subr.bf16.mxu1 %v27995_v42 }
 0x356   :  { %19367 = vmatprep.mubr.f32.mxu1 %v28235_v4  ;;  %v3712_v4 = vand.u32 4294901760, %v3658_v53 }
 0x359   :  { %19368 = vmatmul.mubr.f32.gmra.mrb[28].mxu1 %v28236_v12 }
 0x35a   :  { %19370 = vmatprep.mubr.f32.mxu1 %v28237_v61  ;;  %v24540_v61 = vsub.f32 %v3657_v44, %v3709_v5 }
 0x35d   :  { %19371 = vmatmul.mubr.f32.gmra.mrb[30].mxu1 %v28238_v49  ;;  %v24542_v49 = vsub.f32 %v3658_v53, %v3712_v4 }
 0x35e   :  { %19373 = vmatprep.mubr.f32.mxu1 %v28239_v35 }
 0x361   :  { %19374 = vmatmul.mubr.f32.gmra.mrb[32].mxu1 %v28240_v14  ;;  %v3659_v14 = vld [vmem:[%s27805_s1 + $0x1c0] sm:$0xff] }
 0x362   :  { %19376 = vmatprep.mubr.f32.mxu1 %v28241_v15  ;;  %v3660_v15 = vld [vmem:[%s27805_s1 + $0x1c8] sm:$0xff] }
 0x365   :  { %19377 = vmatmul.mubr.f32.gmra.mrb[34].mxu1 %v28242_v54  ;;  %v24552_v54 = vpack.c.bf16 %v3712_v4, %v3709_v5  ;;  %v24618_v5 = vsub.f32 %v3665_v23, %v3733_v36  ;;  %v3858_v23 = vand.u32 4294901760, %v24504_v30 }
 0x367   :  { %21373 = vmatpush1.bf16.msra.mxu1 %v24552_v54 }
 0x368   :  { %21374 = vmatprep.subr.bf16.mxu1 %v27995_v42 }
 0x3f4   :  { %v19327_v20 = vpop.f32.mrb[0].mxu1 }
 0x3f5   :  { %3487 = vst.msk [vmem:[#allocation2 + $0x10] sm:$0xff] %vm3485_vm1, %v19327_v20  ;;  %v3271_v43 = vpop.f32.mrb[1].mxu1  ;;  %v21426_v20 = vpack.c.bf16 %v24542_v49, %v24540_v61 }
 0x3f6   :  { %3486 = vst.msk [vmem:[#allocation2] sm:$0xff] %vm3485_vm1, %v3271_v43  ;;  %v3715_v43 = vand.u32 4294901760, %v3659_v14 }
 0x3f7   :  { %21427 = vmatpush1.bf16.msra.mxu0 %v21426_v20 }
 0x3f8   :  { %v19330_v55 = vpop.f32.mrb[2].mxu1  ;;  %21428 = vmatprep.subr.bf16.mxu0 %v27995_v42 }
 0x3f9   :  { %3489 = vst.msk [vmem:[#allocation2 + $0x30] sm:$0xff] %vm3485_vm1, %v19330_v55  ;;  %v3283_v1 = vpop.f32.mrb[3].mxu1  ;;  %v3718_v55 = vand.u32 4294901760, %v3660_v15 }
 0x3fa   :  { %3488 = vst.msk [vmem:[#allocation2 + $0x20] sm:$0xff] %vm3485_vm1, %v3283_v1 }
 0x3fb   :  { %v24574_v33 = vpack.c.bf16 %v3718_v55, %v3715_v43 }
 0x3fc   :  { %v19333_v59 = vpop.f32.mrb[4].mxu1 }
 0x3fd   :  { %3496 = vrot.lane.b32.xlu1 %v19333_v59, %s22936_s21  ;;  %v3295_v17 = vpop.f32.mrb[5].mxu1  ;;  %v24560_v59 = vsub.f32 %v3659_v14, %v3715_v43  ;;  %21376 = vmatpush1.bf16.msra.mxu1 %v24574_v33 }
 0x3fe   :  { %3494 = vrot.lane.b32.xlu0 %v3295_v17, %s22936_s21  ;;  %v24562_v17 = vsub.f32 %v3660_v15, %v3718_v55  ;;  %21377 = vmatprep.subr.bf16.mxu1 %v27995_v42  ;;  %v3830_v55 = vand.u32 4294901760, %v24466_v3 }
 0x400   :  { %v24442_v34 = vpop.f32.mrb[6].mxu1  ;;  %v21429_v2 = vpack.c.bf16 %v24562_v17, %v24560_v59 }
 0x401   :  { %v24444_v19 = vpop.f32.mrb[7].mxu1 }
 0x402   :  { %21430 = vmatpush1.bf16.msra.mxu0 %v21429_v2 }
 0x403   :  { %21431 = vmatprep.subr.bf16.mxu0 %v27995_v42 }
 0x404   :  { %v19339_v18 = vpop.f32.mrb[8].mxu1 }
 0x405   :  { %3517 = vrot.lane.b32.xlu0 %v19339_v18, %s22937_s22  ;;  %v3319_v58 = vpop.f32.mrb[9].mxu1 }
 0x408   :  { %v24447_v31 = vpop.f32.mrb[10].mxu1 }
 0x409   :  { %3515 = vrot.lane.b32.xlu0 %v3319_v58, %s22937_s22  ;;  %v24450_v27 = vpop.f32.mrb[11].mxu1  ;;  %v3661_v58 = vld [vmem:[%s27805_s1 + $0x1d0] sm:$0xff] }
 0x40a   :  { %v3721_v6 = vand.u32 4294901760, %v3661_v58 }
 0x40c   :  { %v19345_v48 = vpop.f32.mrb[12].mxu1  ;;  %v24579_v37 = vsub.f32 %v3661_v58, %v3721_v6  ;;  %v24591_v57 = vpack.c.bf16 %v3724_v32, %v3721_v6  ;;  %v3837_v58 = vand.u32 4294901760, %v24468_v60 }
 0x40d   :  { %3538 = vrot.lane.b32.xlu1 %v19345_v48, %s22939_s3  ;;  %v3343_v45 = vpop.f32.mrb[13].mxu1 }
 0x40e   :  { %v21432_v24 = vpack.c.bf16 %v24581_v41, %v24579_v37  ;;  %21379 = vmatpush1.bf16.msra.mxu1 %v24591_v57 }
 0x40f   :  { %21380 = vmatprep.subr.bf16.mxu1 %v27995_v42 }
 0x410   :  { %v24481_v10 = vpop.f32.mrb[14].mxu1  ;;  %21433 = vmatpush1.bf16.msra.mxu0 %v21432_v24 }
 0x411   :  { %3536 = vrot.lane.b32.xlu1 %v3343_v45, %s22939_s3  ;;  %v24486_v11 = vpop.f32.mrb[15].mxu1  ;;  %v3663_v45 = vld [vmem:[%s27805_s1 + $0x1e0] sm:$0xff]  ;;  %21434 = vmatprep.subr.bf16.mxu0 %v27995_v42 }
 0x412   :  { %v3727_v63 = vand.u32 4294901760, %v3663_v45 }
 0x414   :  { %v19351_v50 = vpop.f32.mrb[16].mxu1  ;;  %v24599_v51 = vsub.f32 %v3663_v45, %v3727_v63 }
 0x415   :  { %3559 = vrot.lane.b32.xlu0 %v19351_v50, %s22940_s12  ;;  %v3367_v46 = vpop.f32.mrb[17].mxu1  ;;  %v3666_v50 = vld [vmem:[%s27805_s1 + $0x1f8] sm:$0xff] }
 0x416   :  { %3557 = vrot.lane.b32.xlu1 %v3367_v46, %s22940_s12  ;;  %v24611_v46 = vpack.c.bf16 %v3730_v38, %v3727_v63  ;;  %v21435_v13 = vpack.c.bf16 %v24601_v21, %v24599_v51  ;;  %v3736_v44 = vand.u32 4294901760, %v3666_v50 }
 0x418   :  { %v24521_v28 = vpop.f32.mrb[18].mxu1  ;;  %21382 = vmatpush1.bf16.msra.mxu1 %v24611_v46  ;;  %21436 = vmatpush1.bf16.msra.mxu0 %v21435_v13  ;;  %v24620_v4 = vsub.f32 %v3666_v50, %v3736_v44  ;;  %v24629_v14 = vpack.c.bf16 %v3736_v44, %v3733_v36  ;;  %v3865_v50 = vand.u32 4294901760, %v24506_v56  ;;  %v3859_v44 = vsub.f32 %v24504_v30, %v3858_v23 }
 0x419   :  { %v24526_v40 = vpop.f32.mrb[19].mxu1  ;;  %21383 = vmatprep.subr.bf16.mxu1 %v27995_v42  ;;  %21437 = vmatprep.subr.bf16.mxu0 %v27995_v42 }
 0x41c   :  { %v24538_v12 = vpop.f32.mrb[20].mxu1  ;;  %21385 = vmatpush1.bf16.msra.mxu1 %v24629_v14 }
 0x41d   :  { %v3391_v35 = vpop.f32.mrb[21].mxu1  ;;  %21386 = vmatprep.subr.bf16.mxu1 %v27995_v42 }
 0x41e   :  { %3578 = vrot.lane.b32.xlu0 %v3391_v35, %s22941_s23 }
 0x420   :  { %v24558_v1 = vpop.f32.mrb[22].mxu1 }
 0x421   :  { %v24565_v18 = vpop.f32.mrb[23].mxu1 }
 0x424   :  { %v19363_v62 = vpop.f32.mrb[24].mxu1 }
 0x425   :  { %v3415_v48 = vpop.f32.mrb[25].mxu1 }
 0x426   :  { %3599 = vrot.lane.b32.xlu1 %v3415_v48, %s22942_s5  ;;  %v3844_v48 = vand.u32 4294901760, %v24470_v7 }
 0x428   :  { %v24597_v22 = vpop.f32.mrb[26].mxu1  ;;  %v3845_v45 = vsub.f32 %v24470_v7, %v3844_v48 }
 0x429   :  { %v3427_v26 = vpop.f32.mrb[27].mxu1 }
 0x42a   :  { %3498 = vrot.lane.b32.xlu1 %v24444_v19, %s22936_s21  ;;  %v21438_v19 = vpack.c.bf16 %v24620_v4, %v24618_v5  ;;  %v3846_v63 = vand.u32 4294901760, %v3845_v45 }
 0x42c   :  { %v19369_v53 = vpop.f32.mrb[28].mxu1  ;;  %21439 = vmatpush1.bf16.msra.mxu0 %v21438_v19 }
 0x42d   :  { %v3439_v35 = vpop.f32.mrb[29].mxu1  ;;  %21440 = vmatprep.subr.bf16.mxu0 %v27995_v42 }
 0x42e   :  { %3519 = vrot.lane.b32.xlu1 %v24450_v27, %s22937_s22  ;;  %3620 = vrot.lane.b32.xlu0 %v3439_v35, %s22943_s10 }
 0x430   :  { %v24631_v15 = vpop.f32.mrb[30].mxu1 }
 0x431   :  { %v3451_v20 = vpop.f32.mrb[31].mxu1 }
 0x432   :  { %3540 = vrot.lane.b32.xlu1 %v24486_v11, %s22939_s3  ;;  %3580 = vrot.lane.b32.xlu0 %v24538_v12, %s22941_s23  ;;  %v3831_v11 = vsub.f32 %v24466_v3, %v3830_v55  ;;  %v3838_v12 = vsub.f32 %v24468_v60, %v3837_v58 }
 0x434   :  { %v19375_v27 = vpop.f32.mrb[32].mxu1  ;;  %v3832_v6 = vand.u32 4294901760, %v3831_v11  ;;  %v3839_v32 = vand.u32 4294901760, %v3838_v12  ;;  %v3886_v12 = vand.u32 4294901760, %v24540_v61 }
 0x435   :  { %3638 = vst.msk [vmem:[#allocation2 + $0x18] sm:$0xff] %vm3485_vm1, %v19375_v27  ;;  %v3463_v43 = vpop.f32.mrb[33].mxu1  ;;  %v3872_v27 = vand.u32 4294901760, %v24508_v0 }
 0x436   :  { %3637 = vst.msk [vmem:[#allocation2 + $0x8] sm:$0xff] %vm3485_vm1, %v3463_v43  ;;  %3561 = vrot.lane.b32.xlu1 %v24526_v40, %s22940_s12  ;;  %3601 = vrot.lane.b32.xlu0 %v19363_v62, %s22942_s5  ;;  %v3851_v40 = vand.u32 4294901760, %v24475_v52  ;;  %v24660_v62 = vpack.c.bf16 %v3839_v32, %v3832_v6  ;;  %v3879_v43 = vand.u32 4294901760, %v24513_v39  ;;  %v3887_v6 = vsub.f32 %v24540_v61, %v3886_v12 }
 0x438   :  { %v19378_v25 = vpop.f32.mrb[34].mxu1  ;;  %v3852_v9 = vsub.f32 %v24475_v52, %v3851_v40  ;;  %v24751_v3 = vpack.c.bf16 %v3851_v40, %v3844_v48 }
 0x439   :  { %3640 = vst.msk [vmem:[#allocation2 + $0x38] sm:$0xff] %vm3485_vm1, %v19378_v25  ;;  %v3475_v2 = vpop.f32.mrb[35].mxu1  ;;  %v3893_v25 = vand.u32 4294901760, %v24542_v49 }
 0x43a   :  { %3639 = vst.msk [vmem:[#allocation2 + $0x28] sm:$0xff] %vm3485_vm1, %v3475_v2  ;;  %3582 = vrot.lane.b32.xlu1 %v24565_v18, %s22941_s23  ;;  %3622 = vrot.lane.b32.xlu0 %v19369_v53, %s22943_s10  ;;  %v3853_v38 = vand.u32 4294901760, %v3852_v9  ;;  %v3860_v53 = vand.u32 4294901760, %v3859_v44  ;;  %v3880_v2 = vsub.f32 %v24513_v39, %v3879_v43  ;;  %v3907_v39 = vand.u32 4294901760, %v24562_v17 }
 0x43b   :  { %v3894_v32 = vsub.f32 %v24542_v49, %v3893_v25  ;;  %v3914_v44 = vand.u32 4294901760, %v24579_v37 }
 0x43c   :  { %v24676_v36 = vpack.c.bf16 %v3853_v38, %v3846_v63  ;;  %v3888_v63 = vand.u32 4294901760, %v3887_v6  ;;  %v3908_v49 = vsub.f32 %v24562_v17, %v3907_v39 }
 0x43d   :  { %v3642_v24 = vld [vmem:[#allocation2 + $0x8] sm:$0xff]  ;;  %v3895_v38 = vand.u32 4294901760, %v3894_v32 }
 0x43e   :  { %3603 = vrot.lane.b32.xlu1 %v3427_v26, %s22942_s5  ;;  %3500 = vrot.lane.b32.xlu0 %v24442_v34, %s22936_s21  ;;  %v3673_v18 = vsel %vm3485_vm1, %v3642_v24, 0  ;;  %v3866_v26 = vsub.f32 %v24506_v56, %v3865_v50  ;;  %v3881_v24 = vand.u32 4294901760, %v3880_v2 }
 0x43f   :  { %v24674_v13 = vand.u32 4294901760, %v3673_v18 }
 0x440   :  { %v3867_v35 = vand.u32 4294901760, %v3866_v26  ;;  %v3921_v26 = vand.u32 4294901760, %v24581_v41 }
 0x441   :  { %v24685_v34 = vsub.f32 %v3673_v18, %v24674_v13  ;;  %v3900_v18 = vand.u32 4294901760, %v24560_v59 }
 0x442   :  { %3584 = vrot.lane.b32.xlu1 %v24558_v1, %s22941_s23  ;;  %3521 = vrot.lane.b32.xlu0 %v24447_v31, %s22937_s22  ;;  %v24695_v11 = vpack.c.bf16 %v3867_v35, %v3860_v53  ;;  %v3873_v1 = vsub.f32 %v24508_v0, %v3872_v27  ;;  %v3909_v53 = vand.u32 4294901760, %v3908_v49  ;;  %v3922_v35 = vsub.f32 %v24581_v41, %v3921_v26 }
 0x443   :  { %4112 = vmatprep.mubr.f32.mxu0 %v24685_v34  ;;  %v3768_v19 = vand.u32 4294901760, %v24685_v34  ;;  %v3901_v61 = vsub.f32 %v24560_v59, %v3900_v18  ;;  %v3935_v59 = vand.u32 4294901760, %v24601_v21  ;;  %v24767_v7 = vpack.c.bf16 %v3921_v26, %v3914_v44 }
 0x444   :  { %v3874_v9 = vand.u32 4294901760, %v3873_v1  ;;  %v3923_v1 = vand.u32 4294901760, %v3922_v35 }
 0x445   :  { %v3769_v31 = vsub.f32 %v24685_v34, %v3768_v19  ;;  %v3936_v6 = vsub.f32 %v24601_v21, %v3935_v59  ;;  %v4542_v34 = vlaneseq }
 0x446   :  { %3542 = vrot.lane.b32.xlu0 %v24481_v10, %s22939_s3  ;;  %3624 = vrot.lane.b32.xlu1 %v3451_v20, %s22943_s10  ;;  %v24710_v0 = vpack.c.bf16 %v3881_v24, %v3874_v9  ;;  %v24717_v10 = vpack.c.bf16 %v3895_v38, %v3888_v63  ;;  %v3902_v20 = vand.u32 4294901760, %v3901_v61  ;;  %v3949_v9 = vand.u32 4294901760, %v24620_v4  ;;  %v3644_v61 = vld [vmem:[#allocation2 + $0x18] sm:$0xff] }
 0x447   :  { %v3770_v45 = vand.u32 4294901760, %v3769_v31  ;;  %v3928_v31 = vand.u32 4294901760, %v24599_v51  ;;  %v24759_v63 = vpack.c.bf16 %v3865_v50, %v3858_v23  ;;  %v24761_v38 = vpack.c.bf16 %v3879_v43, %v3872_v27 }
 0x448   :  { %v3950_v21 = vsub.f32 %v24620_v4, %v3949_v9  ;;  %v24765_v4 = vpack.c.bf16 %v3907_v39, %v3900_v18  ;;  %v3676_v49 = vsel %vm3485_vm1, %v3644_v61, 0 }
 0x449   :  { %3771 = vmatprep.mubr.f32.mxu1 %v3770_v45  ;;  %v3929_v2 = vsub.f32 %v24599_v51, %v3928_v31  ;;  %v3942_v45 = vand.u32 4294901760, %v24618_v5  ;;  %v24769_v52 = vpack.c.bf16 %v3935_v59, %v3928_v31  ;;  %v24787_v26 = vand.u32 4294901760, %v3676_v49 }
 0x44a   :  { %3563 = vrot.lane.b32.xlu0 %v24521_v28, %s22940_s12  ;;  %3626 = vrot.lane.b32.xlu1 %v24631_v15, %s22943_s10  ;;  %v3915_v28 = vsub.f32 %v24579_v37, %v3914_v44  ;;  %v24727_v15 = vpack.c.bf16 %v3909_v53, %v3902_v20  ;;  %v24739_v37 = vpack.c.bf16 %v3837_v58, %v3830_v55  ;;  %v3951_v55 = vand.u32 4294901760, %v3950_v21 }
 0x44b   :  { %v3930_v41 = vand.u32 4294901760, %v3929_v2  ;;  %v3943_v51 = vsub.f32 %v24618_v5, %v3942_v45  ;;  %v24763_v5 = vpack.c.bf16 %v3893_v25, %v3886_v12  ;;  %v24772_v30 = vpack.c.bf16 %v3949_v9, %v3942_v45 }
 0x44c   :  { %v3916_v17 = vand.u32 4294901760, %v3915_v28  ;;  %v24792_v35 = vsub.f32 %v3676_v49, %v24787_v26 }
 0x44d   :  { %v3944_v60 = vand.u32 4294901760, %v3943_v51 }
 0x44e   :  { %3605 = vrot.lane.b32.xlu0 %v24597_v22, %s22942_s5  ;;  %v24733_v32 = vpack.c.bf16 %v3923_v1, %v3916_v17  ;;  %v3937_v22 = vand.u32 4294901760, %v3936_v6  ;;  %v3646_v1 = vld [vmem:[#allocation2 + $0x28] sm:$0xff]  ;;  %v3783_v6 = vand.u32 4294901760, %v24792_v35 }
 0x44f   :  { %v24753_v58 = vpack.c.bf16 %v3951_v55, %v3944_v60 }
 0x450   :  { %v24743_v24 = vpack.c.bf16 %v3937_v22, %v3930_v41  ;;  %v3679_v22 = vsel %vm3485_vm1, %v3646_v1, 0  ;;  %v3784_v21 = vsub.f32 %v24792_v35, %v3783_v6 }
 0x451   :  { %v24812_v60 = vand.u32 4294901760, %v3679_v22 }
 0x46f   :  { %v3497_v48 = vpop.permute.xlu1 %3496 }
 0x470   :  { %3508 = vst.msk [vmem:[#allocation2 + $0x10] sm:$0xff] %vm3506_vm2, %v3497_v48  ;;  %v3495_v40 = vpop.permute.xlu0 %3494 }
 0x471   :  { %3507 = vst.msk [vmem:[#allocation2] sm:$0xff] %vm3506_vm2, %v3495_v40 }
 0x477   :  { %v3518_v56 = vpop.permute.xlu0 %3517 }
 0x478   :  { %3529 = vst.msk [vmem:[#allocation2 + $0x10] sm:$0xff] %vm3527_vm3, %v3518_v56 }
 0x47b   :  { %v3516_v23 = vpop.permute.xlu0 %3515 }
 0x47c   :  { %3528 = vst.msk [vmem:[#allocation2] sm:$0xff] %vm3527_vm3, %v3516_v23  ;;  %v3785_v23 = vand.u32 4294901760, %v3784_v21 }
 0x47f   :  { %v3539_v50 = vpop.permute.xlu1 %3538 }
 0x480   :  { %3550 = vst.msk [vmem:[#allocation2 + $0x10] sm:$0xff] %vm3548_vm4, %v3539_v50  ;;  %v24822_v50 = vsub.f32 %v3679_v22, %v24812_v60 }
 0x483   :  { %v3537_v27 = vpop.permute.xlu1 %3536 }
 0x484   :  { %3549 = vst.msk [vmem:[#allocation2] sm:$0xff] %vm3548_vm4, %v3537_v27 }
 0x487   :  { %v3560_v43 = vpop.permute.xlu0 %3559 }
 0x488   :  { %3571 = vst.msk [vmem:[#allocation2 + $0x10] sm:$0xff] %vm3569_vm5, %v3560_v43  ;;  %v3558_v12 = vpop.permute.xlu1 %3557 }
 0x489   :  { %3570 = vst.msk [vmem:[#allocation2] sm:$0xff] %vm3569_vm5, %v3558_v12 }
 0x490   :  { %v3579_v25 = vpop.permute.xlu0 %3578 }
 0x491   :  { %3591 = vst.msk [vmem:[#allocation2] sm:$0xff] %vm3590_vm6, %v3579_v25  ;;  %v3648_v25 = vld [vmem:[#allocation2 + $0x38] sm:$0xff] }
 0x492   :  { %v3682_v49 = vsel %vm3485_vm1, %v3648_v25, 0  ;;  %v4692_v25 = vld [vmem:[%s27805_s1 + $0x290] sm:$0xff] }
 0x498   :  { %v3600_v18 = vpop.permute.xlu1 %3599 }
 0x499   :  { %3612 = vst.msk [vmem:[#allocation2] sm:$0xff] %vm3611_vm7, %v3600_v18 }
 0x49c   :  { %v3499_v39 = vpop.permute.xlu1 %3498 }
 0x49d   :  { %3509 = vst.msk [vmem:[#allocation2 + $0x20] sm:$0xff] %vm3506_vm2, %v3499_v39  ;;  %v3798_v39 = vand.u32 4294901760, %v24822_v50 }
 0x4a0   :  { %v3520_v20 = vpop.permute.xlu1 %3519  ;;  %v3621_v44 = vpop.permute.xlu0 %3620 }
 0x4a1   :  { %3530 = vst.msk [vmem:[#allocation2 + $0x20] sm:$0xff] %vm3527_vm3, %v3520_v20 }
 0x4a2   :  { %3633 = vst.msk [vmem:[#allocation2] sm:$0xff] %vm3632_vm8, %v3621_v44 }
 0x4a4   :  { %v3541_v53 = vpop.permute.xlu1 %3540  ;;  %v3581_v28 = vpop.permute.xlu0 %3580 }
 0x4a5   :  { %3551 = vst.msk [vmem:[#allocation2 + $0x20] sm:$0xff] %vm3548_vm4, %v3541_v53  ;;  %v3799_v53 = vsub.f32 %v24822_v50, %v3798_v39 }
 0x4a6   :  { %3592 = vst.msk [vmem:[#allocation2 + $0x10] sm:$0xff] %vm3590_vm6, %v3581_v28  ;;  %v24848_v28 = vand.u32 4294901760, %v3682_v49 }
 0x4a8   :  { %v3562_v31 = vpop.permute.xlu1 %3561  ;;  %v3602_v59 = vpop.permute.xlu0 %3601  ;;  %v3812_v1 = vsub.f32 %v3682_v49, %v24848_v28 }
 0x4a9   :  { %v3641_v17 = vld [vmem:[#allocation2] sm:$0xff]  ;;  %3572 = vst.msk [vmem:[#allocation2 + $0x20] sm:$0xff] %vm3569_vm5, %v3562_v31 }
 0x4aa   :  { %3613 = vst.msk [vmem:[#allocation2 + $0x10] sm:$0xff] %vm3611_vm7, %v3602_v59  ;;  %v24796_v2 = vand.u32 4294901760, %v3641_v17  ;;  %v3813_v21 = vand.u32 4294901760, %v3812_v1 }
 0x4ac   :  { %v24800_v41 = vsub.f32 %v3641_v17, %v24796_v2  ;;  %v3583_v45 = vpop.permute.xlu1 %3582  ;;  %v3623_v9 = vpop.permute.xlu0 %3622  ;;  %v3800_v17 = vand.u32 4294901760, %v3799_v53 }
 0x4ad   :  { %3593 = vst.msk [vmem:[#allocation2 + $0x20] sm:$0xff] %vm3590_vm6, %v3583_v45 }
 0x4ae   :  { %3634 = vst.msk [vmem:[#allocation2 + $0x10] sm:$0xff] %vm3632_vm8, %v3623_v9  ;;  %4115 = vmatmul.mubr.f32.vlgmr.msra.gmra.mrb[16].mxu0 %v24800_v41  ;;  %v3774_v51 = vand.u32 4294901760, %v24800_v41 }
 0x4af   :  { %4121 = vmatprep.mubr.f32.mxu0 %v24792_v35  ;;  %21442 = vmatpush1.bf16.msra.mxu0 %v24472_v16 }
 0x4b0   :  { %21443 = vmatprep.subr.bf16.mxu0 %v27995_v42  ;;  %v3775_v55 = vsub.f32 %v24800_v41, %v3774_v51  ;;  %v3604_v48 = vpop.permute.xlu1 %3603  ;;  %v3501_v40 = vpop.permute.xlu0 %3500 }
 0x4b1   :  { %3614 = vst.msk [vmem:[#allocation2 + $0x20] sm:$0xff] %vm3611_vm7, %v3604_v48  ;;  %v3814_v48 = vsub.f32 %v3812_v1, %v3813_v21 }
 0x4b2   :  { %3510 = vst.msk [vmem:[#allocation2 + $0x30] sm:$0xff] %vm3506_vm2, %v3501_v40  ;;  %v3776_v56 = vand.u32 4294901760, %v3775_v55  ;;  %vm5591_vm2 = vcmask 64512  }
 0x4b3   :  { %21445 = vmatpush1.bf16.msra.mxu0 %v24495_v29 }
 0x4b4   :  { %3777 = vmatmul.mubr.f32.vlgmr.msra.gmra.mrb[36].mxu1 %v3776_v56  ;;  %21446 = vmatprep.subr.bf16.mxu0 %v27995_v42  ;;  %v3585_v27 = vpop.permute.xlu1 %3584  ;;  %v3522_v43 = vpop.permute.xlu0 %3521 }
 0x4b5   :  { %3786 = vmatprep.mubr.f32.mxu1 %v3785_v23  ;;  %21388 = vmatpush1.bf16.msra.mxu1 %v24660_v62  ;;  %v3643_v12 = vld [vmem:[#allocation2 + $0x10] sm:$0xff]  ;;  %3531 = vst.msk [vmem:[#allocation2 + $0x30] sm:$0xff] %vm3527_vm3, %v3522_v43  ;;  %vm22945_vm3 = vmmov 0  }
 0x4b6   :  { %21389 = vmatprep.subr.bf16.mxu1 %v27995_v42  ;;  %v24828_v18 = vand.u32 4294901760, %v3643_v12 }
 0x4b7   :  { %21448 = vmatpush1.bf16.msra.mxu0 %v24515_v8 }
 0x4b8   :  { %v24833_v61 = vsub.f32 %v3643_v12, %v24828_v18  ;;  %21449 = vmatprep.subr.bf16.mxu0 %v27995_v42  ;;  %v3543_v62 = vpop.permute.xlu0 %3542  ;;  %v3625_v20 = vpop.permute.xlu1 %3624 }
 0x4b9   :  { %21391 = vmatpush1.bf16.msra.mxu1 %v24676_v36  ;;  %3552 = vst.msk [vmem:[#allocation2 + $0x30] sm:$0xff] %vm3548_vm4, %v3543_v62  ;;  %v4676_v62 = vld [vmem:[%s27805_s1 + $0x210] sm:$0xff]  ;;  %vm6647_vm4 = vcmask 15360  }
 0x4ba   :  { %3635 = vst.msk [vmem:[#allocation2 + $0x20] sm:$0xff] %vm3632_vm8, %v3625_v20  ;;  %4124 = vmatmul.mubr.f32.gmra.mrb[18].mxu0 %v24833_v61  ;;  %21392 = vmatprep.subr.bf16.mxu1 %v27995_v42  ;;  %v3789_v44 = vand.u32 4294901760, %v24833_v61 }
 0x4bb   :  { %4130 = vmatprep.mubr.f32.mxu0 %v24822_v50  ;;  %21451 = vmatpush1.bf16.msra.mxu0 %v24535_v47  ;;  %v4691_v50 = vld [vmem:[%s27805_s1 + $0x288] sm:$0xff] }
 0x4bc   :  { %21452 = vmatprep.subr.bf16.mxu0 %v27995_v42  ;;  %v3790_v36 = vsub.f32 %v24833_v61, %v3789_v44  ;;  %v3564_v31 = vpop.permute.xlu0 %3563  ;;  %v3627_v45 = vpop.permute.xlu1 %3626  ;;  %v4772_v20 = vand.u32 4294901760, %v4691_v50 }
 0x4bd   :  { %21394 = vmatpush1.bf16.msra.mxu1 %v24695_v11  ;;  %3573 = vst.msk [vmem:[#allocation2 + $0x30] sm:$0xff] %vm3569_vm5, %v3564_v31  ;;  %vm6657_vm5 = vcmask 1041408  }
 0x4be   :  { %v3791_v59 = vand.u32 4294901760, %v3790_v36  ;;  %21395 = vmatprep.subr.bf16.mxu1 %v27995_v42  ;;  %3594 = vst.msk [vmem:[#allocation2 + $0x30] sm:$0xff] %vm3590_vm6, %v3585_v27  ;;  %vm7202_vm6 = vcmask 261120  }
 0x4bf   :  { %21454 = vmatpush1.bf16.msra.mxu0 %v24552_v54 }
 0x4c0   :  { %3792 = vmatmul.mubr.f32.gmra.mrb[38].mxu1 %v3791_v59  ;;  %21455 = vmatprep.subr.bf16.mxu0 %v27995_v42  ;;  %v3606_v22 = vpop.permute.xlu0 %3605 }
 0x4c1   :  { %3801 = vmatprep.mubr.f32.mxu1 %v3800_v17  ;;  %21397 = vmatpush1.bf16.msra.mxu1 %v24710_v0  ;;  %v3645_v11 = vld [vmem:[#allocation2 + $0x20] sm:$0xff]  ;;  %3615 = vst.msk [vmem:[#allocation2 + $0x30] sm:$0xff] %vm3611_vm7, %v3606_v22  ;;  %v24981_v22 = vsub.f32 %v4691_v50, %v4772_v20  ;;  %v4681_v50 = vld [vmem:[%s27805_s1 + $0x238] sm:$0xff]  ;;  %vm8369_vm7 = vcmask 146432  }
 0x4c2   :  { %21398 = vmatprep.subr.bf16.mxu1 %v27995_v42  ;;  %v24864_v9 = vand.u32 4294901760, %v3645_v11  ;;  %3636 = vst.msk [vmem:[#allocation2 + $0x30] sm:$0xff] %vm3632_vm8, %v3627_v45  ;;  %vm8376_vm8 = vcmask 140288  }
 0x4c3   :  { %21457 = vmatpush1.bf16.msra.mxu0 %v24574_v33 }
 0x4c4   :  { %v3803_v55 = vsub.f32 %v3645_v11, %v24864_v9  ;;  %21458 = vmatprep.subr.bf16.mxu0 %v27995_v42 }
 0x4c5   :  { %21400 = vmatpush1.bf16.msra.mxu1 %v24717_v10  ;;  %v3815_v10 = vand.u32 4294901760, %v3814_v48 }
 0x4c6   :  { %4133 = vmatmul.mubr.f32.gmra.mrb[20].mxu0 %v3803_v55  ;;  %21401 = vmatprep.subr.bf16.mxu1 %v27995_v42  ;;  %v3804_v0 = vand.u32 4294901760, %v3803_v55 }
 0x4c7   :  { %4139 = vmatprep.mubr.f32.mxu0 %v3812_v1  ;;  %21460 = vmatpush1.bf16.msra.mxu0 %v24591_v57 }
 0x4c8   :  { %21461 = vmatprep.subr.bf16.mxu0 %v27995_v42  ;;  %v3805_v40 = vsub.f32 %v3803_v55, %v3804_v0  ;;  %v4694_v55 = vld [vmem:[%s27805_s1 + $0x2a0] sm:$0xff] }
 0x4c9   :  { %21403 = vmatpush1.bf16.msra.mxu1 %v24727_v15  ;;  %v3647_v23 = vld [vmem:[#allocation2 + $0x30] sm:$0xff] }
 0x4ca   :  { %v3806_v56 = vand.u32 4294901760, %v3805_v40  ;;  %21404 = vmatprep.subr.bf16.mxu1 %v27995_v42  ;;  %v24877_v27 = vand.u32 4294901760, %v3647_v23 }
 0x4cb   :  { %21463 = vmatpush1.bf16.msra.mxu0 %v24611_v46 }
 0x4cc   :  { %3807 = vmatmul.mubr.f32.gmra.mrb[40].mxu1 %v3806_v56  ;;  %21464 = vmatprep.subr.bf16.mxu0 %v27995_v42  ;;  %v3818_v43 = vsub.f32 %v3647_v23, %v24877_v27 }
 0x4cd   :  { %3816 = vmatprep.mubr.f32.mxu1 %v3815_v10  ;;  %21406 = vmatpush1.bf16.msra.mxu1 %v24733_v32 }
 0x4ce   :  { %21407 = vmatprep.subr.bf16.mxu1 %v27995_v42  ;;  %4142 = vmatmul.mubr.f32.gmra.mrb[22].mxu0 %v3818_v43  ;;  %v3819_v15 = vand.u32 4294901760, %v3818_v43 }
 0x4cf   :  { %21466 = vmatpush1.bf16.msra.mxu0 %v24629_v14  ;;  %4232 = vmatprep.mubr.f32.mxu0 %v3768_v19  ;;  %v17248_v19 = vld [vmem:[%s27805_s1 + $0x200] ss:$0 sm:$0xff] }
 0x4d0   :  { %21467 = vmatprep.subr.bf16.mxu0 %v27995_v42  ;;  %v3820_v12 = vsub.f32 %v3818_v43, %v3819_v15 }
 0x4d1   :  { %21409 = vmatpush1.bf16.msra.mxu1 %v24743_v24  ;;  %v4543_v24 = vshrl.u32 %v4542_v34, 7 }
 0x4d2   :  { %21410 = vmatprep.subr.bf16.mxu1 %v27995_v42  ;;  %4236 = vmatmul.mubr.f32.vlgmr.msra.gmra.mrb[16].mxu0 %v3774_v51  ;;  %v3821_v32 = vand.u32 4294901760, %v3820_v12 }
 0x4d3   :  { %21469 = vmatpush1.bf16.msra.mxu0 %v24739_v37  ;;  %4243 = vmatprep.mubr.f32.mxu0 %v3783_v6 }
 0x4d4   :  { %3822 = vmatmul.mubr.f32.gmra.mrb[42].mxu1 %v3821_v32  ;;  %21470 = vmatprep.subr.bf16.mxu0 %v27995_v42  ;;  %v4781_v32 = vand.u32 4294901760, %v4694_v55 }
 0x4d5   :  { %21412 = vmatpush1.bf16.msra.mxu1 %v24753_v58  ;;  %3982 = vmatprep.mubr.f32.mxu1 %v24674_v13 }
 0x4d6   :  { %4247 = vmatmul.mubr.f32.gmra.mrb[18].mxu0 %v3789_v44  ;;  %v4775_v44 = vand.u32 4294901760, %v4692_v25 }
 0x4d7   :  { %21472 = vmatpush1.bf16.msra.mxu0 %v24751_v3  ;;  %4254 = vmatprep.mubr.f32.mxu0 %v3798_v39 }
 0x4d8   :  { %3984 = vmatmul.mubr.f32.vlgmr.msra.gmra.mrb[36].mxu1 %v24796_v2  ;;  %21473 = vmatprep.subr.bf16.mxu0 %v27995_v42  ;;  %v24983_v11 = vsub.f32 %v4692_v25, %v4775_v44 }
 0x4d9   :  { %3989 = vmatprep.mubr.f32.mxu1 %v24787_v26 }
 0x4da   :  { %4258 = vmatmul.mubr.f32.gmra.mrb[20].mxu0 %v3804_v0  ;;  %v4677_v0 = vld [vmem:[%s27805_s1 + $0x218] sm:$0xff]  ;;  %v21585_v43 = vpack.c.bf16 %v24983_v11, %v24981_v22 }
 0x4db   :  { %21475 = vmatpush1.bf16.msra.mxu0 %v24759_v63  ;;  %4265 = vmatprep.mubr.f32.mxu0 %v3813_v21  ;;  %v4693_v21 = vld [vmem:[%s27805_s1 + $0x298] sm:$0xff] }
 0x4dc   :  { %3991 = vmatmul.mubr.f32.gmra.mrb[38].mxu1 %v24828_v18  ;;  %21476 = vmatprep.subr.bf16.mxu0 %v27995_v42  ;;  %v4778_v12 = vand.u32 4294901760, %v4693_v21 }
 0x4dd   :  { %3996 = vmatprep.mubr.f32.mxu1 %v24812_v60  ;;  %21586 = vmatprep.subr.bf16.mxu1 %v21585_v43  ;;  %v4684_v43 = vld [vmem:[%s27805_s1 + $0x250] sm:$0xff] }
 0x4de   :  { %4269 = vmatmul.mubr.f32.gmra.mrb[22].mxu0 %v3819_v15 }
 0x4df   :  { %21478 = vmatpush1.bf16.msra.mxu0 %v24761_v38  ;;  %4393 = vmatprep.mubr.f32.mxu0 %v24674_v13 }
 0x4e0   :  { %3998 = vmatmul.mubr.f32.gmra.mrb[40].mxu1 %v24864_v9  ;;  %21479 = vmatprep.subr.bf16.mxu0 %v27995_v42 }
 0x4e1   :  { %4003 = vmatprep.mubr.f32.mxu1 %v24848_v28 }
 0x4e3   :  { %21481 = vmatpush1.bf16.msra.mxu0 %v24763_v5 }
 0x4e4   :  { %4005 = vmatmul.mubr.f32.gmra.mrb[42].mxu1 %v24877_v27  ;;  %21482 = vmatprep.subr.bf16.mxu0 %v27995_v42 }
 0x4e7   :  { %21484 = vmatpush1.bf16.msra.mxu0 %v24765_v4 }
 0x4e8   :  { %21485 = vmatprep.subr.bf16.mxu0 %v27995_v42 }
 0x4eb   :  { %21487 = vmatpush1.bf16.msra.mxu0 %v24767_v7 }
 0x4ec   :  { %21488 = vmatprep.subr.bf16.mxu0 %v27995_v42 }
 0x4ef   :  { %21490 = vmatpush1.bf16.msra.mxu0 %v24769_v52 }
 0x4f0   :  { %21491 = vmatprep.subr.bf16.mxu0 %v27995_v42 }
 0x4f3   :  { %21493 = vmatpush1.bf16.msra.mxu0 %v24772_v30 }
 0x4f4   :  { %21494 = vmatprep.subr.bf16.mxu0 %v27995_v42 }
 0x4f6   :  { %4395 = vmatmul.mubr.f32.vlgmr.msra.gmra.mrb[16].mxu0 %v24796_v2 }
 0x4f7   :  { %4400 = vmatprep.mubr.f32.mxu0 %v24787_v26  ;;  %21496 = vmatpush1.bf16.msra.mxu0 %v24472_v16 }
 0x4f8   :  { %21497 = vmatprep.subr.bf16.mxu0 %v27995_v42 }
 0x4fa   :  { %4402 = vmatmul.mubr.f32.gmra.mrb[18].mxu0 %v24828_v18 }
 0x4fb   :  { %4407 = vmatprep.mubr.f32.mxu0 %v24812_v60  ;;  %21499 = vmatpush1.bf16.msra.mxu0 %v24495_v29 }
 0x4fc   :  { %21500 = vmatprep.subr.bf16.mxu0 %v27995_v42 }
 0x4fe   :  { %4409 = vmatmul.mubr.f32.gmra.mrb[20].mxu0 %v24864_v9 }
 0x4ff   :  { %4414 = vmatprep.mubr.f32.mxu0 %v24848_v28  ;;  %21502 = vmatpush1.bf16.msra.mxu0 %v24515_v8 }
 0x500   :  { %21503 = vmatprep.subr.bf16.mxu0 %v27995_v42 }
 0x502   :  { %4416 = vmatmul.mubr.f32.gmra.mrb[22].mxu0 %v24877_v27 }
 0x503   :  { %21505 = vmatpush1.bf16.msra.mxu0 %v24535_v47  ;;  %4504 = vmatprep.mubr.f32.mxu0 %v24674_v13 }
 0x504   :  { %21506 = vmatprep.subr.bf16.mxu0 %v27995_v42 }
 0x507   :  { %21508 = vmatpush1.bf16.msra.mxu0 %v24552_v54 }
 0x508   :  { %21509 = vmatprep.subr.bf16.mxu0 %v27995_v42 }
 0x50b   :  { %21511 = vmatpush1.bf16.msra.mxu0 %v24574_v33 }
 0x50c   :  { %21512 = vmatprep.subr.bf16.mxu0 %v27995_v42 }
 0x50f   :  { %21514 = vmatpush1.bf16.msra.mxu0 %v24591_v57 }
 0x510   :  { %21515 = vmatprep.subr.bf16.mxu0 %v27995_v42 }
 0x513   :  { %21517 = vmatpush1.bf16.msra.mxu0 %v24611_v46 }
 0x514   :  { %21518 = vmatprep.subr.bf16.mxu0 %v27995_v42 }
 0x517   :  { %21520 = vmatpush1.bf16.msra.mxu0 %v24629_v14  ;;  %v22944_v14 = vmov 1983009808  }
 0x518   :  { %v4540_v13 = vunpack.c.l.s4 %v22944_v14  ;;  %v4696_v14 = vld [vmem:[%s27805_s1 + $0x2b0] sm:$0xff] }
 0x51a   :  { %4506 = vmatmul.mubr.f32.vlgmr.msra.gmra.mrb[16].mxu0 %v24796_v2  ;;  %v4541_v37 = vunpack.c.0.s8 %v4540_v13 }
 0x51b   :  { %4511 = vmatprep.mubr.f32.mxu0 %v24787_v26 }
 0x51c   :  { %v24960_v5 = vsub.s32 %v4541_v37, %v4543_v24  ;;  %v4679_v24 = vld [vmem:[%s27805_s1 + $0x228] sm:$0xff] }
 0x51e   :  { %4513 = vmatmul.mubr.f32.gmra.mrb[18].mxu0 %v24828_v18  ;;  %v4675_v18 = vld [vmem:[%s27805_s1 + $0x208] sm:$0xff] }
 0x51f   :  { %4518 = vmatprep.mubr.f32.mxu0 %v24812_v60  ;;  %v4724_v53 = vand.u32 4294901760, %v4675_v18 }
 0x521   :  { %v24985_v45 = vsub.f32 %v4675_v18, %v4724_v53 }
 0x522   :  { %4520 = vmatmul.mubr.f32.gmra.mrb[20].mxu0 %v24864_v9 }
 0x523   :  { %4525 = vmatprep.mubr.f32.mxu0 %v24848_v28  ;;  %v4727_v28 = vand.u32 4294901760, %v4676_v62 }
 0x525   :  { %v24987_v9 = vsub.f32 %v4676_v62, %v4727_v28 }
 0x526   :  { %4527 = vmatmul.mubr.f32.gmra.mrb[22].mxu0 %v24877_v27  ;;  %v4678_v27 = vld [vmem:[%s27805_s1 + $0x220] sm:$0xff] }
 0x527   :  { %v21587_v15 = vpack.c.bf16 %v24987_v9, %v24985_v45 }
 0x529   :  { %21588 = vmatpush3.bf16.msra.mxu1 %v21587_v15 }
 0x5ab   :  { %v3985_v16 = vpop.f32.mrb[36].mxu1 }
 0x5ac   :  { %v3987_v29 = vpop.f32.mrb[37].mxu1  ;;  %v22089_v3 = vadd.f32 %v17248_v19, %v3985_v16 }
 0x5af   :  { %v3992_v8 = vpop.f32.mrb[38].mxu1 }
 0x5b0   :  { %v3994_v47 = vpop.f32.mrb[39].mxu1  ;;  %v22091_v4 = vadd.f32 %v17248_v19, %v3992_v8 }
 0x5b1   :  { %v4730_v47 = vand.u32 4294901760, %v4677_v0 }
 0x5b3   :  { %v3999_v54 = vpop.f32.mrb[40].mxu1 }
 0x5b4   :  { %v4001_v33 = vpop.f32.mrb[41].mxu1  ;;  %v22093_v2 = vadd.f32 %v17248_v19, %v3999_v54  ;;  %v25013_v54 = vsub.f32 %v4693_v21, %v4778_v12 }
 0x5b5   :  { %v25015_v33 = vsub.f32 %v4694_v55, %v4781_v32  ;;  %v4699_v55 = vld [vmem:[%s27805_s1 + $0x2c8] sm:$0xff] }
 0x5b7   :  { %v4006_v57 = vpop.f32.mrb[42].mxu1 }
 0x5b8   :  { %v4008_v46 = vpop.f32.mrb[43].mxu1  ;;  %v22095_v36 = vadd.f32 %v17248_v19, %v4006_v57  ;;  %v4733_v57 = vand.u32 4294901760, %v4678_v27 }
 0x5b9   :  { %v4695_v46 = vld [vmem:[%s27805_s1 + $0x2a8] sm:$0xff] }
 0x5ba   :  { %v4784_v37 = vand.u32 4294901760, %v4695_v46 }
 0x5ed   :  { %v4507_v58 = vpop.f32.mrb[16].mxu0 }
 0x5ee   :  { %v22090_v63 = vadd.f32 %v22089_v3, %v4507_v58  ;;  %v4509_v38 = vpop.f32.mrb[17].mxu0  ;;  %v4680_v3 = vld [vmem:[%s27805_s1 + $0x230] sm:$0xff]  ;;  %v21589_v58 = vpack.c.bf16 %v25015_v33, %v25013_v54 }
 0x5ef   :  { %v25040_v38 = vsub.f32 %v4678_v27, %v4733_v57  ;;  %v4796_v27 = vand.u32 4294901760, %v4699_v55 }
 0x5f0   :  { %v4532_v7 = vmax.f32 %v22090_v63, 0.0  ;;  %v25038_v63 = vsub.f32 %v4677_v0, %v4730_v47  ;;  %21590 = vmatprep.subr.bf16.mxu1 %v21589_v58  ;;  %v4700_v0 = vld [vmem:[%s27805_s1 + $0x2d0] sm:$0xff] }
 0x5f1   :  { %v4514_v52 = vpop.f32.mrb[18].mxu0 }
 0x5f2   :  { %v22092_v30 = vadd.f32 %v22091_v4, %v4514_v52  ;;  %v4516_v26 = vpop.f32.mrb[19].mxu0  ;;  %v4545_v35 = vrot.slane %v4532_v7, %v24960_v5  ;;  %4537 = vst.msk [vmem:[#allocation3] sm:$0x3] %vm4536_vm9, %v4532_v7  ;;  %v4552_v6 = vcombine.high %v4532_v7, %v4532_v7  ;;  %v25042_v4 = vpack.c.bf16 %v4775_v44, %v4772_v20 }
 0x5f3   :  { %v4787_v26 = vand.u32 4294901760, %v4696_v14  ;;  %v25081_v20 = vpack.c.bf16 %v4733_v57, %v4730_v47  ;;  %v25122_v57 = vsub.f32 %v4699_v55, %v4796_v27 }
 0x5f4   :  { %v4533_v41 = vmax.f32 %v22092_v30, 0.0  ;;  %v4546_v51 = vcombine.high %v4545_v35, %v4545_v35  ;;  %v4559_v17 = vrot.slane %v4552_v6, %v24960_v5  ;;  %v25050_v30 = vpack.c.bf16 %v4727_v28, %v4724_v53  ;;  %21522 = vmatprep.subr.bf16.mxu0 %v25042_v4 }
 0x5f5   :  { %v4521_v60 = vpop.f32.mrb[20].mxu0  ;;  %v21591_v35 = vpack.c.bf16 %v25040_v38, %v25038_v63  ;;  %v4736_v6 = vand.u32 4294901760, %v4679_v24  ;;  %v25069_v18 = vsub.f32 %v4696_v14, %v4787_v26  ;;  %v25092_v21 = vpack.c.bf16 %v4787_v26, %v4784_v37 }
 0x5f6   :  { %v4590_v39 = vcombine.high %v4533_v41, %v4533_v41  ;;  %v22094_v61 = vadd.f32 %v22093_v2, %v4521_v60  ;;  %v4523_v49 = vpop.f32.mrb[21].mxu0  ;;  %4547 = vrot.lane.b32.xlu0 %v4546_v51, %s22936_s21  ;;  %v24978_v31 = vrot.slane %v4533_v41, %v24960_v5  ;;  %v4565_v29 = vcombine.high %v4559_v17, %v4559_v17  ;;  %v4697_v51 = vld [vmem:[%s27805_s1 + $0x2b8] sm:$0xff]  ;;  %v4698_v60 = vld [vmem:[%s27805_s1 + $0x2c0] sm:$0xff] }
 0x5f7   :  { %v25055_v2 = vsub.f32 %v4695_v46, %v4784_v37  ;;  %v4739_v41 = vand.u32 4294901760, %v4680_v3  ;;  %21592 = vmatpush3.bf16.msra.mxu1 %v21591_v35  ;;  %21524 = vmatpush3.bf16.msra.mxu0 %v25050_v30  ;;  %v25077_v49 = vsub.f32 %v4679_v24, %v4736_v6  ;;  %v4790_v44 = vand.u32 4294901760, %v4697_v51  ;;  %v4701_v37 = vld [vmem:[%s27805_s1 + $0x2d8] sm:$0xff]  ;;  %v4702_v24 = vld [vmem:[%s27805_s1 + $0x2e0] sm:$0xff] }
 0x5f8   :  { %v4534_v59 = vmax.f32 %v22094_v61, 0.0  ;;  %v25001_v10 = vrot.slane %v4590_v39, %v24960_v5  ;;  %v4584_v34 = vcombine.high %v24978_v31, %v24978_v31  ;;  %v25071_v39 = vpack.c.bf16 %v4781_v32, %v4778_v12  ;;  %v4682_v61 = vld [vmem:[%s27805_s1 + $0x240] sm:$0xff] }
 0x5f9   :  { %v4528_v1 = vpop.f32.mrb[22].mxu0  ;;  %v25079_v62 = vsub.f32 %v4680_v3, %v4739_v41  ;;  %v21593_v53 = vpack.c.bf16 %v25069_v18, %v25055_v2  ;;  %v4793_v28 = vand.u32 4294901760, %v4698_v60  ;;  %v25115_v15 = vpack.c.bf16 %v4739_v41, %v4736_v6  ;;  %v4685_v3 = vld [vmem:[%s27805_s1 + $0x258] sm:$0xff]  ;;  %v4686_v6 = vld [vmem:[%s27805_s1 + $0x260] sm:$0xff] }
 0x5fa   :  { %v4623_v48 = vcombine.high %v4534_v59, %v4534_v59  ;;  %v22096_v40 = vadd.f32 %v22095_v36, %v4528_v1  ;;  %v4530_v56 = vpop.f32.mrb[23].mxu0  ;;  %4560 = vrot.lane.b32.xlu0 %v4559_v17, %s22937_s22  ;;  %v4617_v23 = vrot.slane %v4534_v59, %v24960_v5  ;;  %4609 = vst.msk [vmem:[#allocation3 + $0x2] sm:$0x3] %vm4536_vm9, %v4534_v59  ;;  %v4742_v36 = vand.u32 4294901760, %v4681_v50 }
 0x5fb   :  { %v4603_v19 = vcombine.high %v25001_v10, %v25001_v10  ;;  %21526 = vmatprep.subr.bf16.mxu0 %v25071_v39  ;;  %v21595_v17 = vpack.c.bf16 %v25079_v62, %v25077_v49  ;;  %v25090_v1 = vsub.f32 %v4697_v51, %v4790_v44  ;;  %21594 = vmatprep.subr.bf16.mxu1 %v21593_v53  ;;  %v4799_v12 = vand.u32 4294901760, %v4700_v0  ;;  %v4703_v51 = vld [vmem:[%s27805_s1 + $0x2e8] sm:$0xff] }
 0x5fc   :  { %v25011_v16 = vmax.f32 %v22096_v40, 0.0  ;;  %v4618_v8 = vcombine.high %v4617_v23, %v4617_v23  ;;  %v4630_v13 = vrot.slane %v4623_v48, %v24960_v5  ;;  %v4683_v48 = vld [vmem:[%s27805_s1 + $0x248] sm:$0xff]  ;;  %v25105_v40 = vsub.f32 %v4698_v60, %v4793_v28  ;;  %21528 = vmatpush3.bf16.msra.mxu0 %v25081_v20 }
 0x5fd   :  { %v25107_v56 = vsub.f32 %v4681_v50, %v4742_v36  ;;  %v4748_v32 = vand.u32 4294901760, %v4683_v48  ;;  %21596 = vmatpush3.bf16.msra.mxu1 %v21595_v17  ;;  %21530 = vmatprep.subr.bf16.mxu0 %v25092_v21  ;;  %v25124_v46 = vsub.f32 %v4700_v0, %v4799_v12  ;;  %v4802_v26 = vand.u32 4294901760, %v4701_v37  ;;  %v4687_v53 = vld [vmem:[%s27805_s1 + $0x268] sm:$0xff] }
 0x5fe   :  { %4566 = vrot.lane.b32.xlu0 %v4565_v29, %s22939_s3  ;;  %4619 = vrot.lane.b32.xlu1 %v4618_v8, %s22936_s21  ;;  %v25046_v7 = vrot.slane %v25011_v16, %v24960_v5  ;;  %v4657_v52 = vcombine.high %v25011_v16, %v25011_v16  ;;  %v4635_v25 = vcombine.high %v4630_v13, %v4630_v13  ;;  %v4751_v29 = vand.u32 4294901760, %v4684_v43 }
 0x5ff   :  { %v21597_v8 = vpack.c.bf16 %v25105_v40, %v25090_v1  ;;  %v25126_v14 = vsub.f32 %v4683_v48, %v4748_v32  ;;  %v4805_v35 = vand.u32 4294901760, %v4702_v24  ;;  %v4754_v41 = vand.u32 4294901760, %v4685_v3 }
 0x600   :  { %v4652_v59 = vcombine.high %v25046_v7, %v25046_v7  ;;  %21532 = vmatpush3.bf16.msra.mxu0 %v25115_v15  ;;  %v21601_v60 = vpack.c.bf16 %v25124_v46, %v25122_v57  ;;  %v4808_v55 = vand.u32 4294901760, %v4703_v51  ;;  %v4664_v0 = vrot.slane %v4657_v52, %v24960_v5 }
 0x601   :  { %21598 = vmatprep.subr.bf16.mxu1 %v21597_v8  ;;  %v25174_v17 = vsub.f32 %v4685_v3, %v4754_v41  ;;  %v4706_v8 = vld [vmem:[%s27805_s1 + $0x300] sm:$0xff]  ;;  %v25201_v16 = vpack.c.bf16 %v4751_v29, %v4748_v32  ;;  %vm14744_vm9 = vcmask 254976  }
 0x602   :  { %4579 = vrot.lane.b32.xlu0 %v24978_v31, %s22940_s12  ;;  %4631 = vrot.lane.b32.xlu1 %v4630_v13, %s22937_s22  ;;  %v4745_v31 = vand.u32 4294901760, %v4682_v61  ;;  %v25128_v13 = vsub.f32 %v4684_v43, %v4751_v29  ;;  %v4760_v43 = vand.u32 4294901760, %v4687_v53  ;;  %v25203_v52 = vsub.f32 %v4703_v51, %v4808_v55 }
 0x603   :  { %28243 = vst [vmem:[#allocation19_spill] sm:$0xff] %v25201_v16  ;;  %v4817_v3 = vand.u32 4294901760, %v4706_v8 }
 0x604   :  { %v25109_v23 = vsub.f32 %v4682_v61, %v4745_v31  ;;  %v25145_v58 = vpack.c.bf16 %v4745_v31, %v4742_v36  ;;  %v21603_v50 = vpack.c.bf16 %v25128_v13, %v25126_v14  ;;  %v25158_v61 = vpack.c.bf16 %v4799_v12, %v4796_v27  ;;  %v4705_v12 = vld [vmem:[%s27805_s1 + $0x2f8] sm:$0xff] }
 0x605   :  { %v25170_v36 = vsub.f32 %v4701_v37, %v4802_v26  ;;  %v25172_v31 = vsub.f32 %v4702_v24, %v4805_v35  ;;  %v4690_v24 = vld [vmem:[%s27805_s1 + $0x280] sm:$0xff]  ;;  %v4814_v29 = vand.u32 4294901760, %v4705_v12 }
 0x606   :  { %4585 = vrot.lane.b32.xlu0 %v4584_v34, %s22941_s23  ;;  %4636 = vrot.lane.b32.xlu1 %v4635_v25, %s22939_s3  ;;  %v21599_v47 = vpack.c.bf16 %v25109_v23, %v25107_v56  ;;  %v25130_v34 = vpack.c.bf16 %v4793_v28, %v4790_v44  ;;  %v4757_v25 = vand.u32 4294901760, %v4686_v6  ;;  %v4704_v44 = vld [vmem:[%s27805_s1 + $0x2f0] sm:$0xff] }
 0x607   :  { %v4688_v28 = vld [vmem:[%s27805_s1 + $0x270] sm:$0xff]  ;;  %v4811_v27 = vand.u32 4294901760, %v4704_v44  ;;  %v21605_v5 = vpack.c.bf16 %v25172_v31, %v25170_v36 }
 0x608   :  { %21600 = vmatpush3.bf16.msra.mxu1 %v21599_v47  ;;  %21534 = vmatprep.subr.bf16.mxu0 %v25130_v34  ;;  %v25180_v48 = vsub.f32 %v4686_v6, %v4757_v25  ;;  %v4689_v47 = vld [vmem:[%s27805_s1 + $0x278] sm:$0xff]  ;;  %v4763_v37 = vand.u32 4294901760, %v4688_v28 }
 0x609   :  { %21602 = vmatprep.subr.bf16.mxu1 %v21601_v60  ;;  %21536 = vmatpush3.bf16.msra.mxu0 %v25145_v58  ;;  %v4766_v6 = vand.u32 4294901760, %v4689_v47  ;;  %v4769_v60 = vand.u32 4294901760, %v4690_v24 }
 0x60a   :  { %4598 = vrot.lane.b32.xlu0 %v25001_v10, %s22942_s5  ;;  %4648 = vrot.lane.b32.xlu1 %v25046_v7, %s22940_s12  ;;  %v21607_v10 = vpack.c.bf16 %v25180_v48, %v25174_v17  ;;  %v25213_v7 = vsub.f32 %v4687_v53, %v4760_v43  ;;  %v25218_v32 = vsub.f32 %v4688_v28, %v4763_v37 }
 0x60b   :  { %21538 = vmatprep.subr.bf16.mxu0 %v25158_v61  ;;  %v25225_v53 = vsub.f32 %v4706_v8, %v4817_v3  ;;  %v25237_v42 = vsub.f32 %v4690_v24, %v4769_v60  ;;  %v4845_v8 = vand.u32 4294901760, %v24987_v9  ;;  %v25252_v24 = vpack.c.bf16 %v4817_v3, %v4814_v29 }
 0x60c   :  { %21604 = vmatpush3.bf16.msra.mxu1 %v21603_v50  ;;  %v25230_v50 = vpack.c.bf16 %v4811_v27, %v4808_v55  ;;  %v21611_v28 = vpack.c.bf16 %v25218_v32, %v25213_v7  ;;  %v4957_v55 = vand.u32 4294901760, %v24983_v11 }
 0x60d   :  { %21606 = vmatprep.subr.bf16.mxu1 %v21605_v5  ;;  %21540 = vmatpush3.bf16.msra.mxu0 %v25201_v16  ;;  %v25235_v5 = vsub.f32 %v4689_v47, %v4766_v6  ;;  %28248 = vst [vmem:[#allocation5_spill] sm:$0xff] %v25252_v24 }
 0x60e   :  { %4604 = vrot.lane.b32.xlu0 %v4603_v19, %s22943_s10  ;;  %4653 = vrot.lane.b32.xlu1 %v4652_v59, %s22941_s23  ;;  %v25211_v19 = vsub.f32 %v4704_v44, %v4811_v27  ;;  %v25215_v59 = vpack.c.bf16 %v4805_v35, %v4802_v26  ;;  %v25223_v44 = vsub.f32 %v4705_v12, %v4814_v29  ;;  %v4838_v12 = vand.u32 4294901760, %v24985_v45 }
 0x60f   :  { %v4669_v26 = vcombine.high %v4664_v0, %v4664_v0  ;;  %v25228_v35 = vpack.c.bf16 %v4757_v25, %v4754_v41  ;;  %28246 = vst [vmem:[#allocation12_spill] sm:$0xff] %v25230_v50  ;;  %v25243_v41 = vpack.c.bf16 %v4763_v37, %v4760_v43  ;;  %v4950_v25 = vand.u32 4294901760, %v24981_v22 }
 0x610   :  { %28244 = vst [vmem:[#allocation10_spill] sm:$0xff] %v25215_v59  ;;  %v21609_v51 = vpack.c.bf16 %v25211_v19, %v25203_v52  ;;  %21608 = vmatpush3.bf16.msra.mxu1 %v21607_v10  ;;  %21542 = vmatprep.subr.bf16.mxu0 %v25215_v59  ;;  %v21615_v27 = vpack.c.bf16 %v25237_v42, %v25235_v5  ;;  %v4964_v43 = vand.u32 4294901760, %v25013_v54  ;;  %v4971_v10 = vand.u32 4294901760, %v25015_v33 }
 0x611   :  { %28245 = vst [vmem:[#allocation11_spill] sm:$0xff] %v25228_v35  ;;  %21544 = vmatpush3.bf16.msra.mxu0 %v25228_v35  ;;  %28247 = vst [vmem:[#allocation4_spill] sm:$0xff] %v25243_v41  ;;  %v21649_v47 = vpack.c.bf16 %v4957_v55, %v4950_v25  ;;  %v25255_v37 = vpack.c.bf16 %v4845_v8, %v4838_v12  ;;  %v4951_v3 = vsub.f32 %v24981_v22, %v4950_v25 }
 0x612   :  { %4665 = vrot.lane.b32.xlu1 %v4664_v0, %s22942_s5  ;;  %21610 = vmatprep.subr.bf16.mxu1 %v21609_v51  ;;  %v21613_v0 = vpack.c.bf16 %v25225_v53, %v25223_v44  ;;  %v4852_v51 = vand.u32 4294901760, %v25038_v63  ;;  %v4839_v35 = vsub.f32 %v24985_v45, %v4838_v12  ;;  %v4846_v59 = vsub.f32 %v24987_v9, %v4845_v8 }
 0x613   :  { %21546 = vmatprep.subr.bf16.mxu0 %v25230_v50  ;;  %v4958_v50 = vsub.f32 %v24983_v11, %v4957_v55  ;;  %v4873_v22 = vand.u32 4294901760, %v25079_v62  ;;  %v4965_v45 = vsub.f32 %v25013_v54, %v4964_v43  ;;  %v4972_v9 = vsub.f32 %v25015_v33, %v4971_v10 }
 0x614   :  { %21612 = vmatpush3.bf16.msra.mxu1 %v21611_v28  ;;  %v25261_v28 = vpack.c.bf16 %v4769_v60, %v4766_v6  ;;  %v4952_v6 = vand.u32 4294901760, %v4951_v3  ;;  %v4847_v16 = vand.u32 4294901760, %v4846_v59  ;;  %v4853_v12 = vsub.f32 %v25038_v63, %v4852_v51 }
 0x615   :  { %21614 = vmatprep.subr.bf16.mxu1 %v21613_v0  ;;  %21548 = vmatpush3.bf16.msra.mxu0 %v25243_v41  ;;  %v25264_v0 = vpack.c.bf16 %v4971_v10, %v4964_v43  ;;  %v4959_v60 = vand.u32 4294901760, %v4958_v50  ;;  %v4840_v41 = vand.u32 4294901760, %v4839_v35  ;;  %v4966_v59 = vand.u32 4294901760, %v4965_v45 }
 0x616   :  { %4670 = vrot.lane.b32.xlu1 %v4669_v26, %s22943_s10  ;;  %v4859_v26 = vand.u32 4294901760, %v25040_v38  ;;  %28249 = vst [vmem:[#allocation7_spill] sm:$0xff] %v25261_v28  ;;  %21550 = vmatprep.subr.bf16.mxu0 %v25252_v24  ;;  %v4985_v24 = vand.u32 4294901760, %v25069_v18  ;;  %v4973_v8 = vand.u32 4294901760, %v4972_v9  ;;  %v4992_v3 = vand.u32 4294901760, %v25090_v1 }
 0x617   :  { %v21553_v25 = vpack.c.bf16 %v4959_v60, %v4952_v6  ;;  %v25281_v55 = vpack.c.bf16 %v4847_v16, %v4840_v41  ;;  %v4999_v6 = vand.u32 4294901760, %v25105_v40  ;;  %v4854_v60 = vand.u32 4294901760, %v4853_v12 }
 0x618   :  { %21616 = vmatpush3.bf16.msra.mxu1 %v21615_v27  ;;  %v25266_v29 = vpack.c.bf16 %v4859_v26, %v4852_v51  ;;  %v4978_v27 = vand.u32 4294901760, %v25055_v2  ;;  %v4860_v35 = vsub.f32 %v25040_v38, %v4859_v26  ;;  %v4880_v54 = vand.u32 4294901760, %v25107_v56 }
 0x619   :  { %21650 = vmatprep.subr.bf16.mxu1 %v21649_v47  ;;  %21552 = vmatpush3.bf16.msra.mxu0 %v25261_v28  ;;  %v4866_v47 = vand.u32 4294901760, %v25077_v49  ;;  %v4887_v33 = vand.u32 4294901760, %v25109_v23  ;;  %v25291_v16 = vpack.c.bf16 %v4973_v8, %v4966_v59  ;;  %v25293_v41 = vpack.c.bf16 %v4999_v6, %v4992_v3 }
 0x61a   :  { %v25277_v11 = vpack.c.bf16 %v4985_v24, %v4978_v27  ;;  %21554 = vmatprep.subr.bf16.mxu0 %v21553_v25  ;;  %v4861_v28 = vand.u32 4294901760, %v4860_v35  ;;  %v4979_v63 = vsub.f32 %v25055_v2, %v4978_v27  ;;  %v4986_v38 = vsub.f32 %v25069_v18, %v4985_v24 }
 0x61b   :  { %v25283_v50 = vpack.c.bf16 %v4873_v22, %v4866_v47  ;;  %v25299_v10 = vpack.c.bf16 %v4887_v33, %v4880_v54  ;;  %v4867_v51 = vsub.f32 %v25077_v49, %v4866_v47  ;;  %v4874_v26 = vsub.f32 %v25079_v62, %v4873_v22 }
 0x61c   :  { %v25297_v43 = vpack.c.bf16 %v4861_v28, %v4854_v60  ;;  %v4980_v25 = vand.u32 4294901760, %v4979_v63  ;;  %v4987_v45 = vand.u32 4294901760, %v4986_v38  ;;  %v5006_v9 = vand.u32 4294901760, %v25122_v57 }
 0x61d   :  { %v5013_v12 = vand.u32 4294901760, %v25124_v46  ;;  %v4868_v35 = vand.u32 4294901760, %v4867_v51  ;;  %v4875_v59 = vand.u32 4294901760, %v4874_v26  ;;  %v4894_v2 = vand.u32 4294901760, %v25126_v14 }
 0x61e   :  { %v4901_v18 = vand.u32 4294901760, %v25128_v13  ;;  %v25307_v24 = vpack.c.bf16 %v4987_v45, %v4980_v25  ;;  %v4993_v49 = vsub.f32 %v25090_v1, %v4992_v3  ;;  %v5000_v62 = vsub.f32 %v25105_v40, %v4999_v6 }
 0x61f   :  { %v25309_v28 = vpack.c.bf16 %v5013_v12, %v5006_v9  ;;  %v25313_v27 = vpack.c.bf16 %v4875_v59, %v4868_v35  ;;  %v4881_v22 = vsub.f32 %v25107_v56, %v4880_v54  ;;  %v4888_v8 = vsub.f32 %v25109_v23, %v4887_v33 }
 0x620   :  { %v25315_v47 = vpack.c.bf16 %v4901_v18, %v4894_v2  ;;  %v4994_v60 = vand.u32 4294901760, %v4993_v49  ;;  %v5001_v63 = vand.u32 4294901760, %v5000_v62  ;;  %v5020_v38 = vand.u32 4294901760, %v25170_v36 }
 0x621   :  { %v5027_v51 = vand.u32 4294901760, %v25172_v31  ;;  %v4882_v26 = vand.u32 4294901760, %v4881_v22  ;;  %v4889_v25 = vand.u32 4294901760, %v4888_v8  ;;  %v4908_v1 = vand.u32 4294901760, %v25174_v17 }
 0x622   :  { %v4915_v40 = vand.u32 4294901760, %v25180_v48  ;;  %v25323_v3 = vpack.c.bf16 %v5001_v63, %v4994_v60  ;;  %v5007_v56 = vsub.f32 %v25122_v57, %v5006_v9  ;;  %v5014_v23 = vsub.f32 %v25124_v46, %v5013_v12 }
 0x623   :  { %v25325_v6 = vpack.c.bf16 %v5027_v51, %v5020_v38  ;;  %v25329_v54 = vpack.c.bf16 %v4889_v25, %v4882_v26  ;;  %v4895_v45 = vsub.f32 %v25126_v14, %v4894_v2  ;;  %v4902_v35 = vsub.f32 %v25128_v13, %v4901_v18 }
 0x624   :  { %v25331_v33 = vpack.c.bf16 %v4915_v40, %v4908_v1  ;;  %v5008_v59 = vand.u32 4294901760, %v5007_v56  ;;  %v5015_v49 = vand.u32 4294901760, %v5014_v23  ;;  %v5034_v62 = vand.u32 4294901760, %v25203_v52 }
 0x625   :  { %v5041_v22 = vand.u32 4294901760, %v25211_v19  ;;  %v4896_v8 = vand.u32 4294901760, %v4895_v45  ;;  %v4903_v60 = vand.u32 4294901760, %v4902_v35  ;;  %v4922_v57 = vand.u32 4294901760, %v25213_v7 }
 0x626   :  { %v4929_v46 = vand.u32 4294901760, %v25218_v32  ;;  %v25339_v9 = vpack.c.bf16 %v5015_v49, %v5008_v59  ;;  %v5021_v14 = vsub.f32 %v25170_v36, %v5020_v38  ;;  %v5028_v13 = vsub.f32 %v25172_v31, %v5027_v51 }
 0x627   :  { %v25341_v12 = vpack.c.bf16 %v5041_v22, %v5034_v62  ;;  %v25345_v2 = vpack.c.bf16 %v4903_v60, %v4896_v8  ;;  %v4909_v63 = vsub.f32 %v25174_v17, %v4908_v1  ;;  %v4916_v26 = vsub.f32 %v25180_v48, %v4915_v40 }
 0x628   :  { %v25347_v18 = vpack.c.bf16 %v4929_v46, %v4922_v57  ;;  %v5022_v25 = vand.u32 4294901760, %v5021_v14  ;;  %v5029_v56 = vand.u32 4294901760, %v5028_v13  ;;  %v5048_v23 = vand.u32 4294901760, %v25223_v44 }
 0x629   :  { %v5055_v45 = vand.u32 4294901760, %v25225_v53  ;;  %v4910_v35 = vand.u32 4294901760, %v4909_v63  ;;  %v4917_v59 = vand.u32 4294901760, %v4916_v26  ;;  %v4936_v36 = vand.u32 4294901760, %v25235_v5 }
 0x62a   :  { %v4943_v31 = vand.u32 4294901760, %v25237_v42  ;;  %v25355_v38 = vpack.c.bf16 %v5029_v56, %v5022_v25  ;;  %v5035_v17 = vsub.f32 %v25203_v52, %v5034_v62  ;;  %v5042_v48 = vsub.f32 %v25211_v19, %v5041_v22 }
 0x62b   :  { %v25357_v51 = vpack.c.bf16 %v5055_v45, %v5048_v23  ;;  %v25361_v1 = vpack.c.bf16 %v4917_v59, %v4910_v35  ;;  %v4923_v49 = vsub.f32 %v25213_v7, %v4922_v57  ;;  %v4930_v8 = vsub.f32 %v25218_v32, %v4929_v46 }
 0x62c   :  { %v25363_v40 = vpack.c.bf16 %v4943_v31, %v4936_v36  ;;  %v5036_v60 = vand.u32 4294901760, %v5035_v17  ;;  %v5043_v14 = vand.u32 4294901760, %v5042_v48  ;;  %v5049_v26 = vsub.f32 %v25223_v44, %v5048_v23 }
 0x62d   :  { %v4924_v13 = vand.u32 4294901760, %v4923_v49  ;;  %v4931_v63 = vand.u32 4294901760, %v4930_v8  ;;  %v5056_v25 = vsub.f32 %v25225_v53, %v5055_v45  ;;  %v4937_v52 = vsub.f32 %v25235_v5, %v4936_v36 }
 0x62e   :  { %v25369_v56 = vpack.c.bf16 %v5043_v14, %v5036_v60  ;;  %v4944_v19 = vsub.f32 %v25237_v42, %v4943_v31  ;;  %v5050_v22 = vand.u32 4294901760, %v5049_v26 }
 0x62f   :  { %v25373_v62 = vpack.c.bf16 %v4931_v63, %v4924_v13  ;;  %v5057_v7 = vand.u32 4294901760, %v5056_v25  ;;  %v4938_v57 = vand.u32 4294901760, %v4937_v52 }
 0x630   :  { %v4945_v32 = vand.u32 4294901760, %v4944_v19 }
 0x631   :  { %v25375_v46 = vpack.c.bf16 %v5057_v7, %v5050_v22 }
 0x632   :  { %v25377_v35 = vpack.c.bf16 %v4945_v32, %v4938_v57 }
 0x668   :  { %v4548_v44 = vpop.permute.xlu0 %4547 }
 0x669   :  { %4551 = vst.msk [vmem:[#allocation3] sm:$0x3] %vm4550_vm10, %v4548_v44 }
 0x66c   :  { %v4561_v53 = vpop.permute.xlu0 %4560 }
 0x66d   :  { %4564 = vst.msk [vmem:[#allocation3] sm:$0x3] %vm4563_vm11, %v4561_v53 }
 0x670   :  { %v4567_v5 = vpop.permute.xlu0 %4566  ;;  %v4620_v23 = vpop.permute.xlu1 %4619 }
 0x671   :  { %4570 = vst.msk [vmem:[#allocation3] sm:$0x3] %vm4569_vm12, %v4567_v5 }
 0x672   :  { %4622 = vst.msk [vmem:[#allocation3 + $0x2] sm:$0x3] %vm4550_vm10, %v4620_v23  ;;  %vm15400_vm10 = vcmask 523264  }
 0x674   :  { %v4580_v42 = vpop.permute.xlu0 %4579  ;;  %v4632_v45 = vpop.permute.xlu1 %4631 }
 0x675   :  { %4583 = vst.msk [vmem:[#allocation3] sm:$0x3] %vm4582_vm13, %v4580_v42 }
 0x676   :  { %4634 = vst.msk [vmem:[#allocation3 + $0x2] sm:$0x3] %vm4563_vm11, %v4632_v45 }
 0x678   :  { %v4586_v59 = vpop.permute.xlu0 %4585  ;;  %v4637_v36 = vpop.permute.xlu1 %4636 }
 0x679   :  { %4589 = vst.msk [vmem:[#allocation3] sm:$0x3] %vm4588_vm14, %v4586_v59 }
 0x67a   :  { %4639 = vst.msk [vmem:[#allocation3 + $0x2] sm:$0x3] %vm4569_vm12, %v4637_v36  ;;  %v6090_v36 = vld [vmem:[%s27805_s1 + $0x338] sm:$0xff] }
 0x67c   :  { %v4599_v31 = vpop.permute.xlu0 %4598  ;;  %v4649_v17 = vpop.permute.xlu1 %4648 }
 0x67d   :  { %4602 = vst.msk [vmem:[#allocation3] sm:$0x3] %vm4601_vm15, %v4599_v31  ;;  %v6094_v31 = vsel %vm3485_vm1, %v6090_v36, 0 }
 0x67e   :  { %4651 = vst.msk [vmem:[#allocation3 + $0x2] sm:$0x3] %vm4582_vm13, %v4649_v17  ;;  %v6091_v17 = vld [vmem:[%s27805_s1 + $0x340] sm:$0xff] }
 0x680   :  { %v4605_v48 = vpop.permute.xlu0 %4604  ;;  %v4654_v49 = vpop.permute.xlu1 %4653 }
 0x681   :  { %4608 = vst.msk [vmem:[#allocation3] sm:$0x3] %vm4607_vm0, %v4605_v48  ;;  %v25519_v48 = vand.u32 4294901760, %v6094_v31 }
 0x682   :  { %4656 = vst.msk [vmem:[#allocation3 + $0x2] sm:$0x3] %vm4588_vm14, %v4654_v49  ;;  %v6097_v49 = vsel %vm3485_vm1, %v6091_v17, 0 }
 0x684   :  { %v4666_v8 = vpop.permute.xlu1 %4665 }
 0x685   :  { %4668 = vst.msk [vmem:[#allocation3 + $0x2] sm:$0x3] %vm4601_vm15, %v4666_v8  ;;  %v6092_v8 = vld [vmem:[%s27805_s1 + $0x348] sm:$0x3] }
 0x688   :  { %v4671_v60 = vpop.permute.xlu1 %4670 }
 0x689   :  { %4673 = vst.msk [vmem:[#allocation3 + $0x2] sm:$0x3] %vm4607_vm0, %v4671_v60 }
 0x690   :  { %v17250_v14 = vld.sshfl [vmem:[#allocation3] sm:$0x33 pattern:$0x76325410] }
 0x691   :  { %v4720_v13 = vcombine.high %v17250_v14, %v17250_v14  ;;  %v25379_v63 = vand.u32 4294901760, %v17250_v14 }
 0x693   :  { %v25381_v26 = vand.u32 4294901760, %v4720_v13  ;;  %v25384_v25 = vsub.f32 %v17250_v14, %v25379_v63 }
 0x695   :  { %v25387_v52 = vsub.f32 %v4720_v13, %v25381_v26  ;;  %v4827_v19 = vand.u32 4294901760, %v25384_v25  ;;  %v25526_v13 = vsub.f32 %v6094_v31, %v25519_v48 }
 0x697   :  { %5197 = vmatprep.mubr.f32.mxu1 %v25387_v52  ;;  %v4821_v22 = vand.u32 4294901760, %v25387_v52  ;;  %v4828_v7 = vsub.f32 %v25384_v25, %v4827_v19 }
 0x698   :  { %5200 = vmatmul.mubr.f32.vlgmr.msra.gmra.mrb[44].mxu1 %v25384_v25  ;;  %v6100_v25 = vsel %vm3485_vm1, %v6092_v8, 0 }
 0x699   :  { %21652 = vmatpush3.bf16.msra.mxu1 %v25255_v37  ;;  %5474 = vmatprep.mubr.f32.mxu1 %v25381_v26  ;;  %v4822_v57 = vsub.f32 %v25387_v52, %v4821_v22  ;;  %v4829_v44 = vand.u32 4294901760, %v4828_v7  ;;  %v27_v37 = vld [vmem:[%s27806_s0 + $0x80] sm:$0xff] }
 0x69a   :  { %21654 = vmatprep.subr.bf16.mxu1 %v25264_v0  ;;  %v5593_v0 = vsel %vm5591_vm2, %v27_v37, 0 }
 0x69b   :  { %v4823_v32 = vand.u32 4294901760, %v4822_v57  ;;  %v25538_v57 = vand.u32 4294901760, %v6100_v25 }
 0x69d   :  { %21656 = vmatpush3.bf16.msra.mxu1 %v25266_v29  ;;  %4824 = vmatprep.mubr.f32.mxu0 %v4823_v32  ;;  %v28_v29 = vld [vmem:[%s27806_s0 + $0x88] sm:$0xff] }
 0x69e   :  { %4830 = vmatmul.mubr.f32.vlgmr.msra.gmra.mrb[24].mxu0 %v4829_v44  ;;  %21658 = vmatprep.subr.bf16.mxu1 %v25277_v11  ;;  %v5585_v11 = vld [vmem:[%s27805_s1 + $0x310] sm:$0xff] }
 0x69f   :  { %21556 = vmatpush3.bf16.msra.mxu0 %v25281_v55  ;;  %5060 = vmatprep.mubr.f32.mxu0 %v25381_v26  ;;  %v25422_v55 = vand.u32 4294901760, %v5593_v0 }
 0x6a0   :  { %21558 = vmatprep.subr.bf16.mxu0 %v25291_v16  ;;  %v25426_v16 = vand.u32 4294901760, %v5585_v11 }
 0x6a1   :  { %21660 = vmatpush3.bf16.msra.mxu1 %v25283_v50  ;;  %v5596_v50 = vsel %vm5591_vm2, %v28_v29, 0 }
 0x6a2   :  { %21662 = vmatprep.subr.bf16.mxu1 %v25293_v41  ;;  %v25430_v41 = vand.u32 4294901760, %v5596_v50 }
 0x6a3   :  { %21560 = vmatpush3.bf16.msra.mxu0 %v25297_v43  ;;  %v5665_v43 = vsub.f32 %v5593_v0, %v25422_v55 }
 0x6a4   :  { %21562 = vmatprep.subr.bf16.mxu0 %v25307_v24  ;;  %v5675_v24 = vsub.f32 %v5596_v50, %v25430_v41 }
 0x6a5   :  { %21664 = vmatpush3.bf16.msra.mxu1 %v25299_v10  ;;  %v5686_v10 = vsub.f32 %v5585_v11, %v25426_v16 }
 0x6a6   :  { %21666 = vmatprep.subr.bf16.mxu1 %v25309_v28  ;;  %v5666_v28 = vand.u32 4294901760, %v5665_v43 }
 0x6a7   :  { %21564 = vmatpush3.bf16.msra.mxu0 %v25313_v27  ;;  %v5687_v27 = vand.u32 4294901760, %v5686_v10 }
 0x6a8   :  { %21566 = vmatprep.subr.bf16.mxu0 %v25323_v3  ;;  %v5667_v3 = vsub.f32 %v5665_v43, %v5666_v28 }
 0x6a9   :  { %21668 = vmatpush3.bf16.msra.mxu1 %v25315_v47  ;;  %v5676_v47 = vand.u32 4294901760, %v5675_v24 }
 0x6aa   :  { %21670 = vmatprep.subr.bf16.mxu1 %v25325_v6  ;;  %v5688_v6 = vsub.f32 %v5686_v10, %v5687_v27 }
 0x6ab   :  { %21568 = vmatpush3.bf16.msra.mxu0 %v25329_v54  ;;  %v5677_v54 = vsub.f32 %v5675_v24, %v5676_v47 }
 0x6ac   :  { %21570 = vmatprep.subr.bf16.mxu0 %v25339_v9  ;;  %v5689_v9 = vand.u32 4294901760, %v5688_v6 }
 0x6ad   :  { %21672 = vmatpush3.bf16.msra.mxu1 %v25331_v33  ;;  %v5668_v33 = vand.u32 4294901760, %v5667_v3 }
 0x6ae   :  { %21674 = vmatprep.subr.bf16.mxu1 %v25341_v12  ;;  %v5678_v12 = vand.u32 4294901760, %v5677_v54 }
 0x6af   :  { %21572 = vmatpush3.bf16.msra.mxu0 %v25345_v2  ;;  %v28250_v2 = vld [vmem:[#allocation19_spill] sm:$0xff] }
 0x6b0   :  { %21574 = vmatprep.subr.bf16.mxu0 %v25355_v38  ;;  %v28252_v38 = vld [vmem:[#allocation11_spill] sm:$0xff] }
 0x6b1   :  { %21676 = vmatpush3.bf16.msra.mxu1 %v25347_v18  ;;  %v28251_v18 = vld [vmem:[#allocation10_spill] sm:$0xff] }
 0x6b2   :  { %21678 = vmatprep.subr.bf16.mxu1 %v25357_v51  ;;  %v28253_v51 = vld [vmem:[#allocation12_spill] sm:$0xff] }
 0x6b3   :  { %21576 = vmatpush3.bf16.msra.mxu0 %v25361_v1  ;;  %v28254_v1 = vld [vmem:[#allocation4_spill] sm:$0xff] }
 0x6b4   :  { %21578 = vmatprep.subr.bf16.mxu0 %v25369_v56  ;;  %v28256_v56 = vld [vmem:[#allocation7_spill] sm:$0xff] }
 0x6b5   :  { %21680 = vmatpush3.bf16.msra.mxu1 %v25363_v40  ;;  %v28255_v40 = vld [vmem:[#allocation5_spill] sm:$0xff] }
 0x6b6   :  { %19379 = vmatprep.subr.mxu1 %v25426_v16 }
 0x6b7   :  { %21580 = vmatpush3.bf16.msra.mxu0 %v25373_v62  ;;  %v28257_v62 = vmov 0.0|0.0  }
 0x6b8   :  { %5476 = vmatmul.mubr.f32.vlgmr.msra.gmra.mrb[46].mxu1 %v25379_v63  ;;  %21582 = vmatprep.subr.bf16.mxu0 %v25375_v46 }
 0x6b9   :  { %19380 = vmatpush3.msra.mxu1 %v25426_v16  ;;  %19381 = vmatprep.mubr.f32.mxu1 %v5668_v33 }
 0x6ba   :  { %19384 = vmatprep.subr.mxu1 %v5689_v9 }
 0x6bb   :  { %21584 = vmatpush3.bf16.msra.mxu0 %v25377_v35  ;;  %v17249_v35 = vld [vmem:[%s27805_s1 + $0x308] ss:$0 sm:$0xff] }
 0x6bc   :  { %19382 = vmatmul.mubr.f32.vlgmr.msra.gmra.mrb[48].mxu1 %v5678_v12  ;;  %21618 = vmatprep.subr.bf16.mxu0 %v25042_v4 }
 0x6bd   :  { %19385 = vmatpush3.msra.mxu1 %v5689_v9  ;;  %19386 = vmatprep.mubr.f32.mxu1 %v25422_v55 }
 0x6be   :  { %5062 = vmatmul.mubr.f32.vlgmr.msra.gmra.mrb[26].mxu0 %v25379_v63  ;;  %19389 = vmatprep.subr.mxu1 %v5686_v10 }
 0x6bf   :  { %21620 = vmatpush3.bf16.msra.mxu0 %v25050_v30  ;;  %5304 = vmatprep.mubr.f32.mxu0 %v4821_v22  ;;  %v6171_v22 = vand.u32 4294901760, %v25526_v13 }
 0x6c0   :  { %21622 = vmatprep.subr.bf16.mxu0 %v25071_v39 }
 0x6c3   :  { %21624 = vmatpush3.bf16.msra.mxu0 %v25081_v20 }
 0x6c4   :  { %19387 = vmatmul.mubr.f32.vlgmr.msra.gmra.mrb[48].mxu1 %v25430_v41  ;;  %21626 = vmatprep.subr.bf16.mxu0 %v25092_v21 }
 0x6c5   :  { %19390 = vmatpush3.msra.mxu1 %v5686_v10  ;;  %19391 = vmatprep.mubr.f32.mxu1 %v5665_v43 }
 0x6c6   :  { %19394 = vmatprep.subr.mxu1 %v25426_v16 }
 0x6c7   :  { %21628 = vmatpush3.bf16.msra.mxu0 %v25115_v15 }
 0x6c8   :  { %21630 = vmatprep.subr.bf16.mxu0 %v25130_v34 }
 0x6cb   :  { %21632 = vmatpush3.bf16.msra.mxu0 %v25145_v58 }
 0x6cc   :  { %19392 = vmatmul.mubr.f32.vlgmr.msra.gmra.mrb[48].mxu1 %v5675_v24  ;;  %21634 = vmatprep.subr.bf16.mxu0 %v25158_v61 }
 0x6cd   :  { %19395 = vmatpush3.msra.mxu1 %v25426_v16  ;;  %19396 = vmatprep.mubr.f32.mxu1 %v5666_v28 }
 0x6ce   :  { %19399 = vmatprep.subr.mxu1 %v5687_v27 }
 0x6cf   :  { %21636 = vmatpush3.bf16.msra.mxu0 %v28250_v2 }
 0x6d0   :  { %21638 = vmatprep.subr.bf16.mxu0 %v28251_v18 }
 0x6d3   :  { %21640 = vmatpush3.bf16.msra.mxu0 %v28252_v38 }
 0x6d4   :  { %19397 = vmatmul.mubr.f32.vlgmr.msra.gmra.mrb[48].mxu1 %v5676_v47  ;;  %21642 = vmatprep.subr.bf16.mxu0 %v28253_v51 }
 0x6d5   :  { %19400 = vmatpush3.msra.mxu1 %v5687_v27  ;;  %19401 = vmatprep.mubr.f32.mxu1 %v25422_v55 }
 0x6d6   :  { %19404 = vmatprep.subr.mxu1 %v25426_v16 }
 0x6d7   :  { %21644 = vmatpush3.bf16.msra.mxu0 %v28254_v1 }
 0x6d8   :  { %21646 = vmatprep.subr.bf16.mxu0 %v28255_v40 }
 0x6db   :  { %21648 = vmatpush3.bf16.msra.mxu0 %v28256_v56 }
 0x6dc   :  { %19402 = vmatmul.mubr.f32.vlgmr.msra.gmra.mrb[48].mxu1 %v25430_v41  ;;  %21682 = vmatprep.subr.bf16.mxu0 %v25042_v4  ;;  %v22946_v4 = vmov 0.0  }
 0x6dd   :  { %19405 = vmatpush3.msra.mxu1 %v25426_v16  ;;  %19406 = vmatprep.mubr.f32.mxu1 %v25422_v55  ;;  %v6172_v55 = vsub.f32 %v25526_v13, %v6171_v22  ;;  %v6190_v16 = vsub.f32 %v6100_v25, %v25538_v57 }
 0x6de   :  { %5308 = vmatmul.mubr.f32.vlgmr.msra.gmra.mrb[28].mxu0 %v4827_v19  ;;  %21713 = vmatprep.subr.bf16.mxu1 %v28257_v62  ;;  %v17251_v19 = vld [vmem:[%s27805_s1 + $0x318] ss:$0 sm:$0xff] }
 0x6df   :  { %21684 = vmatpush3.bf16.msra.mxu0 %v25050_v30  ;;  %5578 = vmatprep.mubr.f32.mxu0 %v25381_v26  ;;  %v6173_v27 = vand.u32 4294901760, %v6172_v55  ;;  %v6191_v3 = vand.u32 4294901760, %v6190_v16 }
 0x6e0   :  { %21686 = vmatprep.subr.bf16.mxu0 %v25071_v39 }
 0x6e3   :  { %21688 = vmatpush3.bf16.msra.mxu0 %v25081_v20 }
 0x6e4   :  { %19407 = vmatmul.mubr.f32.vlgmr.msra.gmra.mrb[48].mxu1 %v25430_v41  ;;  %21690 = vmatprep.subr.bf16.mxu0 %v25092_v21 }
 0x6e5   :  { %19413 = vmatprep.mubr.msk.f32.mxu1 %vm22945_vm3, %v22946_v4 }
 0x6e7   :  { %21692 = vmatpush3.bf16.msra.mxu0 %v25115_v15 }
 0x6e8   :  { %21694 = vmatprep.subr.bf16.mxu0 %v25130_v34 }
 0x6eb   :  { %21696 = vmatpush3.bf16.msra.mxu0 %v25145_v58 }
 0x6ec   :  { %21698 = vmatprep.subr.bf16.mxu0 %v25158_v61 }
 0x6ef   :  { %21700 = vmatpush3.bf16.msra.mxu0 %v28250_v2 }
 0x6f0   :  { %21702 = vmatprep.subr.bf16.mxu0 %v28251_v18 }
 0x6f3   :  { %21704 = vmatpush3.bf16.msra.mxu0 %v28252_v38  ;;  %v6192_v38 = vsub.f32 %v6190_v16, %v6191_v3 }
 0x6f4   :  { %21706 = vmatprep.subr.bf16.mxu0 %v28253_v51 }
 0x6f7   :  { %21708 = vmatpush3.bf16.msra.mxu0 %v28254_v1 }
 0x6f8   :  { %21710 = vmatprep.subr.bf16.mxu0 %v28255_v40  ;;  %v6193_v40 = vand.u32 4294901760, %v6192_v38 }
 0x6fb   :  { %21712 = vmatpush3.bf16.msra.mxu0 %v28256_v56 }
 0x6fc   :  { %21731 = vmatprep.subr.bf16.mxu0 %v28257_v62 }
 0x6fe   :  { %5580 = vmatmul.mubr.f32.vlgmr.msra.gmra.mrb[30].mxu0 %v25379_v63  ;;  %v25528_v63 = vand.u32 4294901760, %v6097_v49 }
 0x6ff   :  { %19561 = vmatprep.mubr.msk.f32.mxu0 %vm22945_vm3, %v22946_v4 }
 0x700   :  { %v25536_v7 = vsub.f32 %v6097_v49, %v25528_v63 }
 0x702   :  { %v6181_v50 = vand.u32 4294901760, %v25536_v7 }
 0x704   :  { %v6182_v47 = vsub.f32 %v25536_v7, %v6181_v50 }
 0x706   :  { %v6183_v18 = vand.u32 4294901760, %v6182_v47 }
 0x76b   :  { %v17825_v30 = vpop.f32.mrb[44].mxu1 }
 0x76c   :  { %v17826_v39 = vpop.f32.mrb[45].mxu1 }
 0x76d   :  { %v17827_v20 = vadd.f32 %v17826_v39, %v17825_v30 }
 0x771   :  { %v17755_v21 = vpop.f32.mrb[24].mxu0 }
 0x772   :  { %v17756_v15 = vpop.f32.mrb[25].mxu0 }
 0x773   :  { %v17757_v34 = vadd.f32 %v17756_v15, %v17755_v21  ;;  %v6087_v21 = vld [vmem:[%s27805_s1 + $0x320] sm:$0xff] }
 0x774   :  { %v6649_v15 = vsel %vm6647_vm4, %v6087_v21, 0 }
 0x775   :  { %v4832_v23 = vadd.f32 %v17757_v34, %v17249_v35  ;;  %v6088_v34 = vld [vmem:[%s27805_s1 + $0x328] sm:$0xff]  ;;  %v6089_v35 = vld [vmem:[%s27805_s1 + $0x330] sm:$0x3] }
 0x78b   :  { %v17895_v58 = vpop.f32.mrb[46].mxu1 }
 0x78c   :  { %v17896_v61 = vpop.f32.mrb[47].mxu1 }
 0x78d   :  { %v17897_v46 = vadd.f32 %v17896_v61, %v17895_v58  ;;  %v25591_v61 = vand.u32 4294901760, %v6649_v15 }
 0x791   :  { %v17790_v53 = vpop.f32.mrb[26].mxu0 }
 0x792   :  { %v17791_v5 = vpop.f32.mrb[27].mxu0 }
 0x793   :  { %v17792_v42 = vadd.f32 %v17791_v5, %v17790_v53  ;;  %v6728_v5 = vsub.f32 %v6649_v15, %v25591_v61 }
 0x795   :  { %v5064_v45 = vadd.f32 %v17792_v42, %v4832_v23  ;;  %v6655_v42 = vsel %vm6647_vm4, %v6089_v35, 0 }
 0x796   :  { %v25608_v31 = vand.u32 4294901760, %v6655_v42 }
 0x797   :  { %v5202_v59 = vadd.f32 %v17827_v20, %v5064_v45 }
 0x7b1   :  { %v17860_v60 = vpop.f32.mrb[28].mxu0 }
 0x7b2   :  { %v17861_v14 = vpop.f32.mrb[29].mxu0 }
 0x7b3   :  { %v17862_v26 = vadd.f32 %v17861_v14, %v17860_v60  ;;  %v6748_v60 = vsub.f32 %v6655_v42, %v25608_v31 }
 0x7b5   :  { %v5310_v52 = vadd.f32 %v17862_v26, %v5202_v59  ;;  %v6729_v59 = vand.u32 4294901760, %v6728_v5  ;;  %v6749_v26 = vand.u32 4294901760, %v6748_v60 }
 0x7b7   :  { %v19408_v32 = vpop.f32.mrb[48].mxu1  ;;  %v5478_v44 = vadd.f32 %v17897_v46, %v5310_v52  ;;  %v6652_v46 = vsel %vm6647_vm4, %v6088_v34, 0  ;;  %v6730_v49 = vsub.f32 %v6728_v5, %v6729_v59 }
 0x7b8   :  { %v22097_v37 = vadd.f32 %v19408_v32, %v17251_v19  ;;  %v6077_v0 = vpop.f32.mrb[49].mxu1  ;;  %v25601_v23 = vand.u32 4294901760, %v6652_v46 }
 0x7b9   :  { %v22098_v29 = vadd.f32 %v17251_v19, %v6077_v0  ;;  %v6731_v14 = vand.u32 4294901760, %v6730_v49 }
 0x7ba   :  { %v6106_v11 = vand.u32 4294901760, %v22097_v37  ;;  %v6738_v36 = vsub.f32 %v6652_v46, %v25601_v23 }
 0x7bb   :  { %v6103_v41 = vand.u32 4294901760, %v22098_v29 }
 0x7bc   :  { %v6208_v43 = vsub.f32 %v22097_v37, %v6106_v11  ;;  %v6739_v8 = vand.u32 4294901760, %v6738_v36 }
 0x7bd   :  { %v21714_v10 = vpack.c.bf16 %v6106_v11, %v6103_v41  ;;  %v6201_v24 = vsub.f32 %v22098_v29, %v6103_v41  ;;  %v7195_v29 = vld [vmem:[%s27805_s1 + $0x390] sm:$0xff]  ;;  %v7196_v11 = vld [vmem:[%s27805_s1 + $0x398] sm:$0xff] }
 0x7be   :  { %v6209_v28 = vand.u32 4294901760, %v6208_v43  ;;  %v7219_v55 = vand.u32 4294901760, %v7195_v29 }
 0x7bf   :  { %v6202_v6 = vand.u32 4294901760, %v6201_v24  ;;  %v21720_v54 = vpack.c.bf16 %v6208_v43, %v6201_v24  ;;  %21715 = vmatpush3.bf16.msra.mxu1 %v21714_v10 }
 0x7c0   :  { %v6210_v33 = vsub.f32 %v6208_v43, %v6209_v28  ;;  %21716 = vmatprep.subr.bf16.mxu1 %v28257_v62  ;;  %v25692_v41 = vsub.f32 %v7195_v29, %v7219_v55 }
 0x7c1   :  { %v6203_v9 = vsub.f32 %v6201_v24, %v6202_v6  ;;  %v21726_v12 = vpack.c.bf16 %v6209_v28, %v6202_v6 }
 0x7c2   :  { %v6211_v2 = vand.u32 4294901760, %v6210_v33  ;;  %19414 = vmatmul.mubr.f32.vlgmr.msra.gmra.mrb[50].mxu1 %v6173_v27  ;;  %v7328_v6 = vand.u32 4294901760, %v25692_v41 }
 0x7c3   :  { %v6204_v51 = vand.u32 4294901760, %v6203_v9  ;;  %19416 = vmatprep.mubr.msk.f32.mxu1 %vm22945_vm3, %v22946_v4 }
 0x7c4   :  { %v7329_v9 = vsub.f32 %v25692_v41, %v7328_v6 }
 0x7c5   :  { %v21717_v1 = vpack.c.bf16 %v6211_v2, %v6204_v51 }
 0x7c6   :  { %19417 = vmatmul.mubr.f32.gmra.mrb[52].mxu1 %v6183_v18  ;;  %v7330_v2 = vand.u32 4294901760, %v7329_v9 }
 0x7c7   :  { %21718 = vmatpush3.bf16.msra.mxu1 %v21717_v1  ;;  %19419 = vmatprep.mubr.msk.f32.mxu1 %vm22945_vm3, %v22946_v4 }
 0x7c8   :  { %21719 = vmatprep.subr.bf16.mxu1 %v28257_v62 }
 0x7ca   :  { %19420 = vmatmul.mubr.f32.gmra.mrb[54].mxu1 %v6193_v40 }
 0x7cb   :  { %19426 = vmatprep.mubr.msk.f32.mxu1 %vm22945_vm3, %v22946_v4 }
 0x7ce   :  { %19427 = vmatmul.mubr.f32.vlgmr.msra.gmra.mrb[50].mxu1 %v25519_v48 }
 0x7cf   :  { %21721 = vmatpush3.bf16.msra.mxu1 %v21720_v54  ;;  %19429 = vmatprep.mubr.msk.f32.mxu1 %vm22945_vm3, %v22946_v4 }
 0x7d0   :  { %21722 = vmatprep.subr.bf16.mxu1 %v28257_v62 }
 0x7d1   :  { %v17930_v56 = vpop.f32.mrb[30].mxu0 }
 0x7d2   :  { %v17931_v30 = vpop.f32.mrb[31].mxu0  ;;  %19430 = vmatmul.mubr.f32.gmra.mrb[52].mxu1 %v25528_v63 }
 0x7d3   :  { %v17932_v39 = vadd.f32 %v17931_v30, %v17930_v56  ;;  %19432 = vmatprep.mubr.msk.f32.mxu1 %vm22945_vm3, %v22946_v4 }
 0x7d5   :  { %v5582_v20 = vadd.f32 %v17932_v39, %v5478_v44 }
 0x7d6   :  { %19433 = vmatmul.mubr.f32.gmra.mrb[54].mxu1 %v25538_v57 }
 0x7d7   :  { %19439 = vmatprep.mubr.msk.f32.mxu1 %vm22945_vm3, %v22946_v4  ;;  %v6659_v58 = vsel %vm6657_vm5, %v5582_v20, 0 }
 0x7d8   :  { %v6662_v53 = vand.u32 4294901760, %v6659_v58 }
 0x7da   :  { %19440 = vmatmul.mubr.f32.vlgmr.msra.gmra.mrb[50].mxu1 %v25526_v13  ;;  %v6759_v45 = vsub.f32 %v6659_v58, %v6662_v53  ;;  %v6740_v13 = vsub.f32 %v6738_v36, %v6739_v8 }
 0x7db   :  { %21724 = vmatpush3.bf16.msra.mxu1 %v21714_v10  ;;  %19442 = vmatprep.mubr.msk.f32.mxu1 %vm22945_vm3, %v22946_v4 }
 0x7dc   :  { %21725 = vmatprep.subr.bf16.mxu1 %v28257_v62  ;;  %v6760_v17 = vand.u32 4294901760, %v6759_v45  ;;  %v6741_v52 = vand.u32 4294901760, %v6740_v13  ;;  %v17252_v13 = vld [vmem:[%s27805_s1 + $0x3a0] ss:$0 sm:$0xff] }
 0x7de   :  { %19443 = vmatmul.mubr.f32.gmra.mrb[52].mxu1 %v25536_v7  ;;  %v7194_v7 = vld [vmem:[%s27805_s1 + $0x388] sm:$0xff] }
 0x7df   :  { %19445 = vmatprep.mubr.msk.f32.mxu1 %vm22945_vm3, %v22946_v4  ;;  %v7216_v32 = vand.u32 4294901760, %v7194_v7 }
 0x7e1   :  { %v25680_v0 = vsub.f32 %v7194_v7, %v7216_v32 }
 0x7e2   :  { %19446 = vmatmul.mubr.f32.gmra.mrb[54].mxu1 %v6190_v16 }
 0x7e3   :  { %19452 = vmatprep.mubr.msk.f32.mxu1 %vm22945_vm3, %v22946_v4  ;;  %v7321_v24 = vand.u32 4294901760, %v25680_v0 }
 0x7e5   :  { %v7322_v27 = vsub.f32 %v25680_v0, %v7321_v24 }
 0x7e6   :  { %19453 = vmatmul.mubr.f32.vlgmr.msra.gmra.mrb[50].mxu1 %v6171_v22  ;;  %v7193_v22 = vld [vmem:[%s27805_s1 + $0x380] sm:$0xff] }
 0x7e7   :  { %21727 = vmatpush3.bf16.msra.mxu1 %v21726_v12  ;;  %19455 = vmatprep.mubr.msk.f32.mxu1 %vm22945_vm3, %v22946_v4 }
 0x7e8   :  { %21728 = vmatprep.subr.bf16.mxu1 %v28257_v62 }
 0x7ea   :  { %19456 = vmatmul.mubr.f32.gmra.mrb[52].mxu1 %v6181_v50  ;;  %v7222_v50 = vand.u32 4294901760, %v7196_v11 }
 0x7eb   :  { %19458 = vmatprep.mubr.msk.f32.mxu1 %vm22945_vm3, %v22946_v4 }
 0x7ec   :  { %v25690_v16 = vpack.c.bf16 %v7222_v50, %v7219_v55  ;;  %v7334_v43 = vsub.f32 %v7196_v11, %v7222_v50 }
 0x7ee   :  { %19459 = vmatmul.mubr.f32.gmra.mrb[54].mxu1 %v6191_v3  ;;  %v7323_v3 = vand.u32 4294901760, %v7322_v27  ;;  %v7335_v54 = vand.u32 4294901760, %v7334_v43  ;;  %v21747_v1 = vpack.c.bf16 %v7334_v43, %v25692_v41 }
 0x7ef   :  { %19465 = vmatprep.mubr.msk.f32.mxu1 %vm22945_vm3, %v22946_v4 }
 0x7f0   :  { %v7336_v12 = vsub.f32 %v7334_v43, %v7335_v54  ;;  %v21759_v56 = vpack.c.bf16 %v7335_v54, %v7328_v6 }
 0x7f2   :  { %19466 = vmatmul.mubr.f32.vlgmr.msra.gmra.mrb[50].mxu1 %v25519_v48  ;;  %v7337_v18 = vand.u32 4294901760, %v7336_v12 }
 0x7f3   :  { %21730 = vmatpush3.bf16.msra.mxu1 %v21714_v10  ;;  %19468 = vmatprep.mubr.msk.f32.mxu1 %vm22945_vm3, %v22946_v4 }
 0x7f4   :  { %19487 = vmatprep.subr.mxu1 %v22946_v4  ;;  %v21741_v38 = vpack.c.bf16 %v7337_v18, %v7330_v2 }
 0x7f6   :  { %19469 = vmatmul.mubr.f32.gmra.mrb[52].mxu1 %v25528_v63 }
 0x7f7   :  { %19471 = vmatprep.mubr.msk.f32.mxu1 %vm22945_vm3, %v22946_v4 }
 0x7fa   :  { %19472 = vmatmul.mubr.f32.gmra.mrb[54].mxu1 %v25538_v57 }
 0x7fb   :  { %19478 = vmatprep.mubr.msk.f32.mxu1 %vm22945_vm3, %v22946_v4 }
 0x7fe   :  { %19479 = vmatmul.mubr.f32.vlgmr.msra.gmra.mrb[50].mxu1 %v25519_v48  ;;  %v6761_v48 = vsub.f32 %v6759_v45, %v6760_v17 }
 0x7ff   :  { %19488 = vmatpush3.msra.mxu1 %v6662_v53  ;;  %19481 = vmatprep.mubr.msk.f32.mxu1 %vm22945_vm3, %v22946_v4 }
 0x800   :  { %19498 = vmatprep.subr.mxu1 %v22946_v4  ;;  %v6762_v25 = vand.u32 4294901760, %v6761_v48 }
 0x802   :  { %19482 = vmatmul.mubr.f32.gmra.mrb[52].mxu1 %v25528_v63  ;;  %v6750_v63 = vsub.f32 %v6748_v60, %v6749_v26 }
 0x803   :  { %19484 = vmatprep.mubr.msk.f32.mxu1 %vm22945_vm3, %v22946_v4 }
 0x804   :  { %v6751_v19 = vand.u32 4294901760, %v6750_v63 }
 0x806   :  { %19485 = vmatmul.mubr.f32.gmra.mrb[54].mxu1 %v25538_v57  ;;  %v7213_v57 = vand.u32 4294901760, %v7193_v22 }
 0x807   :  { %19489 = vmatprep.mubr.msk.f32.mxu1 %vm22945_vm3, %v22946_v4 }
 0x808   :  { %v25676_v44 = vpack.c.bf16 %v7216_v32, %v7213_v57  ;;  %v25678_v37 = vsub.f32 %v7193_v22, %v7213_v57 }
 0x80a   :  { %19490 = vmatmul.mubr.f32.vlgmr.msra.gmra.mrb[50].mxu1 %v6731_v14  ;;  %21733 = vmatpush3.bf16.msra.mxu0 %v25676_v44  ;;  %v7314_v10 = vand.u32 4294901760, %v25678_v37  ;;  %v21744_v51 = vpack.c.bf16 %v25680_v0, %v25678_v37 }
 0x80b   :  { %19499 = vmatpush3.msra.mxu1 %v6762_v25  ;;  %19492 = vmatprep.mubr.msk.f32.mxu1 %vm22945_vm3, %v22946_v4 }
 0x80c   :  { %19509 = vmatprep.subr.mxu1 %v22946_v4  ;;  %21734 = vmatprep.subr.bf16.mxu0 %v28257_v62  ;;  %v7315_v28 = vsub.f32 %v25678_v37, %v7314_v10  ;;  %v21756_v40 = vpack.c.bf16 %v7321_v24, %v7314_v10 }
 0x80e   :  { %19493 = vmatmul.mubr.f32.gmra.mrb[52].mxu1 %v6741_v52  ;;  %21736 = vmatpush3.bf16.msra.mxu0 %v25690_v16  ;;  %v7316_v47 = vand.u32 4294901760, %v7315_v28 }
 0x80f   :  { %19495 = vmatprep.mubr.msk.f32.mxu1 %vm22945_vm3, %v22946_v4  ;;  %21737 = vmatprep.subr.bf16.mxu0 %v28257_v62 }
 0x810   :  { %v21738_v33 = vpack.c.bf16 %v7323_v3, %v7316_v47 }
 0x812   :  { %19496 = vmatmul.mubr.f32.gmra.mrb[54].mxu1 %v6751_v19 }
 0x813   :  { %19500 = vmatprep.mubr.msk.f32.mxu1 %vm22945_vm3, %v22946_v4 }
 0x816   :  { %19501 = vmatmul.mubr.f32.vlgmr.msra.gmra.mrb[50].mxu1 %v25591_v61 }
 0x817   :  { %19510 = vmatpush3.msra.mxu1 %v6759_v45  ;;  %19503 = vmatprep.mubr.msk.f32.mxu1 %vm22945_vm3, %v22946_v4 }
 0x818   :  { %19520 = vmatprep.subr.mxu1 %v22946_v4 }
 0x81a   :  { %19504 = vmatmul.mubr.f32.gmra.mrb[52].mxu1 %v25601_v23 }
 0x81b   :  { %19506 = vmatprep.mubr.msk.f32.mxu1 %vm22945_vm3, %v22946_v4 }
 0x81e   :  { %19507 = vmatmul.mubr.f32.gmra.mrb[54].mxu1 %v25608_v31 }
 0x81f   :  { %19511 = vmatprep.mubr.msk.f32.mxu1 %vm22945_vm3, %v22946_v4 }
 0x822   :  { %19512 = vmatmul.mubr.f32.vlgmr.msra.gmra.mrb[50].mxu1 %v6728_v5 }
 0x823   :  { %19521 = vmatpush3.msra.mxu1 %v6662_v53  ;;  %19514 = vmatprep.mubr.msk.f32.mxu1 %vm22945_vm3, %v22946_v4 }
 0x824   :  { %19531 = vmatprep.subr.mxu1 %v22946_v4 }
 0x826   :  { %19515 = vmatmul.mubr.f32.gmra.mrb[52].mxu1 %v6738_v36 }
 0x827   :  { %19517 = vmatprep.mubr.msk.f32.mxu1 %vm22945_vm3, %v22946_v4 }
 0x82a   :  { %19518 = vmatmul.mubr.f32.gmra.mrb[54].mxu1 %v6748_v60 }
 0x82b   :  { %19522 = vmatprep.mubr.msk.f32.mxu1 %vm22945_vm3, %v22946_v4 }
 0x82e   :  { %19523 = vmatmul.mubr.f32.vlgmr.msra.gmra.mrb[50].mxu1 %v6729_v59 }
 0x82f   :  { %19532 = vmatpush3.msra.mxu1 %v6760_v17  ;;  %19525 = vmatprep.mubr.msk.f32.mxu1 %vm22945_vm3, %v22946_v4 }
 0x830   :  { %19542 = vmatprep.subr.mxu1 %v22946_v4 }
 0x832   :  { %19526 = vmatmul.mubr.f32.gmra.mrb[52].mxu1 %v6739_v8 }
 0x833   :  { %19528 = vmatprep.mubr.msk.f32.mxu1 %vm22945_vm3, %v22946_v4 }
 0x836   :  { %19529 = vmatmul.mubr.f32.gmra.mrb[54].mxu1 %v6749_v26 }
 0x837   :  { %19533 = vmatprep.mubr.msk.f32.mxu1 %vm22945_vm3, %v22946_v4 }
 0x83a   :  { %19534 = vmatmul.mubr.f32.vlgmr.msra.gmra.mrb[50].mxu1 %v25591_v61 }
 0x83b   :  { %19543 = vmatpush3.msra.mxu1 %v6662_v53  ;;  %19536 = vmatprep.mubr.msk.f32.mxu1 %vm22945_vm3, %v22946_v4 }
 0x83c   :  { %21785 = vmatprep.subr.bf16.mxu1 %v28257_v62 }
 0x83e   :  { %19537 = vmatmul.mubr.f32.gmra.mrb[52].mxu1 %v25601_v23 }
 0x83f   :  { %19539 = vmatprep.mubr.msk.f32.mxu1 %vm22945_vm3, %v22946_v4 }
 0x842   :  { %19540 = vmatmul.mubr.f32.gmra.mrb[54].mxu1 %v25608_v31 }
 0x843   :  { %19544 = vmatprep.mubr.msk.f32.mxu1 %vm22945_vm3, %v22946_v4 }
 0x846   :  { %19545 = vmatmul.mubr.f32.vlgmr.msra.gmra.mrb[50].mxu1 %v25591_v61 }
 0x847   :  { %19547 = vmatprep.mubr.msk.f32.mxu1 %vm22945_vm3, %v22946_v4 }
 0x84a   :  { %19548 = vmatmul.mubr.f32.gmra.mrb[52].mxu1 %v25601_v23 }
 0x84b   :  { %19550 = vmatprep.mubr.msk.f32.mxu1 %vm22945_vm3, %v22946_v4 }
 0x84e   :  { %19551 = vmatmul.mubr.f32.gmra.mrb[54].mxu1 %v25608_v31 }
 0x84f   :  { %19751 = vmatprep.mubr.msk.f32.mxu1 %vm22945_vm3, %v22946_v4 }
 0x919   :  { %v25705_v30 = vpop.f32.mrb[50].mxu1 }
 0x91a   :  { %v7204_v39 = vsel %vm7202_vm6, %v25705_v30, 0  ;;  %v19546_v20 = vpop.f32.mrb[51].mxu1 }
 0x91b   :  { %v25709_v21 = vand.u32 4294901760, %v7204_v39 }
 0x91d   :  { %v7282_v15 = vsub.f32 %v7204_v39, %v25709_v21  ;;  %v25712_v34 = vpop.f32.mrb[52].mxu1 }
 0x91e   :  { %v7207_v58 = vsel %vm7202_vm6, %v25712_v34, 0  ;;  %v19549_v61 = vpop.f32.mrb[53].mxu1 }
 0x91f   :  { %v7283_v46 = vand.u32 4294901760, %v7282_v15  ;;  %v25716_v35 = vand.u32 4294901760, %v7207_v58 }
 0x921   :  { %v7284_v53 = vsub.f32 %v7282_v15, %v7283_v46  ;;  %v7292_v5 = vsub.f32 %v7207_v58, %v25716_v35  ;;  %v25719_v23 = vpop.f32.mrb[54].mxu1 }
 0x922   :  { %v7210_v42 = vsel %vm7202_vm6, %v25719_v23, 0  ;;  %v19552_v45 = vpop.f32.mrb[55].mxu1 }
 0x923   :  { %v25723_v59 = vand.u32 4294901760, %v7210_v42  ;;  %v7285_v36 = vand.u32 4294901760, %v7284_v53  ;;  %v7293_v31 = vand.u32 4294901760, %v7292_v5 }
 0x925   :  { %v7302_v17 = vsub.f32 %v7210_v42, %v25723_v59  ;;  %19562 = vmatmul.mubr.f32.vlgmr.msra.gmra.mrb[32].mxu0 %v7285_v36  ;;  %v7294_v49 = vsub.f32 %v7292_v5, %v7293_v31 }
 0x926   :  { %19564 = vmatprep.mubr.msk.f32.mxu0 %vm22945_vm3, %v22946_v4  ;;  %21739 = vmatpush3.bf16.msra.mxu0 %v21738_v33 }
 0x927   :  { %v7295_v8 = vand.u32 4294901760, %v7294_v49  ;;  %v7303_v60 = vand.u32 4294901760, %v7302_v17  ;;  %21740 = vmatprep.subr.bf16.mxu0 %v28257_v62 }
 0x929   :  { %19565 = vmatmul.mubr.f32.gmra.mrb[34].mxu0 %v7295_v8  ;;  %v7304_v48 = vsub.f32 %v7302_v17, %v7303_v60 }
 0x92a   :  { %19567 = vmatprep.mubr.msk.f32.mxu0 %vm22945_vm3, %v22946_v4  ;;  %21742 = vmatpush3.bf16.msra.mxu0 %v21741_v38 }
 0x92b   :  { %v7305_v14 = vand.u32 4294901760, %v7304_v48  ;;  %21743 = vmatprep.subr.bf16.mxu0 %v28257_v62 }
 0x92d   :  { %19568 = vmatmul.mubr.f32.gmra.mrb[36].mxu0 %v7305_v14 }
 0x92e   :  { %19578 = vmatprep.mubr.msk.f32.mxu0 %vm22945_vm3, %v22946_v4 }
 0x931   :  { %19579 = vmatmul.mubr.f32.vlgmr.msra.gmra.mrb[32].mxu0 %v25709_v21 }
 0x932   :  { %19581 = vmatprep.mubr.msk.f32.mxu0 %vm22945_vm3, %v22946_v4  ;;  %21745 = vmatpush3.bf16.msra.mxu0 %v21744_v51 }
 0x933   :  { %21746 = vmatprep.subr.bf16.mxu0 %v28257_v62 }
 0x935   :  { %19582 = vmatmul.mubr.f32.gmra.mrb[34].mxu0 %v25716_v35 }
 0x936   :  { %19584 = vmatprep.mubr.msk.f32.mxu0 %vm22945_vm3, %v22946_v4  ;;  %21748 = vmatpush3.bf16.msra.mxu0 %v21747_v1 }
 0x937   :  { %21749 = vmatprep.subr.bf16.mxu0 %v28257_v62 }
 0x939   :  { %19585 = vmatmul.mubr.f32.gmra.mrb[36].mxu0 %v25723_v59 }
 0x93a   :  { %19595 = vmatprep.mubr.msk.f32.mxu0 %vm22945_vm3, %v22946_v4 }
 0x93d   :  { %19596 = vmatmul.mubr.f32.vlgmr.msra.gmra.mrb[32].mxu0 %v7282_v15 }
 0x93e   :  { %19598 = vmatprep.mubr.msk.f32.mxu0 %vm22945_vm3, %v22946_v4  ;;  %21751 = vmatpush3.bf16.msra.mxu0 %v25676_v44 }
 0x93f   :  { %21752 = vmatprep.subr.bf16.mxu0 %v28257_v62 }
 0x941   :  { %19599 = vmatmul.mubr.f32.gmra.mrb[34].mxu0 %v7292_v5 }
 0x942   :  { %19601 = vmatprep.mubr.msk.f32.mxu0 %vm22945_vm3, %v22946_v4  ;;  %21754 = vmatpush3.bf16.msra.mxu0 %v25690_v16 }
 0x943   :  { %21755 = vmatprep.subr.bf16.mxu0 %v28257_v62 }
 0x945   :  { %19602 = vmatmul.mubr.f32.gmra.mrb[36].mxu0 %v7302_v17 }
 0x946   :  { %19612 = vmatprep.mubr.msk.f32.mxu0 %vm22945_vm3, %v22946_v4 }
 0x949   :  { %19613 = vmatmul.mubr.f32.vlgmr.msra.gmra.mrb[32].mxu0 %v7283_v46 }
 0x94a   :  { %19615 = vmatprep.mubr.msk.f32.mxu0 %vm22945_vm3, %v22946_v4  ;;  %21757 = vmatpush3.bf16.msra.mxu0 %v21756_v40 }
 0x94b   :  { %21758 = vmatprep.subr.bf16.mxu0 %v28257_v62 }
 0x94d   :  { %19616 = vmatmul.mubr.f32.gmra.mrb[34].mxu0 %v7293_v31 }
 0x94e   :  { %19618 = vmatprep.mubr.msk.f32.mxu0 %vm22945_vm3, %v22946_v4  ;;  %21760 = vmatpush3.bf16.msra.mxu0 %v21759_v56 }
 0x94f   :  { %21761 = vmatprep.subr.bf16.mxu0 %v28257_v62 }
 0x951   :  { %19619 = vmatmul.mubr.f32.gmra.mrb[36].mxu0 %v7303_v60 }
 0x952   :  { %19629 = vmatprep.mubr.msk.f32.mxu0 %vm22945_vm3, %v22946_v4 }
 0x955   :  { %19630 = vmatmul.mubr.f32.vlgmr.msra.gmra.mrb[32].mxu0 %v25709_v21 }
 0x956   :  { %19632 = vmatprep.mubr.msk.f32.mxu0 %vm22945_vm3, %v22946_v4  ;;  %21763 = vmatpush3.bf16.msra.mxu0 %v25676_v44 }
 0x957   :  { %21764 = vmatprep.subr.bf16.mxu0 %v28257_v62 }
 0x959   :  { %19633 = vmatmul.mubr.f32.gmra.mrb[34].mxu0 %v25716_v35 }
 0x95a   :  { %19635 = vmatprep.mubr.msk.f32.mxu0 %vm22945_vm3, %v22946_v4  ;;  %21766 = vmatpush3.bf16.msra.mxu0 %v25690_v16 }
 0x95b   :  { %21767 = vmatprep.subr.bf16.mxu0 %v28257_v62 }
 0x95d   :  { %19636 = vmatmul.mubr.f32.gmra.mrb[36].mxu0 %v25723_v59 }
 0x95e   :  { %19646 = vmatprep.mubr.msk.f32.mxu0 %vm22945_vm3, %v22946_v4 }
 0x961   :  { %19647 = vmatmul.mubr.f32.vlgmr.msra.gmra.mrb[32].mxu0 %v25709_v21 }
 0x962   :  { %19649 = vmatprep.mubr.msk.f32.mxu0 %vm22945_vm3, %v22946_v4 }
 0x965   :  { %19650 = vmatmul.mubr.f32.gmra.mrb[34].mxu0 %v25716_v35 }
 0x966   :  { %19652 = vmatprep.mubr.msk.f32.mxu0 %vm22945_vm3, %v22946_v4 }
 0x969   :  { %19653 = vmatmul.mubr.f32.gmra.mrb[36].mxu0 %v25723_v59 }
 0x96a   :  { %19661 = vmatprep.mubr.msk.f32.mxu0 %vm22945_vm3, %v22946_v4 }
 0xa34   :  { %v7767_v26 = vpop.f32.mrb[32].mxu0 }
 0xa35   :  { %v25788_v25 = vadd.f32 %v17252_v13, %v7767_v26  ;;  %v19648_v52 = vpop.f32.mrb[33].mxu0 }
 0xa37   :  { %7793 = vrot.lane.b32.xlu0 %v25788_v25, %s22942_s5  ;;  %v7799_v37 = vsel %vm5591_vm2, %v25788_v25, 0 }
 0xa38   :  { %v7773_v63 = vpop.f32.mrb[34].mxu0  ;;  %v25809_v11 = vand.u32 4294901760, %v7799_v37 }
 0xa39   :  { %v25792_v19 = vadd.f32 %v17252_v13, %v7773_v63  ;;  %v19651_v22 = vpop.f32.mrb[35].mxu0 }
 0xa3a   :  { %v25817_v10 = vsub.f32 %v7799_v37, %v25809_v11 }
 0xa3b   :  { %7795 = vrot.lane.b32.xlu1 %v25792_v19, %s22942_s5  ;;  %v7801_v50 = vsel %vm5591_vm2, %v25792_v19, 0 }
 0xa3c   :  { %v7779_v7 = vpop.f32.mrb[36].mxu0  ;;  %v25819_v24 = vand.u32 4294901760, %v7801_v50  ;;  %v7881_v9 = vand.u32 4294901760, %v25817_v10 }
 0xa3d   :  { %v25796_v57 = vadd.f32 %v17252_v13, %v7779_v7  ;;  %v19654_v32 = vpop.f32.mrb[37].mxu0 }
 0xa3e   :  { %v7890_v12 = vsub.f32 %v7801_v50, %v25819_v24  ;;  %v7882_v1 = vsub.f32 %v25817_v10, %v7881_v9 }
 0xa3f   :  { %8987 = vrot.lane.b32.xlu1 %v25788_v25, %s22947_s19  ;;  %7797 = vrot.lane.b32.xlu0 %v25796_v57, %s22942_s5  ;;  %v7803_v3 = vsel %vm5591_vm2, %v25796_v57, 0 }
 0xa40   :  { %v25834_v2 = vand.u32 4294901760, %v7803_v3  ;;  %v7891_v40 = vand.u32 4294901760, %v7890_v12  ;;  %v7883_v15 = vand.u32 4294901760, %v7882_v1 }
 0xa42   :  { %v7900_v56 = vsub.f32 %v7803_v3, %v25834_v2  ;;  %v7892_v58 = vsub.f32 %v7890_v12, %v7891_v40 }
 0xa43   :  { %8981 = vrot.lane.b32.xlu1 %v25788_v25, %s22948_s20  ;;  %8989 = vrot.lane.b32.xlu0 %v25792_v19, %s22947_s19 }
 0xa44   :  { %v7901_v61 = vand.u32 4294901760, %v7900_v56  ;;  %v7893_v53 = vand.u32 4294901760, %v7892_v58 }
 0xa46   :  { %v7902_v5 = vsub.f32 %v7900_v56, %v7901_v61 }
 0xa47   :  { %8991 = vrot.lane.b32.xlu1 %v25796_v57, %s22947_s19  ;;  %8983 = vrot.lane.b32.xlu0 %v25792_v19, %s22948_s20 }
 0xa48   :  { %v7903_v45 = vand.u32 4294901760, %v7902_v5  ;;  %v7784_v5 = vld [vmem:[%s27805_s1 + $0x370] sm:$0xff] }
 0xa4b   :  { %8985 = vrot.lane.b32.xlu0 %v25796_v57, %s22948_s20 }
 0xaa9   :  { %v7794_v44 = vpop.permute.xlu0 %7793 }
 0xaaa   :  { %v7805_v0 = vsel %vm5591_vm2, %v7794_v44, 0 }
 0xaab   :  { %v7812_v29 = vand.u32 4294901760, %v7805_v0 }
 0xaad   :  { %v7796_v55 = vpop.permute.xlu1 %7795  ;;  %v25814_v41 = vsub.f32 %v7805_v0, %v7812_v29 }
 0xaae   :  { %v7807_v16 = vsel %vm5591_vm2, %v7796_v55, 0 }
 0xaaf   :  { %v7815_v43 = vand.u32 4294901760, %v7807_v16  ;;  %v7912_v54 = vand.u32 4294901760, %v25814_v41 }
 0xab1   :  { %v25821_v28 = vpack.c.bf16 %v7815_v43, %v7812_v29  ;;  %v25823_v27 = vsub.f32 %v7807_v16, %v7815_v43  ;;  %v7798_v47 = vpop.permute.xlu0 %7797  ;;  %v7913_v51 = vsub.f32 %v25814_v41, %v7912_v54  ;;  %v8988_v17 = vpop.permute.xlu1 %8987 }
 0xab2   :  { %v7809_v6 = vsel %vm5591_vm2, %v7798_v47, 0  ;;  %v8999_v48 = vsel %vm5591_vm2, %v8988_v17, 0 }
 0xab3   :  { %v7919_v33 = vand.u32 4294901760, %v25823_v27  ;;  %21769 = vmatpush3.bf16.xpose.msra.mxu0 %v25821_v28  ;;  %v25837_v38 = vand.u32 4294901760, %v7809_v6  ;;  %v7914_v21 = vand.u32 4294901760, %v7913_v51  ;;  %v21774_v36 = vpack.c.bf16 %v25823_v27, %v25814_v41 }
 0xab4   :  { %19659 = vmatprep.subr.mxu0 %v22946_v4  ;;  %v9006_v52 = vand.u32 4294901760, %v8999_v48 }
 0xab5   :  { %v7920_v18 = vsub.f32 %v25823_v27, %v7919_v33  ;;  %v7925_v20 = vsub.f32 %v7809_v6, %v25837_v38  ;;  %v21780_v31 = vpack.c.bf16 %v7919_v33, %v7912_v54  ;;  %v8990_v49 = vpop.permute.xlu0 %8989  ;;  %v8982_v8 = vpop.permute.xlu1 %8981 }
 0xab6   :  { %v9001_v60 = vsel %vm5591_vm2, %v8990_v49, 0  ;;  %v8993_v13 = vsel %vm5591_vm2, %v8982_v8, 0  ;;  %v25902_v44 = vsub.f32 %v8999_v48, %v9006_v52 }
 0xab7   :  { %v7921_v39 = vand.u32 4294901760, %v7920_v18  ;;  %v7926_v46 = vand.u32 4294901760, %v7925_v20  ;;  %v9009_v26 = vand.u32 4294901760, %v9001_v60  ;;  %v25896_v63 = vand.u32 4294901760, %v8993_v13 }
 0xab8   :  { %v9106_v43 = vand.u32 4294901760, %v25902_v44 }
 0xab9   :  { %v21771_v35 = vpack.c.bf16 %v7921_v39, %v7914_v21  ;;  %v7927_v42 = vsub.f32 %v7925_v20, %v7926_v46  ;;  %v8984_v14 = vpop.permute.xlu0 %8983  ;;  %v25898_v22 = vsub.f32 %v9001_v60, %v9009_v26  ;;  %v8992_v37 = vpop.permute.xlu1 %8991  ;;  %v25908_v0 = vsub.f32 %v8993_v13, %v25896_v63 }
 0xaba   :  { %v8995_v7 = vsel %vm5591_vm2, %v8984_v14, 0  ;;  %v25913_v55 = vpack.c.bf16 %v9009_v26, %v9006_v52  ;;  %v9003_v41 = vsel %vm5591_vm2, %v8992_v37, 0  ;;  %v9107_v3 = vsub.f32 %v25902_v44, %v9106_v43 }
 0xabb   :  { %19660 = vmatpush3.xpose.msra.mxu0 %v25837_v38  ;;  %v7928_v59 = vand.u32 4294901760, %v7927_v42  ;;  %v25910_v29 = vand.u32 4294901760, %v8995_v7  ;;  %v9113_v50 = vand.u32 4294901760, %v25898_v22  ;;  %v25933_v47 = vand.u32 4294901760, %v9003_v41 }
 0xabc   :  { %21770 = vmatprep.subr.bf16.mxu0 %v28257_v62  ;;  %v9108_v18 = vand.u32 4294901760, %v9107_v3 }
 0xabd   :  { %v8986_v32 = vpop.permute.xlu0 %8985  ;;  %v21816_v58 = vpack.c.bf16 %v9113_v50, %v9106_v43 }
 0xabe   :  { %19662 = vmatmul.mubr.f32.vlgmr.msra.gmra.mrb[38].mxu0 %v7883_v15  ;;  %v8997_v16 = vsel %vm5591_vm2, %v8986_v32, 0  ;;  %v21810_v15 = vpack.c.bf16 %v25898_v22, %v25902_v44 }
 0xabf   :  { %21772 = vmatpush3.bf16.xpose.msra.mxu0 %v21771_v35  ;;  %19664 = vmatprep.mubr.msk.f32.mxu0 %vm22945_vm3, %v22946_v4  ;;  %v25927_v27 = vand.u32 4294901760, %v8997_v16 }
 0xac0   :  { %19674 = vmatprep.subr.mxu0 %v22946_v4 }
 0xac1   :  { %v9094_v33 = vsub.f32 %v8997_v16, %v25927_v27 }
 0xac2   :  { %19665 = vmatmul.mubr.f32.gmra.mrb[40].mxu0 %v7893_v53 }
 0xac3   :  { %19667 = vmatprep.mubr.msk.f32.mxu0 %vm22945_vm3, %v22946_v4 }
 0xac6   :  { %19668 = vmatmul.mubr.f32.gmra.mrb[42].mxu0 %v7903_v45 }
 0xac7   :  { %19675 = vmatpush3.xpose.msra.mxu0 %v7928_v59  ;;  %19676 = vmatprep.mubr.msk.f32.mxu0 %vm22945_vm3, %v22946_v4 }
 0xac8   :  { %21773 = vmatprep.subr.bf16.mxu0 %v28257_v62 }
 0xaca   :  { %19677 = vmatmul.mubr.f32.vlgmr.msra.gmra.mrb[38].mxu0 %v25809_v11 }
 0xacb   :  { %21775 = vmatpush3.bf16.xpose.msra.mxu0 %v21774_v36  ;;  %19679 = vmatprep.mubr.msk.f32.mxu0 %vm22945_vm3, %v22946_v4 }
 0xacc   :  { %19689 = vmatprep.subr.mxu0 %v22946_v4 }
 0xace   :  { %19680 = vmatmul.mubr.f32.gmra.mrb[40].mxu0 %v25819_v24 }
 0xacf   :  { %19682 = vmatprep.mubr.msk.f32.mxu0 %vm22945_vm3, %v22946_v4 }
 0xad2   :  { %19683 = vmatmul.mubr.f32.gmra.mrb[42].mxu0 %v25834_v2 }
 0xad3   :  { %19690 = vmatpush3.xpose.msra.mxu0 %v7925_v20  ;;  %19691 = vmatprep.mubr.msk.f32.mxu0 %vm22945_vm3, %v22946_v4 }
 0xad4   :  { %21776 = vmatprep.subr.bf16.mxu0 %v28257_v62 }
 0xad6   :  { %19692 = vmatmul.mubr.f32.vlgmr.msra.gmra.mrb[38].mxu0 %v25817_v10  ;;  %v9075_v10 = vand.u32 4294901760, %v25908_v0 }
 0xad7   :  { %21778 = vmatpush3.bf16.xpose.msra.mxu0 %v25821_v28  ;;  %19694 = vmatprep.mubr.msk.f32.mxu0 %vm22945_vm3, %v22946_v4 }
 0xad8   :  { %19704 = vmatprep.subr.mxu0 %v22946_v4  ;;  %v9076_v6 = vsub.f32 %v25908_v0, %v9075_v10 }
 0xada   :  { %19695 = vmatmul.mubr.f32.gmra.mrb[40].mxu0 %v7890_v12  ;;  %v9119_v12 = vsub.f32 %v9003_v41, %v25933_v47 }
 0xadb   :  { %19697 = vmatprep.mubr.msk.f32.mxu0 %vm22945_vm3, %v22946_v4 }
 0xadc   :  { %v9120_v1 = vand.u32 4294901760, %v9119_v12 }
 0xade   :  { %19698 = vmatmul.mubr.f32.gmra.mrb[42].mxu0 %v7900_v56  ;;  %v9121_v39 = vsub.f32 %v9119_v12, %v9120_v1 }
 0xadf   :  { %19705 = vmatpush3.xpose.msra.mxu0 %v25837_v38  ;;  %19706 = vmatprep.mubr.msk.f32.mxu0 %vm22945_vm3, %v22946_v4 }
 0xae0   :  { %21779 = vmatprep.subr.bf16.mxu0 %v28257_v62  ;;  %v9122_v21 = vand.u32 4294901760, %v9121_v39 }
 0xae2   :  { %19707 = vmatmul.mubr.f32.vlgmr.msra.gmra.mrb[38].mxu0 %v7881_v9 }
 0xae3   :  { %21781 = vmatpush3.bf16.xpose.msra.mxu0 %v21780_v31  ;;  %19709 = vmatprep.mubr.msk.f32.mxu0 %vm22945_vm3, %v22946_v4  ;;  %v7785_v31 = vld [vmem:[%s27805_s1 + $0x378] sm:$0x3] }
 0xae4   :  { %19719 = vmatprep.subr.mxu0 %v22946_v4 }
 0xae6   :  { %19710 = vmatmul.mubr.f32.gmra.mrb[40].mxu0 %v7891_v40 }
 0xae7   :  { %19712 = vmatprep.mubr.msk.f32.mxu0 %vm22945_vm3, %v22946_v4 }
 0xaea   :  { %19713 = vmatmul.mubr.f32.gmra.mrb[42].mxu0 %v7901_v61  ;;  %v7783_v61 = vld [vmem:[%s27805_s1 + $0x368] sm:$0xff] }
 0xaeb   :  { %19720 = vmatpush3.xpose.msra.mxu0 %v7926_v46  ;;  %19721 = vmatprep.mubr.msk.f32.mxu0 %vm22945_vm3, %v22946_v4 }
 0xaec   :  { %21782 = vmatprep.subr.bf16.mxu0 %v28257_v62 }
 0xaee   :  { %19722 = vmatmul.mubr.f32.vlgmr.msra.gmra.mrb[38].mxu0 %v25809_v11 }
 0xaef   :  { %21784 = vmatpush3.bf16.xpose.msra.mxu0 %v25821_v28  ;;  %19724 = vmatprep.mubr.msk.f32.mxu0 %vm22945_vm3, %v22946_v4  ;;  %v25925_v28 = vsub.f32 %v8995_v7, %v25910_v29 }
 0xaf0   :  { %19734 = vmatprep.subr.mxu0 %v22946_v4 }
 0xaf1   :  { %v9085_v54 = vand.u32 4294901760, %v25925_v28 }
 0xaf2   :  { %19725 = vmatmul.mubr.f32.gmra.mrb[40].mxu0 %v25819_v24 }
 0xaf3   :  { %19727 = vmatprep.mubr.msk.f32.mxu0 %vm22945_vm3, %v22946_v4  ;;  %v9086_v51 = vsub.f32 %v25925_v28, %v9085_v54 }
 0xaf6   :  { %19728 = vmatmul.mubr.f32.gmra.mrb[42].mxu0 %v25834_v2 }
 0xaf7   :  { %19735 = vmatpush3.xpose.msra.mxu0 %v25837_v38  ;;  %19736 = vmatprep.mubr.msk.f32.mxu0 %vm22945_vm3, %v22946_v4  ;;  %v9095_v38 = vand.u32 4294901760, %v9094_v33 }
 0xaf8   :  { %21803 = vmatprep.subr.bf16.mxu0 %v28257_v62 }
 0xaf9   :  { %v9096_v56 = vsub.f32 %v9094_v33, %v9095_v38 }
 0xafa   :  { %19737 = vmatmul.mubr.f32.vlgmr.msra.gmra.mrb[38].mxu0 %v25809_v11  ;;  %v9114_v11 = vsub.f32 %v25898_v22, %v9113_v50 }
 0xafb   :  { %21805 = vmatpush3.bf16.xpose.msra.mxu0 %v25913_v55  ;;  %19739 = vmatprep.mubr.msk.f32.mxu0 %vm22945_vm3, %v22946_v4  ;;  %v9097_v20 = vand.u32 4294901760, %v9096_v56 }
 0xafc   :  { %19839 = vmatprep.subr.mxu0 %v22946_v4  ;;  %v9115_v9 = vand.u32 4294901760, %v9114_v11 }
 0xafe   :  { %19740 = vmatmul.mubr.f32.gmra.mrb[40].mxu0 %v25819_v24  ;;  %v9077_v24 = vand.u32 4294901760, %v9076_v6  ;;  %v21807_v40 = vpack.c.bf16 %v9115_v9, %v9108_v18 }
 0xaff   :  { %19742 = vmatprep.mubr.msk.f32.mxu0 %vm22945_vm3, %v22946_v4 }
 0xb02   :  { %19743 = vmatmul.mubr.f32.gmra.mrb[42].mxu0 %v25834_v2  ;;  %v9087_v2 = vand.u32 4294901760, %v9086_v51 }
 0xb03   :  { %19840 = vmatpush3.xpose.msra.mxu0 %v25933_v47  ;;  %19841 = vmatprep.mubr.msk.f32.mxu0 %vm22945_vm3, %v22946_v4 }
 0xb04   :  { %21806 = vmatprep.subr.bf16.mxu0 %v28257_v62 }
 0xb06   :  { %19842 = vmatmul.mubr.f32.vlgmr.msra.gmra.mrb[44].mxu0 %v9077_v24 }
 0xb07   :  { %21808 = vmatpush3.bf16.xpose.msra.mxu0 %v21807_v40  ;;  %19844 = vmatprep.mubr.msk.f32.mxu0 %vm22945_vm3, %v22946_v4 }
 0xb08   :  { %19854 = vmatprep.subr.mxu0 %v22946_v4 }
 0xb0a   :  { %19845 = vmatmul.mubr.f32.gmra.mrb[46].mxu0 %v9087_v2 }
 0xb0b   :  { %19847 = vmatprep.mubr.msk.f32.mxu0 %vm22945_vm3, %v22946_v4 }
 0xb0e   :  { %19848 = vmatmul.mubr.f32.gmra.mrb[48].mxu0 %v9097_v20 }
 0xb0f   :  { %19855 = vmatpush3.xpose.msra.mxu0 %v9122_v21  ;;  %19856 = vmatprep.mubr.msk.f32.mxu0 %vm22945_vm3, %v22946_v4 }
 0xb10   :  { %21809 = vmatprep.subr.bf16.mxu0 %v28257_v62 }
 0xb12   :  { %19857 = vmatmul.mubr.f32.vlgmr.msra.gmra.mrb[44].mxu0 %v25896_v63 }
 0xb13   :  { %21811 = vmatpush3.bf16.xpose.msra.mxu0 %v21810_v15  ;;  %19859 = vmatprep.mubr.msk.f32.mxu0 %vm22945_vm3, %v22946_v4 }
 0xb14   :  { %19869 = vmatprep.subr.mxu0 %v22946_v4 }
 0xb16   :  { %19860 = vmatmul.mubr.f32.gmra.mrb[46].mxu0 %v25910_v29 }
 0xb17   :  { %19862 = vmatprep.mubr.msk.f32.mxu0 %vm22945_vm3, %v22946_v4 }
 0xb1a   :  { %19863 = vmatmul.mubr.f32.gmra.mrb[48].mxu0 %v25927_v27 }
 0xb1b   :  { %19870 = vmatpush3.xpose.msra.mxu0 %v9119_v12  ;;  %19871 = vmatprep.mubr.msk.f32.mxu0 %vm22945_vm3, %v22946_v4 }
 0xb1c   :  { %21812 = vmatprep.subr.bf16.mxu0 %v28257_v62 }
 0xb1e   :  { %19872 = vmatmul.mubr.f32.vlgmr.msra.gmra.mrb[44].mxu0 %v25908_v0 }
 0xb1f   :  { %21814 = vmatpush3.bf16.xpose.msra.mxu0 %v25913_v55  ;;  %19874 = vmatprep.mubr.msk.f32.mxu0 %vm22945_vm3, %v22946_v4 }
 0xb20   :  { %19884 = vmatprep.subr.mxu0 %v22946_v4 }
 0xb22   :  { %19875 = vmatmul.mubr.f32.gmra.mrb[46].mxu0 %v25925_v28 }
 0xb23   :  { %19877 = vmatprep.mubr.msk.f32.mxu0 %vm22945_vm3, %v22946_v4 }
 0xb26   :  { %19878 = vmatmul.mubr.f32.gmra.mrb[48].mxu0 %v9094_v33 }
 0xb27   :  { %19885 = vmatpush3.xpose.msra.mxu0 %v25933_v47  ;;  %19886 = vmatprep.mubr.msk.f32.mxu0 %vm22945_vm3, %v22946_v4 }
 0xb28   :  { %21815 = vmatprep.subr.bf16.mxu0 %v28257_v62 }
 0xb2a   :  { %19887 = vmatmul.mubr.f32.vlgmr.msra.gmra.mrb[44].mxu0 %v9075_v10 }
 0xb2b   :  { %21817 = vmatpush3.bf16.xpose.msra.mxu0 %v21816_v58  ;;  %19889 = vmatprep.mubr.msk.f32.mxu0 %vm22945_vm3, %v22946_v4 }
 0xb2c   :  { %19899 = vmatprep.subr.mxu0 %v22946_v4 }
 0xb2e   :  { %19890 = vmatmul.mubr.f32.gmra.mrb[46].mxu0 %v9085_v54 }
 0xb2f   :  { %19892 = vmatprep.mubr.msk.f32.mxu0 %vm22945_vm3, %v22946_v4 }
 0xb32   :  { %19893 = vmatmul.mubr.f32.gmra.mrb[48].mxu0 %v9095_v38 }
 0xb33   :  { %19900 = vmatpush3.xpose.msra.mxu0 %v9120_v1  ;;  %19901 = vmatprep.mubr.msk.f32.mxu0 %vm22945_vm3, %v22946_v4 }
 0xb34   :  { %21818 = vmatprep.subr.bf16.mxu0 %v28257_v62 }
 0xb36   :  { %19902 = vmatmul.mubr.f32.vlgmr.msra.gmra.mrb[44].mxu0 %v25896_v63 }
 0xb37   :  { %21820 = vmatpush3.bf16.xpose.msra.mxu0 %v25913_v55  ;;  %19904 = vmatprep.mubr.msk.f32.mxu0 %vm22945_vm3, %v22946_v4 }
 0xb38   :  { %19914 = vmatprep.subr.mxu0 %v22946_v4 }
 0xb3a   :  { %19905 = vmatmul.mubr.f32.gmra.mrb[46].mxu0 %v25910_v29 }
 0xb3b   :  { %19907 = vmatprep.mubr.msk.f32.mxu0 %vm22945_vm3, %v22946_v4 }
 0xb3e   :  { %19908 = vmatmul.mubr.f32.gmra.mrb[48].mxu0 %v25927_v27 }
 0xb3f   :  { %19915 = vmatpush3.xpose.msra.mxu0 %v25933_v47  ;;  %19916 = vmatprep.mubr.msk.f32.mxu0 %vm22945_vm3, %v22946_v4 }
 0xb40   :  { %20015 = vmatprep.subr.mxu0 %v22946_v4 }
 0xb42   :  { %19917 = vmatmul.mubr.f32.vlgmr.msra.gmra.mrb[44].mxu0 %v25896_v63 }
 0xb43   :  { %19919 = vmatprep.mubr.msk.f32.mxu0 %vm22945_vm3, %v22946_v4 }
 0xb46   :  { %19920 = vmatmul.mubr.f32.gmra.mrb[46].mxu0 %v25910_v29 }
 0xb47   :  { %19922 = vmatprep.mubr.msk.f32.mxu0 %vm22945_vm3, %v22946_v4 }
 0xb4a   :  { %19923 = vmatmul.mubr.f32.gmra.mrb[48].mxu0 %v25927_v27 }
 0xb4b   :  { %20017 = vmatprep.mubr.msk.f32.mxu0 %vm22945_vm3, %v22946_v4 }
 0xbcd   :  { %v8353_v46 = vpop.f32.mrb[38].mxu0 }
 0xbce   :  { %v22102_v35 = vadd.f32 %v8353_v46, %v7783_v61  ;;  %v19738_v53 = vpop.f32.mrb[39].mxu0 }
 0xbd0   :  { %v8370_v42 = vsel %vm8369_vm7, %v22102_v35, -inf }
 0xbd1   :  { %8371 = vmax.xlane.f32.xlu1 %v8370_v42  ;;  %v8359_v45 = vpop.f32.mrb[40].mxu0 }
 0xbd2   :  { %v22103_v59 = vadd.f32 %v8359_v45, %v7784_v5  ;;  %v19741_v36 = vpop.f32.mrb[41].mxu0 }
 0xbd4   :  { %v8373_v17 = vsel %vm8369_vm7, %v22103_v59, -inf }
 0xbd5   :  { %8374 = vmax.xlane.f32.xlu0 %v8373_v17  ;;  %v8365_v49 = vpop.f32.mrb[42].mxu0 }
 0xbd6   :  { %v22104_v8 = vadd.f32 %v8365_v49, %v7785_v31  ;;  %v19744_v60 = vpop.f32.mrb[43].mxu0 }
 0xbd8   :  { %v8377_v48 = vsel %vm8376_vm8, %v22104_v8, -inf }
 0xbd9   :  { %8378 = vmax.xlane.f32.xlu0 %v8377_v48 }
 0xc15   :  { %v9547_v14 = vpop.f32.mrb[44].mxu0 }
 0xc16   :  { %v19918_v13 = vpop.f32.mrb[45].mxu0  ;;  %v22105_v11 = vadd.f32 %v9547_v14, %v7783_v61 }
 0xc18   :  { %v9563_v6 = vsel %vm8369_vm7, %v22105_v11, -inf }
 0xc19   :  { %v9553_v26 = vpop.f32.mrb[46].mxu0 }
 0xc1a   :  { %v19921_v52 = vpop.f32.mrb[47].mxu0  ;;  %v26047_v33 = vadd.f32 %v9553_v26, %v7784_v5 }
 0xc1c   :  { %v9566_v9 = vsel %vm8369_vm7, %v26047_v33, -inf }
 0xc1d   :  { %v9559_v63 = vpop.f32.mrb[48].mxu0 }
 0xc1e   :  { %v19924_v22 = vpop.f32.mrb[49].mxu0  ;;  %v26040_v3 = vadd.f32 %v9559_v63, %v7785_v31 }
 0xc20   :  { %v9569_v54 = vsel %vm8376_vm8, %v26040_v3, -inf }
 0xc5e   :  { %v8372_v7 = vpop.xlane.xlu1 %8371 }
 0xc5f   :  { %v8380_v32 = vsub.f32 %v22102_v35, %v8372_v7 }
 0xc61   :  { %v8383_v44 = vmul.f32 1.442695, %v8380_v32 }
 0xc62   :  { %v8375_v37 = vpop.xlane.xlu0 %8374 }
 0xc63   :  { %22871 = vpow2.f32 %v8383_v44  ;;  %v8381_v0 = vsub.f32 %v22103_v59, %v8375_v37 }
 0xc65   :  { %v8385_v29 = vmul.f32 1.442695, %v8381_v0 }
 0xc66   :  { %v8379_v43 = vpop.xlane.xlu0 %8378 }
 0xc67   :  { %22873 = vpow2.f32 %v8385_v29  ;;  %v8382_v10 = vsub.f32 %v22104_v8, %v8379_v43 }
 0xc69   :  { %v8387_v28 = vmul.f32 1.442695, %v8382_v10 }
 0xc6b   :  { %22875 = vpow2.f32 %v8387_v28 }
 0xc6d   :  { %v22872_v55 = vpop.eup %22871 }
 0xc6e   :  { %v8389_v50 = vsel %vm8369_vm7, %v22872_v55, 0.0 }
 0xc6f   :  { %8390 = vadd.xlane.f32.xlu1 %v8389_v50 }
 0xc71   :  { %v22874_v16 = vpop.eup %22873 }
 0xc72   :  { %v8392_v41 = vsel %vm8369_vm7, %v22874_v16, 0.0 }
 0xc73   :  { %8393 = vadd.xlane.f32.xlu0 %v8392_v41 }
 0xc75   :  { %v26036_v27 = vpop.eup %22875 }
 0xc76   :  { %v8395_v47 = vsel %vm8376_vm8, %v26036_v27, 0.0 }
 0xc80   :  { %8406 = vrot.lane.b32.xlu1 %v25792_v19, %s22940_s12 }
 0xc89   :  { %8404 = vrot.lane.b32.xlu0 %v25788_v25, %s22940_s12 }
 0xca4   :  { %8396 = vadd.xlane.f32.xlu1 %v8395_v47 }
 0xca8   :  { %9564 = vmax.xlane.f32.xlu0 %v9563_v6 }
 0xcac   :  { %9570 = vmax.xlane.f32.xlu0 %v9569_v54 }
 0xcb5   :  { %8408 = vrot.lane.b32.xlu1 %v25796_v57, %s22940_s12 }
 0xcd9   :  { %9567 = vmax.xlane.f32.xlu1 %v9566_v9 }
 0xcea   :  { %9596 = vrot.lane.b32.xlu1 %v25788_v25, %s22949_s28 }
 0xcfc   :  { %v8391_v12 = vpop.xlane.xlu1 %8390 }
 0xcfd   :  { %22877 = vrcp.f32 %v8391_v12 }
 0xd00   :  { %v8394_v18 = vpop.xlane.xlu0 %8393  ;;  %v8407_v24 = vpop.permute.xlu1 %8406 }
 0xd01   :  { %v8427_v51 = vand.u32 4294901760, %v8407_v24  ;;  %22879 = vrcp.f32 %v8394_v18 }
 0xd03   :  { %v26063_v46 = vsub.f32 %v8407_v24, %v8427_v51 }
 0xd04   :  { %v8405_v38 = vpop.permute.xlu0 %8404 }
 0xd05   :  { %v8424_v1 = vand.u32 4294901760, %v8405_v38  ;;  %v8531_v42 = vand.u32 4294901760, %v26063_v46 }
 0xd07   :  { %v26053_v40 = vpack.c.bf16 %v8427_v51, %v8424_v1  ;;  %v22878_v2 = vpop.eup %22877  ;;  %v26060_v58 = vsub.f32 %v8405_v38, %v8424_v1  ;;  %v8532_v17 = vsub.f32 %v26063_v46, %v8531_v42 }
 0xd08   :  { %v8401_v56 = vmul.f32 %v22878_v2, %v22872_v55 }
 0xd09   :  { %21787 = vmatpush3.bf16.msra.mxu1 %v26053_v40  ;;  %v8524_v5 = vand.u32 4294901760, %v26060_v58  ;;  %v8533_v52 = vand.u32 4294901760, %v8532_v17  ;;  %v21792_v38 = vpack.c.bf16 %v26063_v46, %v26060_v58 }
 0xd0a   :  { %19749 = vmatprep.subr.mxu1 %v22946_v4  ;;  %v8413_v20 = vsel %vm8369_vm7, %v8401_v56, 0 }
 0xd0b   :  { %v22880_v39 = vpop.eup %22879  ;;  %v26058_v15 = vand.u32 4294901760, %v8413_v20  ;;  %v8525_v36 = vsub.f32 %v26060_v58, %v8524_v5  ;;  %v21798_v51 = vpack.c.bf16 %v8531_v42, %v8524_v5 }
 0xd0c   :  { %v8402_v21 = vmul.f32 %v22880_v39, %v22874_v16 }
 0xd0d   :  { %v26066_v35 = vsub.f32 %v8413_v20, %v26058_v15  ;;  %v8526_v60 = vand.u32 4294901760, %v8525_v36 }
 0xd0e   :  { %v8416_v61 = vsel %vm8369_vm7, %v8402_v21, 0 }
 0xd0f   :  { %v26068_v53 = vand.u32 4294901760, %v8416_v61  ;;  %v8493_v45 = vand.u32 4294901760, %v26066_v35  ;;  %v21789_v0 = vpack.c.bf16 %v8533_v52, %v8526_v60 }
 0xd11   :  { %v26074_v59 = vsub.f32 %v8416_v61, %v26068_v53  ;;  %v8494_v49 = vsub.f32 %v26066_v35, %v8493_v45 }
 0xd13   :  { %v8503_v8 = vand.u32 4294901760, %v26074_v59  ;;  %v8495_v7 = vand.u32 4294901760, %v8494_v49 }
 0xd15   :  { %v8504_v32 = vsub.f32 %v26074_v59, %v8503_v8 }
 0xd17   :  { %v8505_v41 = vand.u32 4294901760, %v8504_v32 }
 0xd31   :  { %v8397_v31 = vpop.xlane.xlu1 %8396 }
 0xd32   :  { %22881 = vrcp.f32 %v8397_v31 }
 0xd35   :  { %v8409_v48 = vpop.permute.xlu1 %8408  ;;  %v9565_v14 = vpop.xlane.xlu0 %9564 }
 0xd36   :  { %v8421_v13 = vsel %vm6657_vm5, %v8409_v48, 0  ;;  %v9572_v26 = vsub.f32 %v22105_v11, %v9565_v14 }
 0xd37   :  { %v26087_v63 = vand.u32 4294901760, %v8421_v13 }
 0xd38   :  { %v9575_v22 = vmul.f32 1.442695, %v9572_v26 }
 0xd39   :  { %v26093_v44 = vsub.f32 %v8421_v13, %v26087_v63  ;;  %19750 = vmatpush3.msra.mxu1 %v26087_v63  ;;  %v9571_v37 = vpop.xlane.xlu0 %9570 }
 0xd3a   :  { %22883 = vpow2.f32 %v9575_v22  ;;  %v9574_v29 = vsub.f32 %v26040_v3, %v9571_v37  ;;  %19752 = vmatmul.mubr.f32.vlgmr.msra.gmra.mrb[56].mxu1 %v8495_v7  ;;  %21788 = vmatprep.subr.bf16.mxu1 %v28257_v62 }
 0xd3b   :  { %v8538_v55 = vand.u32 4294901760, %v26093_v44  ;;  %21790 = vmatpush3.bf16.msra.mxu1 %v21789_v0  ;;  %19754 = vmatprep.mubr.msk.f32.mxu1 %vm22945_vm3, %v22946_v4 }
 0xd3c   :  { %v22882_v50 = vpop.eup %22881  ;;  %v9579_v16 = vmul.f32 1.442695, %v9574_v29  ;;  %19764 = vmatprep.subr.mxu1 %v22946_v4 }
 0xd3d   :  { %v8403_v43 = vmul.f32 %v22882_v50, %v26036_v27  ;;  %v8539_v10 = vsub.f32 %v26093_v44, %v8538_v55 }
 0xd3e   :  { %22885 = vpow2.f32 %v9579_v16  ;;  %19755 = vmatmul.mubr.f32.gmra.mrb[58].mxu1 %v8505_v41 }
 0xd3f   :  { %v8540_v28 = vand.u32 4294901760, %v8539_v10  ;;  %19757 = vmatprep.mubr.msk.f32.mxu1 %vm22945_vm3, %v22946_v4  ;;  %v8419_v11 = vsel %vm8369_vm7, %v8403_v43, 0 }
 0xd40   :  { %v26107_v47 = vand.u32 4294901760, %v8419_v11 }
 0xd41   :  { %19765 = vmatpush3.msra.mxu1 %v8540_v28 }
 0xd42   :  { %v8512_v3 = vsub.f32 %v8419_v11, %v26107_v47  ;;  %21791 = vmatprep.subr.bf16.mxu1 %v28257_v62 }
 0xd44   :  { %v26111_v6 = vpop.eup %22883  ;;  %v8513_v27 = vand.u32 4294901760, %v8512_v3 }
 0xd45   :  { %v9581_v54 = vsel %vm8369_vm7, %v26111_v6, 0.0 }
 0xd46   :  { %9582 = vadd.xlane.f32.xlu0 %v9581_v54  ;;  %v8514_v9 = vsub.f32 %v8512_v3, %v8513_v27 }
 0xd48   :  { %v26115_v12 = vpop.eup %22885  ;;  %v8515_v18 = vand.u32 4294901760, %v8514_v9 }
 0xd49   :  { %v9587_v24 = vsel %vm8376_vm8, %v26115_v12, 0.0 }
 0xd4a   :  { %19758 = vmatmul.mubr.f32.gmra.mrb[60].mxu1 %v8515_v18  ;;  %9588 = vadd.xlane.f32.xlu0 %v9587_v24 }
 0xd4b   :  { %19766 = vmatprep.mubr.msk.f32.mxu1 %vm22945_vm3, %v22946_v4 }
 0xd4e   :  { %19767 = vmatmul.mubr.f32.vlgmr.msra.gmra.mrb[56].mxu1 %v26058_v15 }
 0xd4f   :  { %21793 = vmatpush3.bf16.msra.mxu1 %v21792_v38  ;;  %19769 = vmatprep.mubr.msk.f32.mxu1 %vm22945_vm3, %v22946_v4 }
 0xd50   :  { %19779 = vmatprep.subr.mxu1 %v22946_v4 }
 0xd52   :  { %19770 = vmatmul.mubr.f32.gmra.mrb[58].mxu1 %v26068_v53 }
 0xd53   :  { %19780 = vmatpush3.msra.mxu1 %v26093_v44  ;;  %19772 = vmatprep.mubr.msk.f32.mxu1 %vm22945_vm3, %v22946_v4 }
 0xd54   :  { %21794 = vmatprep.subr.bf16.mxu1 %v28257_v62 }
 0xd56   :  { %19773 = vmatmul.mubr.f32.gmra.mrb[60].mxu1 %v26107_v47 }
 0xd57   :  { %19781 = vmatprep.mubr.msk.f32.mxu1 %vm22945_vm3, %v22946_v4 }
 0xd5a   :  { %19782 = vmatmul.mubr.f32.vlgmr.msra.gmra.mrb[56].mxu1 %v26066_v35 }
 0xd5b   :  { %21796 = vmatpush3.bf16.msra.mxu1 %v26053_v40  ;;  %19784 = vmatprep.mubr.msk.f32.mxu1 %vm22945_vm3, %v22946_v4 }
 0xd5c   :  { %19794 = vmatprep.subr.mxu1 %v22946_v4 }
 0xd5e   :  { %19785 = vmatmul.mubr.f32.gmra.mrb[58].mxu1 %v26074_v59 }
 0xd5f   :  { %19795 = vmatpush3.msra.mxu1 %v26087_v63  ;;  %19787 = vmatprep.mubr.msk.f32.mxu1 %vm22945_vm3, %v22946_v4 }
 0xd60   :  { %9598 = vrot.lane.b32.xlu0 %v25792_v19, %s22949_s28  ;;  %21797 = vmatprep.subr.bf16.mxu1 %v28257_v62 }
 0xd62   :  { %19788 = vmatmul.mubr.f32.gmra.mrb[60].mxu1 %v8512_v3 }
 0xd63   :  { %19796 = vmatprep.mubr.msk.f32.mxu1 %vm22945_vm3, %v22946_v4 }
 0xd64   :  { %11263 = vrot.lane.b32.xlu0 %v25792_v19, %s22941_s23 }
 0xd66   :  { %19797 = vmatmul.mubr.f32.vlgmr.msra.gmra.mrb[56].mxu1 %v8493_v45  ;;  %v9568_v1 = vpop.xlane.xlu1 %9567 }
 0xd67   :  { %21799 = vmatpush3.bf16.msra.mxu1 %v21798_v51  ;;  %v9573_v2 = vsub.f32 %v26047_v33, %v9568_v1  ;;  %19799 = vmatprep.mubr.msk.f32.mxu1 %vm22945_vm3, %v22946_v4  ;;  %v7786_v51 = vld [vmem:[%s27805_s1 + $0x3a8] sm:$0xff] }
 0xd68   :  { %11257 = vrot.lane.b32.xlu0 %v25792_v19, %s22943_s10  ;;  %19809 = vmatprep.subr.mxu1 %v22946_v4 }
 0xd69   :  { %v9577_v56 = vmul.f32 1.442695, %v9573_v2 }
 0xd6a   :  { %19800 = vmatmul.mubr.f32.gmra.mrb[58].mxu1 %v8503_v8  ;;  %v9597_v21 = vpop.permute.xlu1 %9596 }
 0xd6b   :  { %22887 = vpow2.f32 %v9577_v56  ;;  %19810 = vmatpush3.msra.mxu1 %v8538_v55  ;;  %19802 = vmatprep.mubr.msk.f32.mxu1 %vm22945_vm3, %v22946_v4  ;;  %v9616_v58 = vand.u32 4294901760, %v9597_v21 }
 0xd6c   :  { %11259 = vrot.lane.b32.xlu0 %v25796_v57, %s22943_s10  ;;  %21800 = vmatprep.subr.bf16.mxu1 %v28257_v62 }
 0xd6d   :  { %v26216_v59 = vsub.f32 %v9597_v21, %v9616_v58 }
 0xd6e   :  { %19803 = vmatmul.mubr.f32.gmra.mrb[60].mxu1 %v8513_v27 }
 0xd6f   :  { %19811 = vmatprep.mubr.msk.f32.mxu1 %vm22945_vm3, %v22946_v4  ;;  %v9716_v17 = vand.u32 4294901760, %v26216_v59 }
 0xd71   :  { %v9717_v14 = vsub.f32 %v26216_v59, %v9716_v17 }
 0xd72   :  { %19812 = vmatmul.mubr.f32.vlgmr.msra.gmra.mrb[56].mxu1 %v26058_v15 }
 0xd73   :  { %21802 = vmatpush3.bf16.msra.mxu1 %v26053_v40  ;;  %19814 = vmatprep.mubr.msk.f32.mxu1 %vm22945_vm3, %v22946_v4  ;;  %v9718_v7 = vand.u32 4294901760, %v9717_v14 }
 0xd74   :  { %19824 = vmatprep.subr.mxu1 %v22946_v4 }
 0xd75   :  { %v26177_v33 = vpop.eup %22887 }
 0xd76   :  { %19815 = vmatmul.mubr.f32.gmra.mrb[58].mxu1 %v26068_v53  ;;  %v9584_v39 = vsel %vm8369_vm7, %v26177_v33, 0.0 }
 0xd77   :  { %19825 = vmatpush3.msra.mxu1 %v26087_v63  ;;  %9585 = vadd.xlane.f32.xlu1 %v9584_v39  ;;  %v26314_v39 = vand.u32 4294901760, %v7786_v51 }
 0xd78   :  { %19817 = vmatprep.mubr.msk.f32.mxu1 %vm22945_vm3, %v22946_v4  ;;  %21821 = vmatprep.subr.bf16.mxu1 %v28257_v62 }
 0xd7a   :  { %19818 = vmatmul.mubr.f32.gmra.mrb[60].mxu1 %v26107_v47 }
 0xd7b   :  { %19826 = vmatprep.mubr.msk.f32.mxu1 %vm22945_vm3, %v22946_v4 }
 0xd7e   :  { %19827 = vmatmul.mubr.f32.vlgmr.msra.gmra.mrb[56].mxu1 %v26058_v15 }
 0xd7f   :  { %19829 = vmatprep.mubr.msk.f32.mxu1 %vm22945_vm3, %v22946_v4 }
 0xd82   :  { %19830 = vmatmul.mubr.f32.gmra.mrb[58].mxu1 %v26068_v53 }
 0xd83   :  { %19832 = vmatprep.mubr.msk.f32.mxu1 %vm22945_vm3, %v22946_v4 }
 0xd86   :  { %19833 = vmatmul.mubr.f32.gmra.mrb[60].mxu1 %v26107_v47 }
 0xd87   :  { %19931 = vmatprep.mubr.msk.f32.mxu1 %vm22945_vm3, %v22946_v4 }
 0xd88   :  { %9600 = vrot.lane.b32.xlu1 %v25796_v57, %s22949_s28 }
 0xd8c   :  { %11261 = vrot.lane.b32.xlu1 %v25788_v25, %s22941_s23 }
 0xd90   :  { %11255 = vrot.lane.b32.xlu1 %v25788_v25, %s22943_s10 }
 0xd94   :  { %11265 = vrot.lane.b32.xlu1 %v25796_v57, %s22941_s23 }
 0xdd3   :  { %v9583_v40 = vpop.xlane.xlu0 %9582 }
 0xdd4   :  { %22889 = vrcp.f32 %v9583_v40 }
 0xdd7   :  { %v9589_v20 = vpop.xlane.xlu0 %9588 }
 0xdd8   :  { %22891 = vrcp.f32 %v9589_v20 }
 0xddb   :  { %v9599_v15 = vpop.permute.xlu0 %9598 }
 0xddc   :  { %v9619_v61 = vand.u32 4294901760, %v9599_v15 }
 0xdde   :  { %v26206_v46 = vpack.c.bf16 %v9619_v61, %v9616_v58  ;;  %v22890_v35 = vpop.eup %22889  ;;  %v26214_v45 = vsub.f32 %v9599_v15, %v9619_v61 }
 0xddf   :  { %v9593_v53 = vmul.f32 %v22890_v35, %v26111_v6 }
 0xde0   :  { %21823 = vmatpush3.bf16.msra.mxu1 %v26206_v46  ;;  %v9723_v31 = vand.u32 4294901760, %v26214_v45  ;;  %v21828_v24 = vpack.c.bf16 %v26214_v45, %v26216_v59 }
 0xde1   :  { %19929 = vmatprep.subr.mxu1 %v22946_v4  ;;  %v9605_v5 = vsel %vm8369_vm7, %v9593_v53, 0 }
 0xde2   :  { %v26212_v42 = vand.u32 4294901760, %v9605_v5  ;;  %v9724_v8 = vsub.f32 %v26214_v45, %v9723_v31  ;;  %v22892_v48 = vpop.eup %22891  ;;  %v21834_v38 = vpack.c.bf16 %v9723_v31, %v9716_v17  ;;  %v26348_v31 = vsub.f32 %v7786_v51, %v26314_v39 }
 0xde3   :  { %v9595_v63 = vmul.f32 %v22892_v48, %v26115_v12 }
 0xde4   :  { %v26219_v36 = vsub.f32 %v9605_v5, %v26212_v42  ;;  %v9725_v26 = vand.u32 4294901760, %v9724_v8 }
 0xde5   :  { %v9611_v29 = vsel %vm8369_vm7, %v9595_v63, 0 }
 0xde6   :  { %v9685_v49 = vand.u32 4294901760, %v26219_v36  ;;  %v21825_v0 = vpack.c.bf16 %v9725_v26, %v9718_v7  ;;  %v26245_v43 = vand.u32 4294901760, %v9611_v29  ;;  %v11264_v26 = vpop.permute.xlu0 %11263 }
 0xde7   :  { %v11275_v7 = vsel %vm5591_vm2, %v11264_v26, 0 }
 0xde8   :  { %v9686_v13 = vsub.f32 %v26219_v36, %v9685_v49  ;;  %v9704_v47 = vsub.f32 %v9611_v29, %v26245_v43 }
 0xdea   :  { %v9687_v44 = vand.u32 4294901760, %v9686_v13  ;;  %v9705_v27 = vand.u32 4294901760, %v9704_v47 }
 0xdec   :  { %v9706_v12 = vsub.f32 %v9704_v47, %v9705_v27 }
 0xdee   :  { %v9707_v18 = vand.u32 4294901760, %v9706_v12 }
 0xe04   :  { %v9586_v60 = vpop.xlane.xlu1 %9585 }
 0xe05   :  { %22893 = vrcp.f32 %v9586_v60 }
 0xe08   :  { %v9601_v52 = vpop.permute.xlu1 %9600 }
 0xe09   :  { %v9613_v22 = vsel %vm6657_vm5, %v9601_v52, 0  ;;  %v10822_v52 = vand.u32 4294901760, %v26348_v31 }
 0xe0a   :  { %v26235_v32 = vand.u32 4294901760, %v9613_v22 }
 0xe0c   :  { %v9729_v37 = vsub.f32 %v9613_v22, %v26235_v32  ;;  %19930 = vmatpush3.msra.mxu1 %v26235_v32  ;;  %v11262_v14 = vpop.permute.xlu1 %11261 }
 0xe0d   :  { %19932 = vmatmul.mubr.f32.vlgmr.msra.gmra.mrb[62].mxu1 %v9687_v44  ;;  %21824 = vmatprep.subr.bf16.mxu1 %v28257_v62  ;;  %v11273_v63 = vsel %vm5591_vm2, %v11262_v14, 0 }
 0xe0e   :  { %v9730_v55 = vand.u32 4294901760, %v9729_v37  ;;  %21826 = vmatpush3.bf16.msra.mxu1 %v21825_v0  ;;  %19934 = vmatprep.mubr.msk.f32.mxu1 %vm22945_vm3, %v22946_v4  ;;  %v11280_v44 = vand.u32 4294901760, %v11273_v63  ;;  %v11283_v0 = vand.u32 4294901760, %v11275_v7 }
 0xe0f   :  { %v22894_v50 = vpop.eup %22893  ;;  %19944 = vmatprep.subr.mxu1 %v22946_v4 }
 0xe10   :  { %v9594_v16 = vmul.f32 %v22894_v50, %v26177_v33  ;;  %v9731_v41 = vsub.f32 %v9729_v37, %v9730_v55  ;;  %v11256_v22 = vpop.permute.xlu1 %11255  ;;  %v26381_v50 = vsub.f32 %v11273_v63, %v11280_v44  ;;  %v7787_v63 = vld [vmem:[%s27805_s1 + $0x3b0] sm:$0xff] }
 0xe12   :  { %v9732_v10 = vand.u32 4294901760, %v9731_v41  ;;  %v9608_v28 = vsel %vm8369_vm7, %v9594_v16, 0  ;;  %v26384_v41 = vsub.f32 %v11275_v7, %v11283_v0 }
 0xe13   :  { %v26248_v11 = vand.u32 4294901760, %v9608_v28 }
 0xe14   :  { %19945 = vmatpush3.msra.mxu1 %v9732_v10 }
 0xe15   :  { %21827 = vmatprep.subr.bf16.mxu1 %v28257_v62  ;;  %v9694_v3 = vsub.f32 %v9608_v28, %v26248_v11 }
 0xe17   :  { %v9695_v6 = vand.u32 4294901760, %v9694_v3 }
 0xe19   :  { %v9696_v54 = vsub.f32 %v9694_v3, %v9695_v6 }
 0xe1b   :  { %v9697_v9 = vand.u32 4294901760, %v9696_v54 }
 0xe1d   :  { %19935 = vmatmul.mubr.f32.gmra.mrb[64].mxu1 %v9697_v9 }
 0xe1e   :  { %19937 = vmatprep.mubr.msk.f32.mxu1 %vm22945_vm3, %v22946_v4 }
 0xe21   :  { %19938 = vmatmul.mubr.f32.gmra.mrb[66].mxu1 %v9707_v18 }
 0xe22   :  { %19946 = vmatprep.mubr.msk.f32.mxu1 %vm22945_vm3, %v22946_v4 }
 0xe25   :  { %19947 = vmatmul.mubr.f32.vlgmr.msra.gmra.mrb[62].mxu1 %v26212_v42 }
 0xe26   :  { %21829 = vmatpush3.bf16.msra.mxu1 %v21828_v24  ;;  %19949 = vmatprep.mubr.msk.f32.mxu1 %vm22945_vm3, %v22946_v4 }
 0xe27   :  { %19959 = vmatprep.subr.mxu1 %v22946_v4 }
 0xe29   :  { %19950 = vmatmul.mubr.f32.gmra.mrb[64].mxu1 %v26248_v11 }
 0xe2a   :  { %19960 = vmatpush3.msra.mxu1 %v9729_v37  ;;  %19952 = vmatprep.mubr.msk.f32.mxu1 %vm22945_vm3, %v22946_v4  ;;  %v11267_v37 = vsel %vm5591_vm2, %v11256_v22, 0  ;;  %v26484_v22 = vand.u32 4294901760, %v7787_v63 }
 0xe2b   :  { %21830 = vmatprep.subr.bf16.mxu1 %v28257_v62  ;;  %v26378_v29 = vand.u32 4294901760, %v11267_v37 }
 0xe2c   :  { %20016 = vmatpush3.msra.mxu0 %v26484_v22  ;;  %v26506_v7 = vsub.f32 %v7787_v63, %v26484_v22 }
 0xe2d   :  { %19953 = vmatmul.mubr.f32.gmra.mrb[66].mxu1 %v26245_v43  ;;  %v26391_v28 = vsub.f32 %v11267_v37, %v26378_v29  ;;  %20026 = vmatprep.subr.mxu0 %v22946_v4 }
 0xe2e   :  { %19961 = vmatprep.mubr.msk.f32.mxu1 %vm22945_vm3, %v22946_v4 }
 0xe2f   :  { %v11349_v12 = vand.u32 4294901760, %v26391_v28 }
 0xe31   :  { %19962 = vmatmul.mubr.f32.vlgmr.msra.gmra.mrb[62].mxu1 %v26219_v36 }
 0xe32   :  { %21832 = vmatpush3.bf16.msra.mxu1 %v26206_v46  ;;  %19964 = vmatprep.mubr.msk.f32.mxu1 %vm22945_vm3, %v22946_v4 }
 0xe33   :  { %19974 = vmatprep.subr.mxu1 %v22946_v4 }
 0xe35   :  { %19965 = vmatmul.mubr.f32.gmra.mrb[64].mxu1 %v9694_v3  ;;  %v11380_v3 = vand.u32 4294901760, %v26381_v50 }
 0xe36   :  { %19975 = vmatpush3.msra.mxu1 %v26235_v32  ;;  %19967 = vmatprep.mubr.msk.f32.mxu1 %vm22945_vm3, %v22946_v4 }
 0xe37   :  { %21833 = vmatprep.subr.bf16.mxu1 %v28257_v62  ;;  %v11381_v18 = vsub.f32 %v26381_v50, %v11380_v3 }
 0xe39   :  { %19968 = vmatmul.mubr.f32.gmra.mrb[66].mxu1 %v9704_v47  ;;  %v26394_v47 = vpack.c.bf16 %v11283_v0, %v11280_v44  ;;  %v10281_v0 = vand.u32 4294901760, %v26506_v7 }
 0xe3a   :  { %19976 = vmatprep.mubr.msk.f32.mxu1 %vm22945_vm3, %v22946_v4 }
 0xe3d   :  { %19977 = vmatmul.mubr.f32.vlgmr.msra.gmra.mrb[62].mxu1 %v9685_v49 }
 0xe3e   :  { %21835 = vmatpush3.bf16.msra.mxu1 %v21834_v38  ;;  %19979 = vmatprep.mubr.msk.f32.mxu1 %vm22945_vm3, %v22946_v4 }
 0xe3f   :  { %19989 = vmatprep.subr.mxu1 %v22946_v4 }
 0xe41   :  { %19980 = vmatmul.mubr.f32.gmra.mrb[64].mxu1 %v9695_v6 }
 0xe42   :  { %19990 = vmatpush3.msra.mxu1 %v9730_v55  ;;  %19982 = vmatprep.mubr.msk.f32.mxu1 %vm22945_vm3, %v22946_v4 }
 0xe43   :  { %21836 = vmatprep.subr.bf16.mxu1 %v28257_v62 }
 0xe45   :  { %19983 = vmatmul.mubr.f32.gmra.mrb[66].mxu1 %v9705_v27  ;;  %v11387_v27 = vand.u32 4294901760, %v26384_v41 }
 0xe46   :  { %19991 = vmatprep.mubr.msk.f32.mxu1 %vm22945_vm3, %v22946_v4 }
 0xe47   :  { %v11388_v38 = vsub.f32 %v26384_v41, %v11387_v27  ;;  %v21852_v26 = vpack.c.bf16 %v11387_v27, %v11380_v3 }
 0xe49   :  { %19992 = vmatmul.mubr.f32.vlgmr.msra.gmra.mrb[62].mxu1 %v26212_v42 }
 0xe4a   :  { %21838 = vmatpush3.bf16.msra.mxu1 %v26206_v46  ;;  %19994 = vmatprep.mubr.msk.f32.mxu1 %vm22945_vm3, %v22946_v4 }
 0xe4b   :  { %20004 = vmatprep.subr.mxu1 %v22946_v4 }
 0xe4d   :  { %19995 = vmatmul.mubr.f32.gmra.mrb[64].mxu1 %v26248_v11 }
 0xe4e   :  { %20005 = vmatpush3.msra.mxu1 %v26235_v32  ;;  %19997 = vmatprep.mubr.msk.f32.mxu1 %vm22945_vm3, %v22946_v4  ;;  %v11258_v32 = vpop.permute.xlu0 %11257 }
 0xe4f   :  { %20081 = vmatprep.subr.mxu1 %v22946_v4  ;;  %v11269_v55 = vsel %vm5591_vm2, %v11258_v32, 0 }
 0xe50   :  { %v26388_v10 = vand.u32 4294901760, %v11269_v55 }
 0xe51   :  { %v8965_v1 = vpop.f32.mrb[56].mxu1  ;;  %19998 = vmatmul.mubr.f32.gmra.mrb[66].mxu1 %v26245_v43 }
 0xe52   :  { %v10715_v2 = vsel %vm5591_vm2, %v8965_v1, 0  ;;  %v19828_v56 = vpop.f32.mrb[57].mxu1  ;;  %20006 = vmatprep.mubr.msk.f32.mxu1 %vm22945_vm3, %v22946_v4  ;;  %v11260_v16 = vpop.permute.xlu0 %11259  ;;  %v26404_v54 = vsub.f32 %v11269_v55, %v26388_v10 }
 0xe53   :  { %v26310_v33 = vand.u32 4294901760, %v10715_v2  ;;  %v11382_v56 = vand.u32 4294901760, %v11381_v18 }
 0xe54   :  { %v11359_v51 = vand.u32 4294901760, %v26404_v54 }
 0xe55   :  { %v26317_v40 = vsub.f32 %v10715_v2, %v26310_v33  ;;  %v8971_v20 = vpop.f32.mrb[58].mxu1  ;;  %20007 = vmatmul.mubr.f32.vlgmr.msra.gmra.mrb[62].mxu1 %v26212_v42  ;;  %v11350_v2 = vsub.f32 %v26391_v28, %v11349_v12 }
 0xe56   :  { %v10718_v21 = vsel %vm5591_vm2, %v8971_v20, 0  ;;  %v19831_v15 = vpop.f32.mrb[59].mxu1  ;;  %20009 = vmatprep.mubr.msk.f32.mxu1 %vm22945_vm3, %v22946_v4  ;;  %20082 = vmatpush3.msra.mxu1 %v26314_v39 }
 0xe57   :  { %v26321_v58 = vand.u32 4294901760, %v10718_v21  ;;  %v10791_v61 = vand.u32 4294901760, %v26317_v40  ;;  %20103 = vmatprep.subr.mxu1 %v22946_v4 }
 0xe59   :  { %v26329_v46 = vsub.f32 %v10718_v21, %v26321_v58  ;;  %v8977_v35 = vpop.f32.mrb[60].mxu1  ;;  %20010 = vmatmul.mubr.f32.gmra.mrb[64].mxu1 %v26248_v11  ;;  %v10792_v45 = vsub.f32 %v26317_v40, %v10791_v61  ;;  %v11271_v11 = vsel %vm5591_vm2, %v11260_v16, 0  ;;  %v11389_v21 = vand.u32 4294901760, %v11388_v38 }
 0xe5a   :  { %v10721_v53 = vsel %vm5591_vm2, %v8977_v35, 0  ;;  %v19834_v5 = vpop.f32.mrb[61].mxu1  ;;  %20012 = vmatprep.mubr.msk.f32.mxu1 %vm22945_vm3, %v22946_v4  ;;  %v26406_v9 = vand.u32 4294901760, %v11271_v11  ;;  %v11351_v35 = vand.u32 4294901760, %v11350_v2 }
 0xe5b   :  { %v26333_v42 = vand.u32 4294901760, %v10721_v53  ;;  %v10801_v59 = vand.u32 4294901760, %v26329_v46  ;;  %v10793_v17 = vand.u32 4294901760, %v10792_v45  ;;  %v21843_v45 = vpack.c.bf16 %v11389_v21, %v11382_v56 }
 0xe5c   :  { %v11368_v1 = vsub.f32 %v11271_v11, %v26406_v9 }
 0xe5d   :  { %v26342_v36 = vsub.f32 %v10721_v53, %v26333_v42  ;;  %20013 = vmatmul.mubr.f32.gmra.mrb[66].mxu1 %v26245_v43  ;;  %v10802_v8 = vsub.f32 %v26329_v46, %v10801_v59  ;;  %v11266_v43 = vpop.permute.xlu1 %11265  ;;  %v11360_v53 = vsub.f32 %v26404_v54, %v11359_v51 }
 0xe5e   :  { %20083 = vmatprep.mubr.msk.f32.mxu1 %vm22945_vm3, %v22946_v4  ;;  %v11277_v6 = vsel %vm5591_vm2, %v11266_v43, 0  ;;  %v11369_v15 = vand.u32 4294901760, %v11368_v1  ;;  %v10282_v43 = vsub.f32 %v26506_v7, %v10281_v0 }
 0xe5f   :  { %v10811_v49 = vand.u32 4294901760, %v26342_v36  ;;  %v10803_v60 = vand.u32 4294901760, %v10802_v8  ;;  %v26413_v24 = vand.u32 4294901760, %v11277_v6 }
 0xe60   :  { %v11370_v8 = vsub.f32 %v11368_v1, %v11369_v15 }
 0xe61   :  { %20084 = vmatmul.mubr.f32.vlgmr.msra.gmra.mrb[68].mxu1 %v10793_v17  ;;  %v10812_v48 = vsub.f32 %v26342_v36, %v10811_v49  ;;  %v11393_v20 = vsub.f32 %v11277_v6, %v26413_v24  ;;  %v11361_v17 = vand.u32 4294901760, %v11360_v53 }
 0xe62   :  { %20086 = vmatprep.mubr.msk.f32.mxu1 %vm22945_vm3, %v22946_v4  ;;  %20104 = vmatpush3.msra.mxu1 %v26348_v31 }
 0xe63   :  { %20125 = vmatprep.subr.mxu1 %v22946_v4  ;;  %v10813_v13 = vand.u32 4294901760, %v10812_v48  ;;  %v11394_v5 = vand.u32 4294901760, %v11393_v20  ;;  %v11371_v48 = vand.u32 4294901760, %v11370_v8 }
 0xe65   :  { %20087 = vmatmul.mubr.f32.gmra.mrb[70].mxu1 %v10803_v60  ;;  %v11395_v60 = vsub.f32 %v11393_v20, %v11394_v5 }
 0xe66   :  { %20089 = vmatprep.mubr.msk.f32.mxu1 %vm22945_vm3, %v22946_v4 }
 0xe67   :  { %v11396_v14 = vand.u32 4294901760, %v11395_v60 }
 0xe69   :  { %20090 = vmatmul.mubr.f32.gmra.mrb[72].mxu1 %v10813_v13  ;;  %v21846_v13 = vpack.c.bf16 %v26384_v41, %v26381_v50 }
 0xe6a   :  { %20105 = vmatprep.mubr.msk.f32.mxu1 %vm22945_vm3, %v22946_v4 }
 0xe6d   :  { %20106 = vmatmul.mubr.f32.vlgmr.msra.gmra.mrb[74].mxu1 %v26317_v40 }
 0xe6e   :  { %20108 = vmatprep.mubr.msk.f32.mxu1 %vm22945_vm3, %v22946_v4  ;;  %20126 = vmatpush3.msra.mxu1 %v10822_v52 }
 0xe6f   :  { %21839 = vmatprep.subr.bf16.mxu1 %v28257_v62 }
 0xe71   :  { %20109 = vmatmul.mubr.f32.gmra.mrb[76].mxu1 %v26329_v46 }
 0xe72   :  { %20111 = vmatprep.mubr.msk.f32.mxu1 %vm22945_vm3, %v22946_v4 }
 0xe75   :  { %20112 = vmatmul.mubr.f32.gmra.mrb[78].mxu1 %v26342_v36 }
 0xe76   :  { %20127 = vmatprep.mubr.msk.f32.mxu1 %vm22945_vm3, %v22946_v4 }
 0xe79   :  { %20128 = vmatmul.mubr.f32.vlgmr.msra.gmra.mrb[80].mxu1 %v26310_v33 }
 0xe7a   :  { %21841 = vmatpush3.bf16.xpose.msra.mxu1 %v26394_v47  ;;  %20130 = vmatprep.mubr.msk.f32.mxu1 %vm22945_vm3, %v22946_v4 }
 0xe7b   :  { %20151 = vmatprep.subr.mxu1 %v22946_v4 }
 0xe7d   :  { %20131 = vmatmul.mubr.f32.gmra.mrb[82].mxu1 %v26321_v58 }
 0xe7e   :  { %20133 = vmatprep.mubr.msk.f32.mxu1 %vm22945_vm3, %v22946_v4 }
 0xe81   :  { %20134 = vmatmul.mubr.f32.gmra.mrb[84].mxu1 %v26333_v42 }
 0xe82   :  { %20152 = vmatpush3.xpose.msra.mxu1 %v26413_v24  ;;  %20153 = vmatprep.mubr.msk.f32.mxu1 %vm22945_vm3, %v22946_v4 }
 0xe83   :  { %21842 = vmatprep.subr.bf16.mxu1 %v28257_v62 }
 0xe85   :  { %20154 = vmatmul.mubr.f32.vlgmr.msra.gmra.mrb[86].mxu1 %v11351_v35 }
 0xe86   :  { %21844 = vmatpush3.bf16.xpose.msra.mxu1 %v21843_v45  ;;  %20156 = vmatprep.mubr.msk.f32.mxu1 %vm22945_vm3, %v22946_v4 }
 0xe87   :  { %20166 = vmatprep.subr.mxu1 %v22946_v4 }
 0xe89   :  { %20157 = vmatmul.mubr.f32.gmra.mrb[88].mxu1 %v11361_v17 }
 0xe8a   :  { %20159 = vmatprep.mubr.msk.f32.mxu1 %vm22945_vm3, %v22946_v4 }
 0xe8d   :  { %20160 = vmatmul.mubr.f32.gmra.mrb[90].mxu1 %v11371_v48 }
 0xe8e   :  { %20167 = vmatpush3.xpose.msra.mxu1 %v11396_v14  ;;  %20168 = vmatprep.mubr.msk.f32.mxu1 %vm22945_vm3, %v22946_v4 }
 0xe8f   :  { %21845 = vmatprep.subr.bf16.mxu1 %v28257_v62 }
 0xe91   :  { %20169 = vmatmul.mubr.f32.vlgmr.msra.gmra.mrb[86].mxu1 %v26378_v29 }
 0xe92   :  { %21847 = vmatpush3.bf16.xpose.msra.mxu1 %v21846_v13  ;;  %20171 = vmatprep.mubr.msk.f32.mxu1 %vm22945_vm3, %v22946_v4 }
 0xe93   :  { %20181 = vmatprep.subr.mxu1 %v22946_v4 }
 0xe95   :  { %20172 = vmatmul.mubr.f32.gmra.mrb[88].mxu1 %v26388_v10 }
 0xe96   :  { %20174 = vmatprep.mubr.msk.f32.mxu1 %vm22945_vm3, %v22946_v4 }
 0xe99   :  { %20175 = vmatmul.mubr.f32.gmra.mrb[90].mxu1 %v26406_v9 }
 0xe9a   :  { %20182 = vmatpush3.xpose.msra.mxu1 %v11393_v20  ;;  %20183 = vmatprep.mubr.msk.f32.mxu1 %vm22945_vm3, %v22946_v4 }
 0xe9b   :  { %21848 = vmatprep.subr.bf16.mxu1 %v28257_v62 }
 0xe9d   :  { %20184 = vmatmul.mubr.f32.vlgmr.msra.gmra.mrb[86].mxu1 %v26391_v28 }
 0xe9e   :  { %21850 = vmatpush3.bf16.xpose.msra.mxu1 %v26394_v47  ;;  %20186 = vmatprep.mubr.msk.f32.mxu1 %vm22945_vm3, %v22946_v4 }
 0xe9f   :  { %20196 = vmatprep.subr.mxu1 %v22946_v4 }
 0xea1   :  { %20187 = vmatmul.mubr.f32.gmra.mrb[88].mxu1 %v26404_v54  ;;  %v10283_v54 = vand.u32 4294901760, %v10282_v43 }
 0xea2   :  { %20189 = vmatprep.mubr.msk.f32.mxu1 %vm22945_vm3, %v22946_v4 }
 0xea5   :  { %20190 = vmatmul.mubr.f32.gmra.mrb[90].mxu1 %v11368_v1 }
 0xea6   :  { %20197 = vmatpush3.xpose.msra.mxu1 %v26413_v24  ;;  %20198 = vmatprep.mubr.msk.f32.mxu1 %vm22945_vm3, %v22946_v4 }
 0xea7   :  { %21851 = vmatprep.subr.bf16.mxu1 %v28257_v62 }
 0xea9   :  { %20199 = vmatmul.mubr.f32.vlgmr.msra.gmra.mrb[86].mxu1 %v11349_v12 }
 0xeaa   :  { %21853 = vmatpush3.bf16.xpose.msra.mxu1 %v21852_v26  ;;  %20201 = vmatprep.mubr.msk.f32.mxu1 %vm22945_vm3, %v22946_v4 }
 0xeab   :  { %20211 = vmatprep.subr.mxu1 %v22946_v4 }
 0xead   :  { %20202 = vmatmul.mubr.f32.gmra.mrb[88].mxu1 %v11359_v51 }
 0xeae   :  { %20204 = vmatprep.mubr.msk.f32.mxu1 %vm22945_vm3, %v22946_v4 }
 0xeb1   :  { %20205 = vmatmul.mubr.f32.gmra.mrb[90].mxu1 %v11369_v15 }
 0xeb2   :  { %20212 = vmatpush3.xpose.msra.mxu1 %v11394_v5  ;;  %20213 = vmatprep.mubr.msk.f32.mxu1 %vm22945_vm3, %v22946_v4 }
 0xeb3   :  { %21854 = vmatprep.subr.bf16.mxu1 %v28257_v62 }
 0xeb5   :  { %20214 = vmatmul.mubr.f32.vlgmr.msra.gmra.mrb[86].mxu1 %v26378_v29 }
 0xeb6   :  { %21856 = vmatpush3.bf16.xpose.msra.mxu1 %v26394_v47  ;;  %20216 = vmatprep.mubr.msk.f32.mxu1 %vm22945_vm3, %v22946_v4 }
 0xeb7   :  { %20226 = vmatprep.subr.mxu1 %v22946_v4 }
 0xeb9   :  { %20217 = vmatmul.mubr.f32.gmra.mrb[88].mxu1 %v26388_v10 }
 0xeba   :  { %20219 = vmatprep.mubr.msk.f32.mxu1 %vm22945_vm3, %v22946_v4 }
 0xebd   :  { %20220 = vmatmul.mubr.f32.gmra.mrb[90].mxu1 %v26406_v9 }
 0xebe   :  { %20227 = vmatpush3.xpose.msra.mxu1 %v26413_v24  ;;  %20228 = vmatprep.mubr.msk.f32.mxu1 %vm22945_vm3, %v22946_v4 }
 0xebf   :  { %20327 = vmatprep.subr.mxu1 %v22946_v4 }
 0xec1   :  { %20229 = vmatmul.mubr.f32.vlgmr.msra.gmra.mrb[86].mxu1 %v26378_v29 }
 0xec2   :  { %20231 = vmatprep.mubr.msk.f32.mxu1 %vm22945_vm3, %v22946_v4 }
 0xec5   :  { %20232 = vmatmul.mubr.f32.gmra.mrb[88].mxu1 %v26388_v10 }
 0xec6   :  { %20234 = vmatprep.mubr.msk.f32.mxu1 %vm22945_vm3, %v22946_v4 }
 0xec9   :  { %20235 = vmatmul.mubr.f32.gmra.mrb[90].mxu1 %v26406_v9 }
 0xeca   :  { %20329 = vmatprep.mubr.msk.f32.mxu1 %vm22945_vm3, %v22946_v4 }
 0xf28   :  { %v10157_v32 = vpop.f32.mrb[62].mxu1 }
 0xf29   :  { %v10174_v44 = vsel %vm5591_vm2, %v10157_v32, 0  ;;  %v20008_v37 = vpop.f32.mrb[63].mxu1 }
 0xf2a   :  { %v26510_v29 = vand.u32 4294901760, %v10174_v44 }
 0xf2c   :  { %v26513_v55 = vsub.f32 %v10174_v44, %v26510_v29  ;;  %v10163_v50 = vpop.f32.mrb[64].mxu1 }
 0xf2d   :  { %v10177_v16 = vsel %vm5591_vm2, %v10163_v50, 0  ;;  %v20011_v41 = vpop.f32.mrb[65].mxu1 }
 0xf2e   :  { %v10250_v10 = vand.u32 4294901760, %v26513_v55  ;;  %v26520_v28 = vand.u32 4294901760, %v10177_v16 }
 0xf30   :  { %v10251_v11 = vsub.f32 %v26513_v55, %v10250_v10  ;;  %v10259_v47 = vsub.f32 %v10177_v16, %v26520_v28  ;;  %v10169_v3 = vpop.f32.mrb[66].mxu1 }
 0xf31   :  { %v10180_v6 = vsel %vm5591_vm2, %v10169_v3, 0  ;;  %v20014_v27 = vpop.f32.mrb[67].mxu1 }
 0xf32   :  { %v10252_v9 = vand.u32 4294901760, %v10251_v11  ;;  %v10260_v12 = vand.u32 4294901760, %v10259_v47  ;;  %v26525_v18 = vand.u32 4294901760, %v10180_v6 }
 0xf34   :  { %v10269_v24 = vsub.f32 %v10180_v6, %v26525_v18  ;;  %20018 = vmatmul.mubr.f32.vlgmr.msra.gmra.mrb[50].mxu0 %v10252_v9  ;;  %v26528_v38 = vpop.f32.mrb[68].mxu1  ;;  %v10261_v51 = vsub.f32 %v10259_v47, %v10260_v12 }
 0xf35   :  { %v20085_v1 = vpop.f32.mrb[69].mxu1  ;;  %20020 = vmatprep.mubr.msk.f32.mxu0 %vm22945_vm3, %v22946_v4  ;;  %20027 = vmatpush3.msra.mxu0 %v10283_v54 }
 0xf36   :  { %v10270_v2 = vand.u32 4294901760, %v10269_v24  ;;  %v10262_v56 = vand.u32 4294901760, %v10261_v51  ;;  %20037 = vmatprep.subr.mxu0 %v22946_v4 }
 0xf38   :  { %20021 = vmatmul.mubr.f32.gmra.mrb[52].mxu0 %v10262_v56  ;;  %v26533_v20 = vpop.f32.mrb[70].mxu1  ;;  %v10271_v21 = vsub.f32 %v10269_v24, %v10270_v2 }
 0xf39   :  { %v20088_v15 = vpop.f32.mrb[71].mxu1  ;;  %20023 = vmatprep.mubr.msk.f32.mxu0 %vm22945_vm3, %v22946_v4 }
 0xf3a   :  { %v10272_v35 = vand.u32 4294901760, %v10271_v21 }
 0xf3c   :  { %20024 = vmatmul.mubr.f32.gmra.mrb[54].mxu0 %v10272_v35  ;;  %v26537_v53 = vpop.f32.mrb[72].mxu1 }
 0xf3d   :  { %v20091_v5 = vpop.f32.mrb[73].mxu1  ;;  %20028 = vmatprep.mubr.msk.f32.mxu0 %vm22945_vm3, %v22946_v4 }
 0xf40   :  { %20029 = vmatmul.mubr.f32.vlgmr.msra.gmra.mrb[56].mxu0 %v26510_v29  ;;  %v26542_v45 = vpop.f32.mrb[74].mxu1 }
 0xf41   :  { %v20107_v17 = vpop.f32.mrb[75].mxu1  ;;  %20031 = vmatprep.mubr.msk.f32.mxu0 %vm22945_vm3, %v22946_v4  ;;  %20038 = vmatpush3.msra.mxu0 %v26506_v7  ;;  %v10823_v7 = vsub.f32 %v26348_v31, %v10822_v52 }
 0xf42   :  { %20048 = vmatprep.subr.mxu0 %v22946_v4 }
 0xf44   :  { %20032 = vmatmul.mubr.f32.gmra.mrb[58].mxu0 %v26520_v28  ;;  %v26549_v8 = vpop.f32.mrb[76].mxu1 }
 0xf45   :  { %v20110_v60 = vpop.f32.mrb[77].mxu1  ;;  %20034 = vmatprep.mubr.msk.f32.mxu0 %vm22945_vm3, %v22946_v4 }
 0xf48   :  { %20035 = vmatmul.mubr.f32.gmra.mrb[60].mxu0 %v26525_v18  ;;  %v26554_v48 = vpop.f32.mrb[78].mxu1 }
 0xf49   :  { %v20113_v14 = vpop.f32.mrb[79].mxu1  ;;  %20039 = vmatprep.mubr.msk.f32.mxu0 %vm22945_vm3, %v22946_v4 }
 0xf4c   :  { %20040 = vmatmul.mubr.f32.vlgmr.msra.gmra.mrb[62].mxu0 %v26513_v55  ;;  %v26559_v13 = vpop.f32.mrb[80].mxu1 }
 0xf4d   :  { %v20129_v26 = vpop.f32.mrb[81].mxu1  ;;  %20042 = vmatprep.mubr.msk.f32.mxu0 %vm22945_vm3, %v22946_v4  ;;  %20049 = vmatpush3.msra.mxu0 %v26484_v22 }
 0xf4e   :  { %20059 = vmatprep.subr.mxu0 %v22946_v4 }
 0xf50   :  { %20043 = vmatmul.mubr.f32.gmra.mrb[64].mxu0 %v10259_v47  ;;  %v26565_v63 = vpop.f32.mrb[82].mxu1 }
 0xf51   :  { %v20132_v32 = vpop.f32.mrb[83].mxu1  ;;  %20045 = vmatprep.mubr.msk.f32.mxu0 %vm22945_vm3, %v22946_v4 }
 0xf54   :  { %20046 = vmatmul.mubr.f32.gmra.mrb[66].mxu0 %v10269_v24  ;;  %v26569_v44 = vpop.f32.mrb[84].mxu1 }
 0xf55   :  { %v20135_v37 = vpop.f32.mrb[85].mxu1  ;;  %20050 = vmatprep.mubr.msk.f32.mxu0 %vm22945_vm3, %v22946_v4 }
 0xf58   :  { %20051 = vmatmul.mubr.f32.vlgmr.msra.gmra.mrb[68].mxu0 %v10250_v10 }
 0xf59   :  { %20053 = vmatprep.mubr.msk.f32.mxu0 %vm22945_vm3, %v22946_v4  ;;  %20060 = vmatpush3.msra.mxu0 %v10281_v0  ;;  %v10824_v0 = vand.u32 4294901760, %v10823_v7 }
 0xf5a   :  { %20070 = vmatprep.subr.mxu0 %v22946_v4 }
 0xf5c   :  { %20054 = vmatmul.mubr.f32.gmra.mrb[70].mxu0 %v10260_v12 }
 0xf5d   :  { %20056 = vmatprep.mubr.msk.f32.mxu0 %vm22945_vm3, %v22946_v4 }
 0xf60   :  { %20057 = vmatmul.mubr.f32.gmra.mrb[72].mxu0 %v10270_v2 }
 0xf61   :  { %20061 = vmatprep.mubr.msk.f32.mxu0 %vm22945_vm3, %v22946_v4 }
 0xf64   :  { %20062 = vmatmul.mubr.f32.vlgmr.msra.gmra.mrb[74].mxu0 %v26510_v29 }
 0xf65   :  { %20064 = vmatprep.mubr.msk.f32.mxu0 %vm22945_vm3, %v22946_v4  ;;  %20071 = vmatpush3.msra.mxu0 %v26484_v22 }
 0xf66   :  { %20092 = vmatprep.subr.mxu0 %v22946_v4 }
 0xf68   :  { %20065 = vmatmul.mubr.f32.gmra.mrb[76].mxu0 %v26520_v28 }
 0xf69   :  { %20067 = vmatprep.mubr.msk.f32.mxu0 %vm22945_vm3, %v22946_v4 }
 0xf6c   :  { %20068 = vmatmul.mubr.f32.gmra.mrb[78].mxu0 %v26525_v18 }
 0xf6d   :  { %20072 = vmatprep.mubr.msk.f32.mxu0 %vm22945_vm3, %v22946_v4 }
 0xf70   :  { %20073 = vmatmul.mubr.f32.vlgmr.msra.gmra.mrb[80].mxu0 %v26510_v29 }
 0xf71   :  { %20075 = vmatprep.mubr.msk.f32.mxu0 %vm22945_vm3, %v22946_v4  ;;  %20093 = vmatpush3.msra.mxu0 %v10824_v0 }
 0xf72   :  { %20114 = vmatprep.subr.mxu0 %v22946_v4 }
 0xf74   :  { %20076 = vmatmul.mubr.f32.gmra.mrb[82].mxu0 %v26520_v28 }
 0xf75   :  { %20078 = vmatprep.mubr.msk.f32.mxu0 %vm22945_vm3, %v22946_v4 }
 0xf78   :  { %20079 = vmatmul.mubr.f32.gmra.mrb[84].mxu0 %v26525_v18 }
 0xf79   :  { %20094 = vmatprep.mubr.msk.f32.mxu0 %vm22945_vm3, %v22946_v4 }
 0xf7c   :  { %20095 = vmatmul.mubr.f32.vlgmr.msra.gmra.mrb[86].mxu0 %v26310_v33 }
 0xf7d   :  { %20097 = vmatprep.mubr.msk.f32.mxu0 %vm22945_vm3, %v22946_v4  ;;  %20115 = vmatpush3.msra.mxu0 %v26314_v39 }
 0xf7e   :  { %20136 = vmatprep.subr.mxu0 %v22946_v4 }
 0xf80   :  { %20098 = vmatmul.mubr.f32.gmra.mrb[88].mxu0 %v26321_v58 }
 0xf81   :  { %20100 = vmatprep.mubr.msk.f32.mxu0 %vm22945_vm3, %v22946_v4 }
 0xf84   :  { %20101 = vmatmul.mubr.f32.gmra.mrb[90].mxu0 %v26333_v42 }
 0xf85   :  { %20116 = vmatprep.mubr.msk.f32.mxu0 %vm22945_vm3, %v22946_v4 }
 0xf88   :  { %20117 = vmatmul.mubr.f32.vlgmr.msra.gmra.mrb[92].mxu0 %v10791_v61 }
 0xf89   :  { %20119 = vmatprep.mubr.msk.f32.mxu0 %vm22945_vm3, %v22946_v4  ;;  %20137 = vmatpush3.msra.mxu0 %v26314_v39  ;;  %v26635_v39 = vld [vmem:[%s27805_s1 + $0x368] sm:$0xff] }
 0xf8a   :  { %21857 = vmatprep.subr.bf16.mxu0 %v28257_v62 }
 0xf8c   :  { %20120 = vmatmul.mubr.f32.gmra.mrb[94].mxu0 %v10801_v59 }
 0xf8d   :  { %20122 = vmatprep.mubr.msk.f32.mxu0 %vm22945_vm3, %v22946_v4 }
 0xf90   :  { %20123 = vmatmul.mubr.f32.gmra.mrb[96].mxu0 %v10811_v49 }
 0xf91   :  { %20138 = vmatprep.mubr.msk.f32.mxu0 %vm22945_vm3, %v22946_v4 }
 0xf94   :  { %20139 = vmatmul.mubr.f32.vlgmr.msra.gmra.mrb[98].mxu0 %v26310_v33  ;;  %v11821_v40 = vpop.f32.mrb[86].mxu1  ;;  %v26645_v33 = vld [vmem:[%s27805_s1 + $0x370] sm:$0xff] }
 0xf95   :  { %v22108_v61 = vadd.f32 %v26635_v39, %v11821_v40  ;;  %v20230_v46 = vpop.f32.mrb[87].mxu1  ;;  %20141 = vmatprep.mubr.msk.f32.mxu0 %vm22945_vm3, %v22946_v4 }
 0xf97   :  { %v11837_v59 = vsel %vm8369_vm7, %v22108_v61, -inf }
 0xf98   :  { %20142 = vmatmul.mubr.f32.gmra.mrb[100].mxu0 %v26321_v58  ;;  %11838 = vmax.xlane.f32.xlu1 %v11837_v59  ;;  %v11827_v36 = vpop.f32.mrb[88].mxu1  ;;  %v26655_v58 = vld [vmem:[%s27805_s1 + $0x378] sm:$0x3] }
 0xf99   :  { %v22109_v31 = vadd.f32 %v26645_v33, %v11827_v36  ;;  %v20233_v49 = vpop.f32.mrb[89].mxu1  ;;  %20144 = vmatprep.mubr.msk.f32.mxu0 %vm22945_vm3, %v22946_v4 }
 0xf9b   :  { %v11840_v52 = vsel %vm8369_vm7, %v22109_v31, -inf }
 0xf9c   :  { %20145 = vmatmul.mubr.f32.gmra.mrb[102].mxu0 %v26333_v42  ;;  %11841 = vmax.xlane.f32.xlu0 %v11840_v52  ;;  %v11833_v22 = vpop.f32.mrb[90].mxu1 }
 0xf9d   :  { %v26658_v29 = vadd.f32 %v26655_v58, %v11833_v22  ;;  %v20236_v55 = vpop.f32.mrb[91].mxu1  ;;  %20243 = vmatprep.mubr.msk.f32.mxu0 %vm22945_vm3, %v22946_v4 }
 0xf9f   :  { %v11843_v50 = vsel %vm8376_vm8, %v26658_v29, -inf }
 0xfa0   :  { %11844 = vmax.xlane.f32.xlu0 %v11843_v50 }
0x1007   :  { %v10254_v16 = vpop.f32.mrb[50].mxu0 }
0x1008   :  { %v20019_v42 = vpop.f32.mrb[51].mxu0 }
0x100b   :  { %v10264_v41 = vpop.f32.mrb[52].mxu0 }
0x100c   :  { %v20022_v43 = vpop.f32.mrb[53].mxu0 }
0x100f   :  { %v10274_v10 = vpop.f32.mrb[54].mxu0 }
0x1010   :  { %v20025_v28 = vpop.f32.mrb[55].mxu0 }
0x1013   :  { %v10350_v11 = vpop.f32.mrb[56].mxu0 }
0x1014   :  { %v10351_v47 = vadd.f32 %v10350_v11, %v10254_v16  ;;  %v20030_v3 = vpop.f32.mrb[57].mxu0 }
0x1017   :  { %v10356_v6 = vpop.f32.mrb[58].mxu0 }
0x1018   :  { %v10357_v27 = vadd.f32 %v10356_v6, %v10264_v41  ;;  %v20033_v54 = vpop.f32.mrb[59].mxu0 }
0x101b   :  { %v10362_v9 = vpop.f32.mrb[60].mxu0 }
0x101c   :  { %v10363_v12 = vadd.f32 %v10362_v9, %v10274_v10  ;;  %v20036_v18 = vpop.f32.mrb[61].mxu0 }
0x101f   :  { %v10436_v24 = vpop.f32.mrb[62].mxu0 }
0x1020   :  { %v10437_v51 = vadd.f32 %v10436_v24, %v10351_v47  ;;  %v20041_v1 = vpop.f32.mrb[63].mxu0 }
0x1023   :  { %v10443_v2 = vpop.f32.mrb[64].mxu0 }
0x1024   :  { %v10444_v56 = vadd.f32 %v10443_v2, %v10357_v27  ;;  %v20044_v21 = vpop.f32.mrb[65].mxu0 }
0x1025   :  { %v11839_v15 = vpop.xlane.xlu1 %11838 }
0x1026   :  { %v11846_v35 = vsub.f32 %v22108_v61, %v11839_v15 }
0x1027   :  { %v10450_v5 = vpop.f32.mrb[66].mxu0 }
0x1028   :  { %v11849_v17 = vmul.f32 1.442695, %v11846_v35  ;;  %v10451_v60 = vadd.f32 %v10450_v5, %v10363_v12  ;;  %v20047_v14 = vpop.f32.mrb[67].mxu0 }
0x1029   :  { %v11842_v26 = vpop.xlane.xlu0 %11841 }
0x102a   :  { %22895 = vpow2.f32 %v11849_v17  ;;  %v11847_v32 = vsub.f32 %v22109_v31, %v11842_v26 }
0x102b   :  { %v10524_v37 = vpop.f32.mrb[68].mxu0 }
0x102c   :  { %v11851_v7 = vmul.f32 1.442695, %v11847_v32  ;;  %v10525_v0 = vadd.f32 %v10524_v37, %v10437_v51  ;;  %v20052_v40 = vpop.f32.mrb[69].mxu0 }
0x102e   :  { %22897 = vpow2.f32 %v11851_v7 }
0x102f   :  { %v10532_v46 = vpop.f32.mrb[70].mxu0 }
0x1030   :  { %v10533_v59 = vadd.f32 %v10532_v46, %v10444_v56  ;;  %v20055_v36 = vpop.f32.mrb[71].mxu0 }
0x1033   :  { %v10540_v49 = vpop.f32.mrb[72].mxu0 }
0x1034   :  { %v26664_v52 = vpop.eup %22895  ;;  %v10541_v22 = vadd.f32 %v10540_v49, %v10451_v60  ;;  %v20058_v61 = vpop.f32.mrb[73].mxu0 }
0x1035   :  { %v11855_v55 = vsel %vm8369_vm7, %v26664_v52, 0.0 }
0x1036   :  { %11856 = vadd.xlane.f32.xlu1 %v11855_v55 }
0x1037   :  { %v10614_v50 = vpop.f32.mrb[74].mxu0 }
0x1038   :  { %v26668_v16 = vpop.eup %22897  ;;  %v10615_v31 = vadd.f32 %v10614_v50, %v10525_v0  ;;  %v20063_v42 = vpop.f32.mrb[75].mxu0 }
0x1039   :  { %v11858_v41 = vsel %vm8369_vm7, %v26668_v16, 0.0 }
0x103a   :  { %11859 = vadd.xlane.f32.xlu0 %v11858_v41 }
0x103b   :  { %v10620_v43 = vpop.f32.mrb[76].mxu0 }
0x103c   :  { %v10621_v10 = vadd.f32 %v10620_v43, %v10533_v59  ;;  %v20066_v28 = vpop.f32.mrb[77].mxu0 }
0x103f   :  { %v10626_v11 = vpop.f32.mrb[78].mxu0 }
0x1040   :  { %v10627_v47 = vadd.f32 %v10626_v11, %v10541_v22  ;;  %v20069_v3 = vpop.f32.mrb[79].mxu0 }
0x1043   :  { %v10698_v6 = vpop.f32.mrb[80].mxu0 }
0x1044   :  { %v10699_v27 = vadd.f32 %v10698_v6, %v10615_v31  ;;  %v20074_v54 = vpop.f32.mrb[81].mxu0 }
0x1046   :  { %v10796_v9 = vadd.f32 %v26528_v38, %v10699_v27  ;;  %v11845_v38 = vpop.xlane.xlu0 %11844 }
0x1047   :  { %v10704_v12 = vpop.f32.mrb[82].mxu0  ;;  %11872 = vrot.lane.b32.xlu1 %v25792_v19, %s22939_s3 }
0x1048   :  { %v10705_v18 = vadd.f32 %v10704_v12, %v10621_v10  ;;  %v20077_v24 = vpop.f32.mrb[83].mxu0 }
0x104a   :  { %v10806_v51 = vadd.f32 %v26533_v20, %v10705_v18  ;;  %v11848_v20 = vsub.f32 %v26658_v29, %v11845_v38 }
0x104b   :  { %v10710_v1 = vpop.f32.mrb[84].mxu0 }
0x104c   :  { %v10711_v2 = vadd.f32 %v10710_v1, %v10627_v47  ;;  %v20080_v56 = vpop.f32.mrb[85].mxu0  ;;  %v11853_v0 = vmul.f32 1.442695, %v11848_v20 }
0x104e   :  { %v10816_v21 = vadd.f32 %v26537_v53, %v10711_v2  ;;  %22899 = vpow2.f32 %v11853_v0 }
0x104f   :  { %v10891_v15 = vpop.f32.mrb[86].mxu0 }
0x1050   :  { %v10892_v35 = vadd.f32 %v10891_v15, %v10796_v9  ;;  %v20096_v5 = vpop.f32.mrb[87].mxu0  ;;  %11870 = vrot.lane.b32.xlu0 %v25788_v25, %s22939_s3 }
0x1052   :  { %v10978_v17 = vadd.f32 %v26542_v45, %v10892_v35 }
0x1053   :  { %v10897_v60 = vpop.f32.mrb[88].mxu0 }
0x1054   :  { %v10898_v14 = vadd.f32 %v10897_v60, %v10806_v51  ;;  %v20099_v26 = vpop.f32.mrb[89].mxu0  ;;  %12997 = vrot.lane.b32.xlu0 %v25788_v25, %s22950_s11 }
0x1056   :  { %v10985_v53 = vadd.f32 %v26549_v8, %v10898_v14 }
0x1057   :  { %v10903_v32 = vpop.f32.mrb[90].mxu0 }
0x1058   :  { %v10904_v37 = vadd.f32 %v10903_v32, %v10816_v21  ;;  %v20102_v7 = vpop.f32.mrb[91].mxu0  ;;  %12991 = vrot.lane.b32.xlu0 %v25788_v25, %s22951_s13 }
0x105a   :  { %v10992_v45 = vadd.f32 %v26554_v48, %v10904_v37  ;;  %v26692_v48 = vpop.eup %22899 }
0x105b   :  { %v11065_v40 = vpop.f32.mrb[92].mxu0  ;;  %v11861_v10 = vsel %vm8376_vm8, %v26692_v48, 0.0 }
0x105c   :  { %v11066_v46 = vadd.f32 %v11065_v40, %v10978_v17  ;;  %v20118_v59 = vpop.f32.mrb[93].mxu0  ;;  %13001 = vrot.lane.b32.xlu0 %v25796_v57, %s22950_s11 }
0x105e   :  { %v11156_v29 = vadd.f32 %v26559_v13, %v11066_v46 }
0x105f   :  { %v11073_v8 = vpop.f32.mrb[94].mxu0 }
0x1060   :  { %v11074_v36 = vadd.f32 %v11073_v8, %v10985_v53  ;;  %v20121_v49 = vpop.f32.mrb[95].mxu0 }
0x1062   :  { %v11162_v22 = vadd.f32 %v26565_v63, %v11074_v36 }
0x1063   :  { %v11081_v61 = vpop.f32.mrb[96].mxu0 }
0x1064   :  { %v11082_v55 = vadd.f32 %v11081_v61, %v10992_v45  ;;  %v20124_v50 = vpop.f32.mrb[97].mxu0 }
0x1066   :  { %v11168_v31 = vadd.f32 %v26569_v44, %v11082_v55 }
0x1067   :  { %v11239_v42 = vpop.f32.mrb[98].mxu0 }
0x1068   :  { %v26694_v41 = vadd.f32 %v11239_v42, %v11156_v29  ;;  %v20140_v43 = vpop.f32.mrb[99].mxu0 }
0x106b   :  { %v11245_v13 = vpop.f32.mrb[100].mxu0  ;;  %11862 = vadd.xlane.f32.xlu1 %v11861_v10 }
0x106c   :  { %v26698_v28 = vadd.f32 %v11245_v13, %v11162_v22  ;;  %v20143_v11 = vpop.f32.mrb[101].mxu0 }
0x106f   :  { %v11251_v63 = vpop.f32.mrb[102].mxu0 }
0x1070   :  { %v26700_v47 = vadd.f32 %v11251_v63, %v11168_v31  ;;  %v20146_v3 = vpop.f32.mrb[103].mxu0 }
0x107c   :  { %11874 = vrot.lane.b32.xlu1 %v25796_v57, %s22939_s3 }
0x1080   :  { %12999 = vrot.lane.b32.xlu1 %v25792_v19, %s22950_s11 }
0x1084   :  { %12993 = vrot.lane.b32.xlu1 %v25792_v19, %s22951_s13 }
0x1088   :  { %12995 = vrot.lane.b32.xlu1 %v25796_v57, %s22951_s13 }
0x10c3   :  { %v11857_v44 = vpop.xlane.xlu1 %11856 }
0x10c4   :  { %22901 = vrcp.f32 %v11857_v44  ;;  %v7788_v44 = vld [vmem:[%s27805_s1 + $0x3b8] sm:$0xff] }
0x10c7   :  { %v11860_v6 = vpop.xlane.xlu0 %11859  ;;  %v11873_v27 = vpop.permute.xlu1 %11872 }
0x10c8   :  { %v11893_v9 = vand.u32 4294901760, %v11873_v27  ;;  %22903 = vrcp.f32 %v11860_v6  ;;  %v12457_v6 = vand.u32 4294901760, %v7788_v44 }
0x10ca   :  { %v26722_v5 = vsub.f32 %v11873_v27, %v11893_v9  ;;  %v26823_v27 = vsub.f32 %v7788_v44, %v12457_v6  ;;  %20328 = vmatpush3.msra.mxu1 %v12457_v6 }
0x10cb   :  { %v11871_v54 = vpop.permute.xlu0 %11870  ;;  %20349 = vmatprep.subr.mxu1 %v22946_v4 }
0x10cc   :  { %v11890_v12 = vand.u32 4294901760, %v11871_v54  ;;  %v11997_v60 = vand.u32 4294901760, %v26722_v5 }
0x10ce   :  { %v26710_v18 = vpack.c.bf16 %v11893_v9, %v11890_v12  ;;  %v22902_v24 = vpop.eup %22901  ;;  %v26719_v15 = vsub.f32 %v11871_v54, %v11890_v12  ;;  %v11998_v53 = vsub.f32 %v26722_v5, %v11997_v60  ;;  %v12555_v54 = vand.u32 4294901760, %v26823_v27 }
0x10cf   :  { %v11867_v51 = vmul.f32 %v22902_v24, %v26664_v52 }
0x10d0   :  { %21859 = vmatpush3.bf16.msra.mxu0 %v26710_v18  ;;  %v11990_v52 = vand.u32 4294901760, %v26719_v15  ;;  %v11999_v40 = vand.u32 4294901760, %v11998_v53  ;;  %v12556_v9 = vsub.f32 %v26823_v27, %v12555_v54 }
0x10d1   :  { %20241 = vmatprep.subr.mxu0 %v22946_v4  ;;  %v11879_v2 = vsel %vm8369_vm7, %v11867_v51, 0 }
0x10d2   :  { %v22904_v1 = vpop.eup %22903  ;;  %v26717_v21 = vand.u32 4294901760, %v11879_v2  ;;  %v11991_v26 = vsub.f32 %v26719_v15, %v11990_v52  ;;  %v21870_v3 = vpack.c.bf16 %v11997_v60, %v11990_v52  ;;  %v12557_v12 = vand.u32 4294901760, %v12556_v9 }
0x10d3   :  { %v11868_v56 = vmul.f32 %v22904_v1, %v26668_v16 }
0x10d4   :  { %v26725_v38 = vsub.f32 %v11879_v2, %v26717_v21  ;;  %v11992_v7 = vand.u32 4294901760, %v11991_v26 }
0x10d5   :  { %v11882_v35 = vsel %vm8369_vm7, %v11868_v56, 0 }
0x10d6   :  { %v26727_v17 = vand.u32 4294901760, %v11882_v35  ;;  %v11959_v14 = vand.u32 4294901760, %v26725_v38  ;;  %v21861_v36 = vpack.c.bf16 %v11999_v40, %v11992_v7 }
0x10d8   :  { %v26733_v16 = vsub.f32 %v11882_v35, %v26727_v17  ;;  %v11960_v32 = vsub.f32 %v26725_v38, %v11959_v14 }
0x10da   :  { %v11969_v37 = vand.u32 4294901760, %v26733_v16  ;;  %v11961_v59 = vand.u32 4294901760, %v11960_v32 }
0x10dc   :  { %v11970_v29 = vsub.f32 %v26733_v16, %v11969_v37 }
0x10de   :  { %v11971_v61 = vand.u32 4294901760, %v11970_v29 }
0x10f8   :  { %v11863_v20 = vpop.xlane.xlu1 %11862 }
0x10f9   :  { %22905 = vrcp.f32 %v11863_v20 }
0x10fc   :  { %v11875_v0 = vpop.permute.xlu1 %11874 }
0x10fd   :  { %v11887_v45 = vsel %vm6657_vm5, %v11875_v0, 0 }
0x10fe   :  { %v26746_v46 = vand.u32 4294901760, %v11887_v45 }
0x1100   :  { %v12003_v8 = vsub.f32 %v11887_v45, %v26746_v46  ;;  %20242 = vmatpush3.msra.mxu0 %v26746_v46  ;;  %v12998_v45 = vpop.permute.xlu0 %12997 }
0x1101   :  { %20244 = vmatmul.mubr.f32.vlgmr.msra.gmra.mrb[104].mxu0 %v11961_v59  ;;  %21860 = vmatprep.subr.bf16.mxu0 %v28257_v62 }
0x1102   :  { %v12004_v49 = vand.u32 4294901760, %v12003_v8  ;;  %21862 = vmatpush3.bf16.msra.mxu0 %v21861_v36  ;;  %20246 = vmatprep.mubr.msk.f32.mxu0 %vm22945_vm3, %v22946_v4 }
0x1103   :  { %v22906_v22 = vpop.eup %22905  ;;  %20256 = vmatprep.subr.mxu0 %v22946_v4 }
0x1104   :  { %v11869_v55 = vmul.f32 %v22906_v22, %v26692_v48  ;;  %v12005_v50 = vsub.f32 %v12003_v8, %v12004_v49  ;;  %v21864_v48 = vpack.c.bf16 %v26722_v5, %v26719_v15  ;;  %v12992_v59 = vpop.permute.xlu0 %12991 }
0x1105   :  { %20247 = vmatmul.mubr.f32.gmra.mrb[106].mxu0 %v11971_v61 }
0x1106   :  { %v12006_v31 = vand.u32 4294901760, %v12005_v50  ;;  %20249 = vmatprep.mubr.msk.f32.mxu0 %vm22945_vm3, %v22946_v4  ;;  %v11885_v42 = vsel %vm8369_vm7, %v11869_v55, 0 }
0x1107   :  { %v11977_v43 = vand.u32 4294901760, %v11885_v42 }
0x1108   :  { %20257 = vmatpush3.msra.mxu0 %v12006_v31 }
0x1109   :  { %21863 = vmatprep.subr.bf16.mxu0 %v28257_v62  ;;  %v11978_v10 = vsub.f32 %v11885_v42, %v11977_v43 }
0x110b   :  { %v11979_v13 = vand.u32 4294901760, %v11978_v10 }
0x110d   :  { %v11980_v11 = vsub.f32 %v11978_v10, %v11979_v13 }
0x110f   :  { %v11981_v63 = vand.u32 4294901760, %v11980_v11 }
0x1111   :  { %20250 = vmatmul.mubr.f32.gmra.mrb[108].mxu0 %v11981_v63 }
0x1112   :  { %20258 = vmatprep.mubr.msk.f32.mxu0 %vm22945_vm3, %v22946_v4 }
0x1115   :  { %20259 = vmatmul.mubr.f32.vlgmr.msra.gmra.mrb[104].mxu0 %v26717_v21 }
0x1116   :  { %21865 = vmatpush3.bf16.msra.mxu0 %v21864_v48  ;;  %20261 = vmatprep.mubr.msk.f32.mxu0 %vm22945_vm3, %v22946_v4 }
0x1117   :  { %20271 = vmatprep.subr.mxu0 %v22946_v4 }
0x1119   :  { %20262 = vmatmul.mubr.f32.gmra.mrb[106].mxu0 %v26727_v17 }
0x111a   :  { %20272 = vmatpush3.msra.mxu0 %v12003_v8  ;;  %20264 = vmatprep.mubr.msk.f32.mxu0 %vm22945_vm3, %v22946_v4  ;;  %v13009_v8 = vsel %vm5591_vm2, %v12998_v45, 0 }
0x111b   :  { %21866 = vmatprep.subr.bf16.mxu0 %v28257_v62  ;;  %v13016_v61 = vand.u32 4294901760, %v13009_v8 }
0x111d   :  { %20265 = vmatmul.mubr.f32.gmra.mrb[108].mxu0 %v11977_v43 }
0x111e   :  { %20273 = vmatprep.mubr.msk.f32.mxu0 %vm22945_vm3, %v22946_v4 }
0x1121   :  { %20274 = vmatmul.mubr.f32.vlgmr.msra.gmra.mrb[104].mxu0 %v26725_v38 }
0x1122   :  { %21868 = vmatpush3.bf16.msra.mxu0 %v26710_v18  ;;  %20276 = vmatprep.mubr.msk.f32.mxu0 %vm22945_vm3, %v22946_v4 }
0x1123   :  { %20286 = vmatprep.subr.mxu0 %v22946_v4 }
0x1125   :  { %20277 = vmatmul.mubr.f32.gmra.mrb[106].mxu0 %v26733_v16 }
0x1126   :  { %20287 = vmatpush3.msra.mxu0 %v26746_v46  ;;  %20279 = vmatprep.mubr.msk.f32.mxu0 %vm22945_vm3, %v22946_v4 }
0x1127   :  { %21869 = vmatprep.subr.bf16.mxu0 %v28257_v62 }
0x1129   :  { %20280 = vmatmul.mubr.f32.gmra.mrb[108].mxu0 %v11978_v10  ;;  %v13002_v10 = vpop.permute.xlu0 %13001 }
0x112a   :  { %20288 = vmatprep.mubr.msk.f32.mxu0 %vm22945_vm3, %v22946_v4  ;;  %v13013_v44 = vsel %vm5591_vm2, %v13002_v10, 0 }
0x112d   :  { %20289 = vmatmul.mubr.f32.vlgmr.msra.gmra.mrb[104].mxu0 %v11959_v14 }
0x112e   :  { %21871 = vmatpush3.bf16.msra.mxu0 %v21870_v3  ;;  %20291 = vmatprep.mubr.msk.f32.mxu0 %vm22945_vm3, %v22946_v4 }
0x112f   :  { %20301 = vmatprep.subr.mxu0 %v22946_v4 }
0x1131   :  { %20292 = vmatmul.mubr.f32.gmra.mrb[106].mxu0 %v11969_v37 }
0x1132   :  { %20302 = vmatpush3.msra.mxu0 %v12004_v49  ;;  %20294 = vmatprep.mubr.msk.f32.mxu0 %vm22945_vm3, %v22946_v4  ;;  %v13003_v49 = vsel %vm5591_vm2, %v12992_v59, 0 }
0x1133   :  { %21872 = vmatprep.subr.bf16.mxu0 %v28257_v62  ;;  %v26877_v55 = vand.u32 4294901760, %v13003_v49 }
0x1135   :  { %20295 = vmatmul.mubr.f32.gmra.mrb[108].mxu0 %v11979_v13  ;;  %v26890_v13 = vsub.f32 %v13003_v49, %v26877_v55 }
0x1136   :  { %20303 = vmatprep.mubr.msk.f32.mxu0 %vm22945_vm3, %v22946_v4 }
0x1139   :  { %20304 = vmatmul.mubr.f32.vlgmr.msra.gmra.mrb[104].mxu0 %v26717_v21 }
0x113a   :  { %21874 = vmatpush3.bf16.msra.mxu0 %v26710_v18  ;;  %20306 = vmatprep.mubr.msk.f32.mxu0 %vm22945_vm3, %v22946_v4 }
0x113b   :  { %20316 = vmatprep.subr.mxu0 %v22946_v4 }
0x113d   :  { %20307 = vmatmul.mubr.f32.gmra.mrb[106].mxu0 %v26727_v17 }
0x113e   :  { %20317 = vmatpush3.msra.mxu0 %v26746_v46  ;;  %20309 = vmatprep.mubr.msk.f32.mxu0 %vm22945_vm3, %v22946_v4  ;;  %v13000_v46 = vpop.permute.xlu1 %12999 }
0x113f   :  { %20338 = vmatprep.subr.mxu0 %v22946_v4  ;;  %v13011_v29 = vsel %vm5591_vm2, %v13000_v46, 0 }
0x1140   :  { %v13019_v22 = vand.u32 4294901760, %v13011_v29 }
0x1141   :  { %20310 = vmatmul.mubr.f32.gmra.mrb[108].mxu0 %v11977_v43 }
0x1142   :  { %20318 = vmatprep.mubr.msk.f32.mxu0 %vm22945_vm3, %v22946_v4  ;;  %v12994_v36 = vpop.permute.xlu1 %12993  ;;  %v26879_v50 = vsub.f32 %v13011_v29, %v13019_v22  ;;  %v26894_v63 = vpack.c.bf16 %v13019_v22, %v13016_v61 }
0x1143   :  { %v13005_v31 = vsel %vm5591_vm2, %v12994_v36, 0 }
0x1144   :  { %v26892_v11 = vand.u32 4294901760, %v13005_v31  ;;  %v13123_v48 = vand.u32 4294901760, %v26879_v50 }
0x1145   :  { %20319 = vmatmul.mubr.f32.vlgmr.msra.gmra.mrb[104].mxu0 %v26717_v21 }
0x1146   :  { %20321 = vmatprep.mubr.msk.f32.mxu0 %vm22945_vm3, %v22946_v4  ;;  %20339 = vmatpush3.msra.mxu0 %v12557_v12  ;;  %v12996_v42 = vpop.permute.xlu1 %12995  ;;  %v26914_v12 = vand.u32 4294901760, %v13013_v44 }
0x1147   :  { %20360 = vmatprep.subr.mxu0 %v22946_v4  ;;  %v13007_v3 = vsel %vm5591_vm2, %v12996_v42, 0 }
0x1148   :  { %v26909_v9 = vand.u32 4294901760, %v13007_v3 }
0x1149   :  { %20322 = vmatmul.mubr.f32.gmra.mrb[106].mxu0 %v26727_v17 }
0x114a   :  { %20324 = vmatprep.mubr.msk.f32.mxu0 %vm22945_vm3, %v22946_v4 }
0x114d   :  { %20325 = vmatmul.mubr.f32.gmra.mrb[108].mxu0 %v11977_v43  ;;  %v26883_v43 = vsub.f32 %v13009_v8, %v13016_v61 }
0x114e   :  { %20340 = vmatprep.mubr.msk.f32.mxu0 %vm22945_vm3, %v22946_v4 }
0x1218   :  { %v12431_v18 = vpop.f32.mrb[104].mxu0 }
0x1219   :  { %v12448_v24 = vsel %vm5591_vm2, %v12431_v18, 0  ;;  %v20320_v51 = vpop.f32.mrb[105].mxu0  ;;  %v13124_v18 = vsub.f32 %v26879_v50, %v13123_v48 }
0x121a   :  { %v26830_v1 = vand.u32 4294901760, %v12448_v24 }
0x121c   :  { %v12523_v2 = vsub.f32 %v12448_v24, %v26830_v1  ;;  %v12437_v56 = vpop.f32.mrb[106].mxu0  ;;  %20341 = vmatmul.mubr.f32.vlgmr.msra.gmra.mrb[110].mxu0 %v26830_v1 }
0x121d   :  { %v12451_v21 = vsel %vm5591_vm2, %v12437_v56, 0  ;;  %v20323_v15 = vpop.f32.mrb[107].mxu0  ;;  %20343 = vmatprep.mubr.msk.f32.mxu0 %vm22945_vm3, %v22946_v4  ;;  %20361 = vmatpush3.msra.mxu0 %v12457_v6  ;;  %v13129_v56 = vsub.f32 %v13013_v44, %v26914_v12 }
0x121e   :  { %v12524_v35 = vand.u32 4294901760, %v12523_v2  ;;  %v26837_v5 = vand.u32 4294901760, %v12451_v21  ;;  %20382 = vmatprep.subr.mxu0 %v22946_v4 }
0x1220   :  { %v12525_v38 = vsub.f32 %v12523_v2, %v12524_v35  ;;  %v12533_v17 = vsub.f32 %v12451_v21, %v26837_v5  ;;  %v12443_v52 = vpop.f32.mrb[108].mxu0  ;;  %20344 = vmatmul.mubr.f32.gmra.mrb[112].mxu0 %v26837_v5  ;;  %v13125_v21 = vand.u32 4294901760, %v13124_v18 }
0x1221   :  { %v12454_v60 = vsel %vm5591_vm2, %v12443_v52, 0  ;;  %v20326_v14 = vpop.f32.mrb[109].mxu0  ;;  %20346 = vmatprep.mubr.msk.f32.mxu0 %vm22945_vm3, %v22946_v4 }
0x1222   :  { %v12526_v16 = vand.u32 4294901760, %v12525_v38  ;;  %v12534_v26 = vand.u32 4294901760, %v12533_v17  ;;  %v26845_v20 = vand.u32 4294901760, %v12454_v60 }
0x1224   :  { %v12543_v53 = vsub.f32 %v12454_v60, %v26845_v20  ;;  %20330 = vmatmul.mubr.f32.vlgmr.msra.gmra.mrb[92].mxu1 %v12526_v16  ;;  %20347 = vmatmul.mubr.f32.gmra.mrb[114].mxu0 %v26845_v20  ;;  %v12535_v32 = vsub.f32 %v12533_v17, %v12534_v26 }
0x1225   :  { %20332 = vmatprep.mubr.msk.f32.mxu1 %vm22945_vm3, %v22946_v4  ;;  %20362 = vmatprep.mubr.msk.f32.mxu0 %vm22945_vm3, %v22946_v4 }
0x1226   :  { %v12544_v37 = vand.u32 4294901760, %v12543_v53  ;;  %v12536_v7 = vand.u32 4294901760, %v12535_v32  ;;  %20350 = vmatpush3.msra.mxu1 %v26823_v27  ;;  %v13085_v27 = vand.u32 4294901760, %v26890_v13 }
0x1227   :  { %20371 = vmatprep.subr.mxu1 %v22946_v4 }
0x1228   :  { %20333 = vmatmul.mubr.f32.gmra.mrb[94].mxu1 %v12536_v7  ;;  %20363 = vmatmul.mubr.f32.vlgmr.msra.gmra.mrb[116].mxu0 %v12524_v35  ;;  %v12545_v0 = vsub.f32 %v12543_v53, %v12544_v37  ;;  %v13086_v51 = vsub.f32 %v26890_v13, %v13085_v27 }
0x1229   :  { %20335 = vmatprep.mubr.msk.f32.mxu1 %vm22945_vm3, %v22946_v4  ;;  %20365 = vmatprep.mubr.msk.f32.mxu0 %vm22945_vm3, %v22946_v4 }
0x122a   :  { %v12546_v40 = vand.u32 4294901760, %v12545_v0  ;;  %20383 = vmatpush3.msra.mxu0 %v12457_v6  ;;  %v13116_v6 = vand.u32 4294901760, %v26883_v43  ;;  %v13087_v35 = vand.u32 4294901760, %v13086_v51 }
0x122b   :  { %21893 = vmatprep.subr.bf16.mxu0 %v28257_v62 }
0x122c   :  { %20336 = vmatmul.mubr.f32.gmra.mrb[96].mxu1 %v12546_v40  ;;  %20366 = vmatmul.mubr.f32.gmra.mrb[118].mxu0 %v12534_v26  ;;  %v13117_v24 = vsub.f32 %v26883_v43, %v13116_v6  ;;  %v21888_v32 = vpack.c.bf16 %v13123_v48, %v13116_v6 }
0x122d   :  { %20351 = vmatprep.mubr.msk.f32.mxu1 %vm22945_vm3, %v22946_v4  ;;  %20368 = vmatprep.mubr.msk.f32.mxu0 %vm22945_vm3, %v22946_v4 }
0x122e   :  { %v13118_v15 = vand.u32 4294901760, %v13117_v24 }
0x1230   :  { %20352 = vmatmul.mubr.f32.vlgmr.msra.gmra.mrb[98].mxu1 %v12523_v2  ;;  %20369 = vmatmul.mubr.f32.gmra.mrb[120].mxu0 %v12544_v37  ;;  %v13104_v2 = vsub.f32 %v13007_v3, %v26909_v9  ;;  %v21879_v52 = vpack.c.bf16 %v13125_v21, %v13118_v15 }
0x1231   :  { %20354 = vmatprep.mubr.msk.f32.mxu1 %vm22945_vm3, %v22946_v4  ;;  %20384 = vmatprep.mubr.msk.f32.mxu0 %vm22945_vm3, %v22946_v4 }
0x1232   :  { %20372 = vmatpush3.msra.mxu1 %v12555_v54  ;;  %v26907_v54 = vsub.f32 %v13005_v31, %v26892_v11 }
0x1233   :  { %21875 = vmatprep.subr.bf16.mxu1 %v28257_v62 }
0x1234   :  { %20355 = vmatmul.mubr.f32.gmra.mrb[100].mxu1 %v12533_v17  ;;  %20385 = vmatmul.mubr.f32.vlgmr.msra.gmra.mrb[122].mxu0 %v26830_v1  ;;  %v13130_v17 = vand.u32 4294901760, %v13129_v56 }
0x1235   :  { %20357 = vmatprep.mubr.msk.f32.mxu1 %vm22945_vm3, %v22946_v4  ;;  %20387 = vmatprep.mubr.msk.f32.mxu0 %vm22945_vm3, %v22946_v4 }
0x1236   :  { %v13131_v16 = vsub.f32 %v13129_v56, %v13130_v17 }
0x1238   :  { %20358 = vmatmul.mubr.f32.gmra.mrb[102].mxu1 %v12543_v53  ;;  %20388 = vmatmul.mubr.f32.gmra.mrb[124].mxu0 %v26837_v5  ;;  %v21882_v53 = vpack.c.bf16 %v26879_v50, %v26883_v43 }
0x1239   :  { %20373 = vmatprep.mubr.msk.f32.mxu1 %vm22945_vm3, %v22946_v4  ;;  %20390 = vmatprep.mubr.msk.f32.mxu0 %vm22945_vm3, %v22946_v4 }
0x123c   :  { %20374 = vmatmul.mubr.f32.vlgmr.msra.gmra.mrb[104].mxu1 %v26830_v1  ;;  %20391 = vmatmul.mubr.f32.gmra.mrb[126].mxu0 %v26845_v20  ;;  %v13095_v1 = vand.u32 4294901760, %v26907_v54 }
0x123d   :  { %21877 = vmatpush3.bf16.xpose.msra.mxu1 %v26894_v63  ;;  %20376 = vmatprep.mubr.msk.f32.mxu1 %vm22945_vm3, %v22946_v4 }
0x123e   :  { %20397 = vmatprep.subr.mxu1 %v22946_v4  ;;  %20489 = vmatprep.mubr.msk.f32.mxu0 %vm22945_vm3, %v22946_v4  ;;  %v13096_v38 = vsub.f32 %v26907_v54, %v13095_v1 }
0x1240   :  { %20377 = vmatmul.mubr.f32.gmra.mrb[106].mxu1 %v26837_v5  ;;  %v13105_v5 = vand.u32 4294901760, %v13104_v2  ;;  %v13097_v60 = vand.u32 4294901760, %v13096_v38 }
0x1241   :  { %20379 = vmatprep.mubr.msk.f32.mxu1 %vm22945_vm3, %v22946_v4 }
0x1242   :  { %v13106_v14 = vsub.f32 %v13104_v2, %v13105_v5 }
0x1244   :  { %20380 = vmatmul.mubr.f32.gmra.mrb[108].mxu1 %v26845_v20  ;;  %v13107_v26 = vand.u32 4294901760, %v13106_v14  ;;  %v13132_v20 = vand.u32 4294901760, %v13131_v16 }
0x1245   :  { %20398 = vmatpush3.xpose.msra.mxu1 %v26914_v12  ;;  %20399 = vmatprep.mubr.msk.f32.mxu1 %vm22945_vm3, %v22946_v4 }
0x1246   :  { %21878 = vmatprep.subr.bf16.mxu1 %v28257_v62 }
0x1248   :  { %20400 = vmatmul.mubr.f32.vlgmr.msra.gmra.mrb[110].mxu1 %v13087_v35 }
0x1249   :  { %21880 = vmatpush3.bf16.xpose.msra.mxu1 %v21879_v52  ;;  %20402 = vmatprep.mubr.msk.f32.mxu1 %vm22945_vm3, %v22946_v4 }
0x124a   :  { %20412 = vmatprep.subr.mxu1 %v22946_v4 }
0x124c   :  { %20403 = vmatmul.mubr.f32.gmra.mrb[112].mxu1 %v13097_v60 }
0x124d   :  { %20405 = vmatprep.mubr.msk.f32.mxu1 %vm22945_vm3, %v22946_v4 }
0x1250   :  { %20406 = vmatmul.mubr.f32.gmra.mrb[114].mxu1 %v13107_v26 }
0x1251   :  { %20413 = vmatpush3.xpose.msra.mxu1 %v13132_v20  ;;  %20414 = vmatprep.mubr.msk.f32.mxu1 %vm22945_vm3, %v22946_v4 }
0x1252   :  { %21881 = vmatprep.subr.bf16.mxu1 %v28257_v62 }
0x1254   :  { %20415 = vmatmul.mubr.f32.vlgmr.msra.gmra.mrb[110].mxu1 %v26877_v55 }
0x1255   :  { %21883 = vmatpush3.bf16.xpose.msra.mxu1 %v21882_v53  ;;  %20417 = vmatprep.mubr.msk.f32.mxu1 %vm22945_vm3, %v22946_v4 }
0x1256   :  { %20427 = vmatprep.subr.mxu1 %v22946_v4 }
0x1258   :  { %20418 = vmatmul.mubr.f32.gmra.mrb[112].mxu1 %v26892_v11 }
0x1259   :  { %20420 = vmatprep.mubr.msk.f32.mxu1 %vm22945_vm3, %v22946_v4 }
0x125c   :  { %20421 = vmatmul.mubr.f32.gmra.mrb[114].mxu1 %v26909_v9 }
0x125d   :  { %20428 = vmatpush3.xpose.msra.mxu1 %v13129_v56  ;;  %20429 = vmatprep.mubr.msk.f32.mxu1 %vm22945_vm3, %v22946_v4 }
0x125e   :  { %21884 = vmatprep.subr.bf16.mxu1 %v28257_v62 }
0x1260   :  { %20430 = vmatmul.mubr.f32.vlgmr.msra.gmra.mrb[110].mxu1 %v26890_v13 }
0x1261   :  { %21886 = vmatpush3.bf16.xpose.msra.mxu1 %v26894_v63  ;;  %20432 = vmatprep.mubr.msk.f32.mxu1 %vm22945_vm3, %v22946_v4 }
0x1262   :  { %20442 = vmatprep.subr.mxu1 %v22946_v4 }
0x1264   :  { %20433 = vmatmul.mubr.f32.gmra.mrb[112].mxu1 %v26907_v54 }
0x1265   :  { %20435 = vmatprep.mubr.msk.f32.mxu1 %vm22945_vm3, %v22946_v4 }
0x1268   :  { %20436 = vmatmul.mubr.f32.gmra.mrb[114].mxu1 %v13104_v2 }
0x1269   :  { %20443 = vmatpush3.xpose.msra.mxu1 %v26914_v12  ;;  %20444 = vmatprep.mubr.msk.f32.mxu1 %vm22945_vm3, %v22946_v4 }
0x126a   :  { %21887 = vmatprep.subr.bf16.mxu1 %v28257_v62 }
0x126c   :  { %20445 = vmatmul.mubr.f32.vlgmr.msra.gmra.mrb[110].mxu1 %v13085_v27 }
0x126d   :  { %21889 = vmatpush3.bf16.xpose.msra.mxu1 %v21888_v32  ;;  %20447 = vmatprep.mubr.msk.f32.mxu1 %vm22945_vm3, %v22946_v4 }
0x126e   :  { %20457 = vmatprep.subr.mxu1 %v22946_v4 }
0x1270   :  { %20448 = vmatmul.mubr.f32.gmra.mrb[112].mxu1 %v13095_v1 }
0x1271   :  { %20450 = vmatprep.mubr.msk.f32.mxu1 %vm22945_vm3, %v22946_v4 }
0x1274   :  { %20451 = vmatmul.mubr.f32.gmra.mrb[114].mxu1 %v13105_v5 }
0x1275   :  { %20458 = vmatpush3.xpose.msra.mxu1 %v13130_v17  ;;  %20459 = vmatprep.mubr.msk.f32.mxu1 %vm22945_vm3, %v22946_v4 }
0x1276   :  { %21890 = vmatprep.subr.bf16.mxu1 %v28257_v62 }
0x1278   :  { %20460 = vmatmul.mubr.f32.vlgmr.msra.gmra.mrb[110].mxu1 %v26877_v55 }
0x1279   :  { %21892 = vmatpush3.bf16.xpose.msra.mxu1 %v26894_v63  ;;  %20462 = vmatprep.mubr.msk.f32.mxu1 %vm22945_vm3, %v22946_v4 }
0x127a   :  { %20472 = vmatprep.subr.mxu1 %v22946_v4 }
0x127c   :  { %20463 = vmatmul.mubr.f32.gmra.mrb[112].mxu1 %v26892_v11 }
0x127d   :  { %20465 = vmatprep.mubr.msk.f32.mxu1 %vm22945_vm3, %v22946_v4 }
0x1280   :  { %20466 = vmatmul.mubr.f32.gmra.mrb[114].mxu1 %v26909_v9 }
0x1281   :  { %20473 = vmatpush3.xpose.msra.mxu1 %v26914_v12  ;;  %20474 = vmatprep.mubr.msk.f32.mxu1 %vm22945_vm3, %v22946_v4 }
0x1282   :  { %20573 = vmatprep.subr.mxu1 %v22946_v4 }
0x1284   :  { %20475 = vmatmul.mubr.f32.vlgmr.msra.gmra.mrb[110].mxu1 %v26877_v55 }
0x1285   :  { %20477 = vmatprep.mubr.msk.f32.mxu1 %vm22945_vm3, %v22946_v4 }
0x1288   :  { %20478 = vmatmul.mubr.f32.gmra.mrb[112].mxu1 %v26892_v11 }
0x1289   :  { %20480 = vmatprep.mubr.msk.f32.mxu1 %vm22945_vm3, %v22946_v4 }
0x128c   :  { %20481 = vmatmul.mubr.f32.gmra.mrb[114].mxu1 %v26909_v9 }
0x128d   :  { %20575 = vmatprep.mubr.msk.f32.mxu1 %vm22945_vm3, %v22946_v4 }
0x12ef   :  { %v12624_v37 = vpop.f32.mrb[110].mxu0 }
0x12f0   :  { %v20342_v7 = vpop.f32.mrb[111].mxu0 }
0x12f3   :  { %v12630_v0 = vpop.f32.mrb[112].mxu0 }
0x12f4   :  { %v20345_v45 = vpop.f32.mrb[113].mxu0 }
0x12f7   :  { %v12528_v40 = vpop.f32.mrb[92].mxu1  ;;  %v12636_v46 = vpop.f32.mrb[114].mxu0 }
0x12f8   :  { %v12625_v59 = vadd.f32 %v12624_v37, %v12528_v40  ;;  %v20331_v29 = vpop.f32.mrb[93].mxu1  ;;  %v20348_v8 = vpop.f32.mrb[115].mxu0 }
0x12fb   :  { %v12538_v36 = vpop.f32.mrb[94].mxu1  ;;  %v12798_v49 = vpop.f32.mrb[116].mxu0 }
0x12fc   :  { %v12631_v22 = vadd.f32 %v12630_v0, %v12538_v36  ;;  %v20334_v61 = vpop.f32.mrb[95].mxu1  ;;  %v20364_v55 = vpop.f32.mrb[117].mxu0 }
0x12ff   :  { %v12548_v50 = vpop.f32.mrb[96].mxu1  ;;  %v12806_v31 = vpop.f32.mrb[118].mxu0 }
0x1300   :  { %v12637_v42 = vadd.f32 %v12636_v46, %v12548_v50  ;;  %v20337_v43 = vpop.f32.mrb[97].mxu1  ;;  %v20367_v10 = vpop.f32.mrb[119].mxu0 }
0x1303   :  { %v12710_v13 = vpop.f32.mrb[98].mxu1  ;;  %v12814_v11 = vpop.f32.mrb[120].mxu0 }
0x1304   :  { %v12711_v63 = vadd.f32 %v12710_v13, %v12625_v59  ;;  %v20353_v48 = vpop.f32.mrb[99].mxu1  ;;  %v20370_v3 = vpop.f32.mrb[121].mxu0 }
0x1306   :  { %v12799_v44 = vadd.f32 %v12798_v49, %v12711_v63 }
0x1307   :  { %v12717_v6 = vpop.f32.mrb[100].mxu1  ;;  %v12972_v27 = vpop.f32.mrb[122].mxu0 }
0x1308   :  { %v12718_v54 = vadd.f32 %v12717_v6, %v12631_v22  ;;  %v20356_v9 = vpop.f32.mrb[101].mxu1  ;;  %v20386_v12 = vpop.f32.mrb[123].mxu0 }
0x130a   :  { %v12807_v18 = vadd.f32 %v12806_v31, %v12718_v54 }
0x130b   :  { %v12724_v24 = vpop.f32.mrb[102].mxu1  ;;  %v12978_v51 = vpop.f32.mrb[124].mxu0 }
0x130c   :  { %v12725_v1 = vadd.f32 %v12724_v24, %v12637_v42  ;;  %v20359_v2 = vpop.f32.mrb[103].mxu1  ;;  %v20389_v56 = vpop.f32.mrb[125].mxu0 }
0x130e   :  { %v12815_v21 = vadd.f32 %v12814_v11, %v12725_v1 }
0x130f   :  { %v12888_v15 = vpop.f32.mrb[104].mxu1  ;;  %v12984_v35 = vpop.f32.mrb[126].mxu0 }
0x1310   :  { %v12889_v5 = vadd.f32 %v12888_v15, %v12799_v44  ;;  %v20375_v38 = vpop.f32.mrb[105].mxu1  ;;  %v20392_v17 = vpop.f32.mrb[127].mxu0 }
0x1312   :  { %v12973_v52 = vadd.f32 %v12972_v27, %v12889_v5 }
0x1313   :  { %v12894_v60 = vpop.f32.mrb[106].mxu1 }
0x1314   :  { %v27003_v14 = vadd.f32 %v12973_v52, %v26694_v41  ;;  %v12895_v16 = vadd.f32 %v12894_v60, %v12807_v18  ;;  %v20378_v26 = vpop.f32.mrb[107].mxu1 }
0x1316   :  { %v12979_v20 = vadd.f32 %v12978_v51, %v12895_v16 }
0x1317   :  { %v12900_v53 = vpop.f32.mrb[108].mxu1 }
0x1318   :  { %v27006_v32 = vadd.f32 %v12979_v20, %v26698_v28  ;;  %v12901_v37 = vadd.f32 %v12900_v53, %v12815_v21  ;;  %v20381_v7 = vpop.f32.mrb[109].mxu1 }
0x131a   :  { %v12985_v0 = vadd.f32 %v12984_v35, %v12901_v37 }
0x131c   :  { %v27009_v45 = vadd.f32 %v12985_v0, %v26700_v47 }
0x1357   :  { %v13557_v40 = vpop.f32.mrb[110].mxu1 }
0x1358   :  { %v22111_v46 = vadd.f32 %v26635_v39, %v13557_v40  ;;  %v20476_v59 = vpop.f32.mrb[111].mxu1 }
0x135a   :  { %v13573_v41 = vsel %vm8369_vm7, %v22111_v46, -inf }
0x135b   :  { %13574 = vmax.xlane.f32.xlu0 %v13573_v41  ;;  %v13563_v29 = vpop.f32.mrb[112].mxu1 }
0x135c   :  { %v22112_v8 = vadd.f32 %v26645_v33, %v13563_v29  ;;  %v20479_v36 = vpop.f32.mrb[113].mxu1 }
0x135e   :  { %v13576_v28 = vsel %vm8369_vm7, %v22112_v8, -inf }
0x135f   :  { %13577 = vmax.xlane.f32.xlu1 %v13576_v28  ;;  %v13569_v49 = vpop.f32.mrb[114].mxu1 }
0x1360   :  { %v22113_v22 = vadd.f32 %v26655_v58, %v13569_v49  ;;  %v20482_v61 = vpop.f32.mrb[115].mxu1 }
0x1362   :  { %v13579_v47 = vsel %vm8376_vm8, %v22113_v22, -inf }
0x1363   :  { %13580 = vmax.xlane.f32.xlu0 %v13579_v47 }
0x1370   :  { %13606 = vrot.lane.b32.xlu1 %v25788_v25, %s22952_s15 }
0x13e8   :  { %v13575_v39 = vpop.xlane.xlu0 %13574 }
0x13e9   :  { %v13582_v55 = vsub.f32 %v22111_v46, %v13575_v39 }
0x13eb   :  { %v13585_v50 = vmul.f32 1.442695, %v13582_v55 }
0x13ec   :  { %v13578_v31 = vpop.xlane.xlu1 %13577 }
0x13ed   :  { %22907 = vpow2.f32 %v13585_v50  ;;  %v13583_v33 = vsub.f32 %v22112_v8, %v13578_v31 }
0x13ef   :  { %v13587_v42 = vmul.f32 1.442695, %v13583_v33 }
0x13f0   :  { %v13581_v43 = vpop.xlane.xlu0 %13580  ;;  %v13607_v44 = vpop.permute.xlu1 %13606 }
0x13f1   :  { %22909 = vpow2.f32 %v13587_v42  ;;  %v13584_v10 = vsub.f32 %v22113_v22, %v13581_v43  ;;  %v13626_v54 = vand.u32 4294901760, %v13607_v44 }
0x13f3   :  { %v13589_v13 = vmul.f32 1.442695, %v13584_v10  ;;  %v27023_v18 = vsub.f32 %v13607_v44, %v13626_v54 }
0x13f5   :  { %22911 = vpow2.f32 %v13589_v13 }
0x13f7   :  { %v22908_v58 = vpop.eup %22907 }
0x13f8   :  { %v13591_v11 = vsel %vm8369_vm7, %v22908_v58, 0.0 }
0x13f9   :  { %13592 = vadd.xlane.f32.xlu0 %v13591_v11 }
0x13fb   :  { %v22910_v63 = vpop.eup %22909 }
0x13fc   :  { %v13594_v48 = vsel %vm8369_vm7, %v22910_v63, 0.0 }
0x13fd   :  { %13595 = vadd.xlane.f32.xlu1 %v13594_v48 }
0x13ff   :  { %v22912_v25 = vpop.eup %22911 }
0x1400   :  { %v13597_v3 = vsel %vm8376_vm8, %v22912_v25, 0.0 }
0x1401   :  { %13598 = vadd.xlane.f32.xlu0 %v13597_v3 }
0x140e   :  { %13610 = vrot.lane.b32.xlu1 %v25796_v57, %s22952_s15 }
0x1417   :  { %13608 = vrot.lane.b32.xlu0 %v25792_v19, %s22952_s15  ;;  %v13726_v19 = vand.u32 4294901760, %v27023_v18 }
0x1419   :  { %v13727_v60 = vsub.f32 %v27023_v18, %v13726_v19 }
0x141b   :  { %v13728_v59 = vand.u32 4294901760, %v13727_v60 }
0x1486   :  { %v13593_v6 = vpop.xlane.xlu0 %13592 }
0x1487   :  { %22913 = vrcp.f32 %v13593_v6 }
0x148a   :  { %v13596_v27 = vpop.xlane.xlu1 %13595 }
0x148b   :  { %22915 = vrcp.f32 %v13596_v27 }
0x148e   :  { %v13611_v9 = vpop.permute.xlu1 %13610  ;;  %v13599_v12 = vpop.xlane.xlu0 %13598 }
0x148f   :  { %v13623_v24 = vsel %vm6657_vm5, %v13611_v9, 0  ;;  %22917 = vrcp.f32 %v13599_v12 }
0x1490   :  { %v27026_v2 = vand.u32 4294901760, %v13623_v24 }
0x1491   :  { %v22914_v51 = vpop.eup %22913 }
0x1492   :  { %v13603_v1 = vmul.f32 %v22914_v51, %v22908_v58  ;;  %v13609_v57 = vpop.permute.xlu0 %13608  ;;  %v27037_v52 = vsub.f32 %v13623_v24, %v27026_v2  ;;  %v7789_v58 = vld [vmem:[%s27805_s1 + $0x3c0] sm:$0xff] }
0x1493   :  { %v13629_v56 = vand.u32 4294901760, %v13609_v57  ;;  %v14193_v11 = vand.u32 4294901760, %v7789_v58 }
0x1494   :  { %v13615_v21 = vsel %vm8369_vm7, %v13603_v1, 0  ;;  %v13740_v40 = vand.u32 4294901760, %v27037_v52 }
0x1495   :  { %v22916_v15 = vpop.eup %22915  ;;  %v27030_v35 = vand.u32 4294901760, %v13615_v21  ;;  %v27032_v5 = vpack.c.bf16 %v13629_v56, %v13626_v54  ;;  %v27034_v38 = vsub.f32 %v13609_v57, %v13629_v56  ;;  %20574 = vmatpush3.msra.mxu1 %v14193_v11 }
0x1496   :  { %v13604_v17 = vmul.f32 %v22916_v15, %v22910_v63  ;;  %v13741_v47 = vsub.f32 %v27037_v52, %v13740_v40  ;;  %v14290_v63 = vsub.f32 %v7789_v58, %v14193_v11  ;;  %20595 = vmatprep.subr.mxu1 %v22946_v4 }
0x1497   :  { %v13694_v16 = vsub.f32 %v13615_v21, %v27030_v35  ;;  %v13733_v26 = vand.u32 4294901760, %v27034_v38  ;;  %21895 = vmatpush3.bf16.msra.mxu0 %v27032_v5  ;;  %v21900_v10 = vpack.c.bf16 %v27034_v38, %v27023_v18 }
0x1498   :  { %20487 = vmatprep.subr.mxu0 %v22946_v4  ;;  %v13618_v20 = vsel %vm8369_vm7, %v13604_v17, 0  ;;  %v13742_v33 = vand.u32 4294901760, %v13741_v47  ;;  %v14291_v48 = vand.u32 4294901760, %v14290_v63 }
0x1499   :  { %v22918_v53 = vpop.eup %22917  ;;  %v13734_v37 = vsub.f32 %v27034_v38, %v13733_v26  ;;  %v13695_v7 = vand.u32 4294901760, %v13694_v16  ;;  %v27048_v0 = vand.u32 4294901760, %v13618_v20  ;;  %v21906_v13 = vpack.c.bf16 %v13733_v26, %v13726_v19 }
0x149a   :  { %v13605_v46 = vmul.f32 %v22918_v53, %v22912_v25  ;;  %v14292_v25 = vsub.f32 %v14290_v63, %v14291_v48 }
0x149b   :  { %v13735_v41 = vand.u32 4294901760, %v13734_v37  ;;  %20488 = vmatpush3.msra.mxu0 %v27026_v2  ;;  %v13696_v29 = vsub.f32 %v13694_v16, %v13695_v7  ;;  %v13704_v8 = vsub.f32 %v13618_v20, %v27048_v0 }
0x149c   :  { %21896 = vmatprep.subr.bf16.mxu0 %v28257_v62  ;;  %v13621_v36 = vsel %vm8369_vm7, %v13605_v46, 0  ;;  %v14293_v3 = vand.u32 4294901760, %v14292_v25 }
0x149d   :  { %v13697_v28 = vand.u32 4294901760, %v13696_v29  ;;  %v21897_v49 = vpack.c.bf16 %v13735_v41, %v13728_v59  ;;  %v13705_v22 = vand.u32 4294901760, %v13704_v8  ;;  %v27055_v61 = vand.u32 4294901760, %v13621_v36 }
0x149f   :  { %20490 = vmatmul.mubr.f32.vlgmr.msra.gmra.mrb[128].mxu0 %v13697_v28  ;;  %v13706_v39 = vsub.f32 %v13704_v8, %v13705_v22  ;;  %v13714_v55 = vsub.f32 %v13621_v36, %v27055_v61 }
0x14a0   :  { %21898 = vmatpush3.bf16.msra.mxu0 %v21897_v49  ;;  %20492 = vmatprep.mubr.msk.f32.mxu0 %vm22945_vm3, %v22946_v4 }
0x14a1   :  { %20502 = vmatprep.subr.mxu0 %v22946_v4  ;;  %v13707_v50 = vand.u32 4294901760, %v13706_v39  ;;  %v13715_v31 = vand.u32 4294901760, %v13714_v55 }
0x14a3   :  { %20493 = vmatmul.mubr.f32.gmra.mrb[130].mxu0 %v13707_v50  ;;  %v13716_v42 = vsub.f32 %v13714_v55, %v13715_v31 }
0x14a4   :  { %20503 = vmatpush3.msra.mxu0 %v13742_v33  ;;  %20495 = vmatprep.mubr.msk.f32.mxu0 %vm22945_vm3, %v22946_v4 }
0x14a5   :  { %v13717_v43 = vand.u32 4294901760, %v13716_v42  ;;  %21899 = vmatprep.subr.bf16.mxu0 %v28257_v62 }
0x14a7   :  { %20496 = vmatmul.mubr.f32.gmra.mrb[132].mxu0 %v13717_v43 }
0x14a8   :  { %20504 = vmatprep.mubr.msk.f32.mxu0 %vm22945_vm3, %v22946_v4 }
0x14ab   :  { %20505 = vmatmul.mubr.f32.vlgmr.msra.gmra.mrb[128].mxu0 %v27030_v35 }
0x14ac   :  { %21901 = vmatpush3.bf16.msra.mxu0 %v21900_v10  ;;  %20507 = vmatprep.mubr.msk.f32.mxu0 %vm22945_vm3, %v22946_v4 }
0x14ad   :  { %20517 = vmatprep.subr.mxu0 %v22946_v4 }
0x14af   :  { %20508 = vmatmul.mubr.f32.gmra.mrb[130].mxu0 %v27048_v0 }
0x14b0   :  { %20518 = vmatpush3.msra.mxu0 %v27037_v52  ;;  %20510 = vmatprep.mubr.msk.f32.mxu0 %vm22945_vm3, %v22946_v4 }
0x14b1   :  { %21902 = vmatprep.subr.bf16.mxu0 %v28257_v62 }
0x14b3   :  { %20511 = vmatmul.mubr.f32.gmra.mrb[132].mxu0 %v27055_v61 }
0x14b4   :  { %20519 = vmatprep.mubr.msk.f32.mxu0 %vm22945_vm3, %v22946_v4 }
0x14b7   :  { %20520 = vmatmul.mubr.f32.vlgmr.msra.gmra.mrb[128].mxu0 %v13694_v16 }
0x14b8   :  { %21904 = vmatpush3.bf16.msra.mxu0 %v27032_v5  ;;  %20522 = vmatprep.mubr.msk.f32.mxu0 %vm22945_vm3, %v22946_v4 }
0x14b9   :  { %20532 = vmatprep.subr.mxu0 %v22946_v4 }
0x14bb   :  { %20523 = vmatmul.mubr.f32.gmra.mrb[130].mxu0 %v13704_v8 }
0x14bc   :  { %20533 = vmatpush3.msra.mxu0 %v27026_v2  ;;  %20525 = vmatprep.mubr.msk.f32.mxu0 %vm22945_vm3, %v22946_v4 }
0x14bd   :  { %21905 = vmatprep.subr.bf16.mxu0 %v28257_v62 }
0x14bf   :  { %20526 = vmatmul.mubr.f32.gmra.mrb[132].mxu0 %v13714_v55 }
0x14c0   :  { %20534 = vmatprep.mubr.msk.f32.mxu0 %vm22945_vm3, %v22946_v4 }
0x14c3   :  { %20535 = vmatmul.mubr.f32.vlgmr.msra.gmra.mrb[128].mxu0 %v13695_v7 }
0x14c4   :  { %21907 = vmatpush3.bf16.msra.mxu0 %v21906_v13  ;;  %20537 = vmatprep.mubr.msk.f32.mxu0 %vm22945_vm3, %v22946_v4 }
0x14c5   :  { %20547 = vmatprep.subr.mxu0 %v22946_v4 }
0x14c7   :  { %20538 = vmatmul.mubr.f32.gmra.mrb[130].mxu0 %v13705_v22 }
0x14c8   :  { %20548 = vmatpush3.msra.mxu0 %v13740_v40  ;;  %20540 = vmatprep.mubr.msk.f32.mxu0 %vm22945_vm3, %v22946_v4 }
0x14c9   :  { %21908 = vmatprep.subr.bf16.mxu0 %v28257_v62 }
0x14cb   :  { %20541 = vmatmul.mubr.f32.gmra.mrb[132].mxu0 %v13715_v31 }
0x14cc   :  { %20549 = vmatprep.mubr.msk.f32.mxu0 %vm22945_vm3, %v22946_v4 }
0x14cf   :  { %20550 = vmatmul.mubr.f32.vlgmr.msra.gmra.mrb[128].mxu0 %v27030_v35 }
0x14d0   :  { %21910 = vmatpush3.bf16.msra.mxu0 %v27032_v5  ;;  %20552 = vmatprep.mubr.msk.f32.mxu0 %vm22945_vm3, %v22946_v4 }
0x14d1   :  { %20562 = vmatprep.subr.mxu0 %v22946_v4 }
0x14d3   :  { %20553 = vmatmul.mubr.f32.gmra.mrb[130].mxu0 %v27048_v0 }
0x14d4   :  { %20563 = vmatpush3.msra.mxu0 %v27026_v2  ;;  %20555 = vmatprep.mubr.msk.f32.mxu0 %vm22945_vm3, %v22946_v4 }
0x14d5   :  { %20584 = vmatprep.subr.mxu0 %v22946_v4 }
0x14d7   :  { %20556 = vmatmul.mubr.f32.gmra.mrb[132].mxu0 %v27055_v61 }
0x14d8   :  { %20564 = vmatprep.mubr.msk.f32.mxu0 %vm22945_vm3, %v22946_v4 }
0x14db   :  { %20565 = vmatmul.mubr.f32.vlgmr.msra.gmra.mrb[128].mxu0 %v27030_v35 }
0x14dc   :  { %20567 = vmatprep.mubr.msk.f32.mxu0 %vm22945_vm3, %v22946_v4  ;;  %20585 = vmatpush3.msra.mxu0 %v14293_v3 }
0x14dd   :  { %20606 = vmatprep.subr.mxu0 %v22946_v4 }
0x14df   :  { %20568 = vmatmul.mubr.f32.gmra.mrb[130].mxu0 %v27048_v0 }
0x14e0   :  { %20570 = vmatprep.mubr.msk.f32.mxu0 %vm22945_vm3, %v22946_v4 }
0x14e3   :  { %20571 = vmatmul.mubr.f32.gmra.mrb[132].mxu0 %v27055_v61 }
0x14e4   :  { %20586 = vmatprep.mubr.msk.f32.mxu0 %vm22945_vm3, %v22946_v4 }
0x15ae   :  { %v14167_v44 = vpop.f32.mrb[128].mxu0 }
0x15af   :  { %v14184_v6 = vsel %vm5591_vm2, %v14167_v44, 0  ;;  %v20566_v27 = vpop.f32.mrb[129].mxu0 }
0x15b0   :  { %v14258_v54 = vand.u32 4294901760, %v14184_v6 }
0x15b2   :  { %v14259_v9 = vsub.f32 %v14184_v6, %v14258_v54  ;;  %v14173_v12 = vpop.f32.mrb[130].mxu0  ;;  %20587 = vmatmul.mubr.f32.vlgmr.msra.gmra.mrb[134].mxu0 %v14258_v54 }
0x15b3   :  { %v14187_v18 = vsel %vm5591_vm2, %v14173_v12, 0  ;;  %v20569_v24 = vpop.f32.mrb[131].mxu0  ;;  %20589 = vmatprep.mubr.msk.f32.mxu0 %vm22945_vm3, %v22946_v4  ;;  %20607 = vmatpush3.msra.mxu0 %v14193_v11 }
0x15b4   :  { %v14260_v51 = vand.u32 4294901760, %v14259_v9  ;;  %v14268_v1 = vand.u32 4294901760, %v14187_v18  ;;  %20628 = vmatprep.subr.mxu0 %v22946_v4 }
0x15b6   :  { %v14261_v2 = vsub.f32 %v14259_v9, %v14260_v51  ;;  %v14269_v57 = vsub.f32 %v14187_v18, %v14268_v1  ;;  %v14179_v19 = vpop.f32.mrb[132].mxu0  ;;  %20590 = vmatmul.mubr.f32.gmra.mrb[136].mxu0 %v14268_v1 }
0x15b7   :  { %v14190_v56 = vsel %vm5591_vm2, %v14179_v19, 0  ;;  %v20572_v21 = vpop.f32.mrb[133].mxu0  ;;  %20592 = vmatprep.mubr.msk.f32.mxu0 %vm22945_vm3, %v22946_v4  ;;  %v17253_v19 = vld [vmem:[%s27805_s1 + $0x3c8] ss:$0 sm:$0xff] }
0x15b8   :  { %v14262_v15 = vand.u32 4294901760, %v14261_v2  ;;  %v14270_v35 = vand.u32 4294901760, %v14269_v57  ;;  %v14278_v5 = vand.u32 4294901760, %v14190_v56 }
0x15ba   :  { %v14279_v38 = vsub.f32 %v14190_v56, %v14278_v5  ;;  %20576 = vmatmul.mubr.f32.vlgmr.msra.gmra.mrb[116].mxu1 %v14262_v15  ;;  %20593 = vmatmul.mubr.f32.gmra.mrb[138].mxu0 %v14278_v5  ;;  %v14271_v17 = vsub.f32 %v14269_v57, %v14270_v35 }
0x15bb   :  { %20578 = vmatprep.mubr.msk.f32.mxu1 %vm22945_vm3, %v22946_v4  ;;  %20608 = vmatprep.mubr.msk.f32.mxu0 %vm22945_vm3, %v22946_v4 }
0x15bc   :  { %v14280_v52 = vand.u32 4294901760, %v14279_v38  ;;  %v14272_v60 = vand.u32 4294901760, %v14271_v17  ;;  %20596 = vmatpush3.msra.mxu1 %v14290_v63 }
0x15bd   :  { %20617 = vmatprep.subr.mxu1 %v22946_v4 }
0x15be   :  { %20579 = vmatmul.mubr.f32.gmra.mrb[118].mxu1 %v14272_v60  ;;  %20609 = vmatmul.mubr.f32.vlgmr.msra.gmra.mrb[140].mxu0 %v14260_v51  ;;  %v14281_v16 = vsub.f32 %v14279_v38, %v14280_v52 }
0x15bf   :  { %20581 = vmatprep.mubr.msk.f32.mxu1 %vm22945_vm3, %v22946_v4  ;;  %20611 = vmatprep.mubr.msk.f32.mxu0 %vm22945_vm3, %v22946_v4 }
0x15c0   :  { %v14282_v26 = vand.u32 4294901760, %v14281_v16  ;;  %20629 = vmatpush3.msra.mxu0 %v14193_v11 }
0x15c1   :  { %21947 = vmatprep.subr.bf16.mxu0 %v28257_v62 }
0x15c2   :  { %20582 = vmatmul.mubr.f32.gmra.mrb[120].mxu1 %v14282_v26  ;;  %20612 = vmatmul.mubr.f32.gmra.mrb[142].mxu0 %v14270_v35 }
0x15c3   :  { %20597 = vmatprep.mubr.msk.f32.mxu1 %vm22945_vm3, %v22946_v4  ;;  %20614 = vmatprep.mubr.msk.f32.mxu0 %vm22945_vm3, %v22946_v4 }
0x15c6   :  { %20598 = vmatmul.mubr.f32.vlgmr.msra.gmra.mrb[122].mxu1 %v14259_v9  ;;  %20615 = vmatmul.mubr.f32.gmra.mrb[144].mxu0 %v14280_v52 }
0x15c7   :  { %20600 = vmatprep.mubr.msk.f32.mxu1 %vm22945_vm3, %v22946_v4  ;;  %20630 = vmatprep.mubr.msk.f32.mxu0 %vm22945_vm3, %v22946_v4 }
0x15c8   :  { %20618 = vmatpush3.msra.mxu1 %v14291_v48 }
0x15c9   :  { %21911 = vmatprep.subr.bf16.mxu1 %v28257_v62 }
0x15ca   :  { %20601 = vmatmul.mubr.f32.gmra.mrb[124].mxu1 %v14269_v57  ;;  %20631 = vmatmul.mubr.f32.vlgmr.msra.gmra.mrb[146].mxu0 %v14258_v54 }
0x15cb   :  { %20603 = vmatprep.mubr.msk.f32.mxu1 %vm22945_vm3, %v22946_v4  ;;  %20633 = vmatprep.mubr.msk.f32.mxu0 %vm22945_vm3, %v22946_v4 }
0x15ce   :  { %20604 = vmatmul.mubr.f32.gmra.mrb[126].mxu1 %v14279_v38  ;;  %20634 = vmatmul.mubr.f32.gmra.mrb[148].mxu0 %v14268_v1 }
0x15cf   :  { %20619 = vmatprep.mubr.msk.f32.mxu1 %vm22945_vm3, %v22946_v4  ;;  %20636 = vmatprep.mubr.msk.f32.mxu0 %vm22945_vm3, %v22946_v4 }
0x15d2   :  { %20620 = vmatmul.mubr.f32.vlgmr.msra.gmra.mrb[128].mxu1 %v14258_v54  ;;  %20637 = vmatmul.mubr.f32.gmra.mrb[150].mxu0 %v14278_v5 }
0x15d3   :  { %20622 = vmatprep.mubr.msk.f32.mxu1 %vm22945_vm3, %v22946_v4  ;;  %20757 = vmatprep.mubr.msk.f32.mxu0 %vm22945_vm3, %v22946_v4 }
0x15d6   :  { %20623 = vmatmul.mubr.f32.gmra.mrb[130].mxu1 %v14268_v1 }
0x15d7   :  { %20625 = vmatprep.mubr.msk.f32.mxu1 %vm22945_vm3, %v22946_v4 }
0x15da   :  { %20626 = vmatmul.mubr.f32.gmra.mrb[132].mxu1 %v14278_v5 }
0x15db   :  { %20647 = vmatprep.mubr.msk.f32.mxu1 %vm22945_vm3, %v22946_v4 }
0x1685   :  { %v14360_v20 = vpop.f32.mrb[134].mxu0 }
0x1686   :  { %v20588_v53 = vpop.f32.mrb[135].mxu0 }
0x1689   :  { %v14366_v37 = vpop.f32.mrb[136].mxu0 }
0x168a   :  { %v20591_v7 = vpop.f32.mrb[137].mxu0 }
0x168d   :  { %v14264_v0 = vpop.f32.mrb[116].mxu1  ;;  %v14372_v40 = vpop.f32.mrb[138].mxu0 }
0x168e   :  { %v14361_v46 = vadd.f32 %v14360_v20, %v14264_v0  ;;  %v20577_v59 = vpop.f32.mrb[117].mxu1  ;;  %v20594_v41 = vpop.f32.mrb[139].mxu0 }
0x1691   :  { %v14274_v29 = vpop.f32.mrb[118].mxu1  ;;  %v14534_v8 = vpop.f32.mrb[140].mxu0 }
0x1692   :  { %v14367_v36 = vadd.f32 %v14366_v37, %v14274_v29  ;;  %v20580_v28 = vpop.f32.mrb[119].mxu1  ;;  %v20610_v49 = vpop.f32.mrb[141].mxu0 }
0x1695   :  { %v14284_v22 = vpop.f32.mrb[120].mxu1  ;;  %v14542_v61 = vpop.f32.mrb[142].mxu0 }
0x1696   :  { %v14373_v47 = vadd.f32 %v14372_v40, %v14284_v22  ;;  %v20583_v39 = vpop.f32.mrb[121].mxu1  ;;  %v20613_v55 = vpop.f32.mrb[143].mxu0 }
0x1697   :  { %v14795_v39 = vld [vmem:[%s27805_s1 + $0x3e0] sm:$0xff]  ;;  %v14796_v55 = vld [vmem:[%s27805_s1 + $0x3e8] sm:$0xff] }
0x1699   :  { %v14446_v50 = vpop.f32.mrb[122].mxu1  ;;  %v14550_v31 = vpop.f32.mrb[144].mxu0 }
0x169a   :  { %v14447_v33 = vadd.f32 %v14446_v50, %v14361_v46  ;;  %v20599_v42 = vpop.f32.mrb[123].mxu1  ;;  %v20616_v43 = vpop.f32.mrb[145].mxu0  ;;  %v14797_v50 = vld [vmem:[%s27805_s1 + $0x3f0] sm:$0xff] }
0x169b   :  { %v14798_v42 = vld [vmem:[%s27805_s1 + $0x3f8] sm:$0xff]  ;;  %v14820_v43 = vand.u32 4294901760, %v14797_v50 }
0x169c   :  { %v14535_v10 = vadd.f32 %v14534_v8, %v14447_v33  ;;  %v14817_v33 = vand.u32 4294901760, %v14796_v55 }
0x169d   :  { %v14453_v13 = vpop.f32.mrb[124].mxu1  ;;  %v14708_v58 = vpop.f32.mrb[146].mxu0 }
0x169e   :  { %v14454_v11 = vadd.f32 %v14453_v13, %v14367_v36  ;;  %v20602_v63 = vpop.f32.mrb[125].mxu1  ;;  %v20632_v48 = vpop.f32.mrb[147].mxu0 }
0x169f   :  { %v27216_v63 = vsub.f32 %v14797_v50, %v14820_v43 }
0x16a0   :  { %v14543_v25 = vadd.f32 %v14542_v61, %v14454_v11  ;;  %v27214_v11 = vsub.f32 %v14796_v55, %v14817_v33 }
0x16a1   :  { %v14460_v3 = vpop.f32.mrb[126].mxu1  ;;  %v14714_v44 = vpop.f32.mrb[148].mxu0 }
0x16a2   :  { %v14461_v6 = vadd.f32 %v14460_v3, %v14373_v47  ;;  %v20605_v27 = vpop.f32.mrb[127].mxu1  ;;  %v20635_v54 = vpop.f32.mrb[149].mxu0 }
0x16a4   :  { %v14551_v9 = vadd.f32 %v14550_v31, %v14461_v6  ;;  %v14814_v31 = vand.u32 4294901760, %v14795_v39 }
0x16a5   :  { %v14624_v12 = vpop.f32.mrb[128].mxu1  ;;  %v14720_v18 = vpop.f32.mrb[150].mxu0 }
0x16a6   :  { %v14625_v24 = vadd.f32 %v14624_v12, %v14535_v10  ;;  %v20621_v51 = vpop.f32.mrb[129].mxu1  ;;  %v20638_v1 = vpop.f32.mrb[151].mxu0  ;;  %v14823_v10 = vand.u32 4294901760, %v14798_v42  ;;  %v27210_v13 = vpack.c.bf16 %v14817_v33, %v14814_v31  ;;  %v14929_v12 = vand.u32 4294901760, %v27216_v63 }
0x16a8   :  { %v14709_v2 = vadd.f32 %v14708_v58, %v14625_v24  ;;  %v27212_v58 = vsub.f32 %v14795_v39, %v14814_v31  ;;  %v27218_v48 = vsub.f32 %v14798_v42, %v14823_v10  ;;  %21913 = vmatpush3.bf16.msra.mxu1 %v27210_v13  ;;  %v14930_v51 = vsub.f32 %v27216_v63, %v14929_v12 }
0x16a9   :  { %v14630_v57 = vpop.f32.mrb[130].mxu1  ;;  %21914 = vmatprep.subr.bf16.mxu1 %v28257_v62 }
0x16aa   :  { %v14724_v56 = vadd.f32 %v14709_v2, %v27003_v14  ;;  %v14631_v21 = vadd.f32 %v14630_v57, %v14543_v25  ;;  %v20624_v15 = vpop.f32.mrb[131].mxu1  ;;  %v27221_v25 = vpack.c.bf16 %v14823_v10, %v14820_v43  ;;  %v14915_v3 = vand.u32 4294901760, %v27212_v58 }
0x16ab   :  { %v14931_v2 = vand.u32 4294901760, %v14930_v51 }
0x16ac   :  { %v14715_v35 = vadd.f32 %v14714_v44, %v14631_v21  ;;  %v14732_v5 = vadd.f32 %v17253_v19, %v14724_v56  ;;  %21916 = vmatpush3.bf16.msra.mxu1 %v27221_v25  ;;  %v14922_v44 = vand.u32 4294901760, %v27214_v11  ;;  %v14916_v6 = vsub.f32 %v27212_v58, %v14915_v3 }
0x16ad   :  { %v14636_v38 = vpop.f32.mrb[132].mxu1  ;;  %21917 = vmatprep.subr.bf16.mxu1 %v28257_v62  ;;  %v21924_v56 = vpack.c.bf16 %v27214_v11, %v27212_v58  ;;  %v21927_v21 = vpack.c.bf16 %v27218_v48, %v27216_v63  ;;  %v15392_v58 = vld [vmem:[%s27805_s1 + $0x430] sm:$0xff] }
0x16ae   :  { %v14725_v17 = vadd.f32 %v14715_v35, %v27006_v32  ;;  %v14637_v52 = vadd.f32 %v14636_v38, %v14551_v9  ;;  %v20627_v60 = vpop.f32.mrb[133].mxu1  ;;  %v14735_v16 = vadd.f32 %v14732_v5, %v25705_v30  ;;  %v14923_v27 = vsub.f32 %v27214_v11, %v14922_v44  ;;  %v15387_v5 = vld [vmem:[%s27805_s1 + $0x408] sm:$0xff]  ;;  %v15388_v38 = vld [vmem:[%s27805_s1 + $0x410] sm:$0xff]  ;;  %v15393_v11 = vld [vmem:[%s27805_s1 + $0x438] sm:$0xff] }
0x16af   :  { %v14917_v54 = vand.u32 4294901760, %v14916_v6  ;;  %v27242_v15 = vpack.c.bf16 %v14922_v44, %v14915_v3  ;;  %v15414_v60 = vand.u32 4294901760, %v15388_v38 }
0x16b0   :  { %v14721_v26 = vadd.f32 %v14720_v18, %v14637_v52  ;;  %v14738_v20 = vsel %vm7202_vm6, %v14735_v16, 0.0  ;;  %v14733_v53 = vadd.f32 %v17253_v19, %v14725_v17  ;;  %v14924_v9 = vand.u32 4294901760, %v14923_v27  ;;  %v15389_v17 = vld [vmem:[%s27805_s1 + $0x418] sm:$0xff] }
0x16b1   :  { %14739 = vadd.xlane.f32.xlu1 %v14738_v20  ;;  %v14936_v18 = vand.u32 4294901760, %v27218_v48  ;;  %v15411_v52 = vand.u32 4294901760, %v15387_v5 }
0x16b2   :  { %v14726_v37 = vadd.f32 %v14721_v26, %v27009_v45  ;;  %v14736_v14 = vadd.f32 %v14733_v53, %v25712_v34  ;;  %v27232_v24 = vpack.c.bf16 %v14924_v9, %v14917_v54  ;;  %v15417_v26 = vand.u32 4294901760, %v15389_v17 }
0x16b3   :  { %v14937_v1 = vsub.f32 %v27218_v48, %v14936_v18  ;;  %v27244_v35 = vpack.c.bf16 %v14936_v18, %v14929_v12  ;;  %v27258_v53 = vpack.c.bf16 %v15414_v60, %v15411_v52  ;;  %v15426_v48 = vand.u32 4294901760, %v15392_v58 }
0x16b4   :  { %v14741_v7 = vsel %vm7202_vm6, %v14736_v14, 0.0  ;;  %v14734_v0 = vadd.f32 %v17253_v19, %v14726_v37  ;;  %v27260_v37 = vsub.f32 %v15387_v5, %v15411_v52 }
0x16b5   :  { %14742 = vadd.xlane.f32.xlu0 %v14741_v7  ;;  %v14938_v57 = vand.u32 4294901760, %v14937_v1  ;;  %v27264_v7 = vsub.f32 %v15389_v17, %v15417_v26  ;;  %21949 = vmatpush3.bf16.msra.mxu0 %v27258_v53 }
0x16b6   :  { %v14737_v32 = vadd.f32 %v14734_v0, %v25719_v23  ;;  %21950 = vmatprep.subr.bf16.mxu0 %v28257_v62 }
0x16b7   :  { %v27236_v19 = vpack.c.bf16 %v14938_v57, %v14931_v2 }
0x16b8   :  { %v14745_v40 = vsel %vm14744_vm9, %v14737_v32, 0.0 }
0x16b9   :  { %14746 = vadd.xlane.f32.xlu0 %v14745_v40 }
0x173e   :  { %v14740_v30 = vpop.xlane.xlu1 %14739 }
0x173f   :  { %v14749_v46 = vmul.f32 0.03125, %v14740_v30 }
0x1741   :  { %v27183_v59 = vsub.f32 %v14735_v16, %v14749_v46  ;;  %v15390_v16 = vld [vmem:[%s27805_s1 + $0x420] sm:$0xff] }
0x1742   :  { %v14743_v41 = vpop.xlane.xlu0 %14742  ;;  %v15420_v20 = vand.u32 4294901760, %v15390_v16 }
0x1743   :  { %v14750_v29 = vmul.f32 0.03125, %v14743_v41  ;;  %v14755_v45 = vmul.f32 %v27183_v59, %v27183_v59 }
0x1744   :  { %v27266_v0 = vsub.f32 %v15390_v16, %v15420_v20  ;;  %v27395_v16 = vsub.f32 %v15392_v58, %v15426_v48 }
0x1745   :  { %v27187_v34 = vsub.f32 %v14736_v14, %v14750_v29  ;;  %v14758_v8 = vsel %vm7202_vm6, %v14755_v45, 0.0  ;;  %v27262_v14 = vsub.f32 %v15388_v38, %v15414_v60 }
0x1746   :  { %14759 = vadd.xlane.f32.xlu1 %v14758_v8  ;;  %v14747_v36 = vpop.xlane.xlu0 %14746 }
0x1747   :  { %v14751_v28 = vmul.f32 0.03125, %v14747_v36  ;;  %v14756_v23 = vmul.f32 %v27187_v34, %v27187_v34 }
0x1749   :  { %v27192_v49 = vsub.f32 %v14737_v32, %v14751_v28  ;;  %v14761_v22 = vsel %vm7202_vm6, %v14756_v23, 0.0  ;;  %v27270_v32 = vpack.c.bf16 %v15420_v20, %v15417_v26 }
0x174a   :  { %14762 = vadd.xlane.f32.xlu0 %v14761_v22  ;;  %v17254_v22 = vld [vmem:[%s27805_s1 + $0x3d0] ss:$0 sm:$0xff] }
0x174b   :  { %v14757_v61 = vmul.f32 %v27192_v49, %v27192_v49  ;;  %21952 = vmatpush3.bf16.msra.mxu0 %v27270_v32 }
0x174c   :  { %21953 = vmatprep.subr.bf16.mxu0 %v28257_v62 }
0x174d   :  { %v14764_v47 = vsel %vm14744_vm9, %v14757_v61, 0.0 }
0x174e   :  { %14765 = vadd.xlane.f32.xlu1 %v14764_v47  ;;  %v17255_v47 = vld [vmem:[%s27805_s1 + $0x3d8] ss:$0 sm:$0xff] }
0x17d3   :  { %v14760_v40 = vpop.xlane.xlu1 %14759 }
0x17d4   :  { %v14767_v30 = vmul.f32 0.03125, %v14760_v40 }
0x17d6   :  { %v14770_v46 = vadd.f32 1e-05, %v14767_v30 }
0x17d7   :  { %v14763_v41 = vpop.xlane.xlu0 %14762 }
0x17d8   :  { %22919 = vrsqrt.f32 %v14770_v46  ;;  %v14768_v29 = vmul.f32 0.03125, %v14763_v41 }
0x17da   :  { %v14771_v45 = vadd.f32 1e-05, %v14768_v29 }
0x17db   :  { %v14766_v8 = vpop.xlane.xlu1 %14765 }
0x17dc   :  { %22921 = vrsqrt.f32 %v14771_v45  ;;  %v14769_v36 = vmul.f32 0.03125, %v14766_v8  ;;  %v15530_v45 = vand.u32 4294901760, %v27264_v7  ;;  %v15537_v8 = vand.u32 4294901760, %v27266_v0 }
0x17de   :  { %v14772_v28 = vadd.f32 1e-05, %v14769_v36 }
0x17e0   :  { %22923 = vrsqrt.f32 %v14772_v28  ;;  %v15531_v28 = vsub.f32 %v27264_v7, %v15530_v45 }
0x17e2   :  { %v22920_v23 = vpop.eup %22919 }
0x17e3   :  { %v14776_v61 = vmul.f32 %v22920_v23, %v27183_v59  ;;  %v15538_v23 = vsub.f32 %v27266_v0, %v15537_v8 }
0x17e5   :  { %v14784_v39 = vmul.f32 %v17254_v22, %v14776_v61  ;;  %v15539_v61 = vand.u32 4294901760, %v15538_v23 }
0x17e6   :  { %v22922_v55 = vpop.eup %22921 }
0x17e7   :  { %v27281_v50 = vadd.f32 %v17255_v47, %v14784_v39  ;;  %v14777_v31 = vmul.f32 %v22922_v55, %v27187_v34  ;;  %v15551_v39 = vand.u32 4294901760, %v27395_v16 }
0x17e9   :  { %v14805_v33 = vsel %vm7202_vm6, %v27281_v50, 0  ;;  %v14785_v42 = vmul.f32 %v17254_v22, %v14777_v31 }
0x17ea   :  { %v22924_v43 = vpop.eup %22923  ;;  %v27286_v10 = vand.u32 4294901760, %v14805_v33 }
0x17eb   :  { %v14778_v3 = vmul.f32 %v22924_v43, %v27192_v49  ;;  %v27289_v59 = vadd.f32 %v17255_v47, %v14785_v42 }
0x17ec   :  { %v14883_v44 = vsub.f32 %v14805_v33, %v27286_v10  ;;  %v15552_v33 = vsub.f32 %v27395_v16, %v15551_v39 }
0x17ed   :  { %v14808_v6 = vsel %vm7202_vm6, %v27289_v59, 0  ;;  %v14786_v27 = vmul.f32 %v17254_v22, %v14778_v3  ;;  %v15532_v22 = vand.u32 4294901760, %v15531_v28 }
0x17ee   :  { %v14884_v54 = vand.u32 4294901760, %v14883_v44  ;;  %v27294_v9 = vand.u32 4294901760, %v14808_v6  ;;  %v15553_v3 = vand.u32 4294901760, %v15552_v33 }
0x17ef   :  { %v27296_v34 = vadd.f32 %v17255_v47, %v14786_v27  ;;  %v21963_v55 = vpack.c.bf16 %v15539_v61, %v15532_v22 }
0x17f0   :  { %v14885_v12 = vsub.f32 %v14883_v44, %v14884_v54  ;;  %v14893_v18 = vsub.f32 %v14808_v6, %v27294_v9 }
0x17f1   :  { %v14811_v51 = vsel %vm7202_vm6, %v27296_v34, 0 }
0x17f2   :  { %v14886_v49 = vand.u32 4294901760, %v14885_v12  ;;  %v14894_v1 = vand.u32 4294901760, %v14893_v18  ;;  %v27301_v2 = vand.u32 4294901760, %v14811_v51  ;;  %v21972_v12 = vpack.c.bf16 %v27262_v14, %v27260_v37 }
0x17f4   :  { %20648 = vmatmul.mubr.f32.vlgmr.msra.gmra.mrb[134].mxu1 %v14886_v49  ;;  %v14895_v57 = vsub.f32 %v14893_v18, %v14894_v1  ;;  %v14903_v5 = vsub.f32 %v14811_v51, %v27301_v2  ;;  %v21975_v51 = vpack.c.bf16 %v27266_v0, %v27264_v7 }
0x17f5   :  { %20650 = vmatprep.mubr.msk.f32.mxu1 %vm22945_vm3, %v22946_v4  ;;  %21919 = vmatpush3.bf16.msra.mxu1 %v27232_v24  ;;  %v15429_v24 = vand.u32 4294901760, %v15393_v11 }
0x17f6   :  { %v14896_v38 = vand.u32 4294901760, %v14895_v57  ;;  %v14904_v17 = vand.u32 4294901760, %v14903_v5  ;;  %21920 = vmatprep.subr.bf16.mxu1 %v28257_v62  ;;  %v27436_v57 = vpack.c.bf16 %v15537_v8, %v15530_v45 }
0x17f7   :  { %v27397_v26 = vsub.f32 %v15393_v11, %v15429_v24 }
0x17f8   :  { %20651 = vmatmul.mubr.f32.gmra.mrb[136].mxu1 %v14896_v38  ;;  %v14905_v52 = vsub.f32 %v14903_v5, %v14904_v17 }
0x17f9   :  { %20653 = vmatprep.mubr.msk.f32.mxu1 %vm22945_vm3, %v22946_v4  ;;  %21922 = vmatpush3.bf16.msra.mxu1 %v27236_v19  ;;  %v15558_v42 = vand.u32 4294901760, %v27397_v26 }
0x17fa   :  { %v14906_v60 = vand.u32 4294901760, %v14905_v52  ;;  %21923 = vmatprep.subr.bf16.mxu1 %v28257_v62 }
0x17fc   :  { %20654 = vmatmul.mubr.f32.gmra.mrb[138].mxu1 %v14906_v60 }
0x17fd   :  { %20664 = vmatprep.mubr.msk.f32.mxu1 %vm22945_vm3, %v22946_v4 }
0x1800   :  { %20665 = vmatmul.mubr.f32.vlgmr.msra.gmra.mrb[134].mxu1 %v27286_v10 }
0x1801   :  { %20667 = vmatprep.mubr.msk.f32.mxu1 %vm22945_vm3, %v22946_v4  ;;  %21925 = vmatpush3.bf16.msra.mxu1 %v21924_v56  ;;  %v15516_v56 = vand.u32 4294901760, %v27260_v37 }
0x1802   :  { %21926 = vmatprep.subr.bf16.mxu1 %v28257_v62 }
0x1803   :  { %v15517_v40 = vsub.f32 %v27260_v37, %v15516_v56  ;;  %v17256_v37 = vld [vmem:[%s27805_s1 + $0x400] ss:$0 sm:$0xff] }
0x1804   :  { %20668 = vmatmul.mubr.f32.gmra.mrb[136].mxu1 %v27294_v9 }
0x1805   :  { %20670 = vmatprep.mubr.msk.f32.mxu1 %vm22945_vm3, %v22946_v4  ;;  %21928 = vmatpush3.bf16.msra.mxu1 %v21927_v21  ;;  %v15523_v21 = vand.u32 4294901760, %v27262_v14  ;;  %v15518_v41 = vand.u32 4294901760, %v15517_v40 }
0x1806   :  { %21929 = vmatprep.subr.bf16.mxu1 %v28257_v62 }
0x1807   :  { %v15524_v30 = vsub.f32 %v27262_v14, %v15523_v21 }
0x1808   :  { %20671 = vmatmul.mubr.f32.gmra.mrb[138].mxu1 %v27301_v2 }
0x1809   :  { %20681 = vmatprep.mubr.msk.f32.mxu1 %vm22945_vm3, %v22946_v4  ;;  %v15525_v29 = vand.u32 4294901760, %v15524_v30 }
0x180b   :  { %v27411_v36 = vpack.c.bf16 %v15525_v29, %v15518_v41 }
0x180c   :  { %20682 = vmatmul.mubr.f32.vlgmr.msra.gmra.mrb[134].mxu1 %v14883_v44  ;;  %v15559_v44 = vsub.f32 %v27397_v26, %v15558_v42 }
0x180d   :  { %20684 = vmatprep.mubr.msk.f32.mxu1 %vm22945_vm3, %v22946_v4  ;;  %21931 = vmatpush3.bf16.msra.mxu1 %v27210_v13 }
0x180e   :  { %21932 = vmatprep.subr.bf16.mxu1 %v28257_v62 }
0x1810   :  { %20685 = vmatmul.mubr.f32.gmra.mrb[136].mxu1 %v14893_v18 }
0x1811   :  { %20687 = vmatprep.mubr.msk.f32.mxu1 %vm22945_vm3, %v22946_v4  ;;  %21934 = vmatpush3.bf16.msra.mxu1 %v27221_v25 }
0x1812   :  { %21935 = vmatprep.subr.bf16.mxu1 %v28257_v62 }
0x1814   :  { %20688 = vmatmul.mubr.f32.gmra.mrb[138].mxu1 %v14903_v5 }
0x1815   :  { %20698 = vmatprep.mubr.msk.f32.mxu1 %vm22945_vm3, %v22946_v4 }
0x1818   :  { %20699 = vmatmul.mubr.f32.vlgmr.msra.gmra.mrb[134].mxu1 %v14884_v54  ;;  %v15560_v54 = vand.u32 4294901760, %v15559_v44 }
0x1819   :  { %20701 = vmatprep.mubr.msk.f32.mxu1 %vm22945_vm3, %v22946_v4  ;;  %21937 = vmatpush3.bf16.msra.mxu1 %v27242_v15 }
0x181a   :  { %21938 = vmatprep.subr.bf16.mxu1 %v28257_v62 }
0x181c   :  { %20702 = vmatmul.mubr.f32.gmra.mrb[136].mxu1 %v14894_v1 }
0x181d   :  { %20704 = vmatprep.mubr.msk.f32.mxu1 %vm22945_vm3, %v22946_v4  ;;  %21940 = vmatpush3.bf16.msra.mxu1 %v27244_v35 }
0x181e   :  { %21941 = vmatprep.subr.bf16.mxu1 %v28257_v62 }
0x1820   :  { %20705 = vmatmul.mubr.f32.gmra.mrb[138].mxu1 %v14904_v17 }
0x1821   :  { %20715 = vmatprep.mubr.msk.f32.mxu1 %vm22945_vm3, %v22946_v4 }
0x1824   :  { %20716 = vmatmul.mubr.f32.vlgmr.msra.gmra.mrb[134].mxu1 %v27286_v10 }
0x1825   :  { %20718 = vmatprep.mubr.msk.f32.mxu1 %vm22945_vm3, %v22946_v4  ;;  %21943 = vmatpush3.bf16.msra.mxu1 %v27210_v13  ;;  %v15391_v13 = vld [vmem:[%s27805_s1 + $0x428] sm:$0xff] }
0x1826   :  { %21944 = vmatprep.subr.bf16.mxu1 %v28257_v62  ;;  %v15423_v63 = vand.u32 4294901760, %v15391_v13 }
0x1828   :  { %20719 = vmatmul.mubr.f32.gmra.mrb[136].mxu1 %v27294_v9  ;;  %v27391_v15 = vpack.c.bf16 %v15426_v48, %v15423_v63  ;;  %v27393_v35 = vsub.f32 %v15391_v13, %v15423_v63 }
0x1829   :  { %20721 = vmatprep.mubr.msk.f32.mxu1 %vm22945_vm3, %v22946_v4  ;;  %21946 = vmatpush3.bf16.msra.mxu1 %v27221_v25  ;;  %v15394_v25 = vld [vmem:[%s27805_s1 + $0x440] sm:$0xff] }
0x182a   :  { %22007 = vmatprep.subr.bf16.mxu1 %v28257_v62  ;;  %v15432_v19 = vand.u32 4294901760, %v15394_v25  ;;  %21955 = vmatpush3.bf16.msra.mxu0 %v27391_v15  ;;  %v15544_v47 = vand.u32 4294901760, %v27393_v35  ;;  %v21978_v49 = vpack.c.bf16 %v27395_v16, %v27393_v35 }
0x182b   :  { %21956 = vmatprep.subr.bf16.mxu0 %v28257_v62 }
0x182c   :  { %20722 = vmatmul.mubr.f32.gmra.mrb[138].mxu1 %v27301_v2  ;;  %v27399_v20 = vsub.f32 %v15394_v25, %v15432_v19  ;;  %v27404_v46 = vpack.c.bf16 %v15432_v19, %v15429_v24  ;;  %v15545_v31 = vsub.f32 %v27393_v35, %v15544_v47  ;;  %v27438_v5 = vpack.c.bf16 %v15551_v39, %v15544_v47 }
0x182d   :  { %20732 = vmatprep.mubr.msk.f32.mxu1 %vm22945_vm3, %v22946_v4 }
0x182e   :  { %21958 = vmatpush3.bf16.msra.mxu0 %v27404_v46  ;;  %v15565_v43 = vand.u32 4294901760, %v27399_v20  ;;  %v21981_v1 = vpack.c.bf16 %v27399_v20, %v27397_v26 }
0x182f   :  { %21959 = vmatprep.subr.bf16.mxu0 %v28257_v62 }
0x1830   :  { %20733 = vmatmul.mubr.f32.vlgmr.msra.gmra.mrb[134].mxu1 %v27286_v10  ;;  %v15546_v10 = vand.u32 4294901760, %v15545_v31  ;;  %v15566_v6 = vsub.f32 %v27399_v20, %v15565_v43  ;;  %v27440_v38 = vpack.c.bf16 %v15565_v43, %v15558_v42 }
0x1831   :  { %20735 = vmatprep.mubr.msk.f32.mxu1 %vm22945_vm3, %v22946_v4  ;;  %22009 = vmatpush3.bf16.msra.mxu1 %v27258_v53 }
0x1832   :  { %22010 = vmatprep.subr.bf16.mxu1 %v28257_v62  ;;  %v21966_v27 = vpack.c.bf16 %v15553_v3, %v15546_v10  ;;  %v17257_v10 = vld [vmem:[%s27805_s1 + $0x448] ss:$0 sm:$0xff] }
0x1834   :  { %20736 = vmatmul.mubr.f32.gmra.mrb[136].mxu1 %v27294_v9  ;;  %v15567_v9 = vand.u32 4294901760, %v15566_v6 }
0x1835   :  { %20738 = vmatprep.mubr.msk.f32.mxu1 %vm22945_vm3, %v22946_v4  ;;  %22012 = vmatpush3.bf16.msra.mxu1 %v27270_v32 }
0x1836   :  { %22013 = vmatprep.subr.bf16.mxu1 %v28257_v62  ;;  %v21969_v18 = vpack.c.bf16 %v15567_v9, %v15560_v54 }
0x1838   :  { %20739 = vmatmul.mubr.f32.gmra.mrb[138].mxu1 %v27301_v2  ;;  %v27434_v2 = vpack.c.bf16 %v15523_v21, %v15516_v56 }
0x1839   :  { %20882 = vmatprep.mubr.msk.f32.mxu1 %vm22945_vm3, %v22946_v4  ;;  %22015 = vmatpush3.bf16.msra.mxu1 %v27391_v15 }
0x183a   :  { %22016 = vmatprep.subr.bf16.mxu1 %v28257_v62 }
0x183d   :  { %22018 = vmatpush3.bf16.msra.mxu1 %v27404_v46 }
0x1903   :  { %v15368_v14 = vpop.f32.mrb[134].mxu1 }
0x1904   :  { %v22114_v7 = vadd.f32 %v17256_v37, %v15368_v14  ;;  %v20734_v0 = vpop.f32.mrb[135].mxu1 }
0x1906   :  { %v15384_v17 = vmax.f32 %v22114_v7, 0.0 }
0x1907   :  { %v15374_v52 = vpop.f32.mrb[136].mxu1 }
0x1908   :  { %v15402_v60 = vsel %vm15400_vm10, %v15384_v17, 0  ;;  %v22115_v13 = vadd.f32 %v17256_v37, %v15374_v52  ;;  %v20737_v58 = vpop.f32.mrb[137].mxu1 }
0x1909   :  { %v27446_v11 = vand.u32 4294901760, %v15402_v60 }
0x190a   :  { %v15385_v63 = vmax.f32 %v22115_v13, 0.0 }
0x190b   :  { %v27449_v48 = vsub.f32 %v15402_v60, %v27446_v11  ;;  %v15380_v25 = vpop.f32.mrb[138].mxu1  ;;  %20883 = vmatmul.mubr.f32.vlgmr.msra.gmra.mrb[140].mxu1 %v27446_v11 }
0x190c   :  { %v15405_v24 = vsel %vm15400_vm10, %v15385_v63, 0  ;;  %v22116_v19 = vadd.f32 %v17256_v37, %v15380_v25  ;;  %v20740_v56 = vpop.f32.mrb[139].mxu1  ;;  %20885 = vmatprep.mubr.msk.f32.mxu1 %vm22945_vm3, %v22946_v4 }
0x190d   :  { %v15485_v21 = vand.u32 4294901760, %v27449_v48  ;;  %v27456_v40 = vand.u32 4294901760, %v15405_v24 }
0x190e   :  { %v15386_v30 = vmax.f32 %v22116_v19, 0.0 }
0x190f   :  { %v15486_v41 = vsub.f32 %v27449_v48, %v15485_v21  ;;  %v15494_v29 = vsub.f32 %v15405_v24, %v27456_v40  ;;  %20886 = vmatmul.mubr.f32.gmra.mrb[142].mxu1 %v27456_v40 }
0x1910   :  { %v15408_v45 = vsel %vm15400_vm10, %v15386_v30, 0  ;;  %20888 = vmatprep.mubr.msk.f32.mxu1 %vm22945_vm3, %v22946_v4 }
0x1911   :  { %v15487_v8 = vand.u32 4294901760, %v15486_v41  ;;  %v27464_v28 = vand.u32 4294901760, %v15408_v45  ;;  %v15495_v23 = vand.u32 4294901760, %v15494_v29 }
0x1913   :  { %v15504_v22 = vsub.f32 %v15408_v45, %v27464_v28  ;;  %20758 = vmatmul.mubr.f32.vlgmr.msra.gmra.mrb[152].mxu0 %v15487_v8  ;;  %20889 = vmatmul.mubr.f32.gmra.mrb[144].mxu1 %v27464_v28  ;;  %v15496_v61 = vsub.f32 %v15494_v29, %v15495_v23 }
0x1914   :  { %21961 = vmatpush3.bf16.msra.mxu0 %v27411_v36  ;;  %20760 = vmatprep.mubr.msk.f32.mxu0 %vm22945_vm3, %v22946_v4 }
0x1915   :  { %21962 = vmatprep.subr.bf16.mxu0 %v28257_v62  ;;  %v15497_v47 = vand.u32 4294901760, %v15496_v61  ;;  %v15505_v39 = vand.u32 4294901760, %v15504_v22 }
0x1917   :  { %20761 = vmatmul.mubr.f32.gmra.mrb[154].mxu0 %v15497_v47  ;;  %v15506_v31 = vsub.f32 %v15504_v22, %v15505_v39 }
0x1918   :  { %21964 = vmatpush3.bf16.msra.mxu0 %v21963_v55  ;;  %20763 = vmatprep.mubr.msk.f32.mxu0 %vm22945_vm3, %v22946_v4 }
0x1919   :  { %21965 = vmatprep.subr.bf16.mxu0 %v28257_v62  ;;  %v15507_v33 = vand.u32 4294901760, %v15506_v31 }
0x191b   :  { %20764 = vmatmul.mubr.f32.gmra.mrb[156].mxu0 %v15507_v33 }
0x191c   :  { %21967 = vmatpush3.bf16.msra.mxu0 %v21966_v27  ;;  %20782 = vmatprep.mubr.msk.f32.mxu0 %vm22945_vm3, %v22946_v4 }
0x191d   :  { %21968 = vmatprep.subr.bf16.mxu0 %v28257_v62 }
0x1920   :  { %21970 = vmatpush3.bf16.msra.mxu0 %v21969_v18 }
0x1921   :  { %21971 = vmatprep.subr.bf16.mxu0 %v28257_v62 }
0x1923   :  { %20783 = vmatmul.mubr.f32.vlgmr.msra.gmra.mrb[158].mxu0 %v27446_v11 }
0x1924   :  { %21973 = vmatpush3.bf16.msra.mxu0 %v21972_v12  ;;  %20785 = vmatprep.mubr.msk.f32.mxu0 %vm22945_vm3, %v22946_v4 }
0x1925   :  { %21974 = vmatprep.subr.bf16.mxu0 %v28257_v62 }
0x1927   :  { %20786 = vmatmul.mubr.f32.gmra.mrb[160].mxu0 %v27456_v40 }
0x1928   :  { %21976 = vmatpush3.bf16.msra.mxu0 %v21975_v51  ;;  %20788 = vmatprep.mubr.msk.f32.mxu0 %vm22945_vm3, %v22946_v4 }
0x1929   :  { %21977 = vmatprep.subr.bf16.mxu0 %v28257_v62 }
0x192b   :  { %20789 = vmatmul.mubr.f32.gmra.mrb[162].mxu0 %v27464_v28 }
0x192c   :  { %21979 = vmatpush3.bf16.msra.mxu0 %v21978_v49  ;;  %20807 = vmatprep.mubr.msk.f32.mxu0 %vm22945_vm3, %v22946_v4 }
0x192d   :  { %21980 = vmatprep.subr.bf16.mxu0 %v28257_v62 }
0x1930   :  { %21982 = vmatpush3.bf16.msra.mxu0 %v21981_v1 }
0x1931   :  { %21983 = vmatprep.subr.bf16.mxu0 %v28257_v62 }
0x1933   :  { %20808 = vmatmul.mubr.f32.vlgmr.msra.gmra.mrb[164].mxu0 %v27449_v48 }
0x1934   :  { %21985 = vmatpush3.bf16.msra.mxu0 %v27258_v53  ;;  %20810 = vmatprep.mubr.msk.f32.mxu0 %vm22945_vm3, %v22946_v4 }
0x1935   :  { %21986 = vmatprep.subr.bf16.mxu0 %v28257_v62 }
0x1937   :  { %20811 = vmatmul.mubr.f32.gmra.mrb[166].mxu0 %v15494_v29 }
0x1938   :  { %21988 = vmatpush3.bf16.msra.mxu0 %v27270_v32  ;;  %20813 = vmatprep.mubr.msk.f32.mxu0 %vm22945_vm3, %v22946_v4 }
0x1939   :  { %21989 = vmatprep.subr.bf16.mxu0 %v28257_v62 }
0x193b   :  { %20814 = vmatmul.mubr.f32.gmra.mrb[168].mxu0 %v15504_v22 }
0x193c   :  { %21991 = vmatpush3.bf16.msra.mxu0 %v27391_v15  ;;  %20832 = vmatprep.mubr.msk.f32.mxu0 %vm22945_vm3, %v22946_v4 }
0x193d   :  { %21992 = vmatprep.subr.bf16.mxu0 %v28257_v62 }
0x1940   :  { %21994 = vmatpush3.bf16.msra.mxu0 %v27404_v46 }
0x1941   :  { %21995 = vmatprep.subr.bf16.mxu0 %v28257_v62 }
0x1943   :  { %20833 = vmatmul.mubr.f32.vlgmr.msra.gmra.mrb[170].mxu0 %v15485_v21 }
0x1944   :  { %21997 = vmatpush3.bf16.msra.mxu0 %v27434_v2  ;;  %20835 = vmatprep.mubr.msk.f32.mxu0 %vm22945_vm3, %v22946_v4 }
0x1945   :  { %21998 = vmatprep.subr.bf16.mxu0 %v28257_v62 }
0x1947   :  { %20836 = vmatmul.mubr.f32.gmra.mrb[172].mxu0 %v15495_v23 }
0x1948   :  { %22000 = vmatpush3.bf16.msra.mxu0 %v27436_v57  ;;  %20838 = vmatprep.mubr.msk.f32.mxu0 %vm22945_vm3, %v22946_v4 }
0x1949   :  { %22001 = vmatprep.subr.bf16.mxu0 %v28257_v62 }
0x194b   :  { %20839 = vmatmul.mubr.f32.gmra.mrb[174].mxu0 %v15505_v39 }
0x194c   :  { %22003 = vmatpush3.bf16.msra.mxu0 %v27438_v5  ;;  %20857 = vmatprep.mubr.msk.f32.mxu0 %vm22945_vm3, %v22946_v4 }
0x194d   :  { %22004 = vmatprep.subr.bf16.mxu0 %v28257_v62 }
0x1950   :  { %22006 = vmatpush3.bf16.msra.mxu0 %v27440_v38 }
0x1951   :  { %22019 = vmatprep.subr.bf16.mxu0 %v28257_v62 }
0x1953   :  { %20858 = vmatmul.mubr.f32.vlgmr.msra.gmra.mrb[176].mxu0 %v27446_v11 }
0x1954   :  { %20860 = vmatprep.mubr.msk.f32.mxu0 %vm22945_vm3, %v22946_v4 }
0x1957   :  { %20861 = vmatmul.mubr.f32.gmra.mrb[178].mxu0 %v27456_v40 }
0x1958   :  { %20863 = vmatprep.mubr.msk.f32.mxu0 %vm22945_vm3, %v22946_v4 }
0x195b   :  { %20864 = vmatmul.mubr.f32.gmra.mrb[180].mxu0 %v27464_v28 }
0x195c   :  { %20895 = vmatprep.mubr.msk.f32.mxu0 %vm22945_vm3, %v22946_v4 }
0x19de   :  { %v16017_v53 = vpop.f32.mrb[140].mxu1 }
0x19df   :  { %v20884_v32 = vpop.f32.mrb[141].mxu1 }
0x19e0   :  { %v22934_v32 = vld [vmem:[%s27806_s0 + $0x80] sm:$0xff] }
0x19e2   :  { %v16023_v15 = vpop.f32.mrb[142].mxu1 }
0x19e3   :  { %v20887_v35 = vpop.f32.mrb[143].mxu1 }
0x19e6   :  { %v15489_v16 = vpop.f32.mrb[152].mxu0  ;;  %v16029_v26 = vpop.f32.mrb[144].mxu1 }
0x19e7   :  { %v20759_v20 = vpop.f32.mrb[153].mxu0  ;;  %v20890_v46 = vpop.f32.mrb[145].mxu1  ;;  %v15490_v3 = vadd.f32 %v17257_v10, %v15489_v16  ;;  %v16091_v16 = vld [vmem:[%s27805_s1 + $0x350] sm:$0xff] }
0x19e8   :  { %v16095_v20 = vsel %vm3485_vm1, %v16091_v16, 0 }
0x19ea   :  { %v15499_v36 = vpop.f32.mrb[154].mxu0 }
0x19eb   :  { %v20762_v55 = vpop.f32.mrb[155].mxu0  ;;  %v15500_v54 = vadd.f32 %v17257_v10, %v15499_v36 }
0x19ee   :  { %v15509_v42 = vpop.f32.mrb[156].mxu0 }
0x19ef   :  { %v20765_v43 = vpop.f32.mrb[157].mxu0  ;;  %v15510_v51 = vadd.f32 %v17257_v10, %v15509_v42  ;;  %v27578_v10 = vand.u32 4294901760, %v16095_v20 }
0x19f6   :  { %v15620_v44 = vpop.f32.mrb[158].mxu0 }
0x19f7   :  { %v15621_v6 = vadd.f32 %v15620_v44, %v15490_v3  ;;  %v20784_v27 = vpop.f32.mrb[159].mxu0 }
0x19fa   :  { %v15626_v9 = vpop.f32.mrb[160].mxu0 }
0x19fb   :  { %v15627_v12 = vadd.f32 %v15626_v9, %v15500_v54  ;;  %v20787_v18 = vpop.f32.mrb[161].mxu0 }
0x19fe   :  { %v15632_v49 = vpop.f32.mrb[162].mxu0 }
0x19ff   :  { %v15633_v1 = vadd.f32 %v15632_v49, %v15510_v51  ;;  %v20790_v2 = vpop.f32.mrb[163].mxu0 }
0x1a06   :  { %v15720_v57 = vpop.f32.mrb[164].mxu0 }
0x1a07   :  { %v15721_v5 = vadd.f32 %v15720_v57, %v15621_v6  ;;  %v20809_v38 = vpop.f32.mrb[165].mxu0  ;;  %v16171_v6 = vsub.f32 %v16095_v20, %v27578_v10 }
0x1a09   :  { %v16172_v18 = vand.u32 4294901760, %v16171_v6 }
0x1a0a   :  { %v15727_v37 = vpop.f32.mrb[166].mxu0 }
0x1a0b   :  { %v15728_v14 = vadd.f32 %v15727_v37, %v15627_v12  ;;  %v20812_v7 = vpop.f32.mrb[167].mxu0  ;;  %v16173_v2 = vsub.f32 %v16171_v6, %v16172_v18 }
0x1a0e   :  { %v15734_v0 = vpop.f32.mrb[168].mxu0 }
0x1a0f   :  { %v15735_v17 = vadd.f32 %v15734_v0, %v15633_v1  ;;  %v20815_v52 = vpop.f32.mrb[169].mxu0 }
0x1a16   :  { %v15815_v60 = vpop.f32.mrb[170].mxu0 }
0x1a17   :  { %v15816_v13 = vadd.f32 %v15815_v60, %v15721_v5  ;;  %v20834_v58 = vpop.f32.mrb[171].mxu0 }
0x1a1a   :  { %v15823_v11 = vpop.f32.mrb[172].mxu0 }
0x1a1b   :  { %v15824_v63 = vadd.f32 %v15823_v11, %v15728_v14  ;;  %v20837_v48 = vpop.f32.mrb[173].mxu0  ;;  %v16174_v14 = vand.u32 4294901760, %v16173_v2 }
0x1a1e   :  { %v15831_v25 = vpop.f32.mrb[174].mxu0 }
0x1a1f   :  { %v15832_v24 = vadd.f32 %v15831_v25, %v15735_v17  ;;  %v20840_v19 = vpop.f32.mrb[175].mxu0 }
0x1a26   :  { %v15926_v56 = vpop.f32.mrb[176].mxu0 }
0x1a27   :  { %v15927_v21 = vadd.f32 %v15926_v56, %v15816_v13  ;;  %v20859_v40 = vpop.f32.mrb[177].mxu0 }
0x1a29   :  { %v16018_v30 = vadd.f32 %v16017_v53, %v15927_v21 }
0x1a2a   :  { %v15932_v41 = vpop.f32.mrb[178].mxu0 }
0x1a2b   :  { %v15933_v29 = vadd.f32 %v15932_v41, %v15824_v63  ;;  %v20862_v45 = vpop.f32.mrb[179].mxu0  ;;  %v27540_v8 = vadd.f32 %v16018_v30, %v27281_v50 }
0x1a2d   :  { %v16024_v28 = vadd.f32 %v16023_v15, %v15933_v29  ;;  %v16036_v23 = vsel %vm7202_vm6, %v27540_v8, 0.0  ;;  %v16104_v15 = vand.u32 4294901760, %v22934_v32 }
0x1a2e   :  { %v15938_v22 = vpop.f32.mrb[180].mxu0  ;;  %16037 = vadd.xlane.f32.xlu0 %v16036_v23  ;;  %v16649_v23 = vld [vmem:[%s27805_s1 + $0x468] sm:$0xff] }
0x1a2f   :  { %v15939_v61 = vadd.f32 %v15938_v22, %v15832_v24  ;;  %v20865_v47 = vpop.f32.mrb[181].mxu0  ;;  %v27545_v39 = vadd.f32 %v16024_v28, %v27289_v59  ;;  %v22935_v59 = vld [vmem:[%s27806_s0 + $0x88] sm:$0xff]  ;;  %v27574_v42 = vsub.f32 %v22934_v32, %v16104_v15  ;;  %v16648_v28 = vld [vmem:[%s27805_s1 + $0x460] sm:$0xff]  ;;  %v16650_v22 = vld [vmem:[%s27805_s1 + $0x470] sm:$0xff] }
0x1a30   :  { %v16107_v35 = vand.u32 4294901760, %v22935_v59  ;;  %v16670_v47 = vand.u32 4294901760, %v16649_v23 }
0x1a31   :  { %v16030_v31 = vadd.f32 %v16029_v26, %v15939_v61  ;;  %v16039_v33 = vsel %vm7202_vm6, %v27545_v39, 0.0  ;;  %v16093_v26 = vld [vmem:[%s27805_s1 + $0x360] sm:$0x3]  ;;  %v16203_v27 = vand.u32 4294901760, %v27574_v42  ;;  %v16667_v61 = vand.u32 4294901760, %v16648_v28 }
0x1a32   :  { %16040 = vadd.xlane.f32.xlu1 %v16039_v33  ;;  %v16101_v36 = vsel %vm3485_vm1, %v16093_v26, 0  ;;  %v27572_v55 = vpack.c.bf16 %v16107_v35, %v16104_v15  ;;  %v27576_v43 = vsub.f32 %v22935_v59, %v16107_v35 }
0x1a33   :  { %v27550_v53 = vadd.f32 %v16030_v31, %v27296_v34  ;;  %v16092_v34 = vld [vmem:[%s27805_s1 + $0x358] sm:$0xff]  ;;  %v27582_v44 = vand.u32 4294901760, %v16101_v36  ;;  %v16204_v51 = vsub.f32 %v27574_v42, %v16203_v27  ;;  %v16673_v31 = vand.u32 4294901760, %v16650_v22 }
0x1a34   :  { %v16098_v46 = vsel %vm3485_vm1, %v16092_v34, 0  ;;  %22021 = vmatpush3.bf16.msra.mxu0 %v27572_v55  ;;  %v16210_v54 = vand.u32 4294901760, %v27576_v43  ;;  %v22026_v60 = vpack.c.bf16 %v27576_v43, %v27574_v42  ;;  %v27684_v59 = vpack.c.bf16 %v16670_v47, %v16667_v61 }
0x1a35   :  { %v16042_v50 = vsel %vm14744_vm9, %v27550_v53, 0.0  ;;  %v27580_v3 = vand.u32 4294901760, %v16098_v46  ;;  %22022 = vmatprep.subr.bf16.mxu0 %v28257_v62  ;;  %v16191_v12 = vsub.f32 %v16101_v36, %v27582_v44  ;;  %v16205_v57 = vand.u32 4294901760, %v16204_v51 }
0x1a36   :  { %16043 = vadd.xlane.f32.xlu0 %v16042_v50  ;;  %v16211_v49 = vsub.f32 %v27576_v43, %v16210_v54  ;;  %v27673_v50 = vsub.f32 %v16649_v23, %v16670_v47  ;;  %v27675_v32 = vsub.f32 %v16650_v22, %v16673_v31 }
0x1a37   :  { %v16181_v9 = vsub.f32 %v16098_v46, %v27580_v3  ;;  %v16192_v38 = vand.u32 4294901760, %v16191_v12  ;;  %20896 = vmatmul.mubr.f32.vlgmr.msra.gmra.mrb[182].mxu0 %v16174_v14 }
0x1a38   :  { %v16212_v5 = vand.u32 4294901760, %v16211_v49  ;;  %20898 = vmatprep.mubr.msk.f32.mxu0 %vm22945_vm3, %v22946_v4  ;;  %v16775_v16 = vand.u32 4294901760, %v27673_v50 }
0x1a39   :  { %v16182_v1 = vand.u32 4294901760, %v16181_v9  ;;  %v16193_v17 = vsub.f32 %v16191_v12, %v16192_v38 }
0x1a3a   :  { %v22023_v7 = vpack.c.bf16 %v16212_v5, %v16205_v57  ;;  %v16776_v20 = vsub.f32 %v27673_v50, %v16775_v16 }
0x1a3b   :  { %v16183_v37 = vsub.f32 %v16181_v9, %v16182_v1  ;;  %v16194_v52 = vand.u32 4294901760, %v16193_v17 }
0x1a3c   :  { %22024 = vmatpush3.bf16.msra.mxu0 %v22023_v7  ;;  %v16777_v36 = vand.u32 4294901760, %v16776_v20 }
0x1a3d   :  { %v16184_v0 = vand.u32 4294901760, %v16183_v37  ;;  %22025 = vmatprep.subr.bf16.mxu0 %v28257_v62 }
0x1a3f   :  { %20899 = vmatmul.mubr.f32.gmra.mrb[184].mxu0 %v16184_v0  ;;  %v17258_v0 = vld [vmem:[%s27805_s1 + $0x450] ss:$0 sm:$0xff] }
0x1a40   :  { %20901 = vmatprep.mubr.msk.f32.mxu0 %vm22945_vm3, %v22946_v4 }
0x1a43   :  { %20902 = vmatmul.mubr.f32.gmra.mrb[186].mxu0 %v16194_v52  ;;  %v17259_v52 = vld [vmem:[%s27805_s1 + $0x458] ss:$0 sm:$0xff] }
0x1a44   :  { %20908 = vmatprep.mubr.msk.f32.mxu0 %vm22945_vm3, %v22946_v4 }
0x1a47   :  { %20909 = vmatmul.mubr.f32.vlgmr.msra.gmra.mrb[182].mxu0 %v27578_v10 }
0x1a48   :  { %20911 = vmatprep.mubr.msk.f32.mxu0 %vm22945_vm3, %v22946_v4  ;;  %22027 = vmatpush3.bf16.msra.mxu0 %v22026_v60 }
0x1a49   :  { %22028 = vmatprep.subr.bf16.mxu0 %v28257_v62 }
0x1a4b   :  { %20912 = vmatmul.mubr.f32.gmra.mrb[184].mxu0 %v27580_v3 }
0x1a4c   :  { %20914 = vmatprep.mubr.msk.f32.mxu0 %vm22945_vm3, %v22946_v4 }
0x1a4f   :  { %20915 = vmatmul.mubr.f32.gmra.mrb[186].mxu0 %v27582_v44 }
0x1a50   :  { %20921 = vmatprep.mubr.msk.f32.mxu0 %vm22945_vm3, %v22946_v4 }
0x1a53   :  { %20922 = vmatmul.mubr.f32.vlgmr.msra.gmra.mrb[182].mxu0 %v16171_v6 }
0x1a54   :  { %20924 = vmatprep.mubr.msk.f32.mxu0 %vm22945_vm3, %v22946_v4  ;;  %22030 = vmatpush3.bf16.msra.mxu0 %v27572_v55 }
0x1a55   :  { %22031 = vmatprep.subr.bf16.mxu0 %v28257_v62 }
0x1a57   :  { %20925 = vmatmul.mubr.f32.gmra.mrb[184].mxu0 %v16181_v9 }
0x1a58   :  { %20927 = vmatprep.mubr.msk.f32.mxu0 %vm22945_vm3, %v22946_v4 }
0x1a5b   :  { %20928 = vmatmul.mubr.f32.gmra.mrb[186].mxu0 %v16191_v12 }
0x1a5c   :  { %20934 = vmatprep.mubr.msk.f32.mxu0 %vm22945_vm3, %v22946_v4 }
0x1a5f   :  { %20935 = vmatmul.mubr.f32.vlgmr.msra.gmra.mrb[182].mxu0 %v16172_v18 }
0x1a60   :  { %20937 = vmatprep.mubr.msk.f32.mxu0 %vm22945_vm3, %v22946_v4 }
0x1a63   :  { %20938 = vmatmul.mubr.f32.gmra.mrb[184].mxu0 %v16182_v1 }
0x1a64   :  { %20940 = vmatprep.mubr.msk.f32.mxu0 %vm22945_vm3, %v22946_v4 }
0x1a67   :  { %20941 = vmatmul.mubr.f32.gmra.mrb[186].mxu0 %v16192_v38 }
0x1a68   :  { %20947 = vmatprep.mubr.msk.f32.mxu0 %vm22945_vm3, %v22946_v4 }
0x1abb   :  { %v16038_v13 = vpop.xlane.xlu0 %16037 }
0x1abc   :  { %v16045_v58 = vmul.f32 0.03125, %v16038_v13 }
0x1abe   :  { %v27631_v11 = vsub.f32 %v27540_v8, %v16045_v58  ;;  %v22032_v8 = vpack.c.bf16 %v16210_v54, %v16203_v27 }
0x1abf   :  { %v16041_v63 = vpop.xlane.xlu1 %16040 }
0x1ac0   :  { %v16046_v48 = vmul.f32 0.03125, %v16041_v63  ;;  %v16051_v25 = vmul.f32 %v27631_v11, %v27631_v11  ;;  %22033 = vmatpush3.bf16.msra.mxu0 %v22032_v8 }
0x1ac1   :  { %22034 = vmatprep.subr.bf16.mxu0 %v28257_v62 }
0x1ac2   :  { %v27636_v24 = vsub.f32 %v27545_v39, %v16046_v48  ;;  %v16054_v19 = vsel %vm7202_vm6, %v16051_v25, 0.0  ;;  %v16651_v39 = vld [vmem:[%s27805_s1 + $0x478] sm:$0xff] }
0x1ac3   :  { %16055 = vadd.xlane.f32.xlu1 %v16054_v19  ;;  %v16044_v56 = vpop.xlane.xlu0 %16043  ;;  %20948 = vmatmul.mubr.f32.vlgmr.msra.gmra.mrb[182].mxu0 %v27578_v10  ;;  %v16676_v33 = vand.u32 4294901760, %v16651_v39 }
0x1ac4   :  { %v16047_v21 = vmul.f32 0.03125, %v16044_v56  ;;  %v16052_v40 = vmul.f32 %v27636_v24, %v27636_v24  ;;  %20950 = vmatprep.mubr.msk.f32.mxu0 %vm22945_vm3, %v22946_v4  ;;  %22036 = vmatpush3.bf16.msra.mxu0 %v27572_v55  ;;  %v16782_v55 = vand.u32 4294901760, %v27675_v32 }
0x1ac5   :  { %22037 = vmatprep.subr.bf16.mxu0 %v28257_v62  ;;  %v27679_v15 = vsub.f32 %v16651_v39, %v16676_v33  ;;  %v27692_v34 = vpack.c.bf16 %v16676_v33, %v16673_v31 }
0x1ac6   :  { %v27642_v30 = vsub.f32 %v27550_v53, %v16047_v21  ;;  %v16057_v41 = vsel %vm7202_vm6, %v16052_v40, 0.0  ;;  %v27671_v53 = vsub.f32 %v16648_v28, %v16667_v61 }
0x1ac7   :  { %16058 = vadd.xlane.f32.xlu0 %v16057_v41  ;;  %20951 = vmatmul.mubr.f32.gmra.mrb[184].mxu0 %v27580_v3  ;;  %v16789_v42 = vand.u32 4294901760, %v27679_v15  ;;  %v22053_v12 = vpack.c.bf16 %v27679_v15, %v27675_v32 }
0x1ac8   :  { %v16053_v29 = vmul.f32 %v27642_v30, %v27642_v30  ;;  %20953 = vmatprep.mubr.msk.f32.mxu0 %vm22945_vm3, %v22946_v4  ;;  %v16768_v35 = vand.u32 4294901760, %v27671_v53  ;;  %v22050_v9 = vpack.c.bf16 %v27673_v50, %v27671_v53 }
0x1ac9   :  { %v16790_v6 = vsub.f32 %v27679_v15, %v16789_v42  ;;  %v27715_v51 = vpack.c.bf16 %v16789_v42, %v16782_v55 }
0x1aca   :  { %v16060_v45 = vsel %vm14744_vm9, %v16053_v29, 0.0  ;;  %v16769_v26 = vsub.f32 %v27671_v53, %v16768_v35  ;;  %v27713_v18 = vpack.c.bf16 %v16775_v16, %v16768_v35 }
0x1acb   :  { %16061 = vadd.xlane.f32.xlu1 %v16060_v45  ;;  %20954 = vmatmul.mubr.f32.gmra.mrb[186].mxu0 %v27582_v44  ;;  %v16791_v27 = vand.u32 4294901760, %v16790_v6 }
0x1acc   :  { %20960 = vmatprep.mubr.msk.f32.mxu0 %vm22945_vm3, %v22946_v4  ;;  %v16770_v46 = vand.u32 4294901760, %v16769_v26 }
0x1ace   :  { %v22044_v43 = vpack.c.bf16 %v16777_v36, %v16770_v46 }
0x1acf   :  { %20961 = vmatmul.mubr.f32.vlgmr.msra.gmra.mrb[182].mxu0 %v27578_v10  ;;  %v16783_v10 = vsub.f32 %v27675_v32, %v16782_v55 }
0x1ad0   :  { %20963 = vmatprep.mubr.msk.f32.mxu0 %vm22945_vm3, %v22946_v4  ;;  %22039 = vmatpush3.bf16.msra.mxu0 %v27684_v59 }
0x1ad1   :  { %22040 = vmatprep.subr.bf16.mxu0 %v28257_v62 }
0x1ad3   :  { %20964 = vmatmul.mubr.f32.gmra.mrb[184].mxu0 %v27580_v3  ;;  %v16784_v3 = vand.u32 4294901760, %v16783_v10 }
0x1ad4   :  { %20966 = vmatprep.mubr.msk.f32.mxu0 %vm22945_vm3, %v22946_v4  ;;  %22042 = vmatpush3.bf16.msra.mxu0 %v27692_v34 }
0x1ad5   :  { %22043 = vmatprep.subr.bf16.mxu0 %v28257_v62  ;;  %v22047_v54 = vpack.c.bf16 %v16791_v27, %v16784_v3 }
0x1ad7   :  { %20967 = vmatmul.mubr.f32.gmra.mrb[186].mxu0 %v27582_v44 }
0x1ad8   :  { %20977 = vmatprep.mubr.msk.f32.mxu0 %vm22945_vm3, %v22946_v4 }
0x1b50   :  { %v16056_v49 = vpop.xlane.xlu1 %16055 }
0x1b51   :  { %v16063_v1 = vmul.f32 0.03125, %v16056_v49 }
0x1b53   :  { %v16066_v2 = vadd.f32 1e-05, %v16063_v1 }
0x1b54   :  { %v16059_v44 = vpop.xlane.xlu0 %16058 }
0x1b55   :  { %22925 = vrsqrt.f32 %v16066_v2  ;;  %v16064_v57 = vmul.f32 0.03125, %v16059_v44 }
0x1b57   :  { %v16067_v5 = vadd.f32 1e-05, %v16064_v57 }
0x1b58   :  { %v16062_v38 = vpop.xlane.xlu1 %16061 }
0x1b59   :  { %22927 = vrsqrt.f32 %v16067_v5  ;;  %v16065_v37 = vmul.f32 0.03125, %v16062_v38 }
0x1b5b   :  { %v16068_v14 = vadd.f32 1e-05, %v16065_v37 }
0x1b5d   :  { %22929 = vrsqrt.f32 %v16068_v14 }
0x1b5f   :  { %v22926_v7 = vpop.eup %22925 }
0x1b60   :  { %v16072_v17 = vmul.f32 %v22926_v7, %v27631_v11 }
0x1b62   :  { %v16080_v60 = vmul.f32 %v17258_v0, %v16072_v17 }
0x1b63   :  { %v22928_v13 = vpop.eup %22927 }
0x1b64   :  { %v16088_v58 = vadd.f32 %v17259_v52, %v16080_v60  ;;  %v16073_v63 = vmul.f32 %v22928_v13, %v27636_v24 }
0x1b66   :  { %v16081_v48 = vmul.f32 %v17258_v0, %v16073_v63  ;;  %v16658_v25 = vsel %vm7202_vm6, %v16088_v58, 0 }
0x1b67   :  { %v22930_v19 = vpop.eup %22929  ;;  %v27726_v56 = vand.u32 4294901760, %v16658_v25 }
0x1b68   :  { %v16074_v21 = vmul.f32 %v22930_v19, %v27642_v30  ;;  %v16089_v40 = vadd.f32 %v17259_v52, %v16081_v48 }
0x1b69   :  { %v16736_v11 = vsub.f32 %v16658_v25, %v27726_v56 }
0x1b6a   :  { %v16082_v41 = vmul.f32 %v17258_v0, %v16074_v21  ;;  %v16661_v29 = vsel %vm7202_vm6, %v16089_v40, 0 }
0x1b6b   :  { %v16737_v45 = vand.u32 4294901760, %v16736_v11  ;;  %v27731_v8 = vand.u32 4294901760, %v16661_v29 }
0x1b6c   :  { %v16090_v28 = vadd.f32 %v17259_v52, %v16082_v41 }
0x1b6d   :  { %v16738_v23 = vsub.f32 %v16736_v11, %v16737_v45  ;;  %v16746_v24 = vsub.f32 %v16661_v29, %v27731_v8 }
0x1b6e   :  { %v16664_v22 = vsel %vm7202_vm6, %v16090_v28, 0 }
0x1b6f   :  { %v16739_v61 = vand.u32 4294901760, %v16738_v23  ;;  %v16747_v47 = vand.u32 4294901760, %v16746_v24  ;;  %v16755_v39 = vand.u32 4294901760, %v16664_v22 }
0x1b71   :  { %20978 = vmatmul.mubr.f32.vlgmr.msra.gmra.mrb[182].mxu0 %v16739_v61  ;;  %v16748_v30 = vsub.f32 %v16746_v24, %v16747_v47  ;;  %v16756_v31 = vsub.f32 %v16664_v22, %v16755_v39 }
0x1b72   :  { %20980 = vmatprep.mubr.msk.f32.mxu0 %vm22945_vm3, %v22946_v4  ;;  %22045 = vmatpush3.bf16.msra.mxu0 %v22044_v43 }
0x1b73   :  { %v16749_v33 = vand.u32 4294901760, %v16748_v30  ;;  %v16757_v53 = vand.u32 4294901760, %v16756_v31  ;;  %22046 = vmatprep.subr.bf16.mxu0 %v28257_v62 }
0x1b75   :  { %20981 = vmatmul.mubr.f32.gmra.mrb[184].mxu0 %v16749_v33  ;;  %v16758_v50 = vsub.f32 %v16756_v31, %v16757_v53 }
0x1b76   :  { %20983 = vmatprep.mubr.msk.f32.mxu0 %vm22945_vm3, %v22946_v4  ;;  %22048 = vmatpush3.bf16.msra.mxu0 %v22047_v54 }
0x1b77   :  { %v16759_v35 = vand.u32 4294901760, %v16758_v50  ;;  %22049 = vmatprep.subr.bf16.mxu0 %v28257_v62 }
0x1b79   :  { %20984 = vmatmul.mubr.f32.gmra.mrb[186].mxu0 %v16759_v35 }
0x1b7a   :  { %20994 = vmatprep.mubr.msk.f32.mxu0 %vm22945_vm3, %v22946_v4 }
0x1b7d   :  { %20995 = vmatmul.mubr.f32.vlgmr.msra.gmra.mrb[182].mxu0 %v27726_v56 }
0x1b7e   :  { %20997 = vmatprep.mubr.msk.f32.mxu0 %vm22945_vm3, %v22946_v4  ;;  %22051 = vmatpush3.bf16.msra.mxu0 %v22050_v9 }
0x1b7f   :  { %22052 = vmatprep.subr.bf16.mxu0 %v28257_v62 }
0x1b81   :  { %20998 = vmatmul.mubr.f32.gmra.mrb[184].mxu0 %v27731_v8 }
0x1b82   :  { %21000 = vmatprep.mubr.msk.f32.mxu0 %vm22945_vm3, %v22946_v4  ;;  %22054 = vmatpush3.bf16.msra.mxu0 %v22053_v12 }
0x1b83   :  { %22055 = vmatprep.subr.bf16.mxu0 %v28257_v62 }
0x1b85   :  { %21001 = vmatmul.mubr.f32.gmra.mrb[186].mxu0 %v16755_v39 }
0x1b86   :  { %21011 = vmatprep.mubr.msk.f32.mxu0 %vm22945_vm3, %v22946_v4 }
0x1b89   :  { %21012 = vmatmul.mubr.f32.vlgmr.msra.gmra.mrb[182].mxu0 %v16736_v11 }
0x1b8a   :  { %21014 = vmatprep.mubr.msk.f32.mxu0 %vm22945_vm3, %v22946_v4  ;;  %22057 = vmatpush3.bf16.msra.mxu0 %v27684_v59 }
0x1b8b   :  { %22058 = vmatprep.subr.bf16.mxu0 %v28257_v62 }
0x1b8d   :  { %21015 = vmatmul.mubr.f32.gmra.mrb[184].mxu0 %v16746_v24 }
0x1b8e   :  { %21017 = vmatprep.mubr.msk.f32.mxu0 %vm22945_vm3, %v22946_v4  ;;  %22060 = vmatpush3.bf16.msra.mxu0 %v27692_v34 }
0x1b8f   :  { %22061 = vmatprep.subr.bf16.mxu0 %v28257_v62 }
0x1b91   :  { %21018 = vmatmul.mubr.f32.gmra.mrb[186].mxu0 %v16756_v31 }
0x1b92   :  { %21028 = vmatprep.mubr.msk.f32.mxu0 %vm22945_vm3, %v22946_v4 }
0x1b95   :  { %21029 = vmatmul.mubr.f32.vlgmr.msra.gmra.mrb[182].mxu0 %v16737_v45 }
0x1b96   :  { %21031 = vmatprep.mubr.msk.f32.mxu0 %vm22945_vm3, %v22946_v4  ;;  %22063 = vmatpush3.bf16.msra.mxu0 %v27713_v18 }
0x1b97   :  { %22064 = vmatprep.subr.bf16.mxu0 %v28257_v62 }
0x1b99   :  { %21032 = vmatmul.mubr.f32.gmra.mrb[184].mxu0 %v16747_v47 }
0x1b9a   :  { %21034 = vmatprep.mubr.msk.f32.mxu0 %vm22945_vm3, %v22946_v4  ;;  %22066 = vmatpush3.bf16.msra.mxu0 %v27715_v51 }
0x1b9b   :  { %22067 = vmatprep.subr.bf16.mxu0 %v28257_v62 }
0x1b9d   :  { %21035 = vmatmul.mubr.f32.gmra.mrb[186].mxu0 %v16757_v53 }
0x1b9e   :  { %21045 = vmatprep.mubr.msk.f32.mxu0 %vm22945_vm3, %v22946_v4 }
0x1ba1   :  { %21046 = vmatmul.mubr.f32.vlgmr.msra.gmra.mrb[182].mxu0 %v27726_v56 }
0x1ba2   :  { %21048 = vmatprep.mubr.msk.f32.mxu0 %vm22945_vm3, %v22946_v4  ;;  %22069 = vmatpush3.bf16.msra.mxu0 %v27684_v59 }
0x1ba3   :  { %22070 = vmatprep.subr.bf16.mxu0 %v28257_v62  ;;  %v17260_v62 = vld [vmem:[%s27805_s1 + $0x480] ss:$0 sm:$0xff] }
0x1ba5   :  { %21049 = vmatmul.mubr.f32.gmra.mrb[184].mxu0 %v27731_v8 }
0x1ba6   :  { %21051 = vmatprep.mubr.msk.f32.mxu0 %vm22945_vm3, %v22946_v4  ;;  %22072 = vmatpush3.bf16.msra.mxu0 %v27692_v34 }
0x1ba9   :  { %21052 = vmatmul.mubr.f32.gmra.mrb[186].mxu0 %v16755_v39 }
0x1baa   :  { %21062 = vmatprep.mubr.msk.f32.mxu0 %vm22945_vm3, %v22946_v4 }
0x1bad   :  { %21063 = vmatmul.mubr.f32.vlgmr.msra.gmra.mrb[182].mxu0 %v27726_v56 }
0x1bae   :  { %21065 = vmatprep.mubr.msk.f32.mxu0 %vm22945_vm3, %v22946_v4 }
0x1bb1   :  { %21066 = vmatmul.mubr.f32.gmra.mrb[184].mxu0 %v27731_v8 }
0x1bb2   :  { %21068 = vmatprep.mubr.msk.f32.mxu0 %vm22945_vm3, %v22946_v4 }
0x1bb5   :  { %21069 = vmatmul.mubr.f32.gmra.mrb[186].mxu0 %v16755_v39 }
0x1c80   :  { %v17221_v32 = vpop.f32.mrb[182].mxu0 }
0x1c81   :  { %v22117_v15 = vadd.f32 %v17260_v62, %v17221_v32  ;;  %v21064_v59 = vpop.f32.mrb[183].mxu0 }
0x1c83   :  { %17240 = vst [vmem:[%s27807_s2] sm:$0xff] %v22117_v15 }
0x1c84   :  { %v17227_v16 = vpop.f32.mrb[184].mxu0 }
0x1c85   :  { %v22118_v34 = vadd.f32 %v17260_v62, %v17227_v16  ;;  %v21067_v26 = vpop.f32.mrb[185].mxu0 }
0x1c87   :  { %17241 = vst [vmem:[%s27807_s2 + $0x8] sm:$0xff] %v22118_v34 }
0x1c88   :  { %v17233_v4 = vpop.f32.mrb[186].mxu0 }
0x1c89   :  { %v22119_v20 = vadd.f32 %v17260_v62, %v17233_v4  ;;  %v21070_v46 = vpop.f32.mrb[187].mxu0 }
0x1c8b   :  { %17242 = vst [vmem:[%s27807_s2 + $0x10] sm:$0x3] %v22119_v20 }

</bundles_post_ra>
